<compile_context>
chip_gen: v7x
topology: tpu7x:2x2x1
jax: 0.10.0
libtpu: 0.0.40
codegen_flags: <defaults>
</compile_context>

<pallas_src>
import math

import jax
import jax.numpy as jnp
import numpy as np
from jax.experimental import pallas as pl
from jax.experimental.pallas import tpu as pltpu

# ----------------------------- configuration -------------------------------
METADATA_DIM = 12
HIDDEN_DIM = 24
OUTPUT_DIM = 32
FEATURE_GROUPS = ("weather", "temporal", "calendar")
LN_EPS = 1e-5


def _num_heads(metadata_dim: int) -> int:
    possible = [1, 2, 4, 5, 8, 10]
    nh = 1
    for h in possible:
        if metadata_dim % h == 0 and h <= metadata_dim:
            nh = h
    return nh


NUM_HEADS = _num_heads(METADATA_DIM)          # -> 4 for D=12
HEAD_DIM = METADATA_DIM // NUM_HEADS          # 3
NUM_GROUPS = len(FEATURE_GROUPS)
GROUP_HID = HIDDEN_DIM // NUM_GROUPS          # 8
GROUP_OUT = OUTPUT_DIM // NUM_GROUPS          # 10
TGO = GROUP_OUT * NUM_GROUPS                  # 30 (!= 32 -> group_projection)

# single packed-slab geometry (all rows 128 lanes wide, 8-row-aligned blocks)
SLAB_COLS = 128
ROW_WIN = 0      # rows [0,16):  fused in-proj  [Wq^T*s | Wk^T | Wv^T]   (12, 36)
ROW_WO = 16      # rows [16,32): attention out-proj Wo^T                 (12, 12)
ROW_W1 = 32      # rows [32,48): block-diag group MLP layer-1            (12, 24)
ROW_W2P = 48     # rows [48,72): block-diag layer-2 @ group_projection   (24, 32->128)
ROW_VEC = 72     # rows [72,80): vector rows (importance, biases, LN)
ROW_MASK = 80    # rows [80,88): per-head 0/1 lane masks                  (4, 12)
SLAB_ROWS = 88


# ----------------------------- math helpers --------------------------------
def _gelu(x):
    # Exact GELU (PyTorch nn.GELU default, approximate='none').
    return 0.5 * x * (1.0 + jax.lax.erf(x / jnp.float32(math.sqrt(2.0))))


def _softmax_last_exact(x):
    m = jnp.max(x, axis=-1, keepdims=True)
    e = jnp.exp(x - m)
    return e / jnp.sum(e, axis=-1, keepdims=True)


# ------------------------------ Pallas kernel -------------------------------
def encoder_kernel(meta_ref, slab_ref, out_ref):
    D, Hd = METADATA_DIM, HIDDEN_DIM
    H, S = NUM_HEADS, meta_ref.shape[1]
    BB = meta_ref.shape[0]

    meta = meta_ref[...]                                   # (BB, S, D)
    slab = slab_ref[...]                                   # (88, 128)

    # ---- unpack (static slices of the VMEM-resident slab) ----
    w_in = slab[ROW_WIN:ROW_WIN + D, 0:3 * D]              # (D, 3D)  Q|K|V fused
    w_o = slab[ROW_WO:ROW_WO + D, 0:D]                     # (D, D)
    w1 = slab[ROW_W1:ROW_W1 + D, 0:Hd]                     # (D, Hd)  block-diag
    w2p = slab[ROW_W2P:ROW_W2P + Hd, :]                    # (Hd, 128) proj folded
    iw = slab[ROW_VEC + 0:ROW_VEC + 1, 0:D]                # (1, D) exact softmax wts
    b_in = slab[ROW_VEC + 1:ROW_VEC + 2, 0:3 * D]          # (1, 3D)
    ln_w = slab[ROW_VEC + 2:ROW_VEC + 3, 0:D]
    ln_b = slab[ROW_VEC + 3:ROW_VEC + 4, 0:D]
    b1 = slab[ROW_VEC + 4:ROW_VEC + 5, 0:Hd]
    b2p = slab[ROW_VEC + 5:ROW_VEC + 6, :]                 # (1, 128)
    b_o = slab[ROW_VEC + 6:ROW_VEC + 7, 0:D]
    hmask = slab[ROW_MASK:ROW_MASK + H, 0:D]               # (H, D) 0/1 lane masks

    # ---- feature-importance weighting (softmax pre-computed host-side) ----
    x2 = meta.reshape(BB * S, D) * iw                      # (BB*S, D)

    # ---- fused Q/K/V projection, 1/sqrt(head_dim) folded into Q ----
    qkv = jnp.dot(x2, w_in, preferred_element_type=jnp.float32) + b_in
    q3 = qkv[:, 0:D].reshape(BB, S, D)
    k3 = qkv[:, D:2 * D].reshape(BB, S, D)
    v3 = qkv[:, 2 * D:3 * D].reshape(BB, S, D)

    # ---- all heads at once: stack heads along the query/sublane axis ----
    # qs[b, h*S+i, :] = q3[b, i, :] masked to head h's lanes  -> per-head scores
    qs = (q3[:, None, :, :] * hmask[None, :, None, :]).reshape(BB, H * S, D)
    s = jnp.einsum("bmd,bkd->bmk", qs, k3,
                   preferred_element_type=jnp.float32)      # (BB, H*S, S)
    sm = jnp.max(s, axis=-1, keepdims=True)
    pe = jnp.exp(s - sm)
    p = pe / jnp.sum(pe, axis=-1, keepdims=True)             # exact (torch parity)
    o = jnp.einsum("bmk,bkd->bmd", p, v3,
                   preferred_element_type=jnp.float32)       # (BB, H*S, D)
    # recombine heads onto their own lane groups and sum over the head axis
    attn = jnp.sum(o.reshape(BB, H, S, D) * hmask[None, :, None, :], axis=1)

    attn2 = jnp.dot(attn.reshape(BB * S, D), w_o,
                    preferred_element_type=jnp.float32) + b_o

    # ---- residual + LayerNorm (2-D, per-row over D) ----
    y = attn2 + x2
    mu = jnp.mean(y, axis=-1, keepdims=True)
    var = jnp.mean(jnp.square(y - mu), axis=-1, keepdims=True)
    yn = (y - mu) * jax.lax.rsqrt(var + LN_EPS) * ln_w + ln_b

    # ---- sequence aggregation ----
    agg = jnp.mean(yn.reshape(BB, S, D), axis=1)             # (BB, D)

    # ---- fused block-diagonal group MLPs; group_projection folded into w2p ----
    h1 = _gelu(jnp.dot(agg, w1, preferred_element_type=jnp.float32) + b1)
    out = jnp.dot(h1, w2p, preferred_element_type=jnp.float32) + b2p  # (BB, 128)

    out_ref[...] = out.astype(out_ref.dtype)                 # lane-dense store


# --------------------------- host-side packing ------------------------------
def pack_params(p):
    """Pack all parameters into a single (88, 128) f32 slab."""
    D, Hd, Od = METADATA_DIM, HIDDEN_DIM, OUTPUT_DIM
    H, hd = NUM_HEADS, HEAD_DIM
    ng = NUM_GROUPS
    gs = D // ng
    scale = jnp.float32(1.0 / math.sqrt(hd))

    # fused attention in-projection, stored pre-transposed, scale folded into Q
    w_in = jnp.concatenate([p["wq"].T * scale, p["wk"].T, p["wv"].T], axis=1)
    b_in = jnp.concatenate([p["bq"] * scale, p["bk"], p["bv"]], axis=1)

    # block-diagonal group MLPs
    w1_bd = jnp.zeros((D, Hd), jnp.float32)
    w2_bd = jnp.zeros((Hd, TGO), jnp.float32)
    b1_rows, b2_rows = [], []
    for i, (w1, bb1, w2, bb2) in enumerate(p["groups"]):
        lo = i * gs
        hi = (i + 1) * gs if i < ng - 1 else D
        w1_bd = w1_bd.at[lo:hi, i * GROUP_HID:(i + 1) * GROUP_HID].set(w1.T)
        w2_bd = w2_bd.at[i * GROUP_HID:(i + 1) * GROUP_HID,
                         i * GROUP_OUT:(i + 1) * GROUP_OUT].set(w2.T)
        b1_rows.append(bb1)
        b2_rows.append(bb2)
    b1 = jnp.concatenate(b1_rows, axis=1)                  # (1, Hd)
    b2 = jnp.concatenate(b2_rows, axis=1)                  # (1, TGO)

    # fold group_projection (no nonlinearity in between) into layer-2
    w2p = w2_bd @ p["proj_w"].T                            # (Hd, Od)
    b2p = b2 @ p["proj_w"].T + p["proj_b"]                 # (1, Od)

    # feature-importance softmax is input-independent -> compute exactly here
    iw = jax.nn.softmax(p["imp"], axis=-1)                 # (1, D)

    # per-head 0/1 lane masks
    hmask = jnp.zeros((H, D), jnp.float32)
    for h in range(H):
        hmask = hmask.at[h, h * hd:(h + 1) * hd].set(1.0)

    def pad_cols(m):
        return jnp.pad(m, ((0, 0), (0, SLAB_COLS - m.shape[1])))

    def pad_rows(m, rows):
        return jnp.pad(m, ((0, rows - m.shape[0]), (0, 0)))

    slab = jnp.concatenate([
        pad_rows(pad_cols(w_in), 16),                      # rows [0, 16)
        pad_rows(pad_cols(p["wo"].T), 16),                 # rows [16, 32)
        pad_rows(pad_cols(w1_bd), 16),                     # rows [32, 48)
        pad_rows(pad_cols(w2p), 24),                       # rows [48, 72)
        pad_cols(iw),                                      # row 72
        pad_cols(b_in),                                    # row 73
        pad_cols(p["ln_w"]),                               # row 74
        pad_cols(p["ln_b"]),                               # row 75
        pad_cols(b1),                                      # row 76
        pad_cols(b2p),                                     # row 77
        pad_cols(p["bo"]),                                 # row 78
        jnp.zeros((1, SLAB_COLS), jnp.float32),            # row 79 (pad)
        pad_rows(pad_cols(hmask), 8),                      # rows [80, 88)
    ], axis=0).astype(jnp.float32)
    assert slab.shape == (SLAB_ROWS, SLAB_COLS)
    return slab


def encode(metadata, params, *, batch_block=32):
    """Batched metadata-encoder forward: (B, S, D) -> (B, OUTPUT_DIM)."""
    slab = pack_params(params)
    B, S, D = metadata.shape
    assert D == METADATA_DIM and S > 1

    BB = max(8, (min(batch_block, B) // 8) * 8)            # 8-aligned batch block
    nb = pl.cdiv(B, BB)
    Bp = nb * BB
    meta = metadata.astype(jnp.float32)
    if Bp != B:
        meta = jnp.pad(meta, ((0, Bp - B), (0, 0), (0, 0)))

    out = pl.pallas_call(
        encoder_kernel,
        out_shape=jax.ShapeDtypeStruct((Bp, SLAB_COLS), jnp.float32),
        grid=(nb,),
        in_specs=[
            pl.BlockSpec((BB, S, METADATA_DIM), lambda i: (i, 0, 0)),
            # constant block index -> Pallas keeps the weight slab resident
            pl.BlockSpec((SLAB_ROWS, SLAB_COLS), lambda i: (0, 0)),
        ],
        out_specs=pl.BlockSpec((BB, SLAB_COLS), lambda i: (i, 0)),
        compiler_params=pltpu.CompilerParams(
            # batch blocks are independent -> split across v7x's 2 TensorCores
            dimension_semantics=("parallel",),
        ),
    )(meta, slab)
    # projection output was zero-padded to 128 lanes for a lane-dense store
    return out[:B, :OUTPUT_DIM]


# --------------------------- pure-JAX reference ------------------------------
def reference(meta, p):
    """Unfused reference matching the PyTorch module semantics."""
    B, S, D = meta.shape
    iw = _softmax_last_exact(p["imp"])                     # (1, D)
    weighted = meta * iw[:, None, :]

    x2 = weighted.reshape(B * S, D)
    q = (x2 @ p["wq"].T + p["bq"]).reshape(B, S, D)
    k = (x2 @ p["wk"].T + p["bk"]).reshape(B, S, D)
    v = (x2 @ p["wv"].T + p["bv"]).reshape(B, S, D)

    scale = 1.0 / math.sqrt(HEAD_DIM)
    heads = []
    for h in range(NUM_HEADS):
        lo, hi = h * HEAD_DIM, (h + 1) * HEAD_DIM
        s = jnp.einsum("bqd,bkd->bqk", q[:, :, lo:hi] * scale, k[:, :, lo:hi])
        pah = _softmax_last_exact(s)
        heads.append(jnp.einsum("bqk,bkd->bqd", pah, v[:, :, lo:hi]))
    attn = jnp.concatenate(heads, axis=-1)
    attended = (attn.reshape(B * S, D) @ p["wo"].T + p["bo"]).reshape(B, S, D)

    y = attended + weighted
    mu = jnp.mean(y, axis=-1, keepdims=True)
    var = jnp.mean(jnp.square(y - mu), axis=-1, keepdims=True)
    yn = (y - mu) * jax.lax.rsqrt(var + LN_EPS)
    yn = yn * p["ln_w"][:, None, :] + p["ln_b"][:, None, :]
    agg = jnp.mean(yn, axis=1)

    gs = D // NUM_GROUPS
    outs = []
    for i, (w1, b1, w2, b2) in enumerate(p["groups"]):
        lo = i * gs
        hi = (i + 1) * gs if i < NUM_GROUPS - 1 else D
        h1 = _gelu(agg[:, lo:hi] @ w1.T + b1)
        outs.append(h1 @ w2.T + b2)
    combined = jnp.concatenate(outs, axis=-1)
    return combined @ p["proj_w"].T + p["proj_b"]


# --------------------------- parameter creation -----------------------------
def init_params(key):
    D, Hd, Od = METADATA_DIM, HIDDEN_DIM, OUTPUT_DIM
    ng = NUM_GROUPS
    ks = list(jax.random.split(key, 4 + 4 * ng + 2))

    def u(k, shape, bound):
        return jax.random.uniform(k, shape, jnp.float32, -bound, bound)

    xavier = math.sqrt(6.0 / (D + 3 * D))   # MHA in_proj xavier_uniform bound
    params = dict(
        imp=jnp.ones((1, D), jnp.float32),          # feature_importance init
        wq=u(ks[0], (D, D), xavier),
        wk=u(ks[1], (D, D), xavier),
        wv=u(ks[2], (D, D), xavier),
        bq=jnp.zeros((1, D), jnp.float32),
        bk=jnp.zeros((1, D), jnp.float32),
        bv=jnp.zeros((1, D), jnp.float32),
        wo=u(ks[3], (D, D), 1.0 / math.sqrt(D)),
        bo=jnp.zeros((1, D), jnp.float32),
        ln_w=jnp.ones((1, D), jnp.float32),
        ln_b=jnp.zeros((1, D), jnp.float32),
    )

    gs = D // ng
    groups = []
    kidx = 4
    for i in range(ng):
        gdim = gs if i < ng - 1 else D - i * gs
        b1 = 1.0 / math.sqrt(gdim)
        b2 = 1.0 / math.sqrt(GROUP_HID)
        groups.append((
            u(ks[kidx + 0], (GROUP_HID, gdim), b1),
            u(ks[kidx + 1], (1, GROUP_HID), b1),
            u(ks[kidx + 2], (GROUP_OUT, GROUP_HID), b2),
            u(ks[kidx + 3], (1, GROUP_OUT), b2),
        ))
        kidx += 4
    params["groups"] = groups

    bp = 1.0 / math.sqrt(TGO)
    params["proj_w"] = u(ks[kidx], (Od, TGO), bp)
    params["proj_b"] = u(ks[kidx + 1], (1, Od), bp)
    return params


# ---------------------------------- main -------------------------------------
if __name__ == "__main__":
    # TODO(synk): only the 3-D input / attention / multi-group branch of the
    # PyTorch forward is exercised here (the default config); the 2-D input and
    # single-group `self.encoder` branches (and the rest of ClearE: backbone,
    # drift memory, adaptation generator) are not built.  Dropout = identity.
    key = jax.random.PRNGKey(0)
    pkey, xkey = jax.random.split(key)
    params = init_params(pkey)

    B, S = 64, 8                              # batched per the perf review
    metadata = jax.random.normal(xkey, (B, S, METADATA_DIM), jnp.float32)

    out = jax.block_until_ready(encode(metadata, params, batch_block=32))
    assert out.shape == (B, OUTPUT_DIM)

    ref = jax.block_until_ready(reference(metadata, params))
    np.testing.assert_allclose(np.asarray(out), np.asarray(ref),
                               rtol=1e-3, atol=1e-3)
    print("KERNEL_OK")
</pallas_src>

<mosaic_0001>
module attributes {stable_mosaic.version = 11 : i64} {
  func.func @encoder_kernel(%arg0: i32, %arg1: memref<32x8x12xf32, #tpu.memory_space<vmem>>, %arg2: memref<88x128xf32, #tpu.memory_space<vmem>>, %arg3: memref<32x128xf32, #tpu.memory_space<vmem>>) attributes {dimension_semantics = [#tpu.dimension_semantics<parallel>], iteration_bounds = array<i64: 2>, scalar_prefetch = 0 : i64, scratch_operands = 0 : i64, tpu.core_type = #tpu.core_type<tc>, window_params = [{transform_indices = @transform_0, window_bounds = array<i64: 32, 8, 12>}, {pipeline_mode = #tpu.pipeline_mode<synchronous>, transform_indices = @transform_1, window_bounds = array<i64: 88, 128>}, {transform_indices = @transform_2, window_bounds = array<i64: 32, 128>}]} {
    %c0 = arith.constant 0 : index
    %c0_0 = arith.constant 0 : index
    %c0_1 = arith.constant 0 : index
    %0 = vector.load %arg1[%c0, %c0_0, %c0_1] : memref<32x8x12xf32, #tpu.memory_space<vmem>>, vector<32x8x12xf32>
    %c0_2 = arith.constant 0 : index
    %c0_3 = arith.constant 0 : index
    %1 = vector.load %arg2[%c0_2, %c0_3] : memref<88x128xf32, #tpu.memory_space<vmem>>, vector<88x128xf32>
    %2 = vector.extract_strided_slice %1 {offsets = [0, 0], sizes = [12, 36], strides = [1, 1]} : vector<88x128xf32> to vector<12x36xf32>
    %3 = vector.extract_strided_slice %1 {offsets = [16, 0], sizes = [12, 12], strides = [1, 1]} : vector<88x128xf32> to vector<12x12xf32>
    %4 = vector.extract_strided_slice %1 {offsets = [32, 0], sizes = [12, 24], strides = [1, 1]} : vector<88x128xf32> to vector<12x24xf32>
    %5 = vector.extract_strided_slice %1 {offsets = [48, 0], sizes = [24, 128], strides = [1, 1]} : vector<88x128xf32> to vector<24x128xf32>
    %6 = vector.extract_strided_slice %1 {offsets = [72, 0], sizes = [1, 12], strides = [1, 1]} : vector<88x128xf32> to vector<1x12xf32>
    %7 = vector.extract_strided_slice %1 {offsets = [73, 0], sizes = [1, 36], strides = [1, 1]} : vector<88x128xf32> to vector<1x36xf32>
    %8 = vector.extract_strided_slice %1 {offsets = [74, 0], sizes = [1, 12], strides = [1, 1]} : vector<88x128xf32> to vector<1x12xf32>
    %9 = vector.extract_strided_slice %1 {offsets = [75, 0], sizes = [1, 12], strides = [1, 1]} : vector<88x128xf32> to vector<1x12xf32>
    %10 = vector.extract_strided_slice %1 {offsets = [76, 0], sizes = [1, 24], strides = [1, 1]} : vector<88x128xf32> to vector<1x24xf32>
    %11 = vector.extract_strided_slice %1 {offsets = [77, 0], sizes = [1, 128], strides = [1, 1]} : vector<88x128xf32> to vector<1x128xf32>
    %12 = vector.extract_strided_slice %1 {offsets = [78, 0], sizes = [1, 12], strides = [1, 1]} : vector<88x128xf32> to vector<1x12xf32>
    %13 = vector.extract_strided_slice %1 {offsets = [80, 0], sizes = [4, 12], strides = [1, 1]} : vector<88x128xf32> to vector<4x12xf32>
    %14 = vector.shape_cast %0 : vector<32x8x12xf32> to vector<256x12xf32>
    %15 = vector.broadcast %6 : vector<1x12xf32> to vector<256x12xf32>
    %16 = arith.mulf %14, %15 : vector<256x12xf32>
    %cst = arith.constant dense<0.000000e+00> : vector<256x36xf32>
    %17 = tpu.matmul %16, %2, %cst {dimension_numbers = #tpu.dot_dimension_numbers<[1], [0], [0], [1], [0, 0, 1, 1], [], []>} : vector<256x12xf32>, vector<12x36xf32>, vector<256x36xf32> -> vector<256x36xf32>
    %18 = vector.broadcast %7 : vector<1x36xf32> to vector<256x36xf32>
    %19 = arith.addf %17, %18 : vector<256x36xf32>
    %20 = vector.extract_strided_slice %19 {offsets = [0, 0], sizes = [256, 12], strides = [1, 1]} : vector<256x36xf32> to vector<256x12xf32>
    %21 = vector.shape_cast %20 : vector<256x12xf32> to vector<32x8x12xf32>
    %22 = vector.extract_strided_slice %19 {offsets = [0, 12], sizes = [256, 12], strides = [1, 1]} : vector<256x36xf32> to vector<256x12xf32>
    %23 = vector.shape_cast %22 : vector<256x12xf32> to vector<32x8x12xf32>
    %24 = vector.extract_strided_slice %19 {offsets = [0, 24], sizes = [256, 12], strides = [1, 1]} : vector<256x36xf32> to vector<256x12xf32>
    %25 = vector.shape_cast %24 : vector<256x12xf32> to vector<32x8x12xf32>
    %26 = vector.shape_cast %21 : vector<32x8x12xf32> to vector<32x1x8x12xf32>
    %27 = vector.shape_cast %13 : vector<4x12xf32> to vector<1x4x1x12xf32>
    %28 = vector.broadcast %26 : vector<32x1x8x12xf32> to vector<32x4x8x12xf32>
    %29 = vector.broadcast %27 : vector<1x4x1x12xf32> to vector<32x4x8x12xf32>
    %30 = arith.mulf %28, %29 : vector<32x4x8x12xf32>
    %31 = vector.shape_cast %30 : vector<32x4x8x12xf32> to vector<32x32x12xf32>
    "tpu.trace_start"() <{level = 10 : i32, message = "bmd,bkd->bmk"}> : () -> ()
    %cst_4 = arith.constant dense<0.000000e+00> : vector<32x32x8xf32>
    %32 = tpu.matmul %31, %23, %cst_4 {dimension_numbers = #tpu.dot_dimension_numbers<[2], [2], [1], [1], [0, 0, 0, 1, 1, 1], [0], [0]>} : vector<32x32x12xf32>, vector<32x8x12xf32>, vector<32x32x8xf32> -> vector<32x32x8xf32>
    "tpu.trace_stop"() : () -> ()
    %cst_5 = arith.constant dense<0xFF800000> : vector<32x32xf32>
    %33 = vector.multi_reduction <maximumf>, %32, %cst_5 [2] : vector<32x32x8xf32> to vector<32x32xf32>
    %34 = vector.shape_cast %33 : vector<32x32xf32> to vector<32x32x1xf32>
    %35 = vector.broadcast %34 : vector<32x32x1xf32> to vector<32x32x8xf32>
    %36 = arith.subf %32, %35 : vector<32x32x8xf32>
    %37 = math.exp %36 : vector<32x32x8xf32>
    %cst_6 = arith.constant dense<0.000000e+00> : vector<32x32xf32>
    %38 = vector.multi_reduction <add>, %37, %cst_6 [2] : vector<32x32x8xf32> to vector<32x32xf32>
    %39 = vector.shape_cast %38 : vector<32x32xf32> to vector<32x32x1xf32>
    %40 = vector.broadcast %39 : vector<32x32x1xf32> to vector<32x32x8xf32>
    %41 = arith.divf %37, %40 : vector<32x32x8xf32>
    "tpu.trace_start"() <{level = 10 : i32, message = "bmk,bkd->bmd"}> : () -> ()
    %cst_7 = arith.constant dense<0.000000e+00> : vector<32x32x12xf32>
    %42 = tpu.matmul %41, %25, %cst_7 {dimension_numbers = #tpu.dot_dimension_numbers<[2], [1], [1], [2], [0, 0, 0, 1, 1, 2], [0], [0]>} : vector<32x32x8xf32>, vector<32x8x12xf32>, vector<32x32x12xf32> -> vector<32x32x12xf32>
    "tpu.trace_stop"() : () -> ()
    %43 = vector.shape_cast %42 : vector<32x32x12xf32> to vector<32x4x8x12xf32>
    %44 = vector.shape_cast %13 : vector<4x12xf32> to vector<1x4x1x12xf32>
    %45 = vector.broadcast %44 : vector<1x4x1x12xf32> to vector<32x4x8x12xf32>
    %46 = arith.mulf %43, %45 : vector<32x4x8x12xf32>
    %cst_8 = arith.constant dense<0.000000e+00> : vector<32x8x12xf32>
    %47 = vector.multi_reduction <add>, %46, %cst_8 [1] : vector<32x4x8x12xf32> to vector<32x8x12xf32>
    %48 = vector.shape_cast %47 : vector<32x8x12xf32> to vector<256x12xf32>
    %cst_9 = arith.constant dense<0.000000e+00> : vector<256x12xf32>
    %49 = tpu.matmul %48, %3, %cst_9 {dimension_numbers = #tpu.dot_dimension_numbers<[1], [0], [0], [1], [0, 0, 1, 1], [], []>} : vector<256x12xf32>, vector<12x12xf32>, vector<256x12xf32> -> vector<256x12xf32>
    %50 = vector.broadcast %12 : vector<1x12xf32> to vector<256x12xf32>
    %51 = arith.addf %49, %50 : vector<256x12xf32>
    %52 = arith.addf %51, %16 : vector<256x12xf32>
    %cst_10 = arith.constant dense<0.000000e+00> : vector<256xf32>
    %53 = vector.multi_reduction <add>, %52, %cst_10 [1] : vector<256x12xf32> to vector<256xf32>
    %54 = vector.shape_cast %53 : vector<256xf32> to vector<256x1xf32>
    %cst_11 = arith.constant 1.200000e+01 : f32
    %55 = vector.broadcast %cst_11 : f32 to vector<256x1xf32>
    %56 = arith.divf %54, %55 : vector<256x1xf32>
    %57 = vector.broadcast %56 : vector<256x1xf32> to vector<256x12xf32>
    %58 = arith.subf %52, %57 : vector<256x12xf32>
    %59 = arith.mulf %58, %58 : vector<256x12xf32>
    %cst_12 = arith.constant dense<0.000000e+00> : vector<256xf32>
    %60 = vector.multi_reduction <add>, %59, %cst_12 [1] : vector<256x12xf32> to vector<256xf32>
    %61 = vector.shape_cast %60 : vector<256xf32> to vector<256x1xf32>
    %cst_13 = arith.constant 1.200000e+01 : f32
    %62 = vector.broadcast %cst_13 : f32 to vector<256x1xf32>
    %63 = arith.divf %61, %62 : vector<256x1xf32>
    %64 = vector.broadcast %56 : vector<256x1xf32> to vector<256x12xf32>
    %65 = arith.subf %52, %64 : vector<256x12xf32>
    %cst_14 = arith.constant 9.99999974E-6 : f32
    %66 = vector.broadcast %cst_14 : f32 to vector<256x1xf32>
    %67 = arith.addf %63, %66 : vector<256x1xf32>
    %68 = math.rsqrt %67 : vector<256x1xf32>
    %69 = vector.broadcast %68 : vector<256x1xf32> to vector<256x12xf32>
    %70 = arith.mulf %65, %69 : vector<256x12xf32>
    %71 = vector.broadcast %8 : vector<1x12xf32> to vector<256x12xf32>
    %72 = arith.mulf %70, %71 : vector<256x12xf32>
    %73 = vector.broadcast %9 : vector<1x12xf32> to vector<256x12xf32>
    %74 = arith.addf %72, %73 : vector<256x12xf32>
    %75 = vector.shape_cast %74 : vector<256x12xf32> to vector<32x8x12xf32>
    %cst_15 = arith.constant dense<0.000000e+00> : vector<32x12xf32>
    %76 = vector.multi_reduction <add>, %75, %cst_15 [1] : vector<32x8x12xf32> to vector<32x12xf32>
    %cst_16 = arith.constant 8.000000e+00 : f32
    %77 = vector.broadcast %cst_16 : f32 to vector<32x12xf32>
    %78 = arith.divf %76, %77 : vector<32x12xf32>
    %cst_17 = arith.constant dense<0.000000e+00> : vector<32x24xf32>
    %79 = tpu.matmul %78, %4, %cst_17 {dimension_numbers = #tpu.dot_dimension_numbers<[1], [0], [0], [1], [0, 0, 1, 1], [], []>} : vector<32x12xf32>, vector<12x24xf32>, vector<32x24xf32> -> vector<32x24xf32>
    %80 = vector.broadcast %10 : vector<1x24xf32> to vector<32x24xf32>
    %81 = arith.addf %79, %80 : vector<32x24xf32>
    %cst_18 = arith.constant 5.000000e-01 : f32
    %82 = vector.broadcast %cst_18 : f32 to vector<32x24xf32>
    %83 = arith.mulf %82, %81 : vector<32x24xf32>
    %cst_19 = arith.constant 1.41421354 : f32
    %84 = vector.broadcast %cst_19 : f32 to vector<32x24xf32>
    %85 = arith.divf %81, %84 : vector<32x24xf32>
    %86 = math.erf %85 : vector<32x24xf32>
    %cst_20 = arith.constant 1.000000e+00 : f32
    %87 = vector.broadcast %cst_20 : f32 to vector<32x24xf32>
    %88 = arith.addf %87, %86 : vector<32x24xf32>
    %89 = arith.mulf %83, %88 : vector<32x24xf32>
    %cst_21 = arith.constant dense<0.000000e+00> : vector<32x128xf32>
    %90 = tpu.matmul %89, %5, %cst_21 {dimension_numbers = #tpu.dot_dimension_numbers<[1], [0], [0], [1], [0, 0, 1, 1], [], []>} : vector<32x24xf32>, vector<24x128xf32>, vector<32x128xf32> -> vector<32x128xf32>
    %91 = vector.broadcast %11 : vector<1x128xf32> to vector<32x128xf32>
    %92 = arith.addf %90, %91 : vector<32x128xf32>
    %c0_22 = arith.constant 0 : index
    %c0_23 = arith.constant 0 : index
    %93 = vector.load %arg3[%c0_22, %c0_23] : memref<32x128xf32, #tpu.memory_space<vmem>>, vector<32x128xf32>
    tpu.vector_store %arg3[%c0_22, %c0_23], %92 {strides = array<i32>} : memref<32x128xf32, #tpu.memory_space<vmem>>, vector<32x128xf32>,
    return
  }
  func.func @transform_0(%arg0: i32) -> (i32, i32, i32) {
    %c0_i32 = arith.constant 0 : i32
    %c0_i32_0 = arith.constant 0 : i32
    %c0_i32_1 = arith.constant 0 : i32
    return %arg0, %c0_i32, %c0_i32_0 : i32, i32, i32
  }
  func.func @transform_1(%arg0: i32) -> (i32, i32) {
    %c0_i32 = arith.constant 0 : i32
    %c0_i32_0 = arith.constant 0 : i32
    %c0_i32_1 = arith.constant 0 : i32
    return %c0_i32, %c0_i32_0 : i32, i32
  }
  func.func @transform_2(%arg0: i32) -> (i32, i32) {
    %c0_i32 = arith.constant 0 : i32
    %c0_i32_0 = arith.constant 0 : i32
    return %arg0, %c0_i32 : i32, i32
  }
}

</mosaic_0001>

<bundles_post_ra>
// kernel: tpu_custom_call.1
= control target key start
LH: loop header
LB: loop body
LE: loop exit
PB: predicated region body
PF: predicated region fallthrough
CT: control target
= control target key end

     0   :  { %7 = vsyncpa [#allocation3], 0  ;;  %s16994_s0 = inlined_call_operand.vmem [shape: f32[64,8,12], index: 0, kind: input, shape index: {}]   ;;  %s16995_s1 = inlined_call_operand.vmem [shape: f32[88,128], index: 1, kind: input, shape index: {}]   ;;  %s16996_s2 = inlined_call_operand.hbm [shape: f32[64,128], index: 2, kind: output, shape index: {}]  }
   0x1   :  { %9 = vsyncpa [#allocation3 + $0x1], 0  ;;  %s12585_s9 = smov 0   ;;  %s12587_s10 = smov 0  }
   0x2   :  { %s12589_s11 = smov 0   ;;  %s12591_s12 = smov 0  }
   0x3 LB: > { %s12606_s13 = sadd.s32 4294967295, %s12561_s12   ;;  %s10428_s14 = sadd.s32 4294967294, %s12561_s12   ;;  %s12561_s12 = sphi %s12591_s12, %s18226_s12   ;;  %s12557_s11 = sphi %s12589_s11, %s18225_s11   ;;  %s12553_s10 = sphi %s12587_s10, %s18224_s10   ;;  %s12549_s9 = sphi %s12585_s9, %s18223_s9  }
   0x4   : > { %s12610_s15 = sadd.s32 1, %s12561_s12   ;;  %s69_s16 = sadd.s32 1, %s12557_s11 }
   0x5   : > { %s66_s17 = ssub.s32 %s12561_s12, %s12610_s15  ;;  %p79_p0 = scmp.ne.s32.totalorder %s12557_s11, %s12553_s10 }
   0x6   : > { %p67_p1 = scmp.eq.s32.totalorder %s66_s17, 0  ;;  %p80_p2 = scmp.eq.s32.totalorder %s12606_s13, 1 }
   0x7   : > { %p85_p3 = scmp.ne.s32.totalorder %s12553_s10, %s12549_s9  ;;  %p86_p4 = scmp.eq.s32.totalorder %s10428_s14, 1 }
   0x8   : > { %s12621_s18 = scalar_select %p67_p1, %s12557_s11, %s69_s16  }
   0x9   : > { %p12623_p5 = por %p80_p2, %p79_p0  ;;  %p12627_p6 = por %p86_p4, %p85_p3 }
   0xa   : > { %p10431_p7 = scmp.ge.s32.totalorder %s12561_s12, 1  ;;  %p116_p8 = scmp.lt.s32.totalorder %s12561_s12, 3 }
   0xc   : > { %p117_p9 = pnand %p10431_p7, %p116_p8 }
   0xe   : > { %120 = sbr.rel (%p117_p9) target bundleno = 2814 (0xafe), region = 28 }
  0x15   : > { %v177_v0 = vld [vmem:[%s16995_s1] sm:$0xff]  ;;  %v178_v1 = vld [vmem:[%s16995_s1 + $0x8] sm:$0xff]  ;;  %vm325_vm0 = vcmask 1043456   ;;  %s10433_s25 = sshll.u32 %s12606_s13, 5  ;;  %v188_v2 = vlaneseq  ;;  %vm12563_vm1 = vmmov 1   ;;  %v17387_v4 = vmov 0 }
  0x16   : > { %v11844_v3 = vpack.c.bf16 %v178_v1, %v177_v0  ;;  %vm12640_vm2 = vmpackc.low %vm325_vm0, %vm12563_vm1  ;;  %p139_p10 = scmp.lt.s32.totalorder %s10433_s25, 63  ;;  %v10468_v5 = vld.sshfl [vmem:[%s16995_s1 + $0x50] sm:$0xff pattern:$0x75316420]  ;;  %v12656_v7 = vld [vmem:[%s16995_s1 + $0x48] sm:$0xff]  ;;  %vm228_vm3 = vcmask 97280  }
  0x17   : > { %v17388_v4 = vsel %vm12640_vm2, 4294967295, %v17387_v4  ;;  %v12647_v6 = vshrl.u32 %v188_v2, 7  ;;  %v12564_v8 = vmov 1966171168   ;;  %v562_v11 = vcombine.high %v10468_v5, %v10468_v5  ;;  %s12565_s6 = smov 116   ;;  %s12566_s7 = smov 104  }
  0x18   : > { %17389 = vst [vmem:[#allocation5_spill] sm:$0xff] %v17388_v4  ;;  %11846 = vmatprep.subr.msk.bf16.mxu0 %vm12640_vm2, %v11844_v3  ;;  %11866 = vmatprep.subr.msk.bf16.mxu1 %vm12640_vm2, %v11844_v3  ;;  %s18228_s25 = smov (!%p139_p10, %s10433_s25), 63  ;;  %v564_v9 = vunpack.c.l.s4 %v12564_v8  ;;  %vm3991_vm4 = vcmask 64512   ;;  %vm10094_vm5 = vcmask 1041409   ;;  %vm10096_vm6 = vcmask 1042434   ;;  %s10804_s17 = sshll.u32 %s12606_s13, 9 }
  0x19   : > { %17390 = vst [vmem:[#allocation6_spill] sm:$0xff] %v12647_v6  ;;  %11849 = vmatpush3.bf16.msk.msra.mxu0 %vm12640_vm2, %v11844_v3  ;;  %11867 = vmatpush3.bf16.msk.msra.mxu1 %vm12640_vm2, %v11844_v3  ;;  %v12663_v10 = vsub.s32 0, %v12647_v6  ;;  %s10434_s30 = sshll.u32 %s18228_s25, 3  ;;  %vm10098_vm7 = vcmask 1043459   ;;  %vm10100_vm8 = vcmask 1044484   ;;  %vm10102_vm9 = vcmask 1045509   ;;  %s16951_s23 = scalar_lea.hbm %s16996_s2, %s10804_s17 }
  0x1a   : > { %v565_v12 = vunpack.c.0.s8 %v564_v9  ;;  %s12668_s5 = scalar_lea.vmem %s16994_s0, %s10434_s30  ;;  %vm10104_vm10 = vcmask 1046534   ;;  %vm10106_vm11 = vcmask 1047559   ;;  %vm10250_vm12 = vcmask 195584   ;;  %s12567_s13 = smov [#allocation2]  }
  0x1b   : > { %v12672_v13 = vrot.slane %v12656_v7, %v12663_v10  ;;  %v145_v14 = vld [vmem:[%s12668_s5] sm:$0xff]  ;;  %v146_v17 = vld [vmem:[%s12668_s5 + $0x8] sm:$0xff]  ;;  %v147_v22 = vld [vmem:[%s12668_s5 + $0x10] sm:$0xff]  ;;  %s12503_s26 = sshll.u32 %s12567_s13, 4  ;;  %s12504_s26 = int_to_ptr.vmem [resolvable:$false] %s12503_s26 }
  0x1c   : > { %v568_v15 = vsub.s32 %v565_v12, %v12647_v6  ;;  %v165_v16 = vld [vmem:[%s12668_s5 + $0xa0] sm:$0xff]  ;;  %v166_v21 = vld [vmem:[%s12668_s5 + $0xa8] sm:$0xff]  ;;  %v148_v23 = vld [vmem:[%s12668_s5 + $0x18] sm:$0xff]  ;;  %s12505_s27 = scalar_lea.vmem %s12504_s26, 1024 }
  0x1d   : > { %v12679_v18 = vmul.f32 %v12672_v13, %v145_v14  ;;  %v12682_v19 = vmul.f32 %v12672_v13, %v165_v16  ;;  %v12685_v20 = vmul.f32 %v12672_v13, %v146_v17  ;;  %v12693_v26 = vmul.f32 %v12672_v13, %v166_v21  ;;  %v167_v28 = vld [vmem:[%s12668_s5 + $0xb0] sm:$0xff]  ;;  %v168_v29 = vld [vmem:[%s12668_s5 + $0xb8] sm:$0xff]  ;;  %v149_v30 = vld [vmem:[%s12668_s5 + $0x20] sm:$0xff] }
  0x1e   : > { %v12690_v24 = vrot.slane %v10468_v5, %v568_v15  ;;  %v576_v25 = vrot.slane %v562_v11, %v568_v15  ;;  %v12696_v27 = vmul.f32 %v12672_v13, %v147_v22  ;;  %v12706_v31 = vmul.f32 %v12672_v13, %v167_v28  ;;  %v169_v32 = vld [vmem:[%s12668_s5 + $0xc0] sm:$0xff]  ;;  %v150_v39 = vld [vmem:[%s12668_s5 + $0x28] sm:$0xff]  ;;  %v151_v44 = vld [vmem:[%s12668_s5 + $0x30] sm:$0xff] }
  0x1f   : > { %17391 = vst [vmem:[#allocation7_spill] sm:$0xff] %v12679_v18  ;;  %17392 = vst [vmem:[#allocation8_spill] sm:$0xff] %v12682_v19  ;;  %11210 = vmatprep.mubr.msk.f32.mxu0 %vm228_vm3, %v12679_v18  ;;  %11240 = vmatprep.mubr.msk.f32.mxu1 %vm228_vm3, %v12682_v19  ;;  %v12717_v36 = vmul.f32 %v12672_v13, %v148_v23  ;;  %v12724_v37 = vmul.f32 %v12672_v13, %v168_v29  ;;  %v170_v43 = vld [vmem:[%s12668_s5 + $0xc8] sm:$0xff]  ;;  %v171_v45 = vld [vmem:[%s12668_s5 + $0xd0] sm:$0xff] }
  0x20   : > { %17393 = vst [vmem:[#allocation9_spill] sm:$0xff] %v12685_v20  ;;  %17394 = vst [vmem:[#allocation10_spill] sm:$0xff] %v12693_v26  ;;  %v577_v33 = vcombine.high %v12690_v24, %v12690_v24  ;;  %v578_v34 = vcombine.high %v576_v25, %v576_v25  ;;  %v12712_v35 = vrot.slane %v576_v25, %v12663_v10  ;;  %11211 = vmatmul.mubr.msk.f32.vlgmr.msra.gmra.mrb[0].mxu0 %vm228_vm3, %v12685_v20  ;;  %v152_v49 = vld [vmem:[%s12668_s5 + $0x38] sm:$0xff]  ;;  %v153_v52 = vld [vmem:[%s12668_s5 + $0x40] sm:$0xff] }
  0x21   : > { %17395 = vst [vmem:[#allocation11_spill] sm:$0xff] %v12696_v27  ;;  %17396 = vst [vmem:[#allocation12_spill] sm:$0xff] %v12706_v31  ;;  %11241 = vmatmul.mubr.msk.f32.vlgmr.msra.gmra.mrb[0].mxu1 %vm228_vm3, %v12693_v26  ;;  %11213 = vmatprep.mubr.msk.f32.mxu0 %vm228_vm3, %v12696_v27  ;;  %v12727_v38 = vmul.f32 %v12672_v13, %v149_v30  ;;  %v12739_v42 = vmul.f32 %v12672_v13, %v169_v32  ;;  %v172_v51 = vld [vmem:[%s12668_s5 + $0xd8] sm:$0xff]  ;;  %v173_v53 = vld [vmem:[%s12668_s5 + $0xe0] sm:$0xff] }
  0x22   : > { %17397 = vst [vmem:[#allocation13_spill] sm:$0xff] %v12712_v35  ;;  %17398 = vst [vmem:[#allocation14_spill] sm:$0xff] %v12717_v36  ;;  %v12731_v40 = vrot.slane %v577_v33, %v12663_v10  ;;  %v12734_v41 = vrot.slane %v578_v34, %v12663_v10  ;;  %11243 = vmatprep.mubr.msk.f32.mxu1 %vm228_vm3, %v12706_v31  ;;  %v12747_v46 = vmul.f32 %v12672_v13, %v150_v39  ;;  %v154_v57 = vld [vmem:[%s12668_s5 + $0x48] sm:$0xff]  ;;  %v155_v60 = vld [vmem:[%s12668_s5 + $0x50] sm:$0xff] }
  0x23   : > { %17399 = vst [vmem:[#allocation15_spill] sm:$0xff] %v12724_v37  ;;  %17400 = vst [vmem:[#allocation16_spill] sm:$0xff] %v12727_v38  ;;  %v12754_v47 = vmul.f32 %v12672_v13, %v170_v43  ;;  %v12757_v48 = vmul.f32 %v12672_v13, %v151_v44  ;;  %v12763_v50 = vmul.f32 %v12672_v13, %v171_v45  ;;  %v174_v59 = vld [vmem:[%s12668_s5 + $0xe8] sm:$0xff]  ;;  %v175_v61 = vld [vmem:[%s12668_s5 + $0xf0] sm:$0xff]  ;;  %v226_v34 = vsub.s32 1, %v12647_v6 }
  0x24   : > { %17401 = vst [vmem:[#allocation17_spill] sm:$0xff] %v12731_v40  ;;  %17402 = vst [vmem:[#allocation18_spill] sm:$0xff] %v12734_v41  ;;  %11214 = vmatmul.mubr.msk.f32.gmra.mrb[2].mxu0 %vm228_vm3, %v12717_v36  ;;  %v12771_v54 = vmul.f32 %v12672_v13, %v152_v49  ;;  %v12778_v55 = vmul.f32 %v12672_v13, %v172_v51  ;;  %v12781_v56 = vmul.f32 %v12672_v13, %v153_v52  ;;  %v156_v1 = vld [vmem:[%s12668_s5 + $0x58] sm:$0xff]  ;;  %v157_v5 = vld [vmem:[%s12668_s5 + $0x60] sm:$0xff] }
  0x25   : > { %17403 = vst [vmem:[#allocation19_spill] sm:$0xff] %v12739_v42  ;;  %17404 = vst [vmem:[#allocation20_spill] sm:$0xff] %v12747_v46  ;;  %11244 = vmatmul.mubr.msk.f32.gmra.mrb[2].mxu1 %vm228_vm3, %v12724_v37  ;;  %11216 = vmatprep.mubr.msk.f32.mxu0 %vm228_vm3, %v12727_v38  ;;  %v12787_v58 = vmul.f32 %v12672_v13, %v173_v53  ;;  %v12795_v62 = vmul.f32 %v12672_v13, %v154_v57  ;;  %v176_v3 = vld [vmem:[%s12668_s5 + $0xf8] sm:$0xff]  ;;  %v158_v12 = vld [vmem:[%s12668_s5 + $0x68] sm:$0xff] }
  0x26   : > { %17405 = vst [vmem:[#allocation21_spill] sm:$0xff] %v12754_v47  ;;  %17406 = vst [vmem:[#allocation22_spill] sm:$0xff] %v12757_v48  ;;  %11246 = vmatprep.mubr.msk.f32.mxu1 %vm228_vm3, %v12739_v42  ;;  %v12802_v63 = vmul.f32 %v12672_v13, %v174_v59  ;;  %v12805_v0 = vmul.f32 %v12672_v13, %v155_v60  ;;  %v12811_v2 = vmul.f32 %v12672_v13, %v175_v61  ;;  %v159_v14 = vld [vmem:[%s12668_s5 + $0x70] sm:$0xff]  ;;  %v160_v17 = vld [vmem:[%s12668_s5 + $0x78] sm:$0xff] }
  0x27   : > { %17407 = vst [vmem:[#allocation23_spill] sm:$0xff] %v12763_v50  ;;  %17408 = vst [vmem:[#allocation24_spill] sm:$0xff] %v12771_v54  ;;  %v12818_v8 = vmul.f32 %v12672_v13, %v156_v1  ;;  %v12825_v9 = vmul.f32 %v12672_v13, %v176_v3  ;;  %v12828_v11 = vmul.f32 %v12672_v13, %v157_v5  ;;  %v161_v21 = vld [vmem:[%s12668_s5 + $0x80] sm:$0xff]  ;;  %v162_v25 = vld [vmem:[%s12668_s5 + $0x88] sm:$0xff] }
  0x28   : > { %11217 = vmatmul.mubr.msk.f32.gmra.mrb[4].mxu0 %vm228_vm3, %v12747_v46  ;;  %17409 = vst [vmem:[#allocation25_spill] sm:$0xff] %v12778_v55  ;;  %17410 = vst [vmem:[#allocation26_spill] sm:$0xff] %v12781_v56  ;;  %v12837_v15 = vmul.f32 %v12672_v13, %v158_v12  ;;  %v12844_v16 = vmul.f32 %v12672_v13, %v159_v14  ;;  %v12851_v22 = vmul.f32 %v12672_v13, %v160_v17  ;;  %v163_v28 = vld [vmem:[%s12668_s5 + $0x90] sm:$0xff]  ;;  %v164_v32 = vld [vmem:[%s12668_s5 + $0x98] sm:$0xff] }
  0x29   : > { %11247 = vmatmul.mubr.msk.f32.gmra.mrb[4].mxu1 %vm228_vm3, %v12754_v47  ;;  %11219 = vmatprep.mubr.msk.f32.mxu0 %vm228_vm3, %v12757_v48  ;;  %17411 = vst [vmem:[#allocation27_spill] sm:$0xff] %v12787_v58  ;;  %17412 = vst [vmem:[#allocation28_spill] sm:$0xff] %v12795_v62  ;;  %v12856_v23 = vmul.f32 %v12672_v13, %v161_v21  ;;  %v12863_v29 = vmul.f32 %v12672_v13, %v162_v25 }
  0x2a   : > { %11249 = vmatprep.mubr.msk.f32.mxu1 %vm228_vm3, %v12763_v50  ;;  %17413 = vst [vmem:[#allocation29_spill] sm:$0xff] %v12802_v63  ;;  %17414 = vst [vmem:[#allocation30_spill] sm:$0xff] %v12805_v0  ;;  %v12868_v30 = vmul.f32 %v12672_v13, %v163_v28  ;;  %v12874_v33 = vmul.f32 %v12672_v13, %v164_v32  ;;  %v12882_v39 = vrot.slane %v12656_v7, %v226_v34 }
  0x2b   : > { %17415 = vst [vmem:[#allocation31_spill] sm:$0xff] %v12811_v2  ;;  %17416 = vst [vmem:[#allocation32_spill] sm:$0xff] %v12818_v8  ;;  %v12886_v43 = vrot.slane %v12690_v24, %v12663_v10 }
  0x2c   : > { %11220 = vmatmul.mubr.msk.f32.gmra.mrb[6].mxu0 %vm228_vm3, %v12771_v54  ;;  %17417 = vst [vmem:[#allocation33_spill] sm:$0xff] %v12825_v9  ;;  %17418 = vst [vmem:[#allocation34_spill] sm:$0xff] %v12828_v11 }
  0x2d   : > { %11250 = vmatmul.mubr.msk.f32.gmra.mrb[6].mxu1 %vm228_vm3, %v12778_v55  ;;  %11222 = vmatprep.mubr.msk.f32.mxu0 %vm228_vm3, %v12781_v56  ;;  %17419 = vst [vmem:[#allocation35_spill] sm:$0xff] %v12837_v15  ;;  %17420 = vst [vmem:[#allocation36_spill] sm:$0xff] %v12844_v16 }
  0x2e   : > { %11252 = vmatprep.mubr.msk.f32.mxu1 %vm228_vm3, %v12787_v58  ;;  %17421 = vst [vmem:[#allocation37_spill] sm:$0xff] %v12851_v22  ;;  %17422 = vst [vmem:[#allocation38_spill] sm:$0xff] %v12856_v23 }
  0x2f   : > { %17423 = vst [vmem:[#allocation39_spill] sm:$0xff] %v12863_v29  ;;  %17424 = vst [vmem:[#allocation40_spill] sm:$0xff] %v12868_v30 }
  0x30   : > { %11223 = vmatmul.mubr.msk.f32.gmra.mrb[8].mxu0 %vm228_vm3, %v12795_v62  ;;  %17425 = vst [vmem:[#allocation41_spill] sm:$0xff] %v12874_v33  ;;  %17426 = vst [vmem:[#allocation42_spill] sm:$0xff] %v12886_v43 }
  0x31   : > { %11253 = vmatmul.mubr.msk.f32.gmra.mrb[8].mxu1 %vm228_vm3, %v12802_v63  ;;  %11225 = vmatprep.mubr.msk.f32.mxu0 %vm228_vm3, %v12805_v0 }
  0x32   : > { %11255 = vmatprep.mubr.msk.f32.mxu1 %vm228_vm3, %v12811_v2 }
  0x34   : > { %11226 = vmatmul.mubr.msk.f32.gmra.mrb[10].mxu0 %vm228_vm3, %v12818_v8 }
  0x35   : > { %11256 = vmatmul.mubr.msk.f32.gmra.mrb[10].mxu1 %vm228_vm3, %v12825_v9  ;;  %11228 = vmatprep.mubr.msk.f32.mxu0 %vm228_vm3, %v12828_v11 }
  0x38   : > { %11229 = vmatmul.mubr.msk.f32.gmra.mrb[12].mxu0 %vm228_vm3, %v12837_v15 }
  0x39   : > { %11231 = vmatprep.mubr.msk.f32.mxu0 %vm228_vm3, %v12844_v16 }
  0x3c   : > { %11232 = vmatmul.mubr.msk.f32.gmra.mrb[14].mxu0 %vm228_vm3, %v12851_v22 }
  0x3d   : > { %11234 = vmatprep.mubr.msk.f32.mxu0 %vm228_vm3, %v12856_v23 }
  0x40   : > { %11235 = vmatmul.mubr.msk.f32.gmra.mrb[16].mxu0 %vm228_vm3, %v12863_v29 }
  0x41   : > { %11237 = vmatprep.mubr.msk.f32.mxu0 %vm228_vm3, %v12868_v30 }
  0x44   : > { %11238 = vmatmul.mubr.msk.f32.gmra.mrb[18].mxu0 %vm228_vm3, %v12874_v33 }
  0xf3   : > { %v11212_v44 = vpop.f32.mrb[0].mxu0 }
  0xf4   : > { %v12889_v45 = vadd.f32 %v11212_v44, %v12882_v39  ;;  %v11242_v13 = vpop.f32.mrb[0].mxu1  ;;  %v395_v49 = vpop.f32.mrb[1].mxu0 }
  0xf5   : > { %v12892_v51 = vadd.f32 %v11242_v13, %v12882_v39  ;;  %v12895_v52 = vadd.f32 %v395_v49, %v12882_v39  ;;  %v495_v53 = vpop.f32.mrb[1].mxu1 }
  0xf6   : > { %830 = vrot.lane.b32.xlu0 %v12889_v45, %s12565_s6  ;;  %v12912_v12 = vadd.f32 %v495_v53, %v12882_v39  ;;  %v603_v11 = vmul.f32 %v12886_v43, %v12889_v45 }
  0xf7   : > { %17427 = vst [vmem:[#allocation43_spill] sm:$0xff] %v12892_v51  ;;  %2870 = vrot.lane.b32.xlu1 %v12892_v51, %s12565_s6  ;;  %v599_v7 = vmul.f32 %v12886_v43, %v12895_v52  ;;  %v11215_v10 = vpop.f32.mrb[2].mxu0  ;;  %v600_v26 = vmul.f32 %v12712_v35, %v12895_v52  ;;  %v601_v30 = vmul.f32 %v12731_v40, %v12895_v52 }
  0xf8   : > { %v11245_v24 = vpop.f32.mrb[2].mxu1  ;;  %v405_v57 = vpop.f32.mrb[3].mxu0  ;;  %v12909_v60 = vadd.f32 %v11215_v10, %v12882_v39  ;;  %17428 = vst [vmem:[#allocation44_spill] sm:$0xff] %v12912_v12 }
  0xf9   : > { %11260 = vmatprep.mubr.msk.f32.mxu1 %vm228_vm3, %v599_v7  ;;  %v505_v59 = vpop.f32.mrb[3].mxu1  ;;  %v12919_v14 = vadd.f32 %v11245_v24, %v12882_v39  ;;  %v12926_v32 = vadd.f32 %v405_v57, %v12882_v39 }
  0xfa   : > { %5500 = vrot.lane.b32.xlu0 %v12889_v45, %s12566_s7  ;;  %v12932_v7 = vadd.f32 %v505_v59, %v12882_v39 }
  0xfb   : > { %5400 = vrot.lane.b32.xlu1 %v12895_v52, %s12566_s7  ;;  %v11218_v61 = vpop.f32.mrb[4].mxu0  ;;  %17429 = vst [vmem:[#allocation45_spill] sm:$0xff] %v12919_v14  ;;  %v607_v15 = vmul.f32 %v12886_v43, %v12926_v32 }
  0xfc   : > { %v415_v1 = vpop.f32.mrb[5].mxu0  ;;  %v11248_v3 = vpop.f32.mrb[4].mxu1  ;;  %17430 = vst [vmem:[#allocation46_spill] sm:$0xff] %v12932_v7  ;;  %v12948_v58 = vadd.f32 %v11218_v61, %v12882_v39 }
  0xfd   : > { %v515_v5 = vpop.f32.mrb[5].mxu1  ;;  %v12971_v50 = vadd.f32 %v415_v1, %v12882_v39 }
  0xfe   : > { %728 = vrot.lane.b32.xlu0 %v12895_v52, %s12565_s6  ;;  %v12980_v42 = vadd.f32 %v515_v5, %v12882_v39 }
  0xff   : > { %1034 = vrot.lane.b32.xlu1 %v12909_v60, %s12565_s6  ;;  %v11221_v17 = vpop.f32.mrb[6].mxu0  ;;  %v615_v48 = vmul.f32 %v12886_v43, %v12971_v50 }
 0x100   : > { %v425_v21 = vpop.f32.mrb[7].mxu0  ;;  %v11251_v25 = vpop.f32.mrb[6].mxu1  ;;  %17436 = vst [vmem:[#allocation52_spill] sm:$0xff] %v12980_v42 }
 0x101   : > { %v525_v28 = vpop.f32.mrb[7].mxu1 }
 0x102   : > { %2768 = vrot.lane.b32.xlu0 %v12912_v12, %s12565_s6  ;;  %v13016_v33 = vadd.f32 %v525_v28, %v12882_v39 }
 0x103   : > { %3074 = vrot.lane.b32.xlu1 %v12919_v14, %s12565_s6  ;;  %v11224_v34 = vpop.f32.mrb[8].mxu0 }
 0x104   : > { %v435_v44 = vpop.f32.mrb[9].mxu0  ;;  %v11254_v13 = vpop.f32.mrb[8].mxu1  ;;  %17442 = vst [vmem:[#allocation58_spill] sm:$0xff] %v13016_v33 }
 0x105   : > { %v12929_v49 = vadd.f32 %v435_v44, %v12882_v39  ;;  %v535_v53 = vpop.f32.mrb[9].mxu1 }
 0x106   : > { %5700 = vrot.lane.b32.xlu0 %v12909_v60, %s12566_s7 }
 0x107   : > { %932 = vrot.lane.b32.xlu1 %v12926_v32, %s12565_s6  ;;  %v631_v10 = vmul.f32 %v12886_v43, %v12929_v49  ;;  %v11227_v24 = vpop.f32.mrb[10].mxu0 }
 0x108   : > { %v445_v57 = vpop.f32.mrb[11].mxu0  ;;  %v11257_v2 = vpop.f32.mrb[10].mxu1  ;;  %v13046_v28 = vadd.f32 %v11227_v24, %v12882_v39 }
 0x109   : > { %11324 = vmatprep.mubr.msk.f32.mxu0 %vm228_vm3, %v631_v10  ;;  %v12942_v44 = vadd.f32 %v445_v57, %v12882_v39  ;;  %v12945_v59 = vadd.f32 %v11257_v2, %v12882_v39  ;;  %v545_v9 = vpop.f32.mrb[11].mxu1 }
 0x10a   : > { %2972 = vrot.lane.b32.xlu0 %v12932_v7, %s12565_s6  ;;  %v12953_v63 = vadd.f32 %v545_v9, %v12882_v39  ;;  %v12968_v9 = vadd.f32 %v11248_v3, %v12882_v39 }
 0x10b   : > { %17431 = vst [vmem:[#allocation47_spill] sm:$0xff] %v12945_v59  ;;  %5600 = vrot.lane.b32.xlu1 %v12926_v32, %s12566_s7  ;;  %v11230_v10 = vpop.f32.mrb[12].mxu0 }
 0x10c   : > { %17432 = vst [vmem:[#allocation48_spill] sm:$0xff] %v12953_v63  ;;  %v12958_v57 = vadd.f32 %v11230_v10, %v12882_v39  ;;  %v455_v37 = vpop.f32.mrb[13].mxu0  ;;  %17433 = vst [vmem:[#allocation49_spill] sm:$0xff] %v12968_v9 }
 0x10d   : > { %v12961_v2 = vadd.f32 %v455_v37, %v12882_v39 }
 0x10e   : > { %5900 = vrot.lane.b32.xlu0 %v12948_v58, %s12566_s7 }
 0x10f   : > { %1238 = vrot.lane.b32.xlu1 %v12948_v58, %s12565_s6  ;;  %v11233_v61 = vpop.f32.mrb[14].mxu0 }
 0x110   : > { %v12974_v10 = vadd.f32 %v11233_v61, %v12882_v39  ;;  %v465_v55 = vpop.f32.mrb[15].mxu0 }
 0x111   : > { %v12977_v37 = vadd.f32 %v465_v55, %v12882_v39  ;;  %v12993_v55 = vadd.f32 %v11221_v17, %v12882_v39  ;;  %v13013_v17 = vadd.f32 %v425_v21, %v12882_v39  ;;  %v13034_v21 = vadd.f32 %v11254_v13, %v12882_v39 }
 0x112   : > { %17434 = vst [vmem:[#allocation50_spill] sm:$0xff] %v12974_v10  ;;  %1136 = vrot.lane.b32.xlu0 %v12971_v50, %s12565_s6 }
 0x113   : > { %17435 = vst [vmem:[#allocation51_spill] sm:$0xff] %v12977_v37  ;;  %3278 = vrot.lane.b32.xlu1 %v12968_v9, %s12565_s6  ;;  %v11236_v3 = vpop.f32.mrb[16].mxu0  ;;  %17443 = vst [vmem:[#allocation59_spill] sm:$0xff] %v13034_v21 }
 0x114   : > { %v12987_v1 = vadd.f32 %v11236_v3, %v12882_v39  ;;  %v475_v47 = vpop.f32.mrb[17].mxu0 }
 0x115   : > { %v12990_v61 = vadd.f32 %v475_v47, %v12882_v39  ;;  %v13010_v47 = vadd.f32 %v11251_v25, %v12882_v39  ;;  %v13039_v25 = vadd.f32 %v535_v53, %v12882_v39 }
 0x116   : > { %17437 = vst [vmem:[#allocation53_spill] sm:$0xff] %v12987_v1  ;;  %3176 = vrot.lane.b32.xlu0 %v12980_v42, %s12565_s6 }
 0x117   : > { %17438 = vst [vmem:[#allocation54_spill] sm:$0xff] %v12990_v61  ;;  %5800 = vrot.lane.b32.xlu1 %v12971_v50, %s12566_s7  ;;  %v11239_v5 = vpop.f32.mrb[18].mxu0  ;;  %17441 = vst [vmem:[#allocation57_spill] sm:$0xff] %v13010_v47 }
 0x118   : > { %v13000_v31 = vadd.f32 %v11239_v5, %v12882_v39  ;;  %v485_v19 = vpop.f32.mrb[19].mxu0  ;;  %17444 = vst [vmem:[#allocation60_spill] sm:$0xff] %v13039_v25 }
 0x119   : > { %v13003_v3 = vadd.f32 %v485_v19, %v12882_v39  ;;  %v13023_v19 = vadd.f32 %v11224_v34, %v12882_v39 }
 0x11a   : > { %17439 = vst [vmem:[#allocation55_spill] sm:$0xff] %v13000_v31  ;;  %6100 = vrot.lane.b32.xlu0 %v12993_v55, %s12566_s7 }
 0x11b   : > { %17440 = vst [vmem:[#allocation56_spill] sm:$0xff] %v13003_v3  ;;  %1442 = vrot.lane.b32.xlu1 %v12993_v55, %s12565_s6 }
 0x11e   : > { %1340 = vrot.lane.b32.xlu0 %v13013_v17, %s12565_s6 }
 0x11f   : > { %3482 = vrot.lane.b32.xlu1 %v13010_v47, %s12565_s6 }
 0x122   : > { %3380 = vrot.lane.b32.xlu0 %v13016_v33, %s12565_s6 }
 0x123   : > { %6000 = vrot.lane.b32.xlu1 %v13013_v17, %s12566_s7 }
 0x126   : > { %6300 = vrot.lane.b32.xlu0 %v13023_v19, %s12566_s7 }
 0x127   : > { %1646 = vrot.lane.b32.xlu1 %v13023_v19, %s12565_s6 }
 0x12a   : > { %1544 = vrot.lane.b32.xlu0 %v12929_v49, %s12565_s6 }
 0x12b   : > { %3686 = vrot.lane.b32.xlu1 %v13034_v21, %s12565_s6 }
 0x12e   : > { %3584 = vrot.lane.b32.xlu0 %v13039_v25, %s12565_s6 }
 0x12f   : > { %6200 = vrot.lane.b32.xlu1 %v12929_v49, %s12566_s7 }
 0x132   : > { %6500 = vrot.lane.b32.xlu0 %v13046_v28, %s12566_s7 }
 0x133   : > { %1850 = vrot.lane.b32.xlu1 %v13046_v28, %s12565_s6 }
 0x136   : > { %1748 = vrot.lane.b32.xlu0 %v12942_v44, %s12565_s6 }
 0x137   : > { %3890 = vrot.lane.b32.xlu1 %v12945_v59, %s12565_s6 }
 0x13a   : > { %3788 = vrot.lane.b32.xlu0 %v12953_v63, %s12565_s6 }
 0x13b   : > { %6400 = vrot.lane.b32.xlu1 %v12942_v44, %s12566_s7 }
 0x13e   : > { %6700 = vrot.lane.b32.xlu0 %v12958_v57, %s12566_s7 }
 0x13f   : > { %2054 = vrot.lane.b32.xlu1 %v12958_v57, %s12565_s6 }
 0x142   : > { %1952 = vrot.lane.b32.xlu0 %v12961_v2, %s12565_s6 }
 0x143   : > { %6600 = vrot.lane.b32.xlu1 %v12961_v2, %s12566_s7 }
 0x146   : > { %2156 = vrot.lane.b32.xlu0 %v12977_v37, %s12565_s6 }
 0x147   : > { %2258 = vrot.lane.b32.xlu1 %v12974_v10, %s12565_s6 }
 0x14a   : > { %2360 = vrot.lane.b32.xlu0 %v12990_v61, %s12565_s6 }
 0x14b   : > { %2462 = vrot.lane.b32.xlu1 %v12987_v1, %s12565_s6 }
 0x14e   : > { %2564 = vrot.lane.b32.xlu0 %v13003_v3, %s12565_s6 }
 0x14f   : > { %2666 = vrot.lane.b32.xlu1 %v13000_v31, %s12565_s6 }
 0x168   : > { %v831_v39 = vpop.permute.xlu0 %830 }
 0x169   : > { %v13082_v34 = vpop.permute.xlu1 %2870 }
 0x16c   : > { %v13084_v13 = vpop.permute.xlu0 %5500 }
 0x16d   : > { %v13086_v53 = vpop.permute.xlu1 %5400 }
 0x170   : > { %v729_v24 = vpop.permute.xlu0 %728 }
 0x171   : > { %v1035_v5 = vpop.permute.xlu1 %1034  ;;  %11258 = vmatprep.subr.msk.mxu1 %vm228_vm3, %v729_v24 }
 0x172   : > { %11259 = vmatpush3.xpose.msk.msra.mxu1 %vm228_vm3, %v729_v24  ;;  %v602_v24 = vmul.f32 %v12734_v41, %v12895_v52  ;;  %v605_v52 = vmul.f32 %v12731_v40, %v12889_v45 }
 0x173   : > { %11266 = vmatprep.subr.msk.mxu1 %vm228_vm3, %v831_v39 }
 0x174   : > { %v13093_v29 = vpop.permute.xlu0 %2768 }
 0x175   : > { %v13097_v22 = vpop.permute.xlu1 %3074  ;;  %11261 = vmatmul.mubr.msk.f32.vlgmr.msra.gmra.mrb[12].mxu1 %vm228_vm3, %v600_v26  ;;  %v604_v26 = vmul.f32 %v12712_v35, %v12889_v45 }
 0x176   : > { %11263 = vmatprep.mubr.msk.f32.mxu1 %vm228_vm3, %v601_v30  ;;  %11267 = vmatpush3.xpose.msk.msra.mxu1 %vm228_vm3, %v831_v39 }
 0x178   : > { %v13104_v23 = vpop.permute.xlu0 %5700 }
 0x179   : > { %17445 = vst [vmem:[#allocation61_spill] sm:$0xff] %v13104_v23  ;;  %v933_v16 = vpop.permute.xlu1 %932  ;;  %11264 = vmatmul.mubr.msk.f32.gmra.mrb[14].mxu1 %vm228_vm3, %v602_v24 }
 0x17a   : > { %11274 = vmatprep.subr.msk.mxu1 %vm228_vm3, %v933_v16  ;;  %11268 = vmatprep.mubr.msk.f32.mxu1 %vm228_vm3, %v603_v11  ;;  %v606_v11 = vmul.f32 %v12734_v41, %v12889_v45 }
 0x17c   : > { %v13113_v30 = vpop.permute.xlu0 %2972 }
 0x17d   : > { %v13117_v39 = vpop.permute.xlu1 %5600  ;;  %11269 = vmatmul.mubr.msk.f32.vlgmr.msra.gmra.mrb[16].mxu1 %vm228_vm3, %v604_v26 }
 0x17e   : > { %17446 = vst [vmem:[#allocation62_spill] sm:$0xff] %v13117_v39  ;;  %11275 = vmatpush3.xpose.msk.msra.mxu1 %vm228_vm3, %v933_v16  ;;  %11271 = vmatprep.mubr.msk.f32.mxu1 %vm228_vm3, %v605_v52  ;;  %v608_v16 = vmul.f32 %v12712_v35, %v12926_v32  ;;  %v609_v52 = vmul.f32 %v12731_v40, %v12926_v32 }
 0x17f   : > { %11282 = vmatprep.subr.msk.mxu1 %vm228_vm3, %v1035_v5 }
 0x180   : > { %v13125_v24 = vpop.permute.xlu0 %5900 }
 0x181   : > { %17447 = vst [vmem:[#allocation63_spill] sm:$0xff] %v13125_v24  ;;  %v1239_v56 = vpop.permute.xlu1 %1238  ;;  %11272 = vmatmul.mubr.msk.f32.gmra.mrb[18].mxu1 %vm228_vm3, %v606_v11  ;;  %v611_v11 = vmul.f32 %v12886_v43, %v12909_v60 }
 0x182   : > { %11276 = vmatprep.mubr.msk.f32.mxu1 %vm228_vm3, %v607_v15  ;;  %v610_v15 = vmul.f32 %v12734_v41, %v12926_v32 }
 0x184   : > { %v1137_v26 = vpop.permute.xlu0 %1136 }
 0x185   : > { %v13135_v0 = vpop.permute.xlu1 %3278  ;;  %11277 = vmatmul.mubr.msk.f32.vlgmr.msra.gmra.mrb[20].mxu1 %vm228_vm3, %v608_v16 }
 0x186   : > { %11283 = vmatpush3.xpose.msk.msra.mxu1 %vm228_vm3, %v1035_v5  ;;  %11279 = vmatprep.mubr.msk.f32.mxu1 %vm228_vm3, %v609_v52  ;;  %v612_v5 = vmul.f32 %v12712_v35, %v12909_v60  ;;  %v613_v52 = vmul.f32 %v12731_v40, %v12909_v60 }
 0x187   : > { %11290 = vmatprep.subr.msk.mxu1 %vm228_vm3, %v1137_v26 }
 0x188   : > { %v13143_v45 = vpop.permute.xlu0 %3176 }
 0x189   : > { %v13147_v8 = vpop.permute.xlu1 %5800  ;;  %11280 = vmatmul.mubr.msk.f32.gmra.mrb[22].mxu1 %vm228_vm3, %v610_v15  ;;  %v614_v15 = vmul.f32 %v12734_v41, %v12909_v60 }
 0x18a   : > { %17448 = vst [vmem:[#allocation64_spill] sm:$0xff] %v13147_v8  ;;  %11284 = vmatprep.mubr.msk.f32.mxu1 %vm228_vm3, %v611_v11 }
 0x18c   : > { %v13153_v16 = vpop.permute.xlu0 %6100 }
 0x18d   : > { %17449 = vst [vmem:[#allocation65_spill] sm:$0xff] %v13153_v16  ;;  %v1443_v32 = vpop.permute.xlu1 %1442  ;;  %11285 = vmatmul.mubr.msk.f32.vlgmr.msra.gmra.mrb[24].mxu1 %vm228_vm3, %v612_v5 }
 0x18e   : > { %11291 = vmatpush3.xpose.msk.msra.mxu1 %vm228_vm3, %v1137_v26  ;;  %11287 = vmatprep.mubr.msk.f32.mxu1 %vm228_vm3, %v613_v52  ;;  %v616_v26 = vmul.f32 %v12712_v35, %v12971_v50  ;;  %v617_v52 = vmul.f32 %v12731_v40, %v12971_v50 }
 0x18f   : > { %11298 = vmatprep.subr.msk.mxu1 %vm228_vm3, %v1239_v56 }
 0x190   : > { %v1341_v11 = vpop.permute.xlu0 %1340 }
 0x191   : > { %v13165_v62 = vpop.permute.xlu1 %3482  ;;  %11288 = vmatmul.mubr.msk.f32.gmra.mrb[26].mxu1 %vm228_vm3, %v614_v15  ;;  %v619_v15 = vmul.f32 %v12886_v43, %v12948_v58 }
 0x192   : > { %11292 = vmatprep.mubr.msk.f32.mxu1 %vm228_vm3, %v615_v48  ;;  %v618_v48 = vmul.f32 %v12734_v41, %v12971_v50  ;;  %v622_v50 = vmul.f32 %v12734_v41, %v12948_v58 }
 0x194   : > { %v13171_v5 = vpop.permute.xlu0 %3380 }
 0x195   : > { %v13175_v38 = vpop.permute.xlu1 %6000  ;;  %11293 = vmatmul.mubr.msk.f32.vlgmr.msra.gmra.mrb[28].mxu1 %vm228_vm3, %v616_v26 }
 0x196   : > { %17450 = vst [vmem:[#allocation66_spill] sm:$0xff] %v13175_v38  ;;  %11299 = vmatpush3.xpose.msk.msra.mxu1 %vm228_vm3, %v1239_v56  ;;  %11295 = vmatprep.mubr.msk.f32.mxu1 %vm228_vm3, %v617_v52  ;;  %v620_v56 = vmul.f32 %v12712_v35, %v12948_v58  ;;  %v621_v52 = vmul.f32 %v12731_v40, %v12948_v58 }
 0x197   : > { %11306 = vmatprep.subr.msk.mxu1 %vm228_vm3, %v1341_v11  ;;  %v624_v58 = vmul.f32 %v12712_v35, %v13013_v17 }
 0x198   : > { %v13183_v60 = vpop.permute.xlu0 %6300 }
 0x199   : > { %17451 = vst [vmem:[#allocation67_spill] sm:$0xff] %v13183_v60  ;;  %v1647_v54 = vpop.permute.xlu1 %1646  ;;  %11296 = vmatmul.mubr.msk.f32.gmra.mrb[30].mxu1 %vm228_vm3, %v618_v48 }
 0x19a   : > { %11300 = vmatprep.mubr.msk.f32.mxu1 %vm228_vm3, %v619_v15  ;;  %v632_v15 = vmul.f32 %v12712_v35, %v12929_v49 }
 0x19c   : > { %v1545_v26 = vpop.permute.xlu0 %1544 }
 0x19d   : > { %v13193_v46 = vpop.permute.xlu1 %3686  ;;  %11301 = vmatmul.mubr.msk.f32.vlgmr.msra.gmra.mrb[32].mxu1 %vm228_vm3, %v620_v56  ;;  %11322 = vmatprep.subr.msk.mxu0 %vm228_vm3, %v1545_v26  ;;  %v623_v56 = vmul.f32 %v12886_v43, %v13013_v17 }
 0x19e   : > { %11307 = vmatpush3.xpose.msk.msra.mxu1 %vm228_vm3, %v1341_v11  ;;  %11303 = vmatprep.mubr.msk.f32.mxu1 %vm228_vm3, %v621_v52  ;;  %v633_v11 = vmul.f32 %v12731_v40, %v12929_v49  ;;  %v634_v52 = vmul.f32 %v12734_v41, %v12929_v49  ;;  %v626_v49 = vmul.f32 %v12734_v41, %v13013_v17 }
 0x19f   : > { %11314 = vmatprep.subr.msk.mxu1 %vm228_vm3, %v1443_v32  ;;  %11323 = vmatpush3.xpose.msk.msra.mxu0 %vm228_vm3, %v1545_v26 }
 0x1a0   : > { %v13203_v48 = vpop.permute.xlu0 %3584 }
 0x1a1   : > { %v13209_v27 = vpop.permute.xlu1 %6200  ;;  %11304 = vmatmul.mubr.msk.f32.gmra.mrb[34].mxu1 %vm228_vm3, %v622_v50  ;;  %v625_v50 = vmul.f32 %v12731_v40, %v13013_v17  ;;  %v640_v17 = vmul.f32 %v12712_v35, %v12942_v44 }
 0x1a2   : > { %17452 = vst [vmem:[#allocation68_spill] sm:$0xff] %v13209_v27  ;;  %11325 = vmatmul.mubr.msk.f32.vlgmr.msra.gmra.mrb[20].mxu0 %vm228_vm3, %v632_v15  ;;  %11308 = vmatprep.mubr.msk.f32.mxu1 %vm228_vm3, %v623_v56  ;;  %v639_v15 = vmul.f32 %v12886_v43, %v12942_v44 }
 0x1a3   : > { %11327 = vmatprep.mubr.msk.f32.mxu0 %vm228_vm3, %v633_v11  ;;  %v627_v11 = vmul.f32 %v12886_v43, %v12993_v55 }
 0x1a4   : > { %v13219_v26 = vpop.permute.xlu0 %6500 }
 0x1a5   : > { %17453 = vst [vmem:[#allocation69_spill] sm:$0xff] %v13219_v26  ;;  %11309 = vmatmul.mubr.msk.f32.vlgmr.msra.gmra.mrb[36].mxu1 %vm228_vm3, %v624_v58  ;;  %v1851_v36 = vpop.permute.xlu1 %1850  ;;  %v628_v58 = vmul.f32 %v12712_v35, %v12993_v55 }
 0x1a6   : > { %11315 = vmatpush3.xpose.msk.msra.mxu1 %vm228_vm3, %v1443_v32  ;;  %11328 = vmatmul.mubr.msk.f32.gmra.mrb[22].mxu0 %vm228_vm3, %v634_v52 }
 0x1a7   : > { %11311 = vmatprep.mubr.msk.f32.mxu1 %vm228_vm3, %v625_v50  ;;  %11330 = vmatprep.subr.msk.mxu1 %vm228_vm3, %v1647_v54  ;;  %v629_v50 = vmul.f32 %v12731_v40, %v12993_v55 }
 0x1a8   : > { %11340 = vmatprep.mubr.msk.f32.mxu0 %vm228_vm3, %v639_v15  ;;  %v1749_v56 = vpop.permute.xlu0 %1748  ;;  %v641_v15 = vmul.f32 %v12731_v40, %v12942_v44 }
 0x1a9   : > { %11312 = vmatmul.mubr.msk.f32.gmra.mrb[38].mxu1 %vm228_vm3, %v626_v49  ;;  %11338 = vmatprep.subr.msk.mxu0 %vm228_vm3, %v1749_v56  ;;  %v13239_v32 = vpop.permute.xlu1 %3890  ;;  %v630_v49 = vmul.f32 %v12734_v41, %v12993_v55 }
 0x1aa   : > { %11316 = vmatprep.mubr.msk.f32.mxu1 %vm228_vm3, %v627_v11  ;;  %11339 = vmatpush3.xpose.msk.msra.mxu0 %vm228_vm3, %v1749_v56  ;;  %v642_v56 = vmul.f32 %v12734_v41, %v12942_v44  ;;  %v636_v44 = vmul.f32 %v12712_v35, %v13023_v19 }
 0x1ac   : > { %v13247_v52 = vpop.permute.xlu0 %3788 }
 0x1ad   : > { %11317 = vmatmul.mubr.msk.f32.vlgmr.msra.gmra.mrb[40].mxu1 %vm228_vm3, %v628_v58  ;;  %11341 = vmatmul.mubr.msk.f32.vlgmr.msra.gmra.mrb[24].mxu0 %vm228_vm3, %v640_v17  ;;  %v13263_v11 = vpop.permute.xlu1 %6400  ;;  %v635_v17 = vmul.f32 %v12886_v43, %v13023_v19 }
 0x1ae   : > { %11331 = vmatpush3.xpose.msk.msra.mxu1 %vm228_vm3, %v1647_v54  ;;  %11319 = vmatprep.mubr.msk.f32.mxu1 %vm228_vm3, %v629_v50  ;;  %17454 = vst [vmem:[#allocation70_spill] sm:$0xff] %v13263_v11  ;;  %v647_v54 = vmul.f32 %v12886_v43, %v12961_v2 }
 0x1af   : > { %11343 = vmatprep.mubr.msk.f32.mxu0 %vm228_vm3, %v641_v15  ;;  %11346 = vmatprep.subr.msk.mxu1 %vm228_vm3, %v1851_v36  ;;  %v637_v15 = vmul.f32 %v12731_v40, %v13023_v19 }
 0x1b0   : > { %v13265_v58 = vpop.permute.xlu0 %6700 }
 0x1b1   : > { %17455 = vst [vmem:[#allocation71_spill] sm:$0xff] %v13265_v58  ;;  %11320 = vmatmul.mubr.msk.f32.gmra.mrb[42].mxu1 %vm228_vm3, %v630_v49  ;;  %11344 = vmatmul.mubr.msk.f32.gmra.mrb[26].mxu0 %vm228_vm3, %v642_v56  ;;  %v2055_v55 = vpop.permute.xlu1 %2054  ;;  %v638_v49 = vmul.f32 %v12734_v41, %v13023_v19  ;;  %v648_v56 = vmul.f32 %v12712_v35, %v12961_v2 }
 0x1b2   : > { %11332 = vmatprep.mubr.msk.f32.mxu1 %vm228_vm3, %v635_v17  ;;  %11356 = vmatprep.mubr.msk.f32.mxu0 %vm228_vm3, %v647_v54  ;;  %v643_v17 = vmul.f32 %v12886_v43, %v13046_v28  ;;  %v649_v54 = vmul.f32 %v12731_v40, %v12961_v2  ;;  %v650_v19 = vmul.f32 %v12734_v41, %v12961_v2 }
 0x1b3   : > { %v646_v2 = vmul.f32 %v12734_v41, %v13046_v28 }
 0x1b4   : > { %v1953_v50 = vpop.permute.xlu0 %1952 }
 0x1b5   : > { %11333 = vmatmul.mubr.msk.f32.vlgmr.msra.gmra.mrb[44].mxu1 %vm228_vm3, %v636_v44  ;;  %11354 = vmatprep.subr.msk.mxu0 %vm228_vm3, %v1953_v50 }
 0x1b6   : > { %11335 = vmatprep.mubr.msk.f32.mxu1 %vm228_vm3, %v637_v15  ;;  %11355 = vmatpush3.xpose.msk.msra.mxu0 %vm228_vm3, %v1953_v50  ;;  %v13295_v50 = vpop.permute.xlu1 %6600  ;;  %v645_v15 = vmul.f32 %v12731_v40, %v13046_v28 }
 0x1b7   : > { %11347 = vmatpush3.xpose.msk.msra.mxu1 %vm228_vm3, %v1851_v36  ;;  %17456 = vst [vmem:[#allocation72_spill] sm:$0xff] %v13295_v50  ;;  %v644_v36 = vmul.f32 %v12712_v35, %v13046_v28 }
 0x1b8   : > { %v2157_v44 = vpop.permute.xlu0 %2156  ;;  %11362 = vmatprep.subr.msk.mxu1 %vm228_vm3, %v2055_v55 }
 0x1b9   : > { %11336 = vmatmul.mubr.msk.f32.gmra.mrb[46].mxu1 %vm228_vm3, %v638_v49  ;;  %11357 = vmatmul.mubr.msk.f32.vlgmr.msra.gmra.mrb[28].mxu0 %vm228_vm3, %v648_v56  ;;  %v655_v49 = vmul.f32 %v12886_v43, %v12977_v37 }
 0x1ba   : > { %11348 = vmatprep.mubr.msk.f32.mxu1 %vm228_vm3, %v643_v17  ;;  %11359 = vmatprep.mubr.msk.f32.mxu0 %vm228_vm3, %v649_v54  ;;  %v2259_v17 = vpop.permute.xlu1 %2258  ;;  %v656_v54 = vmul.f32 %v12712_v35, %v12977_v37 }
 0x1bb   : > { %11370 = vmatprep.subr.msk.mxu0 %vm228_vm3, %v2157_v44 }
 0x1bc   : > { %11371 = vmatpush3.xpose.msk.msra.mxu0 %vm228_vm3, %v2157_v44  ;;  %v2361_v56 = vpop.permute.xlu0 %2360  ;;  %v651_v44 = vmul.f32 %v12886_v43, %v12958_v57 }
 0x1bd   : > { %11349 = vmatmul.mubr.msk.f32.vlgmr.msra.gmra.mrb[48].mxu1 %vm228_vm3, %v644_v36  ;;  %11360 = vmatmul.mubr.msk.f32.gmra.mrb[30].mxu0 %vm228_vm3, %v650_v19  ;;  %v657_v36 = vmul.f32 %v12731_v40, %v12977_v37  ;;  %v658_v19 = vmul.f32 %v12734_v41, %v12977_v37 }
 0x1be   : > { %11351 = vmatprep.mubr.msk.f32.mxu1 %vm228_vm3, %v645_v15  ;;  %11372 = vmatprep.mubr.msk.f32.mxu0 %vm228_vm3, %v655_v49  ;;  %v653_v15 = vmul.f32 %v12731_v40, %v12958_v57  ;;  %v663_v49 = vmul.f32 %v12886_v43, %v12990_v61 }
 0x1bf   : > { %11363 = vmatpush3.xpose.msk.msra.mxu1 %vm228_vm3, %v2055_v55  ;;  %11386 = vmatprep.subr.msk.mxu0 %vm228_vm3, %v2361_v56  ;;  %v652_v55 = vmul.f32 %v12712_v35, %v12958_v57 }
 0x1c0   : > { %11378 = vmatprep.subr.msk.mxu1 %vm228_vm3, %v2259_v17  ;;  %v2565_v28 = vpop.permute.xlu0 %2564 }
 0x1c1   : > { %11352 = vmatmul.mubr.msk.f32.gmra.mrb[50].mxu1 %vm228_vm3, %v646_v2  ;;  %11373 = vmatmul.mubr.msk.f32.vlgmr.msra.gmra.mrb[32].mxu0 %vm228_vm3, %v656_v54  ;;  %v2463_v2 = vpop.permute.xlu1 %2462  ;;  %v664_v54 = vmul.f32 %v12712_v35, %v12990_v61 }
 0x1c2   : > { %11364 = vmatprep.mubr.msk.f32.mxu1 %vm228_vm3, %v651_v44  ;;  %11375 = vmatprep.mubr.msk.f32.mxu0 %vm228_vm3, %v657_v36  ;;  %v659_v44 = vmul.f32 %v12886_v43, %v12974_v10  ;;  %v665_v36 = vmul.f32 %v12731_v40, %v12990_v61 }
 0x1c3   : > { %11387 = vmatpush3.xpose.msk.msra.mxu0 %vm228_vm3, %v2361_v56  ;;  %v654_v56 = vmul.f32 %v12734_v41, %v12958_v57  ;;  %v660_v57 = vmul.f32 %v12712_v35, %v12974_v10 }
 0x1c4   : > { %11402 = vmatprep.subr.msk.mxu0 %vm228_vm3, %v2565_v28 }
 0x1c5   : > { %11365 = vmatmul.mubr.msk.f32.vlgmr.msra.gmra.mrb[52].mxu1 %vm228_vm3, %v652_v55  ;;  %11376 = vmatmul.mubr.msk.f32.gmra.mrb[34].mxu0 %vm228_vm3, %v658_v19  ;;  %v661_v55 = vmul.f32 %v12731_v40, %v12974_v10  ;;  %v671_v19 = vmul.f32 %v12886_v43, %v13003_v3 }
 0x1c6   : > { %11367 = vmatprep.mubr.msk.f32.mxu1 %vm228_vm3, %v653_v15  ;;  %11388 = vmatprep.mubr.msk.f32.mxu0 %vm228_vm3, %v663_v49  ;;  %v662_v15 = vmul.f32 %v12734_v41, %v12974_v10  ;;  %v672_v49 = vmul.f32 %v12712_v35, %v13003_v3 }
 0x1c7   : > { %11379 = vmatpush3.xpose.msk.msra.mxu1 %vm228_vm3, %v2259_v17  ;;  %v666_v17 = vmul.f32 %v12734_v41, %v12990_v61 }
 0x1c8   : > { %11394 = vmatprep.subr.msk.mxu1 %vm228_vm3, %v2463_v2 }
 0x1c9   : > { %11368 = vmatmul.mubr.msk.f32.gmra.mrb[54].mxu1 %vm228_vm3, %v654_v56  ;;  %11389 = vmatmul.mubr.msk.f32.vlgmr.msra.gmra.mrb[36].mxu0 %vm228_vm3, %v664_v54  ;;  %v667_v56 = vmul.f32 %v12886_v43, %v12987_v1  ;;  %v673_v54 = vmul.f32 %v12731_v40, %v13003_v3 }
 0x1ca   : > { %11403 = vmatpush3.xpose.msk.msra.mxu0 %vm228_vm3, %v2565_v28  ;;  %11380 = vmatprep.mubr.msk.f32.mxu1 %vm228_vm3, %v659_v44  ;;  %v2667_v28 = vpop.permute.xlu1 %2666  ;;  %v674_v44 = vmul.f32 %v12734_v41, %v13003_v3 }
 0x1cb   : > { %11391 = vmatprep.mubr.msk.f32.mxu0 %vm228_vm3, %v665_v36  ;;  %11418 = vmatprep.subr.msk.mxu0 %vm228_vm3, %v13093_v29  ;;  %v669_v36 = vmul.f32 %v12731_v40, %v12987_v1 }
 0x1cd   : > { %11381 = vmatmul.mubr.msk.f32.vlgmr.msra.gmra.mrb[56].mxu1 %vm228_vm3, %v660_v57  ;;  %11392 = vmatmul.mubr.msk.f32.gmra.mrb[38].mxu0 %vm228_vm3, %v666_v17  ;;  %v670_v57 = vmul.f32 %v12734_v41, %v12987_v1  ;;  %v680_v17 = vmul.f32 %v12712_v35, %v12912_v12 }
 0x1ce   : > { %11383 = vmatprep.mubr.msk.f32.mxu1 %vm228_vm3, %v661_v55  ;;  %11404 = vmatprep.mubr.msk.f32.mxu0 %vm228_vm3, %v671_v19  ;;  %v675_v55 = vmul.f32 %v12886_v43, %v13000_v31  ;;  %v681_v19 = vmul.f32 %v12731_v40, %v12912_v12 }
 0x1cf   : > { %11395 = vmatpush3.xpose.msk.msra.mxu1 %vm228_vm3, %v2463_v2  ;;  %v668_v2 = vmul.f32 %v12712_v35, %v12987_v1 }
 0x1d0   : > { %11410 = vmatprep.subr.msk.mxu1 %vm228_vm3, %v2667_v28 }
 0x1d1   : > { %11384 = vmatmul.mubr.msk.f32.gmra.mrb[58].mxu1 %vm228_vm3, %v662_v15  ;;  %11405 = vmatmul.mubr.msk.f32.vlgmr.msra.gmra.mrb[40].mxu0 %vm228_vm3, %v672_v49  ;;  %v682_v15 = vmul.f32 %v12734_v41, %v12912_v12  ;;  %v677_v49 = vmul.f32 %v12731_v40, %v13000_v31 }
 0x1d2   : > { %11419 = vmatpush3.xpose.msk.msra.mxu0 %vm228_vm3, %v13093_v29  ;;  %11396 = vmatprep.mubr.msk.f32.mxu1 %vm228_vm3, %v667_v56  ;;  %v679_v29 = vmul.f32 %v12886_v43, %v12912_v12  ;;  %v678_v56 = vmul.f32 %v12734_v41, %v13000_v31 }
 0x1d3   : > { %11407 = vmatprep.mubr.msk.f32.mxu0 %vm228_vm3, %v673_v54  ;;  %11434 = vmatprep.subr.msk.mxu0 %vm228_vm3, %v13113_v30  ;;  %v688_v54 = vmul.f32 %v12712_v35, %v12932_v7 }
 0x1d5   : > { %11397 = vmatmul.mubr.msk.f32.vlgmr.msra.gmra.mrb[60].mxu1 %vm228_vm3, %v668_v2  ;;  %11408 = vmatmul.mubr.msk.f32.gmra.mrb[42].mxu0 %vm228_vm3, %v674_v44  ;;  %v683_v2 = vmul.f32 %v12886_v43, %v12892_v51  ;;  %v684_v44 = vmul.f32 %v12712_v35, %v12892_v51 }
 0x1d6   : > { %11411 = vmatpush3.xpose.msk.msra.mxu1 %vm228_vm3, %v2667_v28  ;;  %11399 = vmatprep.mubr.msk.f32.mxu1 %vm228_vm3, %v669_v36  ;;  %v676_v28 = vmul.f32 %v12712_v35, %v13000_v31  ;;  %v690_v36 = vmul.f32 %v12734_v41, %v12932_v7 }
 0x1d7   : > { %11420 = vmatprep.mubr.msk.f32.mxu0 %vm228_vm3, %v679_v29  ;;  %11426 = vmatprep.subr.msk.mxu1 %vm228_vm3, %v13082_v34  ;;  %v685_v29 = vmul.f32 %v12731_v40, %v12892_v51 }
 0x1d9   : > { %11400 = vmatmul.mubr.msk.f32.gmra.mrb[62].mxu1 %vm228_vm3, %v670_v57  ;;  %11421 = vmatmul.mubr.msk.f32.vlgmr.msra.gmra.mrb[44].mxu0 %vm228_vm3, %v680_v17  ;;  %v686_v57 = vmul.f32 %v12734_v41, %v12892_v51  ;;  %v696_v17 = vmul.f32 %v12712_v35, %v12980_v42 }
 0x1da   : > { %11435 = vmatpush3.xpose.msk.msra.mxu0 %vm228_vm3, %v13113_v30  ;;  %11412 = vmatprep.mubr.msk.f32.mxu1 %vm228_vm3, %v675_v55  ;;  %v687_v30 = vmul.f32 %v12886_v43, %v12932_v7  ;;  %v691_v55 = vmul.f32 %v12886_v43, %v12919_v14 }
 0x1db   : > { %11423 = vmatprep.mubr.msk.f32.mxu0 %vm228_vm3, %v681_v19  ;;  %11450 = vmatprep.subr.msk.mxu0 %vm228_vm3, %v13143_v45  ;;  %v692_v19 = vmul.f32 %v12712_v35, %v12919_v14 }
 0x1dd   : > { %11413 = vmatmul.mubr.msk.f32.vlgmr.msra.gmra.mrb[64].mxu1 %vm228_vm3, %v676_v28  ;;  %11424 = vmatmul.mubr.msk.f32.gmra.mrb[46].mxu0 %vm228_vm3, %v682_v15  ;;  %v698_v28 = vmul.f32 %v12734_v41, %v12980_v42  ;;  %v693_v15 = vmul.f32 %v12731_v40, %v12919_v14 }
 0x1de   : > { %11427 = vmatpush3.xpose.msk.msra.mxu1 %vm228_vm3, %v13082_v34  ;;  %11415 = vmatprep.mubr.msk.f32.mxu1 %vm228_vm3, %v677_v49  ;;  %v689_v34 = vmul.f32 %v12731_v40, %v12932_v7  ;;  %v694_v49 = vmul.f32 %v12734_v41, %v12919_v14 }
 0x1df   : > { %11436 = vmatprep.mubr.msk.f32.mxu0 %vm228_vm3, %v687_v30  ;;  %11442 = vmatprep.subr.msk.mxu1 %vm228_vm3, %v13097_v22  ;;  %v704_v30 = vmul.f32 %v12712_v35, %v13016_v33 }
 0x1e1   : > { %11416 = vmatmul.mubr.msk.f32.gmra.mrb[66].mxu1 %vm228_vm3, %v678_v56  ;;  %11437 = vmatmul.mubr.msk.f32.vlgmr.msra.gmra.mrb[48].mxu0 %vm228_vm3, %v688_v54  ;;  %v699_v56 = vmul.f32 %v12886_v43, %v12968_v9  ;;  %v700_v54 = vmul.f32 %v12712_v35, %v12968_v9 }
 0x1e2   : > { %11451 = vmatpush3.xpose.msk.msra.mxu0 %vm228_vm3, %v13143_v45  ;;  %11428 = vmatprep.mubr.msk.f32.mxu1 %vm228_vm3, %v683_v2  ;;  %v695_v45 = vmul.f32 %v12886_v43, %v12980_v42  ;;  %v706_v2 = vmul.f32 %v12734_v41, %v13016_v33 }
 0x1e3   : > { %11439 = vmatprep.mubr.msk.f32.mxu0 %vm228_vm3, %v689_v34  ;;  %11466 = vmatprep.subr.msk.mxu0 %vm228_vm3, %v13171_v5  ;;  %v701_v34 = vmul.f32 %v12731_v40, %v12968_v9 }
 0x1e5   : > { %11429 = vmatmul.mubr.msk.f32.vlgmr.msra.gmra.mrb[68].mxu1 %vm228_vm3, %v684_v44  ;;  %11440 = vmatmul.mubr.msk.f32.gmra.mrb[50].mxu0 %vm228_vm3, %v690_v36  ;;  %v702_v44 = vmul.f32 %v12734_v41, %v12968_v9  ;;  %v712_v36 = vmul.f32 %v12712_v35, %v13039_v25 }
 0x1e6   : > { %11443 = vmatpush3.xpose.msk.msra.mxu1 %vm228_vm3, %v13097_v22  ;;  %11431 = vmatprep.mubr.msk.f32.mxu1 %vm228_vm3, %v685_v29  ;;  %v697_v22 = vmul.f32 %v12731_v40, %v12980_v42  ;;  %v707_v29 = vmul.f32 %v12886_v43, %v13010_v47 }
 0x1e7   : > { %11452 = vmatprep.mubr.msk.f32.mxu0 %vm228_vm3, %v695_v45  ;;  %11458 = vmatprep.subr.msk.mxu1 %vm228_vm3, %v13135_v0  ;;  %v708_v45 = vmul.f32 %v12712_v35, %v13010_v47 }
 0x1e9   : > { %11432 = vmatmul.mubr.msk.f32.gmra.mrb[70].mxu1 %vm228_vm3, %v686_v57  ;;  %11453 = vmatmul.mubr.msk.f32.vlgmr.msra.gmra.mrb[52].mxu0 %vm228_vm3, %v696_v17  ;;  %v714_v57 = vmul.f32 %v12734_v41, %v13039_v25  ;;  %v709_v17 = vmul.f32 %v12731_v40, %v13010_v47 }
 0x1ea   : > { %11467 = vmatpush3.xpose.msk.msra.mxu0 %vm228_vm3, %v13171_v5  ;;  %11444 = vmatprep.mubr.msk.f32.mxu1 %vm228_vm3, %v691_v55  ;;  %v703_v5 = vmul.f32 %v12886_v43, %v13016_v33  ;;  %v710_v55 = vmul.f32 %v12734_v41, %v13010_v47 }
 0x1eb   : > { %11455 = vmatprep.mubr.msk.f32.mxu0 %vm228_vm3, %v697_v22  ;;  %11482 = vmatprep.subr.msk.mxu0 %vm228_vm3, %v13203_v48  ;;  %v720_v22 = vmul.f32 %v12712_v35, %v12953_v63 }
 0x1ed   : > { %11445 = vmatmul.mubr.msk.f32.vlgmr.msra.gmra.mrb[72].mxu1 %vm228_vm3, %v692_v19  ;;  %11456 = vmatmul.mubr.msk.f32.gmra.mrb[54].mxu0 %vm228_vm3, %v698_v28  ;;  %v715_v19 = vmul.f32 %v12886_v43, %v13034_v21  ;;  %v716_v28 = vmul.f32 %v12712_v35, %v13034_v21 }
 0x1ee   : > { %11459 = vmatpush3.xpose.msk.msra.mxu1 %vm228_vm3, %v13135_v0  ;;  %11447 = vmatprep.mubr.msk.f32.mxu1 %vm228_vm3, %v693_v15  ;;  %v705_v0 = vmul.f32 %v12731_v40, %v13016_v33  ;;  %v722_v15 = vmul.f32 %v12734_v41, %v12953_v63 }
 0x1ef   : > { %11468 = vmatprep.mubr.msk.f32.mxu0 %vm228_vm3, %v703_v5  ;;  %11474 = vmatprep.subr.msk.mxu1 %vm228_vm3, %v13165_v62  ;;  %v717_v5 = vmul.f32 %v12731_v40, %v13034_v21 }
 0x1f1   : > { %11448 = vmatmul.mubr.msk.f32.gmra.mrb[74].mxu1 %vm228_vm3, %v694_v49  ;;  %11469 = vmatmul.mubr.msk.f32.vlgmr.msra.gmra.mrb[56].mxu0 %vm228_vm3, %v704_v30  ;;  %v723_v49 = vmul.f32 %v12886_v43, %v12945_v59  ;;  %v724_v30 = vmul.f32 %v12712_v35, %v12945_v59 }
 0x1f2   : > { %11483 = vmatpush3.xpose.msk.msra.mxu0 %vm228_vm3, %v13203_v48  ;;  %11460 = vmatprep.mubr.msk.f32.mxu1 %vm228_vm3, %v699_v56  ;;  %v711_v48 = vmul.f32 %v12886_v43, %v13039_v25  ;;  %v726_v56 = vmul.f32 %v12734_v41, %v12945_v59 }
 0x1f3   : > { %11471 = vmatprep.mubr.msk.f32.mxu0 %vm228_vm3, %v705_v0  ;;  %11498 = vmatprep.subr.msk.mxu0 %vm228_vm3, %v13247_v52 }
 0x1f5   : > { %11461 = vmatmul.mubr.msk.f32.vlgmr.msra.gmra.mrb[76].mxu1 %vm228_vm3, %v700_v54  ;;  %11472 = vmatmul.mubr.msk.f32.gmra.mrb[58].mxu0 %vm228_vm3, %v706_v2 }
 0x1f6   : > { %11475 = vmatpush3.xpose.msk.msra.mxu1 %vm228_vm3, %v13165_v62  ;;  %11463 = vmatprep.mubr.msk.f32.mxu1 %vm228_vm3, %v701_v34  ;;  %v713_v62 = vmul.f32 %v12731_v40, %v13039_v25 }
 0x1f7   : > { %11484 = vmatprep.mubr.msk.f32.mxu0 %vm228_vm3, %v711_v48  ;;  %11490 = vmatprep.subr.msk.mxu1 %vm228_vm3, %v13193_v46 }
 0x1f9   : > { %11464 = vmatmul.mubr.msk.f32.gmra.mrb[78].mxu1 %vm228_vm3, %v702_v44  ;;  %11485 = vmatmul.mubr.msk.f32.vlgmr.msra.gmra.mrb[60].mxu0 %vm228_vm3, %v712_v36 }
 0x1fa   : > { %11499 = vmatpush3.xpose.msk.msra.mxu0 %vm228_vm3, %v13247_v52  ;;  %11476 = vmatprep.mubr.msk.f32.mxu1 %vm228_vm3, %v707_v29  ;;  %v719_v52 = vmul.f32 %v12886_v43, %v12953_v63 }
 0x1fb   : > { %11487 = vmatprep.mubr.msk.f32.mxu0 %vm228_vm3, %v713_v62  ;;  %11514 = vmatprep.subr.mxu0 %v13086_v53 }
 0x1fd   : > { %11477 = vmatmul.mubr.msk.f32.vlgmr.msra.gmra.mrb[80].mxu1 %vm228_vm3, %v708_v45  ;;  %11488 = vmatmul.mubr.msk.f32.gmra.mrb[62].mxu0 %vm228_vm3, %v714_v57 }
 0x1fe   : > { %11491 = vmatpush3.xpose.msk.msra.mxu1 %vm228_vm3, %v13193_v46  ;;  %11479 = vmatprep.mubr.msk.f32.mxu1 %vm228_vm3, %v709_v17  ;;  %v721_v46 = vmul.f32 %v12731_v40, %v12953_v63 }
 0x1ff   : > { %11500 = vmatprep.mubr.msk.f32.mxu0 %vm228_vm3, %v719_v52  ;;  %11506 = vmatprep.subr.msk.mxu1 %vm228_vm3, %v13239_v32 }
 0x201   : > { %11480 = vmatmul.mubr.msk.f32.gmra.mrb[82].mxu1 %vm228_vm3, %v710_v55  ;;  %11501 = vmatmul.mubr.msk.f32.vlgmr.msra.gmra.mrb[64].mxu0 %vm228_vm3, %v720_v22 }
 0x202   : > { %11515 = vmatpush3.msra.mxu0 %v13086_v53  ;;  %11492 = vmatprep.mubr.msk.f32.mxu1 %vm228_vm3, %v715_v19  ;;  %v718_v53 = vmul.f32 %v12734_v41, %v13034_v21 }
 0x203   : > { %11503 = vmatprep.mubr.msk.f32.mxu0 %vm228_vm3, %v721_v46  ;;  %11530 = vmatprep.subr.mxu0 %v13117_v39 }
 0x205   : > { %11493 = vmatmul.mubr.msk.f32.vlgmr.msra.gmra.mrb[84].mxu1 %vm228_vm3, %v716_v28  ;;  %11504 = vmatmul.mubr.msk.f32.gmra.mrb[66].mxu0 %vm228_vm3, %v722_v15 }
 0x206   : > { %11507 = vmatpush3.xpose.msk.msra.mxu1 %vm228_vm3, %v13239_v32  ;;  %11495 = vmatprep.mubr.msk.f32.mxu1 %vm228_vm3, %v717_v5  ;;  %v725_v32 = vmul.f32 %v12731_v40, %v12945_v59 }
 0x207   : > { %11522 = vmatprep.subr.mxu1 %v13084_v13 }
 0x209   : > { %11496 = vmatmul.mubr.msk.f32.gmra.mrb[86].mxu1 %vm228_vm3, %v718_v53 }
 0x20a   : > { %11508 = vmatprep.mubr.msk.f32.mxu1 %vm228_vm3, %v723_v49 }
 0x20d   : > { %11509 = vmatmul.mubr.msk.f32.vlgmr.msra.gmra.mrb[88].mxu1 %vm228_vm3, %v724_v30 }
 0x20e   : > { %11523 = vmatpush3.msra.mxu1 %v13084_v13  ;;  %11511 = vmatprep.mubr.msk.f32.mxu1 %vm228_vm3, %v725_v32 }
 0x20f   : > { %11538 = vmatprep.subr.mxu1 %v13104_v23 }
 0x211   : > { %11512 = vmatmul.mubr.msk.f32.gmra.mrb[90].mxu1 %vm228_vm3, %v726_v56 }
 0x248   : > { %v13606_v0 = vpop.f32.mrb[12].mxu1 }
 0x249   : > { %17457 = vst [vmem:[#allocation73_spill] sm:$0xff] %v13606_v0  ;;  %v13608_v54 = vpop.f32.mrb[13].mxu1  ;;  %v3995_v2 = vsel %vm3991_vm4, %v13606_v0, -inf }
 0x24a   : > { %17458 = vst [vmem:[#allocation74_spill] sm:$0xff] %v13608_v54  ;;  %3996 = vmax.xlane.f32.xlu1 %v3995_v2  ;;  %v3992_v13 = vsel %vm3991_vm4, %v13608_v54, -inf }
 0x24b   : > { %3993 = vmax.xlane.f32.xlu0 %v3992_v13 }
 0x24c   : > { %v13614_v34 = vpop.f32.mrb[14].mxu1 }
 0x24d   : > { %17459 = vst [vmem:[#allocation75_spill] sm:$0xff] %v13614_v34  ;;  %v13616_v48 = vpop.f32.mrb[15].mxu1  ;;  %v4001_v44 = vsel %vm3991_vm4, %v13614_v34, -inf }
 0x24e   : > { %17460 = vst [vmem:[#allocation76_spill] sm:$0xff] %v13616_v48  ;;  %v3998_v36 = vsel %vm3991_vm4, %v13616_v48, -inf }
 0x24f   : > { %4002 = vmax.xlane.f32.xlu0 %v4001_v44  ;;  %3999 = vmax.xlane.f32.xlu1 %v3998_v36 }
 0x250   : > { %v13622_v29 = vpop.f32.mrb[16].mxu1 }
 0x251   : > { %17461 = vst [vmem:[#allocation77_spill] sm:$0xff] %v13622_v29  ;;  %v13624_v62 = vpop.f32.mrb[17].mxu1  ;;  %v4007_v45 = vsel %vm3991_vm4, %v13622_v29, -inf }
 0x252   : > { %17462 = vst [vmem:[#allocation78_spill] sm:$0xff] %v13624_v62  ;;  %v4004_v52 = vsel %vm3991_vm4, %v13624_v62, -inf }
 0x253   : > { %4008 = vmax.xlane.f32.xlu0 %v4007_v45 }
 0x254   : > { %v13628_v57 = vpop.f32.mrb[18].mxu1 }
 0x255   : > { %17463 = vst [vmem:[#allocation79_spill] sm:$0xff] %v13628_v57  ;;  %v13630_v17 = vpop.f32.mrb[19].mxu1  ;;  %v4013_v46 = vsel %vm3991_vm4, %v13628_v57, -inf }
 0x256   : > { %v4010_v55 = vsel %vm3991_vm4, %v13630_v17, -inf }
 0x257   : > { %4005 = vmax.xlane.f32.xlu0 %v4004_v52  ;;  %4011 = vmax.xlane.f32.xlu1 %v4010_v55 }
 0x258   : > { %v13636_v22 = vpop.f32.mrb[20].mxu1 }
 0x259   : > { %17464 = vst [vmem:[#allocation80_spill] sm:$0xff] %v13636_v22  ;;  %v13638_v19 = vpop.f32.mrb[21].mxu1  ;;  %v4019_v53 = vsel %vm3991_vm4, %v13636_v22, -inf }
 0x25a   : > { %v4016_v28 = vsel %vm3991_vm4, %v13638_v19, -inf }
 0x25b   : > { %4014 = vmax.xlane.f32.xlu0 %v4013_v46  ;;  %4017 = vmax.xlane.f32.xlu1 %v4016_v28 }
 0x25c   : > { %v13644_v15 = vpop.f32.mrb[22].mxu1 }
 0x25d   : > { %17465 = vst [vmem:[#allocation81_spill] sm:$0xff] %v13644_v15  ;;  %v13646_v5 = vpop.f32.mrb[23].mxu1  ;;  %v4025_v63 = vsel %vm3991_vm4, %v13644_v15, -inf }
 0x25e   : > { %v4022_v25 = vsel %vm3991_vm4, %v13646_v5, -inf }
 0x25f   : > { %4020 = vmax.xlane.f32.xlu0 %v4019_v53 }
 0x260   : > { %v13650_v49 = vpop.f32.mrb[24].mxu1 }
 0x261   : > { %v13652_v30 = vpop.f32.mrb[25].mxu1 }
 0x262   : > { %v4028_v7 = vsel %vm3991_vm4, %v13652_v30, -inf }
 0x264   : > { %v13654_v32 = vpop.f32.mrb[26].mxu1 }
 0x265   : > { %v13656_v56 = vpop.f32.mrb[27].mxu1 }
 0x266   : > { %v4034_v35 = vsel %vm3991_vm4, %v13656_v56, -inf }
 0x268   : > { %v13658_v2 = vpop.f32.mrb[28].mxu1 }
 0x269   : > { %17466 = vst [vmem:[#allocation82_spill] sm:$0xff] %v13658_v2  ;;  %v13660_v13 = vpop.f32.mrb[29].mxu1  ;;  %v4043_v61 = vsel %vm3991_vm4, %v13658_v2, -inf }
 0x26a   : > { %17467 = vst [vmem:[#allocation83_spill] sm:$0xff] %v13660_v13  ;;  %v4040_v26 = vsel %vm3991_vm4, %v13660_v13, -inf }
 0x26c   : > { %v13662_v44 = vpop.f32.mrb[30].mxu1 }
 0x26d   : > { %17468 = vst [vmem:[#allocation84_spill] sm:$0xff] %v13662_v44  ;;  %v13664_v36 = vpop.f32.mrb[31].mxu1  ;;  %v4049_v37 = vsel %vm3991_vm4, %v13662_v44, -inf }
 0x26e   : > { %17469 = vst [vmem:[#allocation85_spill] sm:$0xff] %v13664_v36  ;;  %v4046_v16 = vsel %vm3991_vm4, %v13664_v36, -inf }
 0x270   : > { %v13666_v45 = vpop.f32.mrb[32].mxu1 }
 0x271   : > { %17470 = vst [vmem:[#allocation86_spill] sm:$0xff] %v13666_v45  ;;  %v13668_v52 = vpop.f32.mrb[33].mxu1  ;;  %v4055_v62 = vsel %vm3991_vm4, %v13666_v45, -inf }
 0x272   : > { %17471 = vst [vmem:[#allocation87_spill] sm:$0xff] %v13668_v52 }
 0x274   : > { %v13670_v55 = vpop.f32.mrb[34].mxu1 }
 0x275   : > { %17472 = vst [vmem:[#allocation88_spill] sm:$0xff] %v13670_v55  ;;  %v13672_v46 = vpop.f32.mrb[20].mxu0  ;;  %v13674_v28 = vpop.f32.mrb[35].mxu1  ;;  %v4061_v48 = vsel %vm3991_vm4, %v13670_v55, -inf }
 0x276   : > { %17473 = vst [vmem:[#allocation89_spill] sm:$0xff] %v13674_v28  ;;  %v13676_v53 = vpop.f32.mrb[21].mxu0  ;;  %v4091_v18 = vsel %vm3991_vm4, %v13672_v46, -inf }
 0x277   : > { %4092 = vmax.xlane.f32.xlu0 %v4091_v18  ;;  %v4088_v20 = vsel %vm3991_vm4, %v13676_v53, -inf }
 0x278   : > { %4089 = vmax.xlane.f32.xlu1 %v4088_v20  ;;  %v13682_v6 = vpop.f32.mrb[36].mxu1 }
 0x279   : > { %17474 = vst [vmem:[#allocation90_spill] sm:$0xff] %v13682_v6  ;;  %v13684_v4 = vpop.f32.mrb[22].mxu0  ;;  %v13686_v59 = vpop.f32.mrb[37].mxu1 }
 0x27a   : > { %17475 = vst [vmem:[#allocation91_spill] sm:$0xff] %v13684_v4  ;;  %17476 = vst [vmem:[#allocation92_spill] sm:$0xff] %v13686_v59  ;;  %v13688_v21 = vpop.f32.mrb[23].mxu0  ;;  %v4097_v20 = vsel %vm3991_vm4, %v13684_v4, -inf }
 0x27b   : > { %4026 = vmax.xlane.f32.xlu0 %v4025_v63  ;;  %v4094_v33 = vsel %vm3991_vm4, %v13688_v21, -inf }
 0x27c   : > { %4023 = vmax.xlane.f32.xlu1 %v4022_v25  ;;  %v13694_v18 = vpop.f32.mrb[38].mxu1  ;;  %v4031_v25 = vsel %vm3991_vm4, %v13650_v49, -inf }
 0x27d   : > { %17477 = vst [vmem:[#allocation93_spill] sm:$0xff] %v13694_v18  ;;  %v13696_v47 = vpop.f32.mrb[39].mxu1 }
 0x27e   : > { %17478 = vst [vmem:[#allocation94_spill] sm:$0xff] %v13696_v47 }
 0x27f   : > { %4098 = vmax.xlane.f32.xlu0 %v4097_v20 }
 0x280   : > { %4095 = vmax.xlane.f32.xlu1 %v4094_v33  ;;  %v13702_v9 = vpop.f32.mrb[40].mxu1  ;;  %v13704_v42 = vpop.f32.mrb[24].mxu0 }
 0x281   : > { %17479 = vst [vmem:[#allocation95_spill] sm:$0xff] %v13702_v9  ;;  %v13706_v63 = vpop.f32.mrb[41].mxu1  ;;  %v13708_v14 = vpop.f32.mrb[25].mxu0  ;;  %v4115_v40 = vsel %vm3991_vm4, %v13704_v42, -inf }
 0x282   : > { %17480 = vst [vmem:[#allocation96_spill] sm:$0xff] %v13706_v63  ;;  %17481 = vst [vmem:[#allocation97_spill] sm:$0xff] %v13708_v14  ;;  %v4112_v41 = vsel %vm3991_vm4, %v13708_v14, -inf }
 0x283   : > { %4032 = vmax.xlane.f32.xlu0 %v4031_v25 }
 0x284   : > { %4029 = vmax.xlane.f32.xlu1 %v4028_v7  ;;  %v13714_v20 = vpop.f32.mrb[42].mxu1  ;;  %v13716_v51 = vpop.f32.mrb[26].mxu0  ;;  %v4037_v7 = vsel %vm3991_vm4, %v13654_v32, -inf }
 0x285   : > { %17482 = vst [vmem:[#allocation98_spill] sm:$0xff] %v13714_v20  ;;  %17483 = vst [vmem:[#allocation99_spill] sm:$0xff] %v13716_v51  ;;  %v13718_v33 = vpop.f32.mrb[43].mxu1  ;;  %v13720_v12 = vpop.f32.mrb[27].mxu0 }
 0x286   : > { %17484 = vst [vmem:[#allocation100_spill] sm:$0xff] %v13718_v33  ;;  %17485 = vst [vmem:[#allocation101_spill] sm:$0xff] %v13720_v12  ;;  %v4118_v58 = vsel %vm3991_vm4, %v13720_v12, -inf }
 0x287   : > { %4116 = vmax.xlane.f32.xlu0 %v4115_v40 }
 0x288   : > { %4113 = vmax.xlane.f32.xlu1 %v4112_v41  ;;  %v13726_v25 = vpop.f32.mrb[44].mxu1  ;;  %v4121_v41 = vsel %vm3991_vm4, %v13716_v51, -inf  ;;  %v4085_v51 = vsel %vm3991_vm4, %v13714_v20, -inf }
 0x289   : > { %17486 = vst [vmem:[#allocation102_spill] sm:$0xff] %v13726_v25  ;;  %v13728_v43 = vpop.f32.mrb[45].mxu1 }
 0x28a   : > { %17487 = vst [vmem:[#allocation103_spill] sm:$0xff] %v13728_v43 }
 0x28b   : > { %4038 = vmax.xlane.f32.xlu0 %v4037_v7 }
 0x28c   : > { %4035 = vmax.xlane.f32.xlu1 %v4034_v35  ;;  %v13734_v31 = vpop.f32.mrb[46].mxu1  ;;  %v13736_v3 = vpop.f32.mrb[28].mxu0 }
 0x28d   : > { %17488 = vst [vmem:[#allocation104_spill] sm:$0xff] %v13734_v31  ;;  %17489 = vst [vmem:[#allocation105_spill] sm:$0xff] %v13736_v3  ;;  %v13738_v40 = vpop.f32.mrb[47].mxu1  ;;  %v13740_v50 = vpop.f32.mrb[29].mxu0  ;;  %v4139_v38 = vsel %vm3991_vm4, %v13736_v3, -inf }
 0x28e   : > { %17490 = vst [vmem:[#allocation106_spill] sm:$0xff] %v13738_v40  ;;  %17491 = vst [vmem:[#allocation107_spill] sm:$0xff] %v13740_v50  ;;  %v4136_v8 = vsel %vm3991_vm4, %v13740_v50, -inf }
 0x28f   : > { %4122 = vmax.xlane.f32.xlu0 %v4121_v41 }
 0x290   : > { %4119 = vmax.xlane.f32.xlu1 %v4118_v58  ;;  %v13746_v7 = vpop.f32.mrb[48].mxu1  ;;  %v13748_v11 = vpop.f32.mrb[30].mxu0 }
 0x291   : > { %17492 = vst [vmem:[#allocation108_spill] sm:$0xff] %v13746_v7  ;;  %17493 = vst [vmem:[#allocation109_spill] sm:$0xff] %v13748_v11  ;;  %v13750_v35 = vpop.f32.mrb[49].mxu1  ;;  %v13752_v1 = vpop.f32.mrb[31].mxu0  ;;  %v4145_v22 = vsel %vm3991_vm4, %v13748_v11, -inf  ;;  %v4052_v11 = vsel %vm3991_vm4, %v13668_v52, -inf }
 0x292   : > { %17494 = vst [vmem:[#allocation110_spill] sm:$0xff] %v13750_v35  ;;  %17495 = vst [vmem:[#allocation111_spill] sm:$0xff] %v13752_v1  ;;  %v4142_v34 = vsel %vm3991_vm4, %v13752_v1, -inf }
 0x293   : > { %4044 = vmax.xlane.f32.xlu0 %v4043_v61 }
 0x294   : > { %4041 = vmax.xlane.f32.xlu1 %v4040_v26  ;;  %v13758_v41 = vpop.f32.mrb[50].mxu1  ;;  %v13760_v27 = vpop.f32.mrb[32].mxu0 }
 0x295   : > { %17496 = vst [vmem:[#allocation112_spill] sm:$0xff] %v13760_v27  ;;  %v13762_v58 = vpop.f32.mrb[51].mxu1  ;;  %v13764_v60 = vpop.f32.mrb[33].mxu0  ;;  %v4163_v36 = vsel %vm3991_vm4, %v13760_v27, -inf  ;;  %v4058_v27 = vsel %vm3991_vm4, %v13674_v28, -inf }
 0x296   : > { %17497 = vst [vmem:[#allocation113_spill] sm:$0xff] %v13764_v60  ;;  %v4160_v45 = vsel %vm3991_vm4, %v13764_v60, -inf }
 0x297   : > { %4140 = vmax.xlane.f32.xlu0 %v4139_v38 }
 0x298   : > { %4137 = vmax.xlane.f32.xlu1 %v4136_v8  ;;  %v13770_v61 = vpop.f32.mrb[52].mxu1  ;;  %v13772_v39 = vpop.f32.mrb[34].mxu0 }
 0x299   : > { %17498 = vst [vmem:[#allocation114_spill] sm:$0xff] %v13772_v39  ;;  %v13774_v26 = vpop.f32.mrb[53].mxu1  ;;  %v13776_v10 = vpop.f32.mrb[35].mxu0 }
 0x29a   : > { %17499 = vst [vmem:[#allocation115_spill] sm:$0xff] %v13774_v26  ;;  %17500 = vst [vmem:[#allocation116_spill] sm:$0xff] %v13776_v10  ;;  %v4166_v55 = vsel %vm3991_vm4, %v13776_v10, -inf }
 0x29b   : > { %4050 = vmax.xlane.f32.xlu0 %v4049_v37 }
 0x29c   : > { %4047 = vmax.xlane.f32.xlu1 %v4046_v16  ;;  %v13782_v38 = vpop.f32.mrb[54].mxu1  ;;  %v13784_v24 = vpop.f32.mrb[36].mxu0 }
 0x29d   : > { %17501 = vst [vmem:[#allocation117_spill] sm:$0xff] %v13784_v24  ;;  %v13786_v8 = vpop.f32.mrb[55].mxu1  ;;  %v13788_v23 = vpop.f32.mrb[37].mxu0 }
 0x29e   : > { %17502 = vst [vmem:[#allocation118_spill] sm:$0xff] %v13786_v8  ;;  %17503 = vst [vmem:[#allocation119_spill] sm:$0xff] %v13788_v23 }
 0x29f   : > { %4146 = vmax.xlane.f32.xlu0 %v4145_v22 }
 0x2a0   : > { %4143 = vmax.xlane.f32.xlu1 %v4142_v34  ;;  %v13794_v37 = vpop.f32.mrb[56].mxu1  ;;  %v13796_v0 = vpop.f32.mrb[38].mxu0 }
 0x2a1   : > { %17504 = vst [vmem:[#allocation120_spill] sm:$0xff] %v13796_v0  ;;  %v13798_v16 = vpop.f32.mrb[57].mxu1  ;;  %v13800_v57 = vpop.f32.mrb[39].mxu0 }
 0x2a2   : > { %17505 = vst [vmem:[#allocation121_spill] sm:$0xff] %v13798_v16  ;;  %17506 = vst [vmem:[#allocation122_spill] sm:$0xff] %v13800_v57 }
 0x2a3   : > { %4056 = vmax.xlane.f32.xlu0 %v4055_v62 }
 0x2a4   : > { %4053 = vmax.xlane.f32.xlu1 %v4052_v11  ;;  %v13806_v22 = vpop.f32.mrb[58].mxu1  ;;  %v13808_v1 = vpop.f32.mrb[40].mxu0 }
 0x2a5   : > { %17507 = vst [vmem:[#allocation123_spill] sm:$0xff] %v13806_v22  ;;  %17508 = vst [vmem:[#allocation124_spill] sm:$0xff] %v13808_v1  ;;  %v13810_v34 = vpop.f32.mrb[59].mxu1  ;;  %v13812_v29 = vpop.f32.mrb[41].mxu0  ;;  %v4211_v12 = vsel %vm3991_vm4, %v13808_v1, -inf  ;;  %v4082_v1 = vsel %vm3991_vm4, %v13718_v33, -inf }
 0x2a6   : > { %17509 = vst [vmem:[#allocation125_spill] sm:$0xff] %v13810_v34  ;;  %17510 = vst [vmem:[#allocation126_spill] sm:$0xff] %v13812_v29 }
 0x2a7   : > { %4164 = vmax.xlane.f32.xlu0 %v4163_v36 }
 0x2a8   : > { %4161 = vmax.xlane.f32.xlu1 %v4160_v45  ;;  %v13818_v62 = vpop.f32.mrb[60].mxu1  ;;  %v13820_v52 = vpop.f32.mrb[42].mxu0 }
 0x2a9   : > { %17511 = vst [vmem:[#allocation127_spill] sm:$0xff] %v13818_v62  ;;  %17512 = vst [vmem:[#allocation128_spill] sm:$0xff] %v13820_v52  ;;  %v13822_v11 = vpop.f32.mrb[61].mxu1  ;;  %v13824_v44 = vpop.f32.mrb[43].mxu0 }
 0x2aa   : > { %17513 = vst [vmem:[#allocation129_spill] sm:$0xff] %v13822_v11  ;;  %17514 = vst [vmem:[#allocation130_spill] sm:$0xff] %v13824_v44  ;;  %v4169_v11 = vsel %vm3991_vm4, %v13772_v39, -inf  ;;  %v4064_v39 = vsel %vm3991_vm4, %v13686_v59, -inf  ;;  %v4214_v20 = vsel %vm3991_vm4, %v13824_v44, -inf }
 0x2ab   : > { %4062 = vmax.xlane.f32.xlu0 %v4061_v48 }
 0x2ac   : > { %4059 = vmax.xlane.f32.xlu1 %v4058_v27  ;;  %v13830_v36 = vpop.f32.mrb[62].mxu1  ;;  %v13832_v60 = vpop.f32.mrb[44].mxu0 }
 0x2ad   : > { %17515 = vst [vmem:[#allocation131_spill] sm:$0xff] %v13830_v36  ;;  %17516 = vst [vmem:[#allocation132_spill] sm:$0xff] %v13832_v60  ;;  %v13834_v45 = vpop.f32.mrb[63].mxu1  ;;  %v13836_v50 = vpop.f32.mrb[45].mxu0 }
 0x2ae   : > { %17517 = vst [vmem:[#allocation133_spill] sm:$0xff] %v13834_v45  ;;  %17518 = vst [vmem:[#allocation134_spill] sm:$0xff] %v13836_v50  ;;  %v4067_v45 = vsel %vm3991_vm4, %v13682_v6, -inf  ;;  %v4184_v6 = vsel %vm3991_vm4, %v13788_v23, -inf }
 0x2af   : > { %4170 = vmax.xlane.f32.xlu0 %v4169_v11 }
 0x2b0   : > { %4167 = vmax.xlane.f32.xlu1 %v4166_v55  ;;  %v13842_v48 = vpop.f32.mrb[64].mxu1  ;;  %v13844_v28 = vpop.f32.mrb[46].mxu0 }
 0x2b1   : > { %17519 = vst [vmem:[#allocation135_spill] sm:$0xff] %v13842_v48  ;;  %17520 = vst [vmem:[#allocation136_spill] sm:$0xff] %v13844_v28  ;;  %v13846_v27 = vpop.f32.mrb[65].mxu1  ;;  %v13848_v3 = vpop.f32.mrb[47].mxu0 }
 0x2b2   : > { %17521 = vst [vmem:[#allocation137_spill] sm:$0xff] %v13846_v27  ;;  %17522 = vst [vmem:[#allocation138_spill] sm:$0xff] %v13848_v3  ;;  %v4187_v27 = vsel %vm3991_vm4, %v13784_v24, -inf  ;;  %v4070_v24 = vsel %vm3991_vm4, %v13696_v47, -inf }
 0x2b3   : > { %4068 = vmax.xlane.f32.xlu0 %v4067_v45 }
 0x2b4   : > { %4065 = vmax.xlane.f32.xlu1 %v4064_v39  ;;  %v13854_v11 = vpop.f32.mrb[66].mxu1  ;;  %v13856_v10 = vpop.f32.mrb[48].mxu0 }
 0x2b5   : > { %17523 = vst [vmem:[#allocation139_spill] sm:$0xff] %v13854_v11  ;;  %17524 = vst [vmem:[#allocation140_spill] sm:$0xff] %v13856_v10  ;;  %v13858_v55 = vpop.f32.mrb[67].mxu1  ;;  %v13860_v54 = vpop.f32.mrb[49].mxu0 }
 0x2b6   : > { %17525 = vst [vmem:[#allocation141_spill] sm:$0xff] %v13858_v55  ;;  %17526 = vst [vmem:[#allocation142_spill] sm:$0xff] %v13860_v54  ;;  %v4073_v55 = vsel %vm3991_vm4, %v13694_v18, -inf  ;;  %v4190_v18 = vsel %vm3991_vm4, %v13800_v57, -inf }
 0x2b7   : > { %4188 = vmax.xlane.f32.xlu0 %v4187_v27 }
 0x2b8   : > { %4185 = vmax.xlane.f32.xlu1 %v4184_v6  ;;  %v13866_v45 = vpop.f32.mrb[68].mxu1  ;;  %v13868_v59 = vpop.f32.mrb[50].mxu0 }
 0x2b9   : > { %17527 = vst [vmem:[#allocation143_spill] sm:$0xff] %v13866_v45  ;;  %17528 = vst [vmem:[#allocation144_spill] sm:$0xff] %v13868_v59  ;;  %v13870_v39 = vpop.f32.mrb[69].mxu1  ;;  %v13872_v34 = vpop.f32.mrb[51].mxu0 }
 0x2ba   : > { %17529 = vst [vmem:[#allocation145_spill] sm:$0xff] %v13870_v39  ;;  %17530 = vst [vmem:[#allocation146_spill] sm:$0xff] %v13872_v34  ;;  %v4193_v39 = vsel %vm3991_vm4, %v13796_v0, -inf  ;;  %v4076_v0 = vsel %vm3991_vm4, %v13706_v63, -inf }
 0x2bb   : > { %4074 = vmax.xlane.f32.xlu0 %v4073_v55 }
 0x2bc   : > { %4071 = vmax.xlane.f32.xlu1 %v4070_v24  ;;  %v13878_v27 = vpop.f32.mrb[70].mxu1  ;;  %v13880_v23 = vpop.f32.mrb[52].mxu0 }
 0x2bd   : > { %17531 = vst [vmem:[#allocation147_spill] sm:$0xff] %v13878_v27  ;;  %17532 = vst [vmem:[#allocation148_spill] sm:$0xff] %v13880_v23  ;;  %v13882_v6 = vpop.f32.mrb[71].mxu1  ;;  %v13884_v13 = vpop.f32.mrb[53].mxu0 }
 0x2be   : > { %17533 = vst [vmem:[#allocation149_spill] sm:$0xff] %v13882_v6  ;;  %17534 = vst [vmem:[#allocation150_spill] sm:$0xff] %v13884_v13  ;;  %v4079_v6 = vsel %vm3991_vm4, %v13702_v9, -inf  ;;  %v4208_v9 = vsel %vm3991_vm4, %v13812_v29, -inf }
 0x2bf   : > { %4194 = vmax.xlane.f32.xlu0 %v4193_v39 }
 0x2c0   : > { %4191 = vmax.xlane.f32.xlu1 %v4190_v18  ;;  %v13890_v55 = vpop.f32.mrb[72].mxu1  ;;  %v13892_v47 = vpop.f32.mrb[54].mxu0 }
 0x2c1   : > { %17535 = vst [vmem:[#allocation151_spill] sm:$0xff] %v13890_v55  ;;  %17536 = vst [vmem:[#allocation152_spill] sm:$0xff] %v13892_v47  ;;  %v13894_v24 = vpop.f32.mrb[73].mxu1  ;;  %v13896_v2 = vpop.f32.mrb[55].mxu0 }
 0x2c2   : > { %17537 = vst [vmem:[#allocation153_spill] sm:$0xff] %v13894_v24  ;;  %17538 = vst [vmem:[#allocation154_spill] sm:$0xff] %v13896_v2 }
 0x2c3   : > { %4080 = vmax.xlane.f32.xlu0 %v4079_v6 }
 0x2c4   : > { %4077 = vmax.xlane.f32.xlu1 %v4076_v0  ;;  %v13902_v39 = vpop.f32.mrb[74].mxu1  ;;  %v13904_v57 = vpop.f32.mrb[56].mxu0 }
 0x2c5   : > { %17539 = vst [vmem:[#allocation155_spill] sm:$0xff] %v13902_v39  ;;  %17540 = vst [vmem:[#allocation156_spill] sm:$0xff] %v13904_v57  ;;  %v13906_v18 = vpop.f32.mrb[75].mxu1  ;;  %v13908_v55 = vpop.f32.mrb[57].mxu0 }
 0x2c6   : > { %17541 = vst [vmem:[#allocation157_spill] sm:$0xff] %v13906_v18  ;;  %17542 = vst [vmem:[#allocation158_spill] sm:$0xff] %v13908_v55 }
 0x2c7   : > { %4212 = vmax.xlane.f32.xlu0 %v4211_v12 }
 0x2c8   : > { %4209 = vmax.xlane.f32.xlu1 %v4208_v9  ;;  %v13914_v6 = vpop.f32.mrb[76].mxu1  ;;  %v13916_v63 = vpop.f32.mrb[58].mxu0 }
 0x2c9   : > { %17543 = vst [vmem:[#allocation159_spill] sm:$0xff] %v13914_v6  ;;  %17544 = vst [vmem:[#allocation160_spill] sm:$0xff] %v13916_v63  ;;  %v13918_v0 = vpop.f32.mrb[77].mxu1  ;;  %v13920_v39 = vpop.f32.mrb[59].mxu0  ;;  %v4217_v63 = vsel %vm3991_vm4, %v13820_v52, -inf  ;;  %v4100_v52 = vsel %vm3991_vm4, %v13728_v43, -inf }
 0x2ca   : > { %17545 = vst [vmem:[#allocation161_spill] sm:$0xff] %v13918_v0  ;;  %17546 = vst [vmem:[#allocation162_spill] sm:$0xff] %v13920_v39 }
 0x2cb   : > { %4086 = vmax.xlane.f32.xlu0 %v4085_v51 }
 0x2cc   : > { %4083 = vmax.xlane.f32.xlu1 %v4082_v1  ;;  %v13926_v12 = vpop.f32.mrb[78].mxu1  ;;  %v13928_v29 = vpop.f32.mrb[60].mxu0 }
 0x2cd   : > { %17547 = vst [vmem:[#allocation163_spill] sm:$0xff] %v13926_v12  ;;  %17548 = vst [vmem:[#allocation164_spill] sm:$0xff] %v13928_v29  ;;  %v13930_v9 = vpop.f32.mrb[79].mxu1  ;;  %v13932_v6 = vpop.f32.mrb[61].mxu0  ;;  %v4103_v29 = vsel %vm3991_vm4, %v13726_v25, -inf  ;;  %v4232_v25 = vsel %vm3991_vm4, %v13836_v50, -inf }
 0x2ce   : > { %17549 = vst [vmem:[#allocation165_spill] sm:$0xff] %v13930_v9  ;;  %17550 = vst [vmem:[#allocation166_spill] sm:$0xff] %v13932_v6 }
 0x2cf   : > { %4218 = vmax.xlane.f32.xlu0 %v4217_v63 }
 0x2d0   : > { %4215 = vmax.xlane.f32.xlu1 %v4214_v20  ;;  %v13938_v51 = vpop.f32.mrb[80].mxu1  ;;  %v13940_v33 = vpop.f32.mrb[62].mxu0 }
 0x2d1   : > { %17551 = vst [vmem:[#allocation167_spill] sm:$0xff] %v13938_v51  ;;  %17552 = vst [vmem:[#allocation168_spill] sm:$0xff] %v13940_v33  ;;  %v13942_v1 = vpop.f32.mrb[81].mxu1  ;;  %v13944_v12 = vpop.f32.mrb[63].mxu0  ;;  %v4235_v33 = vsel %vm3991_vm4, %v13832_v60, -inf }
 0x2d2   : > { %17553 = vst [vmem:[#allocation169_spill] sm:$0xff] %v13942_v1  ;;  %17554 = vst [vmem:[#allocation170_spill] sm:$0xff] %v13944_v12  ;;  %v4316_v14 = vsel %vm3991_vm4, %v13942_v1, -inf }
 0x2d3   : > { %4104 = vmax.xlane.f32.xlu0 %v4103_v29 }
 0x2d4   : > { %4101 = vmax.xlane.f32.xlu1 %v4100_v52  ;;  %v13950_v63 = vpop.f32.mrb[82].mxu1  ;;  %v13952_v44 = vpop.f32.mrb[64].mxu0 }
 0x2d5   : > { %17555 = vst [vmem:[#allocation171_spill] sm:$0xff] %v13950_v63  ;;  %17556 = vst [vmem:[#allocation172_spill] sm:$0xff] %v13952_v44  ;;  %v13954_v20 = vpop.f32.mrb[83].mxu1  ;;  %v13956_v51 = vpop.f32.mrb[65].mxu0 }
 0x2d6   : > { %17557 = vst [vmem:[#allocation173_spill] sm:$0xff] %v13954_v20  ;;  %17558 = vst [vmem:[#allocation174_spill] sm:$0xff] %v13956_v51  ;;  %v4109_v51 = vsel %vm3991_vm4, %v13734_v31, -inf }
 0x2d7   : > { %4236 = vmax.xlane.f32.xlu0 %v4235_v33  ;;  %v13968_v63 = vpop.xlane.xlu1 %3996  ;;  %v4106_v33 = vsel %vm3991_vm4, %v13738_v40, -inf }
 0x2d8   : > { %4233 = vmax.xlane.f32.xlu1 %v4232_v25  ;;  %v13962_v29 = vpop.f32.mrb[66].mxu0  ;;  %v13964_v43 = vpop.f32.mrb[84].mxu1  ;;  %17562 = vst [vmem:[#allocation178_spill] sm:$0xff] %v13968_v63  ;;  %v4238_v63 = vsel %vm3991_vm4, %v13848_v3, -inf  ;;  %v4151_v3 = vsel %vm3991_vm4, %v13770_v61, -inf }
 0x2d9   : > { %17559 = vst [vmem:[#allocation175_spill] sm:$0xff] %v13962_v29  ;;  %17560 = vst [vmem:[#allocation176_spill] sm:$0xff] %v13964_v43  ;;  %v13966_v52 = vpop.f32.mrb[67].mxu0  ;;  %v13970_v44 = vpop.f32.mrb[85].mxu1  ;;  %v4241_v43 = vsel %vm3991_vm4, %v13844_v28, -inf  ;;  %v4133_v28 = vsel %vm3991_vm4, %v13758_v41, -inf }
 0x2da   : > { %17561 = vst [vmem:[#allocation177_spill] sm:$0xff] %v13966_v52  ;;  %17563 = vst [vmem:[#allocation179_spill] sm:$0xff] %v13970_v44  ;;  %v13990_v40 = vpop.xlane.xlu0 %3993 }
 0x2db   : > { %4110 = vmax.xlane.f32.xlu0 %v4109_v51 }
 0x2dc   : > { %4107 = vmax.xlane.f32.xlu1 %v4106_v33  ;;  %v13976_v50 = vpop.f32.mrb[86].mxu1  ;;  %v13984_v60 = vpop.xlane.xlu1 %3999  ;;  %v4127_v33 = vsel %vm3991_vm4, %v13746_v7, -inf }
 0x2dd   : > { %17564 = vst [vmem:[#allocation180_spill] sm:$0xff] %v13976_v50  ;;  %v13978_v25 = vpop.f32.mrb[87].mxu1  ;;  %v4259_v50 = vsel %vm3991_vm4, %v13856_v10, -inf  ;;  %v4175_v10 = vsel %vm3991_vm4, %v13794_v37, -inf }
 0x2de   : > { %17565 = vst [vmem:[#allocation181_spill] sm:$0xff] %v13978_v25  ;;  %v14008_v7 = vpop.xlane.xlu0 %4002 }
 0x2df   : > { %4242 = vmax.xlane.f32.xlu0 %v4241_v43  ;;  %17570 = vst [vmem:[#allocation186_spill] sm:$0xff] %v14008_v7 }
 0x2e0   : > { %4239 = vmax.xlane.f32.xlu1 %v4238_v63  ;;  %v13986_v31 = vpop.f32.mrb[88].mxu1 }
 0x2e1   : > { %17566 = vst [vmem:[#allocation182_spill] sm:$0xff] %v13986_v31  ;;  %v13988_v51 = vpop.f32.mrb[89].mxu1 }
 0x2e2   : > { %17567 = vst [vmem:[#allocation183_spill] sm:$0xff] %v13988_v51 }
 0x2e3   : > { %4128 = vmax.xlane.f32.xlu0 %v4127_v33  ;;  %v4124_v33 = vsel %vm3991_vm4, %v13750_v35, -inf  ;;  %v4157_v35 = vsel %vm3991_vm4, %v13782_v38, -inf }
 0x2e4   : > { %4260 = vmax.xlane.f32.xlu1 %v4259_v50  ;;  %v13996_v43 = vpop.xlane.xlu1 %4011  ;;  %v14000_v63 = vpop.f32.mrb[90].mxu1 }
 0x2e5   : > { %17568 = vst [vmem:[#allocation184_spill] sm:$0xff] %v14000_v63  ;;  %v14002_v31 = vpop.f32.mrb[91].mxu1  ;;  %v4256_v63 = vsel %vm3991_vm4, %v13860_v54, -inf }
 0x2e6   : > { %17569 = vst [vmem:[#allocation185_spill] sm:$0xff] %v14002_v31 }
 0x2e7   : > { %4134 = vmax.xlane.f32.xlu0 %v4133_v28  ;;  %v14018_v28 = vpop.xlane.xlu0 %4008 }
 0x2e8   : > { %4125 = vmax.xlane.f32.xlu1 %v4124_v33  ;;  %v14010_v50 = vpop.xlane.xlu1 %4017  ;;  %v4265_v33 = vsel %vm3991_vm4, %v13868_v59, -inf }
 0x2eb   : > { %4152 = vmax.xlane.f32.xlu0 %v4151_v3  ;;  %v4130_v3 = vsel %vm3991_vm4, %v13762_v58, -inf  ;;  %v14028_v7 = vpop.xlane.xlu0 %4005 }
 0x2ec   : > { %4257 = vmax.xlane.f32.xlu1 %v4256_v63  ;;  %v4181_v63 = vsel %vm3991_vm4, %v13806_v22, -inf }
 0x2ef   : > { %4158 = vmax.xlane.f32.xlu0 %v4157_v35  ;;  %v4262_v35 = vsel %vm3991_vm4, %v13872_v34, -inf  ;;  %v14034_v59 = vpop.xlane.xlu0 %4014 }
 0x2f0   : > { %4266 = vmax.xlane.f32.xlu1 %v4265_v33  ;;  %v4199_v33 = vsel %vm3991_vm4, %v13818_v62, -inf }
 0x2f3   : > { %4176 = vmax.xlane.f32.xlu0 %v4175_v10  ;;  %v4283_v10 = vsel %vm3991_vm4, %v13880_v23, -inf  ;;  %v14044_v22 = vpop.xlane.xlu0 %4020  ;;  %v17592_v23 = vld [vmem:[#allocation109_spill] sm:$0xff] }
 0x2f4   : > { %4131 = vmax.xlane.f32.xlu1 %v4130_v3  ;;  %v4205_v3 = vsel %vm3991_vm4, %v13830_v36, -inf  ;;  %v17600_v36 = vld [vmem:[#allocation112_spill] sm:$0xff] }
 0x2f7   : > { %4182 = vmax.xlane.f32.xlu0 %v4181_v63  ;;  %v4148_v63 = vsel %vm3991_vm4, %v13774_v26, -inf  ;;  %v4247_v26 = vsel %vm3991_vm4, %v13866_v45, -inf }
 0x2f8   : > { %4263 = vmax.xlane.f32.xlu1 %v4262_v35  ;;  %v4223_v35 = vsel %vm3991_vm4, %v13842_v48, -inf }
 0x2fb   : > { %4200 = vmax.xlane.f32.xlu0 %v4199_v33  ;;  %v4280_v33 = vsel %vm3991_vm4, %v13884_v13, -inf }
 0x2fc   : > { %4284 = vmax.xlane.f32.xlu1 %v4283_v10  ;;  %v4253_v10 = vsel %vm3991_vm4, %v13878_v27, -inf }
 0x2ff   : > { %4206 = vmax.xlane.f32.xlu0 %v4205_v3 }
 0x300   : > { %4149 = vmax.xlane.f32.xlu1 %v4148_v63  ;;  %v4229_v63 = vsel %vm3991_vm4, %v13854_v11, -inf }
 0x303   : > { %4224 = vmax.xlane.f32.xlu0 %v4223_v35  ;;  %v4289_v35 = vsel %vm3991_vm4, %v13892_v47, -inf }
 0x304   : > { %v14050_v62 = vpop.xlane.xlu0 %4092  ;;  %4281 = vmax.xlane.f32.xlu1 %v4280_v33  ;;  %v4268_v33 = vsel %vm3991_vm4, %v13894_v24, -inf }
 0x305   : > { %v14054_v3 = vpop.xlane.xlu1 %4089 }
 0x307   : > { %4230 = vmax.xlane.f32.xlu0 %v4229_v63  ;;  %v4154_v63 = vsel %vm3991_vm4, %v13786_v8, -inf }
 0x308   : > { %v14062_v48 = vpop.xlane.xlu0 %4026  ;;  %4290 = vmax.xlane.f32.xlu1 %v4289_v35  ;;  %v4274_v35 = vsel %vm3991_vm4, %v13906_v18, -inf }
 0x309   : > { %17571 = vst [vmem:[#allocation187_spill] sm:$0xff] %v14062_v48  ;;  %v14066_v13 = vpop.xlane.xlu1 %4023 }
 0x30b   : > { %4248 = vmax.xlane.f32.xlu0 %v4247_v26  ;;  %v4286_v26 = vsel %vm3991_vm4, %v13896_v2, -inf }
 0x30c   : > { %v14074_v11 = vpop.xlane.xlu0 %4098  ;;  %4155 = vmax.xlane.f32.xlu1 %v4154_v63  ;;  %v4292_v63 = vsel %vm3991_vm4, %v13918_v0, -inf  ;;  %v17577_v0 = vld [vmem:[#allocation160_spill] sm:$0xff] }
 0x30d   : > { %17572 = vst [vmem:[#allocation188_spill] sm:$0xff] %v14074_v11  ;;  %v14078_v47 = vpop.xlane.xlu1 %4095 }
 0x30f   : > { %4254 = vmax.xlane.f32.xlu0 %v4253_v10  ;;  %v4307_v10 = vsel %vm3991_vm4, %v13904_v57, -inf }
 0x310   : > { %v14086_v45 = vpop.xlane.xlu0 %4032  ;;  %4287 = vmax.xlane.f32.xlu1 %v4286_v26  ;;  %v4298_v26 = vsel %vm3991_vm4, %v13930_v9, -inf  ;;  %v17581_v9 = vld [vmem:[#allocation125_spill] sm:$0xff] }
 0x311   : > { %v14090_v8 = vpop.xlane.xlu1 %4029 }
 0x313   : > { %4269 = vmax.xlane.f32.xlu0 %v4268_v33  ;;  %v4172_v33 = vsel %vm3991_vm4, %v13798_v16, -inf  ;;  %v17580_v16 = vld [vmem:[#allocation83_spill] sm:$0xff] }
 0x314   : > { %v14098_v27 = vpop.xlane.xlu0 %4116  ;;  %4308 = vmax.xlane.f32.xlu1 %v4307_v10  ;;  %v17589_v10 = vld [vmem:[#allocation85_spill] sm:$0xff] }
 0x315   : > { %v14102_v2 = vpop.xlane.xlu1 %4113 }
 0x316   : > { %17573 = vst [vmem:[#allocation189_spill] sm:$0xff] %v14102_v2 }
 0x317   : > { %4275 = vmax.xlane.f32.xlu0 %v4274_v35  ;;  %v4304_v35 = vsel %vm3991_vm4, %v13908_v55, -inf  ;;  %v17583_v55 = vld [vmem:[#allocation105_spill] sm:$0xff] }
 0x318   : > { %v14110_v24 = vpop.xlane.xlu0 %4038  ;;  %4173 = vmax.xlane.f32.xlu1 %v4172_v33  ;;  %v17574_v33 = vld [vmem:[#allocation99_spill] sm:$0xff] }
 0x319   : > { %v14114_v57 = vpop.xlane.xlu1 %4035 }
 0x31b   : > { %4293 = vmax.xlane.f32.xlu0 %v4292_v63  ;;  %v4313_v63 = vsel %vm3991_vm4, %v17577_v0, -inf }
 0x31c   : > { %v14122_v18 = vpop.xlane.xlu0 %4122  ;;  %4305 = vmax.xlane.f32.xlu1 %v4304_v35 }
 0x31d   : > { %v14126_v2 = vpop.xlane.xlu1 %4119 }
 0x31e   : > { %17575 = vst [vmem:[#allocation99_spill] sm:$0xff] %v14126_v2 }
 0x31f   : > { %4299 = vmax.xlane.f32.xlu0 %v4298_v26  ;;  %v4178_v26 = vsel %vm3991_vm4, %v17581_v9, -inf  ;;  %v4310_v9 = vsel %vm3991_vm4, %v13920_v39, -inf  ;;  %v17590_v39 = vld [vmem:[#allocation164_spill] sm:$0xff] }
 0x320   : > { %v14134_v11 = vpop.xlane.xlu0 %4044  ;;  %4314 = vmax.xlane.f32.xlu1 %v4313_v63  ;;  %v17582_v63 = vld [vmem:[#allocation74_spill] sm:$0xff] }
 0x321   : > { %17578 = vst [vmem:[#allocation190_spill] sm:$0xff] %v14134_v11  ;;  %v14138_v4 = vpop.xlane.xlu1 %4041  ;;  %v4376_v0 = vsub.f32 %v17582_v63, %v13990_v40  ;;  %v17587_v40 = vld [vmem:[#allocation76_spill] sm:$0xff] }
 0x322   : > { %v4378_v63 = vsub.f32 %v17587_v40, %v13984_v60 }
 0x323   : > { %4317 = vmax.xlane.f32.xlu0 %v4316_v14  ;;  %v4322_v14 = vsel %vm3991_vm4, %v13954_v20, -inf  ;;  %v4331_v20 = vsel %vm3991_vm4, %v17590_v39, -inf  ;;  %v17595_v39 = vld [vmem:[#allocation129_spill] sm:$0xff] }
 0x324   : > { %v14146_v2 = vpop.xlane.xlu0 %4140  ;;  %4179 = vmax.xlane.f32.xlu1 %v4178_v26  ;;  %v4504_v26 = vmul.f32 1.442695, %v4376_v0  ;;  %v4508_v60 = vmul.f32 1.442695, %v4378_v63  ;;  %v17591_v0 = vld [vmem:[#allocation77_spill] sm:$0xff]  ;;  %v17596_v63 = vld [vmem:[#allocation78_spill] sm:$0xff] }
 0x325   : > { %v14152_v35 = vpop.xlane.xlu1 %4137  ;;  %v4381_v40 = vsub.f32 %v17591_v0, %v14018_v28  ;;  %v4380_v0 = vsub.f32 %v17596_v63, %v14028_v7 }
 0x326   : > { %17584 = vst [vmem:[#allocation83_spill] sm:$0xff] %v14152_v35  ;;  %11913 = vpow2.f32 %v4504_v26 }
 0x327   : > { %4323 = vmax.xlane.f32.xlu0 %v4322_v14  ;;  %v4340_v14 = vsel %vm3991_vm4, %v13970_v44, -inf  ;;  %11915 = vpow2.f32 %v4508_v60  ;;  %v4514_v28 = vmul.f32 1.442695, %v4381_v40  ;;  %v17598_v44 = vld [vmem:[#allocation87_spill] sm:$0xff]  ;;  %v4512_v7 = vmul.f32 1.442695, %v4380_v0 }
 0x328   : > { %v14160_v1 = vpop.xlane.xlu0 %4050  ;;  %4311 = vmax.xlane.f32.xlu1 %v4310_v9  ;;  %v17599_v40 = vld [vmem:[#allocation79_spill] sm:$0xff] }
 0x329   : > { %17586 = vst [vmem:[#allocation74_spill] sm:$0xff] %v14160_v1  ;;  %v14166_v48 = vpop.xlane.xlu1 %4047  ;;  %v17597_v1 = vld [vmem:[#allocation86_spill] sm:$0xff]  ;;  %11917 = vpow2.f32 %v4514_v28  ;;  %v4383_v63 = vsub.f32 %v17599_v40, %v14034_v59  ;;  %v17605_v40 = vld [vmem:[#allocation88_spill] sm:$0xff] }
 0x32a   : > { %11919 = vpow2.f32 %v4512_v7  ;;  %v17610_v7 = vsub.f32 %v13630_v17, %v13996_v43  ;;  %v17616_v43 = vsub.f32 %v13638_v19, %v14010_v50  ;;  %v17621_v19 = vsub.f32 %v13676_v53, %v14054_v3 }
 0x32b   : > { %4341 = vmax.xlane.f32.xlu0 %v4340_v14  ;;  %v4346_v14 = vsel %vm3991_vm4, %v13978_v25, -inf  ;;  %v4518_v59 = vmul.f32 1.442695, %v4383_v63  ;;  %v17628_v53 = vsub.f32 %v13646_v5, %v14066_v13  ;;  %v17633_v5 = vsub.f32 %v13688_v21, %v14078_v47 }
 0x32c   : > { %v14174_v9 = vpop.xlane.xlu0 %4146  ;;  %4332 = vmax.xlane.f32.xlu1 %v4331_v20  ;;  %v4196_v20 = vsel %vm3991_vm4, %v17595_v39, -inf  ;;  %v4516_v63 = vmul.f32 1.442695, %v17610_v7  ;;  %v17611_v39 = vld [vmem:[#allocation114_spill] sm:$0xff]  ;;  %v4568_v50 = vmul.f32 1.442695, %v17621_v19  ;;  %v17638_v47 = vsub.f32 %v13650_v49, %v14086_v45 }
 0x32d   : > { %v14180_v11 = vpop.xlane.xlu1 %4143  ;;  %11921 = vpow2.f32 %v4518_v59  ;;  %v4520_v59 = vmul.f32 1.442695, %v17616_v43  ;;  %v17622_v43 = vld [vmem:[#allocation117_spill] sm:$0xff]  ;;  %v4524_v3 = vmul.f32 1.442695, %v17628_v53  ;;  %v17634_v53 = vld [vmem:[#allocation120_spill] sm:$0xff]  ;;  %v17643_v49 = vsub.f32 %v13704_v42, %v14098_v27 }
 0x32e   : > { %17593 = vst [vmem:[#allocation105_spill] sm:$0xff] %v14180_v11  ;;  %11923 = vpow2.f32 %v4516_v63  ;;  %v4572_v13 = vmul.f32 1.442695, %v17633_v5  ;;  %v4530_v21 = vmul.f32 1.442695, %v17638_v47  ;;  %v17639_v5 = vld [vmem:[#allocation95_spill] sm:$0xff]  ;;  %v17648_v42 = vsub.f32 %v13652_v30, %v14090_v8 }
 0x32f   : > { %4347 = vmax.xlane.f32.xlu0 %v4346_v14  ;;  %v4364_v14 = vsel %vm3991_vm4, %v13988_v51, -inf  ;;  %11925 = vpow2.f32 %v4520_v59  ;;  %v4586_v45 = vmul.f32 1.442695, %v17643_v49  ;;  %v17644_v47 = vld [vmem:[#allocation124_spill] sm:$0xff]  ;;  %v17649_v49 = vld [vmem:[#allocation98_spill] sm:$0xff]  ;;  %v17655_v8 = vsub.f32 %v13654_v32, %v14110_v24 }
 0x330   : > { %v14188_v26 = vpop.xlane.xlu0 %4056  ;;  %4197 = vmax.xlane.f32.xlu1 %v4196_v20  ;;  %v4328_v20 = vsel %vm3991_vm4, %v13932_v6, -inf  ;;  %v14214_v6 = vpop.eup %11913  ;;  %11927 = vpow2.f32 %v4568_v50  ;;  %v4528_v27 = vmul.f32 1.442695, %v17648_v42  ;;  %v17661_v32 = vsub.f32 %v17574_v33, %v14122_v18 }
 0x331   : > { %v14194_v15 = vpop.xlane.xlu1 %4053  ;;  %17603 = vst [vmem:[#allocation85_spill] sm:$0xff] %v14214_v6  ;;  %11929 = vpow2.f32 %v4524_v3  ;;  %v4361_v3 = vsel %vm3991_vm4, %v13962_v29, -inf  ;;  %v17667_v18 = vsub.f32 %v13656_v56, %v14114_v57  ;;  %v17673_v56 = vsub.f32 %v17583_v55, %v14146_v2 }
 0x332   : > { %11931 = vpow2.f32 %v4572_v13  ;;  %v4590_v24 = vmul.f32 1.442695, %v17661_v32  ;;  %v17679_v2 = vsub.f32 %v17580_v16, %v14138_v4  ;;  %v17685_v16 = vsub.f32 %v17592_v23, %v14174_v9  ;;  %v17692_v23 = vld [vmem:[#allocation73_spill] sm:$0xff] }
 0x333   : > { %4365 = vmax.xlane.f32.xlu0 %v4364_v14  ;;  %v4370_v14 = vsel %vm3991_vm4, %v14002_v31, -inf  ;;  %v4760_v31 = vsel %vm3991_vm4, %v14214_v6, 0.0  ;;  %11933 = vpow2.f32 %v4530_v21  ;;  %v4358_v21 = vsel %vm3991_vm4, %v13966_v52, -inf }
 0x334   : > { %v14202_v60 = vpop.xlane.xlu0 %4164  ;;  %4329 = vmax.xlane.f32.xlu1 %v4328_v20  ;;  %v17604_v20 = vld [vmem:[#allocation168_spill] sm:$0xff]  ;;  %11935 = vpow2.f32 %v4586_v45  ;;  %v4534_v45 = vmul.f32 1.442695, %v17655_v8  ;;  %v17662_v8 = vld [vmem:[#allocation102_spill] sm:$0xff]  ;;  %v4532_v33 = vmul.f32 1.442695, %v17667_v18 }
 0x335   : > { %v14208_v11 = vpop.xlane.xlu1 %4161  ;;  %v4337_v28 = vsel %vm3991_vm4, %v17604_v20, -inf  ;;  %v17609_v20 = vld [vmem:[#allocation133_spill] sm:$0xff]  ;;  %11937 = vpow2.f32 %v4528_v27  ;;  %v17674_v18 = vld [vmem:[#allocation104_spill] sm:$0xff]  ;;  %v4536_v55 = vmul.f32 1.442695, %v17679_v2 }
 0x336   : > { %17601 = vst [vmem:[#allocation76_spill] sm:$0xff] %v14208_v11  ;;  %v4202_v25 = vsel %vm3991_vm4, %v17609_v20, -inf  ;;  %11939 = vpow2.f32 %v4534_v45  ;;  %v17686_v2 = vld [vmem:[#allocation108_spill] sm:$0xff] }
 0x337   : > { %4371 = vmax.xlane.f32.xlu0 %v4370_v14  ;;  %v14228_v14 = vpop.eup %11915  ;;  %11941 = vpow2.f32 %v4590_v24  ;;  %v4602_v24 = vmul.f32 1.442695, %v17673_v56 }
 0x338   : > { %v14218_v0 = vpop.xlane.xlu0 %4062  ;;  %4338 = vmax.xlane.f32.xlu1 %v4337_v28  ;;  %17608 = vst [vmem:[#allocation109_spill] sm:$0xff] %v14228_v14  ;;  %v14245_v20 = vpop.eup %11917  ;;  %11943 = vpow2.f32 %v4532_v33 }
 0x339   : > { %v14222_v35 = vpop.xlane.xlu1 %4059  ;;  %17614 = vst [vmem:[#allocation86_spill] sm:$0xff] %v14245_v20  ;;  %11945 = vpow2.f32 %v4602_v24  ;;  %v4606_v24 = vmul.f32 1.442695, %v17685_v16 }
 0x33a   : > { %17606 = vst [vmem:[#allocation77_spill] sm:$0xff] %v14222_v35  ;;  %11947 = vpow2.f32 %v4536_v55 }
 0x33b   : > { %4761 = vadd.xlane.f32.xlu0 %v4760_v31  ;;  %v4766_v31 = vsel %vm3991_vm4, %v14228_v14, 0.0  ;;  %v17618_v14 = vld [vmem:[#allocation92_spill] sm:$0xff]  ;;  %11949 = vpow2.f32 %v4606_v24 }
 0x33c   : > { %v14232_v28 = vpop.xlane.xlu0 %4170  ;;  %4203 = vmax.xlane.f32.xlu1 %v4202_v25  ;;  %v4334_v25 = vsel %vm3991_vm4, %v13944_v12, -inf  ;;  %v14262_v12 = vpop.eup %11919 }
 0x33d   : > { %v14239_v35 = vpop.xlane.xlu1 %4167  ;;  %17619 = vst [vmem:[#allocation79_spill] sm:$0xff] %v14262_v12 }
 0x33e   : > { %17612 = vst [vmem:[#allocation78_spill] sm:$0xff] %v14239_v35 }
 0x33f   : > { %4767 = vadd.xlane.f32.xlu0 %v4766_v31  ;;  %v4775_v31 = vsel %vm3991_vm4, %v14245_v20, 0.0 }
 0x340   : > { %v14249_v17 = vpop.xlane.xlu0 %4068  ;;  %4335 = vmax.xlane.f32.xlu1 %v4334_v25  ;;  %v17620_v25 = vld [vmem:[#allocation172_spill] sm:$0xff] }
 0x341   : > { %17615 = vst [vmem:[#allocation87_spill] sm:$0xff] %v14249_v17  ;;  %v14256_v11 = vpop.xlane.xlu1 %4065  ;;  %v4355_v63 = vsel %vm3991_vm4, %v17620_v25, -inf  ;;  %v14279_v25 = vpop.eup %11921 }
 0x342   : > { %17625 = vst [vmem:[#allocation88_spill] sm:$0xff] %v14279_v25 }
 0x343   : > { %4776 = vadd.xlane.f32.xlu0 %v4775_v31  ;;  %v4772_v31 = vsel %vm3991_vm4, %v14262_v12, 0.0  ;;  %v17630_v12 = vld [vmem:[#allocation94_spill] sm:$0xff] }
 0x344   : > { %v14266_v6 = vpop.xlane.xlu0 %4188  ;;  %4356 = vmax.xlane.f32.xlu1 %v4355_v63  ;;  %v17626_v63 = vld [vmem:[#allocation137_spill] sm:$0xff] }
 0x345   : > { %v14273_v35 = vpop.xlane.xlu1 %4185  ;;  %v4220_v59 = vsel %vm3991_vm4, %v17626_v63, -inf  ;;  %v14296_v63 = vpop.eup %11923 }
 0x346   : > { %17623 = vst [vmem:[#allocation112_spill] sm:$0xff] %v14273_v35  ;;  %17631 = vst [vmem:[#allocation92_spill] sm:$0xff] %v14296_v63 }
 0x347   : > { %4773 = vadd.xlane.f32.xlu0 %v4772_v31  ;;  %v4781_v31 = vsel %vm3991_vm4, %v14279_v25, 0.0 }
 0x348   : > { %v14283_v7 = vpop.xlane.xlu0 %4074  ;;  %4221 = vmax.xlane.f32.xlu1 %v4220_v59  ;;  %v17632_v59 = vld [vmem:[#allocation174_spill] sm:$0xff] }
 0x349   : > { %17627 = vst [vmem:[#allocation114_spill] sm:$0xff] %v14283_v7  ;;  %v14290_v51 = vpop.xlane.xlu1 %4071  ;;  %v4352_v50 = vsel %vm3991_vm4, %v17632_v59, -inf  ;;  %v14313_v59 = vpop.eup %11925 }
 0x34a   : > { %17637 = vst [vmem:[#allocation94_spill] sm:$0xff] %v14313_v59  ;;  %v14330_v29 = vpop.eup %11927 }
 0x34b   : > { %4782 = vadd.xlane.f32.xlu0 %v4781_v31  ;;  %v4778_v31 = vsel %vm3991_vm4, %v14296_v63, 0.0  ;;  %v17640_v63 = vld [vmem:[#allocation96_spill] sm:$0xff]  ;;  %17641 = vst [vmem:[#allocation120_spill] sm:$0xff] %v14330_v29 }
 0x34c   : > { %v14300_v20 = vpop.xlane.xlu0 %4194  ;;  %4353 = vmax.xlane.f32.xlu1 %v4352_v50 }
 0x34d   : > { %v14307_v35 = vpop.xlane.xlu1 %4191 }
 0x34e   : > { %17635 = vst [vmem:[#allocation117_spill] sm:$0xff] %v14307_v35 }
 0x34f   : > { %4779 = vadd.xlane.f32.xlu0 %v4778_v31  ;;  %v4784_v31 = vsel %vm3991_vm4, %v14313_v59, 0.0 }
 0x350   : > { %v14317_v50 = vpop.xlane.xlu0 %4080  ;;  %4362 = vmax.xlane.f32.xlu1 %v4361_v3  ;;  %v17642_v3 = vld [vmem:[#allocation141_spill] sm:$0xff] }
 0x351   : > { %v14324_v17 = vpop.xlane.xlu1 %4077  ;;  %v4226_v13 = vsel %vm3991_vm4, %v17642_v3, -inf  ;;  %v14347_v3 = vpop.eup %11929 }
 0x352   : > { %17647 = vst [vmem:[#allocation96_spill] sm:$0xff] %v14347_v3  ;;  %v14364_v52 = vpop.eup %11931 }
 0x353   : > { %4785 = vadd.xlane.f32.xlu0 %v4784_v31  ;;  %v4856_v31 = vsel %vm3991_vm4, %v14330_v29, 0.0  ;;  %17652 = vst [vmem:[#allocation98_spill] sm:$0xff] %v14364_v52 }
 0x354   : > { %v14334_v25 = vpop.xlane.xlu0 %4212  ;;  %4227 = vmax.xlane.f32.xlu1 %v4226_v13 }
 0x355   : > { %v14341_v7 = vpop.xlane.xlu1 %4209 }
 0x356   : > { %17645 = vst [vmem:[#allocation95_spill] sm:$0xff] %v14341_v7 }
 0x357   : > { %4857 = vadd.xlane.f32.xlu0 %v4856_v31  ;;  %v4790_v31 = vsel %vm3991_vm4, %v14347_v3, 0.0 }
 0x358   : > { %v14351_v13 = vpop.xlane.xlu0 %4086  ;;  %4359 = vmax.xlane.f32.xlu1 %v4358_v21  ;;  %v17653_v21 = vld [vmem:[#allocation145_spill] sm:$0xff] }
 0x359   : > { %v14358_v35 = vpop.xlane.xlu1 %4083  ;;  %v4244_v59 = vsel %vm3991_vm4, %v17653_v21, -inf  ;;  %v14381_v21 = vpop.eup %11933 }
 0x35a   : > { %17650 = vst [vmem:[#allocation124_spill] sm:$0xff] %v14358_v35  ;;  %17659 = vst [vmem:[#allocation193_spill] sm:$0xff] %v14381_v21 }
 0x35b   : > { %4791 = vadd.xlane.f32.xlu0 %v4790_v31  ;;  %v4862_v31 = vsel %vm3991_vm4, %v14364_v52, 0.0  ;;  %v17663_v52 = vld [vmem:[#allocation103_spill] sm:$0xff] }
 0x35c   : > { %v14368_v30 = vpop.xlane.xlu0 %4218  ;;  %4245 = vmax.xlane.f32.xlu1 %v4244_v59  ;;  %v17660_v59 = vld [vmem:[#allocation149_spill] sm:$0xff] }
 0x35d   : > { %17654 = vst [vmem:[#allocation191_spill] sm:$0xff] %v14368_v30  ;;  %v14375_v19 = vpop.xlane.xlu1 %4215  ;;  %v4250_v27 = vsel %vm3991_vm4, %v17660_v59, -inf  ;;  %v14398_v59 = vpop.eup %11935 }
 0x35e   : > { %17657 = vst [vmem:[#allocation192_spill] sm:$0xff] %v14375_v19  ;;  %17664 = vst [vmem:[#allocation102_spill] sm:$0xff] %v14398_v59 }
 0x35f   : > { %4863 = vadd.xlane.f32.xlu0 %v4862_v31  ;;  %v4799_v31 = vsel %vm3991_vm4, %v14381_v21, 0.0 }
 0x360   : > { %v14385_v29 = vpop.xlane.xlu0 %4104  ;;  %4251 = vmax.xlane.f32.xlu1 %v4250_v27  ;;  %v17665_v27 = vld [vmem:[#allocation151_spill] sm:$0xff] }
 0x361   : > { %v14392_v7 = vpop.xlane.xlu1 %4101  ;;  %v4271_v45 = vsel %vm3991_vm4, %v17665_v27, -inf  ;;  %v14415_v27 = vpop.eup %11937 }
 0x362   : > { %17671 = vst [vmem:[#allocation195_spill] sm:$0xff] %v14415_v27 }
 0x363   : > { %4800 = vadd.xlane.f32.xlu0 %v4799_v31  ;;  %v4883_v31 = vsel %vm3991_vm4, %v14398_v59, 0.0  ;;  %v17675_v59 = vld [vmem:[#allocation106_spill] sm:$0xff] }
 0x364   : > { %v14402_v3 = vpop.xlane.xlu0 %4236  ;;  %4272 = vmax.xlane.f32.xlu1 %v4271_v45  ;;  %v17672_v45 = vld [vmem:[#allocation155_spill] sm:$0xff] }
 0x365   : > { %17666 = vst [vmem:[#allocation103_spill] sm:$0xff] %v14402_v3  ;;  %v14409_v35 = vpop.xlane.xlu1 %4233  ;;  %v4277_v42 = vsel %vm3991_vm4, %v17672_v45, -inf  ;;  %v14432_v45 = vpop.eup %11939  ;;  %v17693_v3 = vsub.f32 %v17589_v10, %v14166_v48 }
 0x366   : > { %17669 = vst [vmem:[#allocation194_spill] sm:$0xff] %v14409_v35  ;;  %17676 = vst [vmem:[#allocation104_spill] sm:$0xff] %v14432_v45 }
 0x367   : > { %4884 = vadd.xlane.f32.xlu0 %v4883_v31  ;;  %v4796_v31 = vsel %vm3991_vm4, %v14415_v27, 0.0  ;;  %v4540_v56 = vmul.f32 1.442695, %v17693_v3  ;;  %v17697_v3 = vsub.f32 %v17597_v1, %v14188_v26 }
 0x368   : > { %v14419_v57 = vpop.xlane.xlu0 %4110  ;;  %4278 = vmax.xlane.f32.xlu1 %v4277_v42  ;;  %v17677_v42 = vld [vmem:[#allocation159_spill] sm:$0xff] }
 0x369   : > { %v14426_v19 = vpop.xlane.xlu1 %4107  ;;  %v4295_v33 = vsel %vm3991_vm4, %v17677_v42, -inf  ;;  %v14449_v42 = vpop.eup %11941  ;;  %11951 = vpow2.f32 %v4540_v56  ;;  %v4546_v24 = vmul.f32 1.442695, %v17697_v3  ;;  %v17702_v56 = vld [vmem:[#allocation176_spill] sm:$0xff] }
 0x36a   : > { %17683 = vst [vmem:[#allocation197_spill] sm:$0xff] %v14449_v42  ;;  %v4343_v1 = vsel %vm3991_vm4, %v17702_v56, -inf  ;;  %v17731_v56 = vld [vmem:[#allocation131_spill] sm:$0xff] }
 0x36b   : > { %4797 = vadd.xlane.f32.xlu0 %v4796_v31  ;;  %v4805_v31 = vsel %vm3991_vm4, %v14432_v45, 0.0  ;;  %v17700_v45 = vld [vmem:[#allocation75_spill] sm:$0xff] }
 0x36c   : > { %v14436_v21 = vpop.xlane.xlu0 %4242  ;;  %4296 = vmax.xlane.f32.xlu1 %v4295_v33  ;;  %v17684_v33 = vld [vmem:[#allocation163_spill] sm:$0xff] }
 0x36d   : > { %17678 = vst [vmem:[#allocation106_spill] sm:$0xff] %v14436_v21  ;;  %v14443_v30 = vpop.xlane.xlu1 %4239  ;;  %v4301_v32 = vsel %vm3991_vm4, %v17684_v33, -inf  ;;  %v14466_v33 = vpop.eup %11943  ;;  %v17691_v21 = vld [vmem:[#allocation178_spill] sm:$0xff] }
 0x36e   : > { %17681 = vst [vmem:[#allocation196_spill] sm:$0xff] %v14443_v30  ;;  %17689 = vst [vmem:[#allocation198_spill] sm:$0xff] %v14466_v33  ;;  %v4377_v9 = vsub.f32 %v17692_v23, %v17691_v21  ;;  %v14485_v21 = vpop.eup %11945  ;;  %v17699_v30 = vld [vmem:[#allocation186_spill] sm:$0xff] }
 0x36f   : > { %4806 = vadd.xlane.f32.xlu0 %v4805_v31  ;;  %v4889_v31 = vsel %vm3991_vm4, %v14449_v42, 0.0  ;;  %17695 = vst [vmem:[#allocation178_spill] sm:$0xff] %v14485_v21 }
 0x370   : > { %v14453_v4 = vpop.xlane.xlu0 %4128  ;;  %4302 = vmax.xlane.f32.xlu1 %v4301_v32  ;;  %v17690_v32 = vld [vmem:[#allocation167_spill] sm:$0xff]  ;;  %v4506_v48 = vmul.f32 1.442695, %v4377_v9  ;;  %v4907_v9 = vsel %vm3991_vm4, %v14485_v21, 0.0 }
 0x371   : > { %v14460_v35 = vpop.xlane.xlu1 %4260  ;;  %v4319_v55 = vsel %vm3991_vm4, %v17690_v32, -inf  ;;  %v4802_v32 = vsel %vm3991_vm4, %v14466_v33, 0.0 }
 0x372   : > { %17687 = vst [vmem:[#allocation108_spill] sm:$0xff] %v14460_v35  ;;  %11953 = vpow2.f32 %v4506_v48 }
 0x373   : > { %4890 = vadd.xlane.f32.xlu0 %v4889_v31  ;;  %v17694_v31 = vld [vmem:[#allocation110_spill] sm:$0xff]  ;;  %11955 = vpow2.f32 %v4546_v24 }
 0x374   : > { %v14472_v16 = vpop.xlane.xlu0 %4134  ;;  %4320 = vmax.xlane.f32.xlu1 %v4319_v55  ;;  %v17696_v55 = vld [vmem:[#allocation171_spill] sm:$0xff] }
 0x375   : > { %v14479_v42 = vpop.xlane.xlu1 %4125  ;;  %v4325_v23 = vsel %vm3991_vm4, %v17696_v55, -inf }
 0x377   : > { %4803 = vadd.xlane.f32.xlu0 %v4802_v32  ;;  %v4379_v32 = vsub.f32 %v17700_v45, %v17699_v30  ;;  %v17703_v30 = vsub.f32 %v17600_v36, %v14202_v60  ;;  %v17708_v36 = vld [vmem:[#allocation180_spill] sm:$0xff] }
 0x378   : > { %v14489_v10 = vpop.xlane.xlu0 %4152  ;;  %4326 = vmax.xlane.f32.xlu1 %v4325_v23  ;;  %v14504_v23 = vpop.eup %11947  ;;  %v4349_v60 = vsel %vm3991_vm4, %v17708_v36, -inf }
 0x379   : > { %v14496_v35 = vpop.xlane.xlu1 %4257  ;;  %17701 = vst [vmem:[#allocation110_spill] sm:$0xff] %v14504_v23  ;;  %v4618_v45 = vmul.f32 1.442695, %v17703_v30  ;;  %v4510_v27 = vmul.f32 1.442695, %v4379_v32  ;;  %v14523_v24 = vpop.eup %11949  ;;  %v17709_v32 = vsub.f32 %v17598_v44, %v14194_v15 }
 0x37a   : > { %17698 = vst [vmem:[#allocation73_spill] sm:$0xff] %v14496_v35  ;;  %17707 = vst [vmem:[#allocation75_spill] sm:$0xff] %v14523_v24  ;;  %v4913_v36 = vsel %vm3991_vm4, %v14523_v24, 0.0  ;;  %v17722_v24 = vld [vmem:[#allocation81_spill] sm:$0xff]  ;;  %v17735_v35 = vld [vmem:[#allocation115_spill] sm:$0xff] }
 0x37b   : > { %4908 = vadd.xlane.f32.xlu0 %v4907_v9  ;;  %v17705_v9 = vld [vmem:[#allocation80_spill] sm:$0xff]  ;;  %v4544_v3 = vmul.f32 1.442695, %v17709_v32  ;;  %11957 = vpow2.f32 %v4618_v45  ;;  %v17713_v45 = vld [vmem:[#allocation123_spill] sm:$0xff] }
 0x37c   : > { %v14508_v26 = vpop.xlane.xlu0 %4158  ;;  %4344 = vmax.xlane.f32.xlu1 %v4343_v1  ;;  %v4385_v21 = vsub.f32 %v17705_v9, %v14044_v22  ;;  %v4808_v1 = vsel %vm3991_vm4, %v14504_v23, 0.0  ;;  %11959 = vpow2.f32 %v4510_v27  ;;  %v17712_v27 = vsub.f32 %v17605_v40, %v14218_v0  ;;  %v17718_v40 = vld [vmem:[#allocation184_spill] sm:$0xff] }
 0x37d   : > { %v14515_v55 = vpop.xlane.xlu1 %4266  ;;  %11961 = vpow2.f32 %v4544_v3 }
 0x37e   : > { %17704 = vst [vmem:[#allocation186_spill] sm:$0xff] %v14515_v55  ;;  %v4522_v48 = vmul.f32 1.442695, %v4385_v21  ;;  %v14540_v55 = vpop.eup %11951  ;;  %v4550_v21 = vmul.f32 1.442695, %v17712_v27  ;;  %v4373_v27 = vsel %vm3991_vm4, %v17718_v40, -inf }
 0x37f   : > { %4809 = vadd.xlane.f32.xlu0 %v4808_v1  ;;  %17710 = vst [vmem:[#allocation80_spill] sm:$0xff] %v14540_v55  ;;  %v14553_v1 = vpop.eup %11953  ;;  %v4814_v3 = vsel %vm3991_vm4, %v14540_v55, 0.0  ;;  %v17733_v40 = vld [vmem:[#allocation188_spill] sm:$0xff] }
 0x380   : > { %v14527_v30 = vpop.xlane.xlu0 %4176  ;;  %4350 = vmax.xlane.f32.xlu1 %v4349_v60  ;;  %v17711_v60 = vld [vmem:[#allocation182_spill] sm:$0xff]  ;;  %17715 = vst [vmem:[#allocation199_spill] sm:$0xff] %v14553_v1  ;;  %11963 = vpow2.f32 %v4522_v48  ;;  %v14562_v0 = vpop.eup %11955  ;;  %v17720_v48 = vld [vmem:[#allocation127_spill] sm:$0xff] }
 0x381   : > { %v14534_v9 = vpop.xlane.xlu1 %4131  ;;  %v4367_v15 = vsel %vm3991_vm4, %v17711_v60, -inf  ;;  %17717 = vst [vmem:[#allocation200_spill] sm:$0xff] %v14562_v0  ;;  %11965 = vpow2.f32 %v4550_v21  ;;  %v4823_v21 = vsel %vm3991_vm4, %v14562_v0, 0.0 }
 0x383   : > { %4914 = vadd.xlane.f32.xlu0 %v4913_v36  ;;  %v17716_v36 = vsub.f32 %v13672_v46, %v14050_v62  ;;  %v17719_v46 = vsub.f32 %v17611_v39, %v14232_v28  ;;  %v4763_v39 = vsel %vm3991_vm4, %v14553_v1, 0.0 }
 0x384   : > { %v14544_v44 = vpop.xlane.xlu0 %4182  ;;  %4368 = vmax.xlane.f32.xlu1 %v4367_v15 }
 0x385   : > { %v14551_v22 = vpop.xlane.xlu1 %4263  ;;  %v4570_v60 = vmul.f32 1.442695, %v17716_v36  ;;  %v4622_v62 = vmul.f32 1.442695, %v17719_v46  ;;  %v17742_v36 = vld [vmem:[#allocation189_spill] sm:$0xff] }
 0x386   : > { %17714 = vst [vmem:[#allocation123_spill] sm:$0xff] %v14551_v22  ;;  %v17723_v22 = vld [vmem:[#allocation187_spill] sm:$0xff] }
 0x387   : > { %4815 = vadd.xlane.f32.xlu0 %v4814_v3  ;;  %11967 = vpow2.f32 %v4570_v60  ;;  %v17724_v3 = vsub.f32 %v17722_v24, %v17723_v22  ;;  %v17728_v60 = vld [vmem:[#allocation89_spill] sm:$0xff] }
 0x388   : > { %v14566_v32 = vpop.xlane.xlu0 %4200  ;;  %4374 = vmax.xlane.f32.xlu1 %v4373_v27  ;;  %v14582_v27 = vpop.eup %11957  ;;  %v17729_v24 = vld [vmem:[#allocation77_spill] sm:$0xff]  ;;  %11969 = vpow2.f32 %v4622_v62 }
 0x389   : > { %v14573_v15 = vpop.xlane.xlu1 %4284  ;;  %v4526_v34 = vmul.f32 1.442695, %v17724_v3  ;;  %17726 = vst [vmem:[#allocation81_spill] sm:$0xff] %v14582_v27  ;;  %v14586_v28 = vpop.eup %11959  ;;  %v17730_v22 = vsub.f32 %v17728_v60, %v17729_v24 }
 0x38a   : > { %17721 = vst [vmem:[#allocation127_spill] sm:$0xff] %v14573_v15  ;;  %17727 = vst [vmem:[#allocation187_spill] sm:$0xff] %v14586_v28  ;;  %v14604_v0 = vpop.eup %11961  ;;  %v4769_v62 = vsel %vm3991_vm4, %v14586_v28, 0.0 }
 0x38b   : > { %4824 = vadd.xlane.f32.xlu0 %v4823_v21  ;;  %v4548_v3 = vmul.f32 1.442695, %v17730_v22  ;;  %11971 = vpow2.f32 %v4526_v34  ;;  %v17732_v21 = vld [vmem:[#allocation91_spill] sm:$0xff]  ;;  %17736 = vst [vmem:[#allocation89_spill] sm:$0xff] %v14604_v0  ;;  %v14608_v60 = vpop.eup %11963  ;;  %v17738_v34 = vsub.f32 %v17622_v43, %v14266_v6 }
 0x38c   : > { %v14588_v46 = vpop.xlane.xlu0 %4206  ;;  %4764 = vadd.xlane.f32.xlu1 %v4763_v39  ;;  %v17734_v55 = vsub.f32 %v17732_v21, %v17733_v40  ;;  %v4931_v39 = vsel %vm3991_vm4, %v14582_v27, 0.0  ;;  %17737 = vst [vmem:[#allocation77_spill] sm:$0xff] %v14608_v60  ;;  %v17739_v40 = vld [vmem:[#allocation135_spill] sm:$0xff]  ;;  %v4787_v6 = vsel %vm3991_vm4, %v14608_v60, 0.0 }
 0x38d   : > { %v14595_v15 = vpop.xlane.xlu1 %4149  ;;  %11973 = vpow2.f32 %v4548_v3  ;;  %v4820_v3 = vsel %vm3991_vm4, %v14604_v0, 0.0  ;;  %v17751_v22 = vld [vmem:[#allocation99_spill] sm:$0xff]  ;;  %v17760_v0 = vld [vmem:[#allocation190_spill] sm:$0xff] }
 0x38e   : > { %v4574_v23 = vmul.f32 1.442695, %v17734_v55  ;;  %v4634_v55 = vmul.f32 1.442695, %v17738_v34 }
 0x38f   : > { %4932 = vadd.xlane.f32.xlu0 %v4931_v39  ;;  %v17741_v39 = vld [vmem:[#allocation97_spill] sm:$0xff] }
 0x390   : > { %v14610_v24 = vpop.xlane.xlu0 %4224  ;;  %4770 = vadd.xlane.f32.xlu1 %v4769_v62  ;;  %11975 = vpow2.f32 %v4574_v23  ;;  %v17743_v54 = vsub.f32 %v17741_v39, %v17742_v36  ;;  %v14626_v62 = vpop.eup %11965  ;;  %v17748_v36 = vld [vmem:[#allocation139_spill] sm:$0xff] }
 0x391   : > { %v14617_v21 = vpop.xlane.xlu1 %4281  ;;  %17745 = vst [vmem:[#allocation91_spill] sm:$0xff] %v14626_v62  ;;  %v14630_v43 = vpop.eup %11967  ;;  %11977 = vpow2.f32 %v4634_v55 }
 0x392   : > { %17740 = vst [vmem:[#allocation131_spill] sm:$0xff] %v14617_v21  ;;  %v4584_v27 = vmul.f32 1.442695, %v17743_v54  ;;  %17746 = vst [vmem:[#allocation188_spill] sm:$0xff] %v14630_v43  ;;  %v17747_v54 = vsub.f32 %v17618_v14, %v14256_v11  ;;  %v14648_v33 = vpop.eup %11969  ;;  %v4859_v11 = vsel %vm3991_vm4, %v14630_v43, 0.0 }
 0x393   : > { %4821 = vadd.xlane.f32.xlu0 %v4820_v3  ;;  %v17750_v3 = vld [vmem:[#allocation101_spill] sm:$0xff]  ;;  %17754 = vst [vmem:[#allocation135_spill] sm:$0xff] %v14648_v33  ;;  %v4937_v60 = vsel %vm3991_vm4, %v14648_v33, 0.0 }
 0x394   : > { %v14632_v34 = vpop.xlane.xlu0 %4230  ;;  %4788 = vadd.xlane.f32.xlu1 %v4787_v6  ;;  %v4552_v23 = vmul.f32 1.442695, %v17747_v54  ;;  %11979 = vpow2.f32 %v4584_v27  ;;  %v17752_v21 = vsub.f32 %v17750_v3, %v17751_v22  ;;  %v4829_v6 = vsel %vm3991_vm4, %v14626_v62, 0.0 }
 0x395   : > { %v14639_v1 = vpop.xlane.xlu1 %4290  ;;  %v14652_v14 = vpop.eup %11971  ;;  %v17757_v27 = vsub.f32 %v17634_v53, %v14300_v20 }
 0x396   : > { %17749 = vst [vmem:[#allocation115_spill] sm:$0xff] %v14639_v1  ;;  %v4588_v28 = vmul.f32 1.442695, %v17752_v21  ;;  %17755 = vst [vmem:[#allocation97_spill] sm:$0xff] %v14652_v14  ;;  %11981 = vpow2.f32 %v4552_v23  ;;  %v17758_v21 = vld [vmem:[#allocation143_spill] sm:$0xff]  ;;  %v4793_v20 = vsel %vm3991_vm4, %v14652_v14, 0.0 }
 0x397   : > { %4830 = vadd.xlane.f32.xlu0 %v4829_v6  ;;  %v4638_v22 = vmul.f32 1.442695, %v17757_v27  ;;  %v17759_v6 = vld [vmem:[#allocation82_spill] sm:$0xff]  ;;  %v14668_v43 = vpop.eup %11973 }
 0x398   : > { %v14654_v55 = vpop.xlane.xlu0 %4248  ;;  %4860 = vadd.xlane.f32.xlu1 %v4859_v11  ;;  %11983 = vpow2.f32 %v4588_v28  ;;  %v17761_v39 = vsub.f32 %v17759_v6, %v17760_v0  ;;  %v17763_v28 = vsub.f32 %v17630_v12, %v14290_v51  ;;  %v17764_v0 = vld [vmem:[#allocation147_spill] sm:$0xff]  ;;  %v17776_v14 = vld [vmem:[#allocation74_spill] sm:$0xff] }
 0x399   : > { %17756 = vst [vmem:[#allocation189_spill] sm:$0xff] %v14654_v55  ;;  %v14661_v3 = vpop.xlane.xlu1 %4155  ;;  %11985 = vpow2.f32 %v4638_v22  ;;  %v17767_v6 = vld [vmem:[#allocation83_spill] sm:$0xff] }
 0x39a   : > { %v4538_v1 = vmul.f32 1.442695, %v17761_v39  ;;  %v14672_v53 = vpop.eup %11975  ;;  %v4556_v11 = vmul.f32 1.442695, %v17763_v28  ;;  %v17773_v28 = vld [vmem:[#allocation153_spill] sm:$0xff] }
 0x39b   : > { %4938 = vadd.xlane.f32.xlu0 %v4937_v60  ;;  %17762 = vst [vmem:[#allocation139_spill] sm:$0xff] %v14672_v53  ;;  %v17766_v60 = vld [vmem:[#allocation107_spill] sm:$0xff]  ;;  %v14690_v55 = vpop.eup %11977  ;;  %v4865_v12 = vsel %vm3991_vm4, %v14672_v53, 0.0 }
 0x39c   : > { %v14674_v23 = vpop.xlane.xlu0 %4254  ;;  %4794 = vadd.xlane.f32.xlu1 %v4793_v20  ;;  %11987 = vpow2.f32 %v4538_v1  ;;  %v17768_v54 = vsub.f32 %v17766_v60, %v17767_v6  ;;  %v4826_v20 = vsel %vm3991_vm4, %v14668_v43, 0.0  ;;  %17770 = vst [vmem:[#allocation99_spill] sm:$0xff] %v14690_v55  ;;  %v17772_v1 = vsub.f32 %v17639_v5, %v14317_v50  ;;  %v17785_v60 = vld [vmem:[#allocation105_spill] sm:$0xff] }
 0x39d   : > { %v14681_v27 = vpop.xlane.xlu1 %4287  ;;  %11989 = vpow2.f32 %v4556_v11  ;;  %v4955_v11 = vsel %vm3991_vm4, %v14690_v55, 0.0 }
 0x39e   : > { %17765 = vst [vmem:[#allocation101_spill] sm:$0xff] %v14681_v27  ;;  %v4600_v33 = vmul.f32 1.442695, %v17768_v54  ;;  %v14694_v51 = vpop.eup %11979  ;;  %v4562_v54 = vmul.f32 1.442695, %v17772_v1 }
 0x39f   : > { %4827 = vadd.xlane.f32.xlu0 %v4826_v20  ;;  %17771 = vst [vmem:[#allocation143_spill] sm:$0xff] %v14694_v51  ;;  %v17775_v20 = vld [vmem:[#allocation84_spill] sm:$0xff]  ;;  %v4880_v50 = vsel %vm3991_vm4, %v14694_v51, 0.0 }
 0x3a0   : > { %v14696_v22 = vpop.xlane.xlu0 %4269  ;;  %4866 = vadd.xlane.f32.xlu1 %v4865_v12  ;;  %11991 = vpow2.f32 %v4600_v33  ;;  %v17777_v39 = vsub.f32 %v17775_v20, %v17776_v14  ;;  %v14712_v12 = vpop.eup %11981  ;;  %v17782_v33 = vsub.f32 %v17644_v47, %v14334_v25 }
 0x3a1   : > { %v14703_v6 = vpop.xlane.xlu1 %4308  ;;  %17779 = vst [vmem:[#allocation190_spill] sm:$0xff] %v14712_v12  ;;  %11993 = vpow2.f32 %v4562_v54  ;;  %v4832_v62 = vsel %vm3991_vm4, %v14712_v12, 0.0 }
 0x3a2   : > { %17774 = vst [vmem:[#allocation82_spill] sm:$0xff] %v14703_v6  ;;  %v4542_v27 = vmul.f32 1.442695, %v17777_v39  ;;  %v14716_v5 = vpop.eup %11983  ;;  %v4650_v14 = vmul.f32 1.442695, %v17782_v33  ;;  %v17802_v39 = vld [vmem:[#allocation78_spill] sm:$0xff] }
 0x3a3   : > { %4956 = vadd.xlane.f32.xlu0 %v4955_v11  ;;  %17780 = vst [vmem:[#allocation147_spill] sm:$0xff] %v14716_v5  ;;  %v17784_v11 = vld [vmem:[#allocation111_spill] sm:$0xff]  ;;  %v14732_v51 = vpop.eup %11985  ;;  %v4886_v25 = vsel %vm3991_vm4, %v14716_v5, 0.0 }
 0x3a4   : > { %v14718_v1 = vpop.xlane.xlu0 %4275  ;;  %4881 = vadd.xlane.f32.xlu1 %v4880_v50  ;;  %11995 = vpow2.f32 %v4542_v27  ;;  %v17786_v55 = vsub.f32 %v17784_v11, %v17785_v60  ;;  %17787 = vst [vmem:[#allocation83_spill] sm:$0xff] %v14732_v51  ;;  %v17789_v27 = vsub.f32 %v17640_v63, %v14324_v17  ;;  %v17793_v11 = vld [vmem:[#allocation76_spill] sm:$0xff] }
 0x3a5   : > { %17781 = vst [vmem:[#allocation107_spill] sm:$0xff] %v14718_v1  ;;  %v14725_v53 = vpop.xlane.xlu1 %4173  ;;  %11997 = vpow2.f32 %v4650_v14  ;;  %v17895_v1 = vld [vmem:[#allocation141_spill] sm:$0xff] }
 0x3a6   : > { %v4604_v6 = vmul.f32 1.442695, %v17786_v55  ;;  %v14736_v47 = vpop.eup %11987  ;;  %v4560_v50 = vmul.f32 1.442695, %v17789_v27 }
 0x3a7   : > { %4833 = vadd.xlane.f32.xlu0 %v4832_v62  ;;  %v17792_v62 = vld [vmem:[#allocation113_spill] sm:$0xff]  ;;  %v14754_v12 = vpop.eup %11989  ;;  %v4811_v17 = vsel %vm3991_vm4, %v14736_v47, 0.0 }
 0x3a8   : > { %v14738_v54 = vpop.xlane.xlu0 %4293  ;;  %4887 = vadd.xlane.f32.xlu1 %v4886_v25  ;;  %11999 = vpow2.f32 %v4604_v6  ;;  %v17794_v20 = vsub.f32 %v17792_v62, %v17793_v11  ;;  %v4961_v25 = vsel %vm3991_vm4, %v14732_v51, 0.0  ;;  %v17798_v6 = vsub.f32 %v17649_v49, %v14351_v13 }
 0x3a9   : > { %17788 = vst [vmem:[#allocation153_spill] sm:$0xff] %v14738_v54  ;;  %v14745_v33 = vpop.xlane.xlu1 %4305  ;;  %12001 = vpow2.f32 %v4560_v50  ;;  %v4838_v50 = vsel %vm3991_vm4, %v14754_v12, 0.0 }
 0x3aa   : > { %17791 = vst [vmem:[#allocation84_spill] sm:$0xff] %v14745_v33  ;;  %v4616_v5 = vmul.f32 1.442695, %v17794_v20  ;;  %v14758_v63 = vpop.eup %11991  ;;  %v4566_v20 = vmul.f32 1.442695, %v17798_v6  ;;  %v17811_v33 = vld [vmem:[#allocation87_spill] sm:$0xff] }
 0x3ab   : > { %4962 = vadd.xlane.f32.xlu0 %v4961_v25  ;;  %17796 = vst [vmem:[#allocation74_spill] sm:$0xff] %v14758_v63  ;;  %v17801_v25 = vld [vmem:[#allocation116_spill] sm:$0xff]  ;;  %v4904_v13 = vsel %vm3991_vm4, %v14758_v63, 0.0  ;;  %v17827_v63 = vld [vmem:[#allocation114_spill] sm:$0xff] }
 0x3ac   : > { %v14760_v14 = vpop.xlane.xlu0 %4299  ;;  %4812 = vadd.xlane.f32.xlu1 %v4811_v17  ;;  %12003 = vpow2.f32 %v4616_v5  ;;  %v17803_v60 = vsub.f32 %v17801_v25, %v17802_v39  ;;  %v14776_v17 = vpop.eup %11993  ;;  %v17806_v5 = vld [vmem:[#allocation100_spill] sm:$0xff] }
 0x3ad   : > { %17797 = vst [vmem:[#allocation111_spill] sm:$0xff] %v14760_v14  ;;  %v14767_v11 = vpop.xlane.xlu1 %4314  ;;  %12005 = vpow2.f32 %v4566_v20  ;;  %v17807_v39 = vld [vmem:[#allocation124_spill] sm:$0xff]  ;;  %v4847_v54 = vsel %vm3991_vm4, %v14776_v17, 0.0 }
 0x3ae   : > { %17800 = vst [vmem:[#allocation105_spill] sm:$0xff] %v14767_v11  ;;  %v4620_v51 = vmul.f32 1.442695, %v17803_v60  ;;  %v14780_v49 = vpop.eup %11995  ;;  %v17808_v60 = vsub.f32 %v17806_v5, %v17807_v39 }
 0x3af   : > { %4839 = vadd.xlane.f32.xlu0 %v4838_v50  ;;  %v17810_v50 = vld [vmem:[#allocation90_spill] sm:$0xff]  ;;  %v14796_v55 = vpop.eup %11997  ;;  %v4817_v20 = vsel %vm3991_vm4, %v14780_v49, 0.0 }
 0x3b0   : > { %v14782_v6 = vpop.xlane.xlu0 %4317  ;;  %4905 = vadd.xlane.f32.xlu1 %v4904_v13  ;;  %v4564_v25 = vmul.f32 1.442695, %v17808_v60  ;;  %12007 = vpow2.f32 %v4620_v51  ;;  %v17812_v14 = vsub.f32 %v17810_v50, %v17811_v33  ;;  %17813 = vst [vmem:[#allocation76_spill] sm:$0xff] %v14796_v55  ;;  %v17815_v51 = vsub.f32 %v17662_v8, %v14385_v29  ;;  %v17819_v50 = vld [vmem:[#allocation112_spill] sm:$0xff] }
 0x3b1   : > { %17805 = vst [vmem:[#allocation113_spill] sm:$0xff] %v14782_v6  ;;  %v14789_v11 = vpop.xlane.xlu1 %4179 }
 0x3b2   : > { %v4554_v27 = vmul.f32 1.442695, %v17812_v14  ;;  %v14800_v13 = vpop.eup %11999  ;;  %12009 = vpow2.f32 %v4564_v25  ;;  %v4578_v33 = vmul.f32 1.442695, %v17815_v51  ;;  %v4979_v25 = vsel %vm3991_vm4, %v14796_v55, 0.0 }
 0x3b3   : > { %4848 = vadd.xlane.f32.xlu0 %v4847_v54  ;;  %v17818_v54 = vld [vmem:[#allocation119_spill] sm:$0xff]  ;;  %v4910_v29 = vsel %vm3991_vm4, %v14800_v13, 0.0 }
 0x3b4   : > { %v14802_v5 = vpop.xlane.xlu0 %4323  ;;  %4818 = vadd.xlane.f32.xlu1 %v4817_v20  ;;  %12011 = vpow2.f32 %v4554_v27  ;;  %v17820_v62 = vsub.f32 %v17818_v54, %v17819_v50  ;;  %v14818_v20 = vpop.eup %12001  ;;  %v17823_v27 = vsub.f32 %v17663_v52, %v14392_v7 }
 0x3b5   : > { %17814 = vst [vmem:[#allocation116_spill] sm:$0xff] %v14802_v5  ;;  %v14809_v60 = vpop.xlane.xlu1 %4311  ;;  %12013 = vpow2.f32 %v4578_v33  ;;  %v4844_v33 = vsel %vm3991_vm4, %v14818_v20, 0.0 }
 0x3b6   : > { %17817 = vst [vmem:[#allocation78_spill] sm:$0xff] %v14809_v60  ;;  %v4632_v6 = vmul.f32 1.442695, %v17820_v62  ;;  %v14822_v8 = vpop.eup %12003  ;;  %v4576_v62 = vmul.f32 1.442695, %v17823_v27  ;;  %v17835_v60 = vld [vmem:[#allocation117_spill] sm:$0xff] }
 0x3b7   : > { %4980 = vadd.xlane.f32.xlu0 %v4979_v25  ;;  %v17826_v25 = vld [vmem:[#allocation93_spill] sm:$0xff]  ;;  %v4928_v52 = vsel %vm3991_vm4, %v14822_v8, 0.0 }
 0x3b8   : > { %v14824_v51 = vpop.xlane.xlu0 %4341  ;;  %4911 = vadd.xlane.f32.xlu1 %v4910_v29  ;;  %12015 = vpow2.f32 %v4632_v6  ;;  %v17828_v55 = vsub.f32 %v17826_v25, %v17827_v63  ;;  %v14840_v29 = vpop.eup %12005  ;;  %v17831_v6 = vsub.f32 %v17674_v18, %v14419_v57 }
 0x3b9   : > { %17822 = vst [vmem:[#allocation100_spill] sm:$0xff] %v14824_v51  ;;  %v14831_v39 = vpop.xlane.xlu1 %4332  ;;  %12017 = vpow2.f32 %v4576_v62  ;;  %v17837_v62 = vsub.f32 %v17675_v59, %v14426_v19 }
 0x3ba   : > { %17825 = vst [vmem:[#allocation124_spill] sm:$0xff] %v14831_v39  ;;  %v4558_v5 = vmul.f32 1.442695, %v17828_v55  ;;  %v14844_v7 = vpop.eup %12007  ;;  %v4582_v27 = vmul.f32 1.442695, %v17831_v6  ;;  %v4853_v39 = vsel %vm3991_vm4, %v14840_v29, 0.0 }
 0x3bb   : > { %4845 = vadd.xlane.f32.xlu0 %v4844_v33  ;;  %17830 = vst [vmem:[#allocation90_spill] sm:$0xff] %v14844_v7  ;;  %v17834_v33 = vld [vmem:[#allocation122_spill] sm:$0xff]  ;;  %v4934_v57 = vsel %vm3991_vm4, %v14844_v7, 0.0 }
 0x3bc   : > { %v14849_v63 = vpop.xlane.xlu0 %4347  ;;  %4929 = vadd.xlane.f32.xlu1 %v4928_v52  ;;  %12019 = vpow2.f32 %v4558_v5  ;;  %v17836_v51 = vsub.f32 %v17834_v33, %v17835_v60  ;;  %v14860_v14 = vpop.eup %12009  ;;  %v4580_v5 = vmul.f32 1.442695, %v17837_v62  ;;  %v17842_v33 = vld [vmem:[#allocation95_spill] sm:$0xff]  ;;  %v17892_v60 = vld [vmem:[#allocation130_spill] sm:$0xff] }
 0x3bd   : > { %17832 = vst [vmem:[#allocation87_spill] sm:$0xff] %v14849_v63  ;;  %v14853_v50 = vpop.xlane.xlu1 %4197  ;;  %12021 = vpow2.f32 %v4582_v27  ;;  %v4850_v19 = vsel %vm3991_vm4, %v14860_v14, 0.0 }
 0x3be   : > { %v4636_v54 = vmul.f32 1.442695, %v17836_v51  ;;  %v14864_v18 = vpop.eup %12011 }
 0x3bf   : > { %4854 = vadd.xlane.f32.xlu0 %v4853_v39  ;;  %v17841_v39 = vld [vmem:[#allocation126_spill] sm:$0xff]  ;;  %v14882_v59 = vpop.eup %12013 }
 0x3c0   : > { %v14869_v52 = vpop.xlane.xlu0 %4365  ;;  %4935 = vadd.xlane.f32.xlu1 %v4934_v57  ;;  %12023 = vpow2.f32 %v4636_v54  ;;  %v17843_v25 = vsub.f32 %v17841_v39, %v17842_v33  ;;  %v4835_v57 = vsel %vm3991_vm4, %v14864_v18, 0.0  ;;  %v17846_v54 = vsub.f32 %v17686_v2, %v14453_v4 }
 0x3c1   : > { %17838 = vst [vmem:[#allocation119_spill] sm:$0xff] %v14869_v52  ;;  %v14873_v6 = vpop.xlane.xlu1 %4329  ;;  %12025 = vpow2.f32 %v4580_v5  ;;  %v4871_v4 = vsel %vm3991_vm4, %v14882_v59, 0.0 }
 0x3c2   : > { %17840 = vst [vmem:[#allocation112_spill] sm:$0xff] %v14873_v6  ;;  %v4648_v63 = vmul.f32 1.442695, %v17843_v25  ;;  %v14886_v62 = vpop.eup %12015  ;;  %v4594_v39 = vmul.f32 1.442695, %v17846_v54 }
 0x3c3   : > { %4851 = vadd.xlane.f32.xlu0 %v4850_v19  ;;  %17845 = vst [vmem:[#allocation93_spill] sm:$0xff] %v14886_v62  ;;  %v17850_v19 = vsub.f32 %v17694_v31, %v14479_v42  ;;  %v14904_v2 = vpop.eup %12017  ;;  %v17852_v42 = vsub.f32 %v13758_v41, %v14472_v16  ;;  %v17855_v16 = vsub.f32 %v13770_v61, %v14489_v10 }
 0x3c4   : > { %4836 = vadd.xlane.f32.xlu1 %v4835_v57  ;;  %v14891_v25 = vpop.xlane.xlu0 %4371  ;;  %12027 = vpow2.f32 %v4648_v63  ;;  %v4952_v57 = vsel %vm3991_vm4, %v14886_v62, 0.0  ;;  %v17860_v61 = vsub.f32 %v13782_v38, %v14508_v26  ;;  %v17863_v38 = vld [vmem:[#allocation121_spill] sm:$0xff] }
 0x3c5   : > { %17847 = vst [vmem:[#allocation114_spill] sm:$0xff] %v14891_v25  ;;  %v14895_v27 = vpop.xlane.xlu1 %4338  ;;  %v4592_v52 = vmul.f32 1.442695, %v17850_v19  ;;  %12029 = vpow2.f32 %v4594_v39  ;;  %v4598_v31 = vmul.f32 1.442695, %v17852_v42  ;;  %v4868_v25 = vsel %vm3991_vm4, %v14904_v2, 0.0 }
 0x3c6   : > { %17849 = vst [vmem:[#allocation122_spill] sm:$0xff] %v14895_v27  ;;  %v14908_v54 = vpop.eup %12019  ;;  %v4614_v10 = vmul.f32 1.442695, %v17860_v61  ;;  %v4436_v26 = vsub.f32 %v17863_v38, %v14725_v53  ;;  %v17866_v38 = vld [vmem:[#allocation125_spill] sm:$0xff] }
 0x3c7   : > { %4872 = vadd.xlane.f32.xlu0 %v4871_v4  ;;  %v14915_v51 = vpop.eup %12021  ;;  %12031 = vpow2.f32 %v4592_v52  ;;  %v17853_v4 = vsub.f32 %v13762_v58, %v14534_v9  ;;  %v4841_v39 = vsel %vm3991_vm4, %v14908_v54, 0.0  ;;  %v4610_v52 = vmul.f32 1.442695, %v17855_v16 }
 0x3c8   : > { %4953 = vadd.xlane.f32.xlu1 %v4952_v57  ;;  %v4762_v63 = vpop.xlane.xlu0 %4761  ;;  %v4877_v9 = vsel %vm3991_vm4, %v14915_v51, 0.0 }
 0x3c9   : > { %v14913_v19 = vpop.xlane.xlu1 %4203  ;;  %v4596_v5 = vmul.f32 1.442695, %v17853_v4  ;;  %12033 = vrcp.f32 %v4762_v63  ;;  %v17858_v4 = vld [vmem:[#allocation118_spill] sm:$0xff] }
 0x3ca   : > { %v14924_v57 = vpop.eup %12023  ;;  %12035 = vpow2.f32 %v4598_v31 }
 0x3cb   : > { %4869 = vadd.xlane.f32.xlu0 %v4868_v25  ;;  %17854 = vst [vmem:[#allocation117_spill] sm:$0xff] %v14924_v57  ;;  %v14935_v63 = vpop.eup %12025  ;;  %12037 = vpow2.f32 %v4596_v5  ;;  %v17857_v25 = vsub.f32 %v17735_v35, %v14595_v15  ;;  %v4958_v16 = vsel %vm3991_vm4, %v14924_v57, 0.0 }
 0x3cc   : > { %4842 = vadd.xlane.f32.xlu1 %v4841_v39  ;;  %v14926_v41 = vpop.xlane.xlu0 %4767  ;;  %v4430_v39 = vsub.f32 %v17858_v4, %v14661_v3  ;;  %12039 = vpow2.f32 %v4610_v52  ;;  %v4874_v15 = vsel %vm3991_vm4, %v14935_v63, 0.0  ;;  %v4438_v4 = vsub.f32 %v17866_v38, %v14789_v11 }
 0x3cd   : > { %v14931_v58 = vpop.xlane.xlu1 %4335  ;;  %v4608_v42 = vmul.f32 1.442695, %v17857_v25 }
 0x3ce   : > { %17856 = vst [vmem:[#allocation126_spill] sm:$0xff] %v14931_v58  ;;  %v14949_v27 = vpop.eup %12027  ;;  %v4612_v25 = vmul.f32 1.442695, %v4430_v39 }
 0x3cf   : > { %4878 = vadd.xlane.f32.xlu0 %v4877_v9  ;;  %17861 = vst [vmem:[#allocation95_spill] sm:$0xff] %v14949_v27  ;;  %v14955_v3 = vpop.eup %12029  ;;  %12041 = vpow2.f32 %v4608_v42  ;;  %v4976_v52 = vsel %vm3991_vm4, %v14949_v27, 0.0  ;;  %v17865_v42 = vsub.f32 %v13794_v37, %v14527_v30  ;;  %v17868_v9 = vsub.f32 %v17713_v45, %v14544_v44 }
 0x3d0   : > { %4959 = vadd.xlane.f32.xlu1 %v4958_v16  ;;  %v4777_v5 = vpop.xlane.xlu0 %4776  ;;  %12043 = vpow2.f32 %v4614_v10  ;;  %v4895_v10 = vsel %vm3991_vm4, %v14955_v3, 0.0 }
 0x3d1   : > { %v14951_v35 = vpop.xlane.xlu1 %4356  ;;  %v14963_v61 = vpop.eup %12031  ;;  %12045 = vrcp.f32 %v4777_v5  ;;  %v4626_v39 = vmul.f32 1.442695, %v17865_v42  ;;  %v4630_v37 = vmul.f32 1.442695, %v17868_v9 }
 0x3d2   : > { %17862 = vst [vmem:[#allocation118_spill] sm:$0xff] %v14951_v35  ;;  %v17867_v35 = vld [vmem:[#allocation85_spill] sm:$0xff]  ;;  %v4892_v30 = vsel %vm3991_vm4, %v14963_v61, 0.0 }
 0x3d3   : > { %4875 = vadd.xlane.f32.xlu0 %v4874_v15  ;;  %v12034_v33 = vpop.eup %12033  ;;  %v4624_v15 = vmul.f32 1.442695, %v4436_v26 }
 0x3d4   : > { %4977 = vadd.xlane.f32.xlu1 %v4976_v52  ;;  %v4774_v16 = vpop.xlane.xlu0 %4773  ;;  %v5145_v5 = vmul.f32 %v12034_v33, %v17867_v35  ;;  %v14975_v52 = vpop.eup %12035  ;;  %v4628_v33 = vmul.f32 1.442695, %v4438_v4  ;;  %v17870_v35 = vld [vmem:[#allocation129_spill] sm:$0xff] }
 0x3d5   : > { %12047 = vrcp.f32 %v4774_v16  ;;  %v14968_v53 = vpop.xlane.xlu1 %4221  ;;  %v14982_v16 = vpop.eup %12037  ;;  %v4444_v26 = vsub.f32 %v17870_v35, %v14853_v50  ;;  %v4901_v44 = vsel %vm3991_vm4, %v14975_v52, 0.0  ;;  %v17872_v50 = vsub.f32 %v17720_v48, %v14566_v32  ;;  %v17875_v48 = vld [vmem:[#allocation79_spill] sm:$0xff] }
 0x3d6   : > { %12049 = vpow2.f32 %v4612_v25  ;;  %11516 = vmatprep.mubr.msk.f32.mxu0 %vm3991_vm4, %v5145_v5  ;;  %v14991_v45 = vpop.eup %12039  ;;  %v4898_v9 = vsel %vm3991_vm4, %v14982_v16, 0.0 }
 0x3d7   : > { %4896 = vadd.xlane.f32.xlu0 %v4895_v10  ;;  %12051 = vpow2.f32 %v4626_v39  ;;  %v4642_v4 = vmul.f32 1.442695, %v17872_v50  ;;  %v4640_v5 = vmul.f32 1.442695, %v4444_v26  ;;  %v17877_v26 = vld [vmem:[#allocation86_spill] sm:$0xff] }
 0x3d8   : > { %4893 = vadd.xlane.f32.xlu1 %v4892_v30  ;;  %v4783_v25 = vpop.xlane.xlu0 %4782  ;;  %12053 = vpow2.f32 %v4624_v15 }
 0x3d9   : > { %v14985_v11 = vpop.xlane.xlu1 %4353  ;;  %12055 = vpow2.f32 %v4630_v37  ;;  %v14995_v42 = vpop.eup %12041  ;;  %v17874_v37 = vld [vmem:[#allocation133_spill] sm:$0xff] }
 0x3da   : > { %17869 = vst [vmem:[#allocation121_spill] sm:$0xff] %v14985_v11  ;;  %12057 = vrcp.f32 %v4783_v25  ;;  %v14997_v10 = vpop.eup %12043  ;;  %v4446_v30 = vsub.f32 %v17874_v37, %v14913_v19  ;;  %v4919_v25 = vsel %vm3991_vm4, %v14991_v45, 0.0 }
 0x3db   : > { %4902 = vadd.xlane.f32.xlu0 %v4901_v44  ;;  %17871 = vst [vmem:[#allocation125_spill] sm:$0xff] %v14997_v10  ;;  %v12046_v38 = vpop.eup %12045  ;;  %v4916_v44 = vsel %vm3991_vm4, %v14995_v42, 0.0 }
 0x3dc   : > { %4899 = vadd.xlane.f32.xlu1 %v4898_v9  ;;  %v4780_v39 = vpop.xlane.xlu0 %4779  ;;  %v5155_v50 = vmul.f32 %v12046_v38, %v17877_v26 }
 0x3dd   : > { %12059 = vrcp.f32 %v4780_v39  ;;  %v15002_v15 = vpop.xlane.xlu1 %4362 }
 0x3de   : > { %17873 = vst [vmem:[#allocation85_spill] sm:$0xff] %v15002_v15  ;;  %12061 = vpow2.f32 %v4628_v33  ;;  %v17876_v33 = vsub.f32 %v17731_v56, %v14588_v46  ;;  %v17878_v15 = vld [vmem:[#allocation137_spill] sm:$0xff] }
 0x3df   : > { %v12048_v35 = vpop.eup %12047  ;;  %4920 = vadd.xlane.f32.xlu0 %v4919_v25  ;;  %12063 = vpow2.f32 %v4642_v4  ;;  %v4644_v25 = vmul.f32 1.442695, %v4446_v30  ;;  %v4452_v11 = vsub.f32 %v17878_v15, %v14968_v53  ;;  %v17881_v4 = vld [vmem:[#allocation61_spill] sm:$0xff]  ;;  %v17883_v15 = vsub.f32 %v17739_v40, %v14610_v24  ;;  %v17884_v30 = vld [vmem:[#allocation63_spill] sm:$0xff]  ;;  %v17887_v40 = vld [vmem:[#allocation92_spill] sm:$0xff] }
 0x3e0   : > { %v15010_v9 = vpop.eup %12049  ;;  %4917 = vadd.xlane.f32.xlu1 %v4916_v44  ;;  %v15012_v32 = vpop.xlane.xlu0 %4785  ;;  %v5153_v39 = vmul.f32 %v12048_v35, %v17875_v48  ;;  %v4646_v19 = vmul.f32 1.442695, %v17876_v33  ;;  %12065 = vpow2.f32 %v4640_v5  ;;  %v4925_v44 = vsel %vm3991_vm4, %v14997_v10, 0.0 }
 0x3e1   : > { %v4228_v37 = vpop.xlane.xlu1 %4227  ;;  %v15024_v58 = vpop.eup %12051  ;;  %v4922_v56 = vsel %vm3991_vm4, %v15010_v9, 0.0  ;;  %v4658_v5 = vmul.f32 1.442695, %v17883_v15 }
 0x3e2   : > { %11524 = vmatprep.mubr.msk.f32.mxu1 %vm3991_vm4, %v5153_v39  ;;  %17879 = vst [vmem:[#allocation129_spill] sm:$0xff] %v15024_v58  ;;  %v15029_v46 = vpop.eup %12053  ;;  %12067 = vpow2.f32 %v4646_v19  ;;  %v4656_v39 = vmul.f32 1.442695, %v4452_v11  ;;  %v4943_v33 = vsel %vm3991_vm4, %v15024_v58, 0.0  ;;  %v4454_v27 = vsub.f32 %v17895_v1, %v4228_v37 }
 0x3e3   : > { %4926 = vadd.xlane.f32.xlu0 %v4925_v44  ;;  %11525 = vmatmul.mubr.msk.f32.vlgmr.msra.gmra.mrb[92].mxu1 %vm3991_vm4, %v5155_v50  ;;  %17880 = vst [vmem:[#allocation133_spill] sm:$0xff] %v15029_v46  ;;  %v15034_v53 = vpop.eup %12055  ;;  %12069 = vpow2.f32 %v4644_v25  ;;  %v4940_v50 = vsel %vm3991_vm4, %v15029_v46, 0.0  ;;  %v17898_v1 = vsub.f32 %v17748_v36, %v14632_v34  ;;  %v17902_v34 = vld [vmem:[#allocation103_spill] sm:$0xff] }
 0x3e4   : > { %11539 = vmatpush3.msra.mxu1 %v17881_v4  ;;  %4923 = vadd.xlane.f32.xlu1 %v4922_v56  ;;  %v15032_v38 = vpop.xlane.xlu0 %4857  ;;  %17882 = vst [vmem:[#allocation79_spill] sm:$0xff] %v15034_v53  ;;  %v12058_v48 = vpop.eup %12057  ;;  %v17888_v56 = vld [vmem:[#allocation128_spill] sm:$0xff]  ;;  %v17889_v4 = vld [vmem:[#allocation191_spill] sm:$0xff]  ;;  %12071 = vpow2.f32 %v4658_v5 }
 0x3e5   : > { %11554 = vmatprep.subr.mxu1 %v17884_v30  ;;  %v15040_v35 = vpop.xlane.xlu1 %4359  ;;  %v17890_v15 = vsub.f32 %v17888_v56, %v17889_v4  ;;  %12073 = vpow2.f32 %v4656_v39  ;;  %v17901_v4 = vld [vmem:[#allocation132_spill] sm:$0xff] }
 0x3e6   : > { %17885 = vst [vmem:[#allocation86_spill] sm:$0xff] %v15040_v35  ;;  %v17891_v35 = vld [vmem:[#allocation88_spill] sm:$0xff]  ;;  %v17903_v36 = vsub.f32 %v17901_v4, %v17902_v34 }
 0x3e7   : > { %v12060_v26 = vpop.eup %12059  ;;  %4944 = vadd.xlane.f32.xlu0 %v4943_v33  ;;  %v4654_v25 = vmul.f32 1.442695, %v17890_v15  ;;  %v5159_v31 = vmul.f32 %v12058_v48, %v17891_v35  ;;  %v17893_v33 = vld [vmem:[#allocation192_spill] sm:$0xff]  ;;  %v4660_v48 = vmul.f32 1.442695, %v4454_v27  ;;  %v17904_v27 = vld [vmem:[#allocation134_spill] sm:$0xff] }
 0x3e8   : > { %v15046_v19 = vpop.eup %12061  ;;  %4941 = vadd.xlane.f32.xlu1 %v4940_v50  ;;  %v15048_v24 = vpop.xlane.xlu0 %4791  ;;  %v5157_v44 = vmul.f32 %v12060_v26, %v17887_v40  ;;  %v17894_v6 = vsub.f32 %v17892_v60, %v17893_v33  ;;  %v4949_v26 = vsel %vm3991_vm4, %v15034_v53, 0.0  ;;  %v4666_v15 = vmul.f32 1.442695, %v17903_v36  ;;  %v17940_v53 = vld [vmem:[#allocation136_spill] sm:$0xff] }
 0x3e9   : > { %17886 = vst [vmem:[#allocation137_spill] sm:$0xff] %v15046_v19  ;;  %v4246_v11 = vpop.xlane.xlu1 %4245  ;;  %v15062_v50 = vpop.eup %12063  ;;  %v4946_v5 = vsel %vm3991_vm4, %v15046_v19, 0.0  ;;  %12075 = vpow2.f32 %v4654_v25  ;;  %v17905_v25 = vld [vmem:[#allocation194_spill] sm:$0xff]  ;;  %v17945_v19 = vld [vmem:[#allocation196_spill] sm:$0xff] }
 0x3ea   : > { %v4652_v55 = vmul.f32 1.442695, %v17894_v6  ;;  %11527 = vmatprep.mubr.msk.f32.mxu1 %vm3991_vm4, %v5157_v44  ;;  %17896 = vst [vmem:[#allocation61_spill] sm:$0xff] %v15062_v50  ;;  %v15067_v35 = vpop.eup %12065  ;;  %v4662_v6 = vmul.f32 1.442695, %v17898_v1  ;;  %v17906_v33 = vsub.f32 %v17904_v27, %v17905_v25 }
 0x3eb   : > { %4950 = vadd.xlane.f32.xlu0 %v4949_v26  ;;  %11528 = vmatmul.mubr.msk.f32.gmra.mrb[94].mxu1 %vm3991_vm4, %v5159_v31  ;;  %17897 = vst [vmem:[#allocation63_spill] sm:$0xff] %v15067_v35  ;;  %v4967_v31 = vsel %vm3991_vm4, %v15062_v50, 0.0  ;;  %v4964_v40 = vsel %vm3991_vm4, %v15067_v35, 0.0 }
 0x3ec   : > { %4947 = vadd.xlane.f32.xlu1 %v4946_v5  ;;  %v15069_v60 = vpop.xlane.xlu0 %4863  ;;  %12077 = vpow2.f32 %v4652_v55  ;;  %v15078_v39 = vpop.eup %12067  ;;  %v4664_v26 = vmul.f32 1.442695, %v17906_v33  ;;  %v17907_v5 = vld [vmem:[#allocation145_spill] sm:$0xff] }
 0x3ed   : > { %v15074_v37 = vpop.xlane.xlu1 %4251  ;;  %17899 = vst [vmem:[#allocation92_spill] sm:$0xff] %v15078_v39  ;;  %v15082_v44 = vpop.eup %12069  ;;  %12079 = vpow2.f32 %v4662_v6  ;;  %v4460_v1 = vsub.f32 %v17907_v5, %v4246_v11 }
 0x3ee   : > { %17900 = vst [vmem:[#allocation128_spill] sm:$0xff] %v15082_v44  ;;  %12081 = vpow2.f32 %v4660_v48  ;;  %v15095_v57 = vpop.eup %12071  ;;  %v4970_v6 = vsel %vm3991_vm4, %v15082_v44, 0.0 }
 0x3ef   : > { %4968 = vadd.xlane.f32.xlu0 %v4967_v31  ;;  %v4973_v31 = vsel %vm3991_vm4, %v15078_v39, 0.0  ;;  %17908 = vst [vmem:[#allocation191_spill] sm:$0xff] %v15095_v57  ;;  %v15102_v34 = vpop.eup %12073  ;;  %12083 = vpow2.f32 %v4666_v15  ;;  %v4672_v48 = vmul.f32 1.442695, %v4460_v1  ;;  %v4991_v27 = vsel %vm3991_vm4, %v15095_v57, 0.0 }
 0x3f0   : > { %4965 = vadd.xlane.f32.xlu1 %v4964_v40  ;;  %v4801_v56 = vpop.xlane.xlu0 %4800  ;;  %v17909_v40 = vld [vmem:[#allocation189_spill] sm:$0xff]  ;;  %17911 = vst [vmem:[#allocation88_spill] sm:$0xff] %v15102_v34  ;;  %12085 = vpow2.f32 %v4664_v26 }
 0x3f1   : > { %v15087_v55 = vpop.xlane.xlu1 %4272  ;;  %v17910_v50 = vsub.f32 %v17758_v21, %v17909_v40  ;;  %v4988_v21 = vsel %vm3991_vm4, %v15102_v34, 0.0  ;;  %v17923_v34 = vld [vmem:[#allocation193_spill] sm:$0xff] }
 0x3f3   : > { %v4674_v4 = vmul.f32 1.442695, %v17910_v50  ;;  %4974 = vadd.xlane.f32.xlu0 %v4973_v31  ;;  %v15110_v25 = vpop.eup %12075 }
 0x3f4   : > { %4971 = vadd.xlane.f32.xlu1 %v4970_v6  ;;  %v15104_v36 = vpop.xlane.xlu0 %4884  ;;  %17912 = vst [vmem:[#allocation130_spill] sm:$0xff] %v15110_v25  ;;  %v4985_v26 = vsel %vm3991_vm4, %v15110_v25, 0.0 }
 0x3f5   : > { %v15106_v11 = vpop.xlane.xlu1 %4278  ;;  %12087 = vpow2.f32 %v4674_v4 }
 0x3f6   : > { %v15114_v50 = vpop.eup %12077  ;;  %12089 = vrcp.f32 %v4801_v56 }
 0x3f7   : > { %4992 = vadd.xlane.f32.xlu0 %v4991_v27  ;;  %17913 = vst [vmem:[#allocation192_spill] sm:$0xff] %v15114_v50  ;;  %v15120_v5 = vpop.eup %12079  ;;  %v4982_v1 = vsel %vm3991_vm4, %v15114_v50, 0.0 }
 0x3f8   : > { %4989 = vadd.xlane.f32.xlu1 %v4988_v21  ;;  %v4798_v33 = vpop.xlane.xlu0 %4797  ;;  %17914 = vst [vmem:[#allocation141_spill] sm:$0xff] %v15120_v5  ;;  %v15124_v31 = vpop.eup %12081  ;;  %v4997_v4 = vsel %vm3991_vm4, %v15120_v5, 0.0 }
 0x3f9   : > { %12091 = vrcp.f32 %v4798_v33  ;;  %v15116_v15 = vpop.xlane.xlu1 %4296  ;;  %17915 = vst [vmem:[#allocation132_spill] sm:$0xff] %v15124_v31  ;;  %v15130_v6 = vpop.eup %12083 }
 0x3fa   : > { %12093 = vpow2.f32 %v4672_v48  ;;  %17917 = vst [vmem:[#allocation134_spill] sm:$0xff] %v15130_v6  ;;  %v4994_v48 = vsel %vm3991_vm4, %v15124_v31, 0.0  ;;  %v15134_v27 = vpop.eup %12085  ;;  %v5003_v25 = vsel %vm3991_vm4, %v15130_v6, 0.0  ;;  %v17922_v31 = vld [vmem:[#allocation195_spill] sm:$0xff] }
 0x3fb   : > { %4986 = vadd.xlane.f32.xlu0 %v4985_v26  ;;  %17918 = vst [vmem:[#allocation194_spill] sm:$0xff] %v15134_v27 }
 0x3fc   : > { %4983 = vadd.xlane.f32.xlu1 %v4982_v1  ;;  %v4807_v40 = vpop.xlane.xlu0 %4806 }
 0x3fd   : > { %v15126_v56 = vpop.xlane.xlu1 %4302  ;;  %12095 = vrcp.f32 %v4807_v40 }
 0x3fe   : > { %17916 = vst [vmem:[#allocation103_spill] sm:$0xff] %v15126_v56 }
 0x3ff   : > { %4998 = vadd.xlane.f32.xlu0 %v4997_v4  ;;  %v15138_v33 = vpop.eup %12087  ;;  %v5000_v4 = vsel %vm3991_vm4, %v15134_v27, 0.0  ;;  %v17930_v27 = vld [vmem:[#allocation104_spill] sm:$0xff] }
 0x400   : > { %4995 = vadd.xlane.f32.xlu1 %v4994_v48  ;;  %v15136_v21 = vpop.xlane.xlu0 %4890  ;;  %17919 = vst [vmem:[#allocation145_spill] sm:$0xff] %v15138_v33  ;;  %v12090_v1 = vpop.eup %12089 }
 0x401   : > { %v15140_v26 = vpop.xlane.xlu1 %4320  ;;  %v5171_v39 = vmul.f32 %v12090_v1, %v17923_v34  ;;  %v17925_v34 = vld [vmem:[#allocation65_spill] sm:$0xff] }
 0x402   : > { %17920 = vst [vmem:[#allocation189_spill] sm:$0xff] %v15140_v26  ;;  %v17936_v26 = vld [vmem:[#allocation109_spill] sm:$0xff] }
 0x403   : > { %v12092_v5 = vpop.eup %12091  ;;  %5004 = vadd.xlane.f32.xlu0 %v5003_v25  ;;  %v5015_v25 = vsel %vm3991_vm4, %v15138_v33, 0.0 }
 0x404   : > { %v15146_v50 = vpop.eup %12093  ;;  %5001 = vadd.xlane.f32.xlu1 %v5000_v4  ;;  %v4804_v48 = vpop.xlane.xlu0 %4803  ;;  %v5169_v57 = vmul.f32 %v12092_v5, %v17922_v31 }
 0x405   : > { %17921 = vst [vmem:[#allocation201_spill] sm:$0xff] %v15146_v50  ;;  %12097 = vrcp.f32 %v4804_v48  ;;  %v15150_v44 = vpop.xlane.xlu1 %4326  ;;  %v5012_v40 = vsel %vm3991_vm4, %v15146_v50, 0.0 }
 0x406   : > { %17924 = vst [vmem:[#allocation195_spill] sm:$0xff] %v15150_v44  ;;  %11540 = vmatprep.mubr.msk.f32.mxu1 %vm3991_vm4, %v5169_v57  ;;  %12099 = vrcp.f32 %v14926_v41 }
 0x407   : > { %5016 = vadd.xlane.f32.xlu0 %v5015_v25  ;;  %11541 = vmatmul.mubr.msk.f32.vlgmr.msra.gmra.mrb[96].mxu1 %vm3991_vm4, %v5171_v39  ;;  %v12096_v4 = vpop.eup %12095  ;;  %v17928_v39 = vld [vmem:[#allocation198_spill] sm:$0xff] }
 0x408   : > { %11555 = vmatpush3.msra.mxu1 %v17884_v30  ;;  %5013 = vadd.xlane.f32.xlu1 %v5012_v40  ;;  %v15159_v5 = vpop.xlane.xlu0 %4908  ;;  %v5175_v30 = vmul.f32 %v12096_v4, %v17930_v27 }
 0x409   : > { %11570 = vmatprep.subr.mxu1 %v17925_v34  ;;  %v15162_v31 = vpop.xlane.xlu1 %4344 }
 0x40a   : > { %17926 = vst [vmem:[#allocation193_spill] sm:$0xff] %v15162_v31 }
 0x40c   : > { %v4810_v1 = vpop.xlane.xlu0 %4809 }
 0x40d   : > { %v15164_v57 = vpop.xlane.xlu1 %4350 }
 0x40e   : > { %17927 = vst [vmem:[#allocation65_spill] sm:$0xff] %v15164_v57  ;;  %v17932_v57 = vld [vmem:[#allocation51_spill] sm:$0xff] }
 0x40f   : > { %v12098_v48 = vpop.eup %12097 }
 0x410   : > { %v15166_v25 = vpop.xlane.xlu0 %4914  ;;  %v5173_v6 = vmul.f32 %v12098_v48, %v17928_v39 }
 0x411   : > { %v15169_v33 = vpop.xlane.xlu1 %4368 }
 0x412   : > { %17929 = vst [vmem:[#allocation198_spill] sm:$0xff] %v15169_v33  ;;  %11543 = vmatprep.mubr.msk.f32.mxu1 %vm3991_vm4, %v5173_v6  ;;  %v17934_v6 = vld [vmem:[#allocation50_spill] sm:$0xff] }
 0x413   : > { %11544 = vmatmul.mubr.msk.f32.gmra.mrb[98].mxu1 %vm3991_vm4, %v5175_v30 }
 0x414   : > { %v15174_v40 = vpop.xlane.xlu0 %4815 }
 0x415   : > { %v15176_v50 = vpop.xlane.xlu1 %4374 }
 0x416   : > { %17931 = vst [vmem:[#allocation104_spill] sm:$0xff] %v15176_v50  ;;  %v17935_v50 = vld [vmem:[#allocation199_spill] sm:$0xff] }
 0x418   : > { %v4825_v31 = vpop.xlane.xlu0 %4824 }
 0x419   : > { %6800 = vrot.lane.b32.xlu1 %v17932_v57, %s12566_s7  ;;  %v4765_v44 = vpop.xlane.xlu1 %4764  ;;  %v12100_v57 = vpop.eup %12099 }
 0x41a   : > { %12101 = vrcp.f32 %v4765_v44  ;;  %v5149_v56 = vmul.f32 %v12100_v57, %v17936_v26  ;;  %v17943_v26 = vld [vmem:[#allocation64_spill] sm:$0xff]  ;;  %v17944_v57 = vld [vmem:[#allocation138_spill] sm:$0xff] }
 0x41b   : > { %12103 = vrcp.f32 %v15012_v32  ;;  %v17946_v58 = vsub.f32 %v17944_v57, %v17945_v19  ;;  %v17952_v19 = vsub.f32 %v17764_v0, %v14674_v23  ;;  %v17955_v0 = vld [vmem:[#allocation140_spill] sm:$0xff]  ;;  %v17960_v57 = vld [vmem:[#allocation142_spill] sm:$0xff] }
 0x41c   : > { %v15181_v48 = vpop.xlane.xlu0 %4932 }
 0x41d   : > { %17933 = vst [vmem:[#allocation51_spill] sm:$0xff] %v15181_v48  ;;  %v4771_v27 = vpop.xlane.xlu1 %4770  ;;  %6900 = vrot.lane.b32.xlu0 %v17934_v6, %s12566_s7 }
 0x41e   : > { %12105 = vrcp.f32 %v4771_v27 }
 0x41f   : > { %12107 = vrcp.f32 %v15048_v24 }
 0x420   : > { %12109 = vrcp.f32 %v4825_v31  ;;  %v4822_v4 = vpop.xlane.xlu0 %4821  ;;  %v17938_v31 = vld [vmem:[#allocation62_spill] sm:$0xff] }
 0x421   : > { %12111 = vrcp.f32 %v4822_v4  ;;  %v4789_v39 = vpop.xlane.xlu1 %4788  ;;  %v17939_v4 = vld [vmem:[#allocation187_spill] sm:$0xff] }
 0x422   : > { %12113 = vrcp.f32 %v4789_v39 }
 0x423   : > { %12115 = vrcp.f32 %v4810_v1  ;;  %v4668_v1 = vmul.f32 1.442695, %v17946_v58 }
 0x424   : > { %v4831_v30 = vpop.xlane.xlu0 %4830  ;;  %v12102_v41 = vpop.eup %12101 }
 0x425   : > { %v15187_v44 = vpop.xlane.xlu1 %4860  ;;  %v5147_v33 = vmul.f32 %v12102_v41, %v17935_v50  ;;  %v12104_v32 = vpop.eup %12103  ;;  %v17941_v50 = vld [vmem:[#allocation106_spill] sm:$0xff] }
 0x426   : > { %v17942_v41 = vsub.f32 %v17940_v53, %v17941_v50  ;;  %v17949_v53 = vld [vmem:[#allocation89_spill] sm:$0xff]  ;;  %v17950_v50 = vld [vmem:[#allocation200_spill] sm:$0xff] }
 0x427   : > { %11517 = vmatmul.mubr.msk.f32.vlgmr.msra.gmra.mrb[68].mxu0 %vm3991_vm4, %v5147_v33 }
 0x428   : > { %v12106_v62 = vpop.eup %12105  ;;  %v15192_v27 = vpop.xlane.xlu0 %4938  ;;  %11531 = vmatpush3.msra.mxu0 %v17938_v31  ;;  %11519 = vmatprep.mubr.msk.f32.mxu0 %vm3991_vm4, %v5149_v56  ;;  %v4670_v7 = vmul.f32 1.442695, %v17942_v41  ;;  %v17947_v31 = vld [vmem:[#allocation149_spill] sm:$0xff]  ;;  %v17948_v56 = vld [vmem:[#allocation94_spill] sm:$0xff] }
 0x429   : > { %17937 = vst [vmem:[#allocation50_spill] sm:$0xff] %v15192_v27  ;;  %v12108_v24 = vpop.eup %12107  ;;  %v4795_v6 = vpop.xlane.xlu1 %4794  ;;  %v5151_v39 = vmul.f32 %v12106_v62, %v17939_v4  ;;  %11546 = vmatprep.subr.mxu0 %v17943_v26  ;;  %v4462_v27 = vsub.f32 %v17947_v31, %v15074_v37  ;;  %v5161_v48 = vmul.f32 %v12104_v32, %v17948_v56  ;;  %v4678_v37 = vmul.f32 1.442695, %v17952_v19  ;;  %v17953_v32 = vld [vmem:[#allocation96_spill] sm:$0xff] }
 0x42a   : > { %v12110_v35 = vpop.eup %12109  ;;  %12117 = vrcp.f32 %v4795_v6  ;;  %v17951_v6 = vld [vmem:[#allocation77_spill] sm:$0xff] }
 0x42b   : > { %v12112_v33 = vpop.eup %12111  ;;  %12119 = vrcp.f32 %v4831_v30  ;;  %11520 = vmatmul.mubr.msk.f32.gmra.mrb[70].mxu0 %vm3991_vm4, %v5151_v39  ;;  %v5187_v41 = vmul.f32 %v12110_v35, %v17950_v50  ;;  %v4676_v30 = vmul.f32 1.442695, %v4462_v27  ;;  %v5165_v35 = vmul.f32 %v12108_v24, %v17953_v32  ;;  %v17958_v24 = vld [vmem:[#allocation66_spill] sm:$0xff] }
 0x42c   : > { %v12114_v46 = vpop.eup %12113  ;;  %v4828_v62 = vpop.xlane.xlu0 %4827  ;;  %v5185_v4 = vmul.f32 %v12112_v33, %v17949_v53  ;;  %11532 = vmatprep.mubr.msk.f32.mxu0 %vm3991_vm4, %v5161_v48  ;;  %v17956_v48 = vld [vmem:[#allocation108_spill] sm:$0xff] }
 0x42d   : > { %v5163_v10 = vmul.f32 %v12114_v46, %v17951_v6  ;;  %12121 = vrcp.f32 %v4828_v62  ;;  %v15212_v58 = vpop.xlane.xlu1 %4866  ;;  %v17954_v46 = vld [vmem:[#allocation151_spill] sm:$0xff]  ;;  %v17957_v27 = vsub.f32 %v17955_v0, %v17956_v48  ;;  %v17964_v6 = vld [vmem:[#allocation110_spill] sm:$0xff] }
 0x42e   : > { %12123 = vpow2.f32 %v4670_v7  ;;  %11556 = vmatprep.mubr.msk.f32.mxu1 %vm3991_vm4, %v5185_v4  ;;  %v4469_v39 = vsub.f32 %v17954_v46, %v15087_v55  ;;  %v17959_v55 = vld [vmem:[#allocation67_spill] sm:$0xff]  ;;  %v17963_v4 = vld [vmem:[#allocation97_spill] sm:$0xff] }
 0x42f   : > { %12125 = vpow2.f32 %v4668_v1  ;;  %11557 = vmatmul.mubr.msk.f32.vlgmr.msra.gmra.mrb[100].mxu1 %vm3991_vm4, %v5187_v41  ;;  %11533 = vmatmul.mubr.msk.f32.vlgmr.msra.gmra.mrb[72].mxu0 %vm3991_vm4, %v5163_v10  ;;  %v4682_v33 = vmul.f32 1.442695, %v17957_v27  ;;  %v12116_v10 = vpop.eup %12115  ;;  %v17966_v27 = vld [vmem:[#allocation91_spill] sm:$0xff] }
 0x430   : > { %11571 = vmatpush3.msra.mxu1 %v17925_v34  ;;  %v15224_v7 = vpop.xlane.xlu0 %4956  ;;  %11547 = vmatpush3.msra.mxu0 %v17943_v26  ;;  %12127 = vpow2.f32 %v4678_v37  ;;  %v17961_v34 = vld [vmem:[#allocation73_spill] sm:$0xff]  ;;  %v4690_v56 = vmul.f32 1.442695, %v4469_v39  ;;  %v5177_v19 = vmul.f32 %v12116_v10, %v17964_v6 }
 0x431   : > { %11535 = vmatprep.mubr.msk.f32.mxu0 %vm3991_vm4, %v5165_v35  ;;  %v15228_v23 = vpop.xlane.xlu1 %4881  ;;  %11562 = vmatprep.subr.mxu0 %v17958_v24  ;;  %v17962_v1 = vsub.f32 %v17960_v57, %v17961_v34  ;;  %12129 = vpow2.f32 %v4676_v30  ;;  %v17965_v30 = vsub.f32 %v17773_v28, %v14696_v22 }
 0x432   : > { %11586 = vmatprep.subr.mxu1 %v17959_v55  ;;  %12131 = vpow2.f32 %v4682_v33 }
 0x433   : > { %v4680_v31 = vmul.f32 1.442695, %v17962_v1  ;;  %v4688_v35 = vmul.f32 1.442695, %v17965_v30 }
 0x434   : > { %v12118_v26 = vpop.eup %12117  ;;  %v4834_v62 = vpop.xlane.xlu0 %4833 }
 0x435   : > { %v15238_v53 = vpop.xlane.xlu1 %4887  ;;  %v5167_v50 = vmul.f32 %v12118_v26, %v17963_v4  ;;  %v12120_v41 = vpop.eup %12119  ;;  %12133 = vpow2.f32 %v4680_v31 }
 0x436   : > { %12135 = vpow2.f32 %v4690_v56  ;;  %v5191_v33 = vmul.f32 %v12120_v41, %v17966_v27  ;;  %v17967_v27 = vld [vmem:[#allocation80_spill] sm:$0xff] }
 0x437   : > { %v12122_v37 = vpop.eup %12121  ;;  %11536 = vmatmul.mubr.msk.f32.gmra.mrb[74].mxu0 %vm3991_vm4, %v5167_v50  ;;  %12137 = vrcp.f32 %v15174_v40 }
 0x438   : > { %v15243_v32 = vpop.eup %12123  ;;  %11548 = vmatprep.mubr.msk.f32.mxu0 %vm3991_vm4, %v5177_v19  ;;  %v15249_v46 = vpop.xlane.xlu0 %4962  ;;  %v5189_v39 = vmul.f32 %v12122_v37, %v14668_v43 }
 0x439   : > { %v15252_v0 = vpop.eup %12125  ;;  %v4813_v48 = vpop.xlane.xlu1 %4812  ;;  %v5009_v22 = vsel %vm3991_vm4, %v15243_v32, 0.0 }
 0x43a   : > { %12139 = vrcp.f32 %v4813_v48  ;;  %11559 = vmatprep.mubr.msk.f32.mxu1 %vm3991_vm4, %v5189_v39  ;;  %v15260_v28 = vpop.eup %12127  ;;  %v5006_v10 = vsel %vm3991_vm4, %v15252_v0, 0.0 }
 0x43b   : > { %11560 = vmatmul.mubr.msk.f32.gmra.mrb[102].mxu1 %vm3991_vm4, %v5191_v33  ;;  %12141 = vpow2.f32 %v4688_v35  ;;  %v15264_v40 = vpop.eup %12129  ;;  %v5021_v34 = vsel %vm3991_vm4, %v15260_v28, 0.0 }
 0x43c   : > { %5010 = vadd.xlane.f32.xlu0 %v5009_v22  ;;  %v4840_v43 = vpop.xlane.xlu0 %4839  ;;  %v15270_v1 = vpop.eup %12131  ;;  %v5018_v26 = vsel %vm3991_vm4, %v15264_v40, 0.0  ;;  %12143 = vrcp.f32 %v4834_v62 }
 0x43d   : > { %5007 = vadd.xlane.f32.xlu1 %v5006_v10  ;;  %v15266_v57 = vpop.xlane.xlu1 %4905  ;;  %v5027_v6 = vsel %vm3991_vm4, %v15270_v1, 0.0 }
 0x43f   : > { %v15274_v56 = vpop.eup %12133 }
 0x440   : > { %5022 = vadd.xlane.f32.xlu0 %v5021_v34  ;;  %v4849_v31 = vpop.xlane.xlu0 %4848  ;;  %v15276_v50 = vpop.eup %12135  ;;  %v5024_v30 = vsel %vm3991_vm4, %v15274_v56, 0.0 }
 0x441   : > { %5019 = vadd.xlane.f32.xlu1 %v5018_v26  ;;  %v4819_v4 = vpop.xlane.xlu1 %4818  ;;  %v12138_v41 = vpop.eup %12137  ;;  %v5039_v48 = vsel %vm3991_vm4, %v15276_v50, 0.0 }
 0x442   : > { %12145 = vrcp.f32 %v4819_v4  ;;  %v5181_v33 = vmul.f32 %v12138_v41, %v17967_v27 }
 0x443   : > { %12147 = vrcp.f32 %v4849_v31  ;;  %v17969_v31 = vld [vmem:[#allocation190_spill] sm:$0xff] }
 0x444   : > { %v12140_v19 = vpop.eup %12139  ;;  %5028 = vadd.xlane.f32.xlu0 %v5027_v6  ;;  %v15280_v37 = vpop.xlane.xlu0 %4980 }
 0x445   : > { %v5179_v35 = vmul.f32 %v12140_v19, %v14736_v47  ;;  %5025 = vadd.xlane.f32.xlu1 %v5024_v30  ;;  %v15285_v62 = vpop.xlane.xlu1 %4911  ;;  %v15287_v39 = vpop.eup %12141  ;;  %v17968_v47 = vld [vmem:[#allocation68_spill] sm:$0xff] }
 0x446   : > { %v5036_v10 = vsel %vm3991_vm4, %v15287_v39, 0.0  ;;  %v12144_v26 = vpop.eup %12143 }
 0x447   : > { %11549 = vmatmul.mubr.msk.f32.vlgmr.msra.gmra.mrb[76].mxu0 %vm3991_vm4, %v5179_v35  ;;  %v5193_v19 = vmul.f32 %v12144_v26, %v17969_v31  ;;  %v17971_v26 = vld [vmem:[#allocation186_spill] sm:$0xff] }
 0x448   : > { %11563 = vmatpush3.msra.mxu0 %v17958_v24  ;;  %5040 = vadd.xlane.f32.xlu0 %v5039_v48  ;;  %v4846_v22 = vpop.xlane.xlu0 %4845 }
 0x449   : > { %11551 = vmatprep.mubr.msk.f32.mxu0 %vm3991_vm4, %v5181_v33  ;;  %11578 = vmatprep.subr.mxu0 %v17968_v47  ;;  %12149 = vrcp.f32 %v4846_v22  ;;  %v15298_v34 = vpop.xlane.xlu1 %4929 }
 0x44a   : > { %5037 = vadd.xlane.f32.xlu1 %v5036_v10  ;;  %12151 = vrcp.f32 %v4840_v43  ;;  %v17970_v43 = vld [vmem:[#allocation144_spill] sm:$0xff] }
 0x44c   : > { %v12146_v4 = vpop.eup %12145  ;;  %v4855_v6 = vpop.xlane.xlu0 %4854 }
 0x44d   : > { %v15300_v41 = vpop.xlane.xlu1 %4935  ;;  %v5183_v24 = vmul.f32 %v12146_v4, %v14780_v49  ;;  %12153 = vrcp.f32 %v4855_v6  ;;  %v12148_v48 = vpop.eup %12147  ;;  %v17972_v4 = vsub.f32 %v17970_v43, %v17971_v26  ;;  %v17976_v43 = vld [vmem:[#allocation123_spill] sm:$0xff] }
 0x44e   : > { %v5203_v10 = vmul.f32 %v12148_v48, %v14776_v17 }
 0x44f   : > { %11552 = vmatmul.mubr.msk.f32.gmra.mrb[78].mxu0 %vm3991_vm4, %v5183_v24  ;;  %v4686_v6 = vmul.f32 1.442695, %v17972_v4 }
 0x450   : > { %11564 = vmatprep.mubr.msk.f32.mxu0 %vm3991_vm4, %v5193_v19  ;;  %v4852_v30 = vpop.xlane.xlu0 %4851 }
 0x451   : > { %12155 = vrcp.f32 %v4852_v30  ;;  %v4837_v35 = vpop.xlane.xlu1 %4836 }
 0x452   : > { %12157 = vrcp.f32 %v4837_v35  ;;  %v17974_v35 = vld [vmem:[#allocation54_spill] sm:$0xff] }
 0x453   : > { %v12150_v27 = vpop.eup %12149  ;;  %12159 = vrcp.f32 %v15032_v38 }
 0x454   : > { %v4873_v33 = vpop.xlane.xlu0 %4872  ;;  %v5201_v22 = vmul.f32 %v12150_v27, %v14818_v20  ;;  %v12152_v31 = vpop.eup %12151  ;;  %v17973_v20 = vld [vmem:[#allocation69_spill] sm:$0xff] }
 0x455   : > { %v15308_v49 = vpop.xlane.xlu1 %4953  ;;  %12161 = vrcp.f32 %v4873_v33 }
 0x456   : > { %11572 = vmatprep.mubr.msk.f32.mxu1 %vm3991_vm4, %v5201_v22 }
 0x457   : > { %11573 = vmatmul.mubr.msk.f32.vlgmr.msra.gmra.mrb[104].mxu1 %vm3991_vm4, %v5203_v10  ;;  %v12154_v19 = vpop.eup %12153  ;;  %v17975_v10 = vld [vmem:[#allocation146_spill] sm:$0xff] }
 0x458   : > { %11587 = vmatpush3.msra.mxu1 %v17959_v55  ;;  %v4870_v24 = vpop.xlane.xlu0 %4869  ;;  %v5207_v22 = vmul.f32 %v12154_v19, %v14840_v29  ;;  %v17977_v26 = vsub.f32 %v17975_v10, %v17976_v43  ;;  %v17983_v10 = vld [vmem:[#allocation98_spill] sm:$0xff] }
 0x459   : > { %11602 = vmatprep.subr.mxu1 %v17973_v20  ;;  %12163 = vrcp.f32 %v4870_v24  ;;  %v4843_v17 = vpop.xlane.xlu1 %4842 }
 0x45a   : > { %12165 = vrcp.f32 %v4843_v17  ;;  %v4684_v4 = vmul.f32 1.442695, %v17977_v26 }
 0x45b   : > { %v12156_v30 = vpop.eup %12155  ;;  %12167 = vpow2.f32 %v4686_v6  ;;  %7000 = vrot.lane.b32.xlu1 %v17974_v35, %s12566_s7  ;;  %v17978_v6 = vld [vmem:[#allocation53_spill] sm:$0xff] }
 0x45c   : > { %v12158_v48 = vpop.eup %12157  ;;  %12169 = vrcp.f32 %v15187_v44  ;;  %v4879_v38 = vpop.xlane.xlu0 %4878  ;;  %v5205_v27 = vmul.f32 %v12156_v30, %v14860_v14  ;;  %v5197_v14 = vmul.f32 %v12152_v31, %v14754_v12 }
 0x45d   : > { %12171 = vrcp.f32 %v15069_v60  ;;  %v5195_v55 = vmul.f32 %v12158_v48, %v14864_v18  ;;  %v15324_v33 = vpop.xlane.xlu1 %4959  ;;  %v12160_v18 = vpop.eup %12159  ;;  %v17979_v60 = vld [vmem:[#allocation70_spill] sm:$0xff]  ;;  %v17980_v48 = vld [vmem:[#allocation120_spill] sm:$0xff] }
 0x45e   : > { %12173 = vrcp.f32 %v15212_v58  ;;  %7100 = vrot.lane.b32.xlu0 %v17978_v6, %s12566_s7  ;;  %11575 = vmatprep.mubr.msk.f32.mxu1 %vm3991_vm4, %v5205_v27 }
 0x45f   : > { %12175 = vrcp.f32 %v15228_v23  ;;  %11565 = vmatmul.mubr.msk.f32.vlgmr.msra.gmra.mrb[80].mxu0 %vm3991_vm4, %v5195_v55  ;;  %11576 = vmatmul.mubr.msk.f32.gmra.mrb[106].mxu1 %vm3991_vm4, %v5207_v22  ;;  %v12162_v58 = vpop.eup %12161  ;;  %v17982_v55 = vld [vmem:[#allocation71_spill] sm:$0xff] }
 0x460   : > { %12177 = vrcp.f32 %v4879_v38  ;;  %11579 = vmatpush3.msra.mxu0 %v17968_v47  ;;  %11567 = vmatprep.mubr.msk.f32.mxu0 %vm3991_vm4, %v5197_v14  ;;  %v4876_v29 = vpop.xlane.xlu0 %4875  ;;  %v5219_v17 = vmul.f32 %v12162_v58, %v14882_v59  ;;  %v17986_v58 = vld [vmem:[#allocation139_spill] sm:$0xff] }
 0x461   : > { %11594 = vmatprep.subr.mxu0 %v17979_v60  ;;  %12179 = vrcp.f32 %v4876_v29  ;;  %v15341_v44 = vpop.xlane.xlu1 %4977 }
 0x462   : > { %12181 = vpow2.f32 %v4684_v4  ;;  %v17984_v4 = vld [vmem:[#allocation155_spill] sm:$0xff] }
 0x463   : > { %v12164_v12 = vpop.eup %12163  ;;  %12183 = vrcp.f32 %v15104_v36  ;;  %v5209_v36 = vmul.f32 %v12160_v18, %v17980_v48  ;;  %v17985_v18 = vld [vmem:[#allocation72_spill] sm:$0xff] }
 0x464   : > { %v12166_v23 = vpop.eup %12165  ;;  %12185 = vrcp.f32 %v15238_v53  ;;  %v4897_v24 = vpop.xlane.xlu0 %4896  ;;  %v5217_v47 = vmul.f32 %v12164_v12, %v14904_v2  ;;  %v17981_v53 = vld [vmem:[#allocation188_spill] sm:$0xff] }
 0x465   : > { %v15346_v31 = vpop.eup %12167  ;;  %12187 = vrcp.f32 %v4897_v24  ;;  %v4894_v19 = vpop.xlane.xlu1 %4893  ;;  %v5199_v30 = vmul.f32 %v12166_v23, %v14908_v54 }
 0x466   : > { %v12170_v35 = vpop.eup %12169  ;;  %12189 = vrcp.f32 %v4894_v19  ;;  %11588 = vmatprep.mubr.msk.f32.mxu1 %vm3991_vm4, %v5217_v47  ;;  %v17988_v19 = vld [vmem:[#allocation157_spill] sm:$0xff] }
 0x467   : > { %v12172_v38 = vpop.eup %12171  ;;  %12191 = vrcp.f32 %v15136_v21  ;;  %11568 = vmatmul.mubr.msk.f32.gmra.mrb[82].mxu0 %vm3991_vm4, %v5199_v30  ;;  %11589 = vmatmul.mubr.msk.f32.vlgmr.msra.gmra.mrb[108].mxu1 %vm3991_vm4, %v5219_v17  ;;  %v5211_v27 = vmul.f32 %v12170_v35, %v17981_v53  ;;  %v17989_v30 = vld [vmem:[#allocation107_spill] sm:$0xff] }
 0x468   : > { %v12174_v2 = vpop.eup %12173  ;;  %12193 = vrcp.f32 %v15266_v57  ;;  %11603 = vmatpush3.msra.mxu1 %v17973_v20  ;;  %11580 = vmatprep.mubr.msk.f32.mxu0 %vm3991_vm4, %v5209_v36  ;;  %v4903_v59 = vpop.xlane.xlu0 %4902  ;;  %v5213_v43 = vmul.f32 %v12172_v38, %v17983_v10  ;;  %v4471_v57 = vsub.f32 %v17984_v4, %v15106_v11  ;;  %v17990_v35 = vsub.f32 %v17988_v19, %v17989_v30  ;;  %v17991_v36 = vld [vmem:[#allocation102_spill] sm:$0xff] }
 0x469   : > { %v12176_v54 = vpop.eup %12175  ;;  %11618 = vmatprep.subr.mxu1 %v17982_v55  ;;  %12195 = vrcp.f32 %v4903_v59  ;;  %v4900_v22 = vpop.xlane.xlu1 %4899 }
 0x46a   : > { %v12178_v21 = vpop.eup %12177  ;;  %12197 = vrcp.f32 %v4900_v22  ;;  %v4694_v47 = vmul.f32 1.442695, %v4471_v57  ;;  %v4692_v48 = vmul.f32 1.442695, %v17990_v35  ;;  %v17994_v22 = vld [vmem:[#allocation127_spill] sm:$0xff]  ;;  %v18005_v35 = vld [vmem:[#allocation178_spill] sm:$0xff] }
 0x46b   : > { %v12180_v26 = vpop.eup %12179  ;;  %12199 = vrcp.f32 %v15159_v5  ;;  %11581 = vmatmul.mubr.msk.f32.vlgmr.msra.gmra.mrb[84].mxu0 %vm3991_vm4, %v5211_v27  ;;  %v5215_v5 = vmul.f32 %v12174_v2, %v17986_v58  ;;  %v5223_v12 = vmul.f32 %v12178_v21, %v14915_v51 }
 0x46c   : > { %v15365_v20 = vpop.eup %12181  ;;  %12201 = vrcp.f32 %v15285_v62  ;;  %11595 = vmatpush3.msra.mxu0 %v17979_v60  ;;  %11583 = vmatprep.mubr.msk.f32.mxu0 %vm3991_vm4, %v5213_v43  ;;  %v4921_v6 = vpop.xlane.xlu0 %4920  ;;  %v5221_v14 = vmul.f32 %v12180_v26, %v14935_v63  ;;  %v17987_v62 = vld [vmem:[#allocation143_spill] sm:$0xff] }
 0x46d   : > { %v12184_v29 = vpop.eup %12183  ;;  %11610 = vmatprep.subr.mxu0 %v17985_v18  ;;  %12203 = vrcp.f32 %v4921_v6  ;;  %v4918_v11 = vpop.xlane.xlu1 %4917  ;;  %v5225_v60 = vmul.f32 %v12176_v54, %v17987_v62  ;;  %v17992_v54 = vld [vmem:[#allocation147_spill] sm:$0xff] }
 0x46e   : > { %v12186_v23 = vpop.eup %12185  ;;  %12205 = vrcp.f32 %v4918_v11  ;;  %11591 = vmatprep.mubr.msk.f32.mxu1 %vm3991_vm4, %v5221_v14  ;;  %v5227_v38 = vmul.f32 %v12184_v29, %v17991_v36  ;;  %v17996_v43 = vld [vmem:[#allocation159_spill] sm:$0xff]  ;;  %v17997_v14 = vld [vmem:[#allocation150_spill] sm:$0xff] }
 0x46f   : > { %v12188_v24 = vpop.eup %12187  ;;  %12207 = vrcp.f32 %v15166_v25  ;;  %11584 = vmatmul.mubr.msk.f32.gmra.mrb[86].mxu0 %vm3991_vm4, %v5215_v5  ;;  %11592 = vmatmul.mubr.msk.f32.gmra.mrb[110].mxu1 %vm3991_vm4, %v5223_v12  ;;  %v5229_v53 = vmul.f32 %v12186_v23, %v17992_v54  ;;  %v4477_v26 = vsub.f32 %v17996_v43, %v15116_v15  ;;  %v17998_v29 = vld [vmem:[#allocation131_spill] sm:$0xff]  ;;  %v18000_v15 = vld [vmem:[#allocation197_spill] sm:$0xff] }
 0x470   : > { %v12190_v63 = vpop.eup %12189  ;;  %12209 = vrcp.f32 %v15298_v34  ;;  %11596 = vmatprep.mubr.msk.f32.mxu0 %vm3991_vm4, %v5225_v60  ;;  %v4927_v51 = vpop.xlane.xlu0 %4926  ;;  %v17993_v34 = vld [vmem:[#allocation148_spill] sm:$0xff]  ;;  %v5235_v4 = vmul.f32 %v12188_v24, %v14955_v3  ;;  %v17999_v11 = vsub.f32 %v17997_v14, %v17998_v29  ;;  %v18008_v29 = vld [vmem:[#allocation133_spill] sm:$0xff] }
 0x471   : > { %v12192_v17 = vpop.eup %12191  ;;  %12211 = vrcp.f32 %v4927_v51  ;;  %v4924_v2 = vpop.xlane.xlu1 %4923  ;;  %v5233_v25 = vmul.f32 %v12190_v63, %v14963_v61  ;;  %v17995_v21 = vsub.f32 %v17993_v34, %v17994_v22  ;;  %v4706_v24 = vmul.f32 1.442695, %v4477_v26  ;;  %v18007_v26 = vld [vmem:[#allocation125_spill] sm:$0xff] }
 0x472   : > { %v12194_v59 = vpop.eup %12193  ;;  %12213 = vrcp.f32 %v4924_v2  ;;  %v4696_v58 = vmul.f32 1.442695, %v17999_v11  ;;  %v5231_v5 = vmul.f32 %v12192_v17, %v18000_v15  ;;  %v18003_v17 = vld [vmem:[#allocation153_spill] sm:$0xff] }
 0x473   : > { %v12196_v27 = vpop.eup %12195  ;;  %v4698_v10 = vmul.f32 1.442695, %v17995_v21  ;;  %12215 = vpow2.f32 %v4694_v47  ;;  %11597 = vmatmul.mubr.msk.f32.vlgmr.msra.gmra.mrb[88].mxu0 %vm3991_vm4, %v5227_v38  ;;  %11604 = vmatprep.mubr.msk.f32.mxu1 %vm3991_vm4, %v5233_v25  ;;  %v5030_v21 = vsel %vm3991_vm4, %v15365_v20, 0.0 }
 0x474   : > { %v12198_v61 = vpop.eup %12197  ;;  %11611 = vmatpush3.msra.mxu0 %v17985_v18  ;;  %11599 = vmatprep.mubr.msk.f32.mxu0 %vm3991_vm4, %v5229_v53  ;;  %v15397_v57 = vpop.xlane.xlu0 %4944  ;;  %12217 = vpow2.f32 %v4692_v48  ;;  %v18001_v18 = vld [vmem:[#allocation74_spill] sm:$0xff]  ;;  %v5239_v47 = vmul.f32 %v12196_v27, %v14975_v52  ;;  %v5033_v27 = vsel %vm3991_vm4, %v15346_v31, 0.0 }
 0x475   : > { %v12200_v6 = vpop.eup %12199  ;;  %11605 = vmatmul.mubr.msk.f32.vlgmr.msra.gmra.mrb[112].mxu1 %vm3991_vm4, %v5235_v4  ;;  %v4942_v3 = vpop.xlane.xlu1 %4941  ;;  %v5237_v12 = vmul.f32 %v12198_v61, %v14982_v16  ;;  %v5241_v62 = vmul.f32 %v12194_v59, %v18001_v18 }
 0x476   : > { %v12202_v23 = vpop.eup %12201  ;;  %11619 = vmatpush3.msra.mxu1 %v17982_v55  ;;  %12219 = vrcp.f32 %v4942_v3  ;;  %v18002_v55 = vld [vmem:[#allocation161_spill] sm:$0xff]  ;;  %v5243_v48 = vmul.f32 %v12200_v6, %v18005_v35 }
 0x477   : > { %v12204_v60 = vpop.eup %12203  ;;  %12221 = vpow2.f32 %v4698_v10  ;;  %11600 = vmatmul.mubr.msk.f32.gmra.mrb[90].mxu0 %vm3991_vm4, %v5231_v5  ;;  %11607 = vmatprep.mubr.msk.f32.mxu1 %vm3991_vm4, %v5237_v12  ;;  %v18004_v19 = vsub.f32 %v18002_v55, %v18003_v17  ;;  %v5245_v52 = vmul.f32 %v12202_v23, %v14800_v13 }
 0x478   : > { %v12206_v63 = vpop.eup %12205  ;;  %11612 = vmatprep.mubr.msk.f32.mxu0 %vm3991_vm4, %v5241_v62  ;;  %v15411_v51 = vpop.xlane.xlu0 %4950  ;;  %12223 = vpow2.f32 %v4696_v58  ;;  %v5251_v59 = vmul.f32 %v12204_v60, %v14991_v45  ;;  %v18006_v45 = vld [vmem:[#allocation75_spill] sm:$0xff] }
 0x479   : > { %v12208_v16 = vpop.eup %12207  ;;  %v4704_v30 = vmul.f32 1.442695, %v18004_v19  ;;  %11608 = vmatmul.mubr.msk.f32.gmra.mrb[114].mxu1 %vm3991_vm4, %v5239_v47  ;;  %v4948_v36 = vpop.xlane.xlu1 %4947  ;;  %v5249_v38 = vmul.f32 %v12206_v63, %v14995_v42  ;;  %12225 = vpow2.f32 %v4706_v24  ;;  %v18010_v19 = vld [vmem:[#allocation50_spill] sm:$0xff] }
 0x47a   : > { %v12210_v2 = vpop.eup %12209  ;;  %v5247_v34 = vmul.f32 %v12208_v16, %v18006_v45  ;;  %v18009_v16 = vld [vmem:[#allocation51_spill] sm:$0xff] }
 0x47b   : > { %v12212_v25 = vpop.eup %12211  ;;  %11613 = vmatmul.mubr.msk.f32.vlgmr.msra.gmra.mrb[92].mxu0 %vm3991_vm4, %v5243_v48  ;;  %11620 = vmatprep.mubr.msk.f32.mxu1 %vm3991_vm4, %v5249_v38  ;;  %12227 = vpow2.f32 %v4704_v30  ;;  %v5257_v10 = vmul.f32 %v12210_v2, %v14822_v8 }
 0x47c   : > { %v12214_v54 = vpop.eup %12213  ;;  %11615 = vmatprep.mubr.msk.f32.mxu0 %vm3991_vm4, %v5245_v52  ;;  %v15424_v53 = vpop.xlane.xlu0 %4968  ;;  %v5255_v4 = vmul.f32 %v12212_v25, %v18007_v26  ;;  %12229 = vrcp.f32 %v18009_v16  ;;  %v18021_v16 = vld [vmem:[#allocation152_spill] sm:$0xff] }
 0x47d   : > { %v15428_v42 = vpop.eup %12215  ;;  %11621 = vmatmul.mubr.msk.f32.vlgmr.msra.gmra.mrb[116].mxu1 %vm3991_vm4, %v5251_v59  ;;  %v4966_v13 = vpop.xlane.xlu1 %4965  ;;  %5034 = vadd.xlane.f32.xlu0 %v5033_v27  ;;  %v5253_v22 = vmul.f32 %v12214_v54, %v15010_v9  ;;  %12231 = vrcp.f32 %v15397_v57  ;;  %v18011_v59 = vld [vmem:[#allocation129_spill] sm:$0xff] }
 0x47e   : > { %v15436_v43 = vpop.eup %12217  ;;  %v5045_v9 = vsel %vm3991_vm4, %v15428_v42, 0.0  ;;  %12233 = vrcp.f32 %v15300_v41 }
 0x47f   : > { %5031 = vadd.xlane.f32.xlu1 %v5030_v21  ;;  %11616 = vmatmul.mubr.msk.f32.gmra.mrb[94].mxu0 %vm3991_vm4, %v5247_v34  ;;  %v5042_v58 = vsel %vm3991_vm4, %v15436_v43, 0.0  ;;  %12235 = vrcp.f32 %v4948_v36  ;;  %v18013_v34 = vld [vmem:[#allocation137_spill] sm:$0xff]  ;;  %v18014_v21 = vld [vmem:[#allocation90_spill] sm:$0xff] }
 0x480   : > { %v12220_v61 = vpop.eup %12219  ;;  %11623 = vmatprep.mubr.msk.f32.mxu1 %vm3991_vm4, %v5253_v22  ;;  %11628 = vmatprep.mubr.msk.f32.mxu0 %vm3991_vm4, %v5257_v10  ;;  %v15442_v6 = vpop.xlane.xlu0 %4974  ;;  %12237 = vrcp.f32 %v18010_v19  ;;  %v18022_v19 = vld [vmem:[#allocation115_spill] sm:$0xff] }
 0x481   : > { %v15446_v14 = vpop.eup %12221  ;;  %11624 = vmatmul.mubr.msk.f32.gmra.mrb[118].mxu1 %vm3991_vm4, %v5255_v4  ;;  %v15449_v8 = vpop.xlane.xlu1 %4971  ;;  %5046 = vadd.xlane.f32.xlu0 %v5045_v9  ;;  %v5265_v11 = vmul.f32 %v12220_v61, %v18008_v29  ;;  %12239 = vrcp.f32 %v15411_v51  ;;  %v18015_v4 = vld [vmem:[#allocation56_spill] sm:$0xff]  ;;  %v18016_v61 = vld [vmem:[#allocation79_spill] sm:$0xff] }
 0x482   : > { %v15454_v3 = vpop.eup %12223  ;;  %v5051_v5 = vsel %vm3991_vm4, %v15446_v14, 0.0  ;;  %12241 = vrcp.f32 %v4966_v13  ;;  %v18012_v13 = vld [vmem:[#allocation81_spill] sm:$0xff]  ;;  %v18017_v29 = vld [vmem:[#allocation135_spill] sm:$0xff] }
 0x483   : > { %5043 = vadd.xlane.f32.xlu1 %v5042_v58  ;;  %11636 = vmatprep.mubr.msk.f32.mxu1 %vm3991_vm4, %v5265_v11  ;;  %v15461_v12 = vpop.eup %12225  ;;  %v5048_v18 = vsel %vm3991_vm4, %v15454_v3, 0.0  ;;  %12243 = vrcp.f32 %v15308_v49  ;;  %v18018_v58 = vld [vmem:[#allocation63_spill] sm:$0xff] }
 0x484   : > { %v15457_v15 = vpop.xlane.xlu0 %4992  ;;  %v5063_v24 = vsel %vm3991_vm4, %v15461_v12, 0.0 }
 0x485   : > { %v15463_v23 = vpop.xlane.xlu1 %4989  ;;  %5052 = vadd.xlane.f32.xlu0 %v5051_v5  ;;  %v15467_v62 = vpop.eup %12227 }
 0x486   : > { %v5060_v63 = vsel %vm3991_vm4, %v15467_v62, 0.0  ;;  %v12230_v57 = vpop.eup %12229 }
 0x487   : > { %5049 = vadd.xlane.f32.xlu1 %v5048_v18  ;;  %v12232_v41 = vpop.eup %12231  ;;  %v5259_v45 = vmul.f32 %v12230_v57, %v18012_v13  ;;  %v18019_v18 = vld [vmem:[#allocation55_spill] sm:$0xff]  ;;  %v18023_v57 = vsub.f32 %v18021_v16, %v18022_v19  ;;  %v18029_v13 = vld [vmem:[#allocation165_spill] sm:$0xff] }
 0x488   : > { %v15469_v60 = vpop.xlane.xlu0 %4986  ;;  %v12234_v2 = vpop.eup %12233  ;;  %v5267_v54 = vmul.f32 %v12232_v41, %v18011_v59  ;;  %v18027_v59 = vld [vmem:[#allocation101_spill] sm:$0xff] }
 0x489   : > { %v15473_v47 = vpop.xlane.xlu1 %4983  ;;  %5064 = vadd.xlane.f32.xlu0 %v5063_v24  ;;  %v12236_v52 = vpop.eup %12235  ;;  %v5261_v10 = vmul.f32 %v12234_v2, %v18014_v21  ;;  %v18020_v24 = vld [vmem:[#allocation93_spill] sm:$0xff]  ;;  %v4702_v41 = vmul.f32 1.442695, %v18023_v57  ;;  %v18024_v2 = vld [vmem:[#allocation103_spill] sm:$0xff]  ;;  %v18033_v21 = vld [vmem:[#allocation82_spill] sm:$0xff] }
 0x48a   : > { %v12238_v25 = vpop.eup %12237  ;;  %v5269_v22 = vmul.f32 %v12236_v52, %v18013_v34  ;;  %v18025_v52 = vld [vmem:[#allocation163_spill] sm:$0xff]  ;;  %v18041_v57 = vld [vmem:[#allocation42_spill] sm:$0xff] }
 0x48b   : > { %5061 = vadd.xlane.f32.xlu1 %v5060_v63  ;;  %v12240_v27 = vpop.eup %12239  ;;  %v5263_v11 = vmul.f32 %v12238_v25, %v18017_v29  ;;  %v18026_v25 = vld [vmem:[#allocation154_spill] sm:$0xff]  ;;  %12245 = vpow2.f32 %v4702_v41 }
 0x48c   : > { %v15479_v55 = vpop.xlane.xlu0 %4998  ;;  %v12242_v49 = vpop.eup %12241  ;;  %v5271_v9 = vmul.f32 %v12240_v27, %v18016_v61  ;;  %v18036_v61 = vld [vmem:[#allocation167_spill] sm:$0xff]  ;;  %v18037_v29 = vld [vmem:[#allocation158_spill] sm:$0xff] }
 0x48d   : > { %v15482_v17 = vpop.xlane.xlu1 %4995  ;;  %v12244_v26 = vpop.eup %12243  ;;  %v5281_v5 = vmul.f32 %v12242_v49, %v18018_v58 }
 0x48e   : > { %v5273_v63 = vmul.f32 %v12244_v26, %v18020_v24  ;;  %v18040_v24 = vld [vmem:[#allocation13_spill] sm:$0xff] }
 0x490   : > { %v15486_v30 = vpop.xlane.xlu0 %5004 }
 0x491   : > { %v15488_v35 = vpop.xlane.xlu1 %5001 }
 0x494   : > { %v15491_v48 = vpop.xlane.xlu0 %5016 }
 0x495   : > { %v15493_v38 = vpop.xlane.xlu1 %5013 }
 0x498   : > { %v6901_v36 = vpop.permute.xlu0 %6900 }
 0x499   : > { %v6801_v51 = vpop.permute.xlu1 %6800  ;;  %11634 = vmatprep.subr.mxu1 %v6901_v36 }
 0x49a   : > { %11626 = vmatprep.subr.mxu0 %v6801_v51  ;;  %11635 = vmatpush3.msra.mxu1 %v6901_v36  ;;  %v4479_v36 = vsub.f32 %v18025_v52, %v18024_v2  ;;  %v15537_v52 = vpop.eup %12245 }
 0x49b   : > { %11627 = vmatpush3.msra.mxu0 %v6801_v51  ;;  %11637 = vmatmul.mubr.msk.f32.vlgmr.msra.gmra.mrb[120].mxu1 %vm3991_vm4, %v5267_v54  ;;  %v18028_v54 = vsub.f32 %v18026_v25, %v18027_v59  ;;  %18042 = vst [vmem:[#allocation199_spill] sm:$0xff] %v15537_v52  ;;  %v18044_v25 = vld [vmem:[#allocation113_spill] sm:$0xff] }
 0x49c   : > { %7200 = vrot.lane.b32.xlu1 %v18015_v4, %s12566_s7  ;;  %11629 = vmatmul.mubr.msk.f32.vlgmr.msra.gmra.mrb[96].mxu0 %vm3991_vm4, %v5259_v45  ;;  %v4710_v27 = vmul.f32 1.442695, %v4479_v36  ;;  %v18030_v45 = vld [vmem:[#allocation111_spill] sm:$0xff]  ;;  %v18035_v4 = vld [vmem:[#allocation189_spill] sm:$0xff] }
 0x49d   : > { %11639 = vmatprep.mubr.msk.f32.mxu1 %vm3991_vm4, %v5269_v22  ;;  %11631 = vmatprep.mubr.msk.f32.mxu0 %vm3991_vm4, %v5261_v10  ;;  %v4700_v51 = vmul.f32 1.442695, %v18028_v54  ;;  %v18031_v49 = vsub.f32 %v18029_v13, %v18030_v45  ;;  %v18032_v22 = vld [vmem:[#allocation156_spill] sm:$0xff]  ;;  %v18043_v36 = vld [vmem:[#allocation169_spill] sm:$0xff]  ;;  %v5057_v45 = vsel %vm3991_vm4, %v15537_v52, 0.0 }
 0x49e   : > { %v18034_v10 = vsub.f32 %v18032_v22, %v18033_v21  ;;  %v18045_v59 = vsub.f32 %v18043_v36, %v18044_v25 }
 0x49f   : > { %7300 = vrot.lane.b32.xlu0 %v18019_v18, %s12566_s7  ;;  %11640 = vmatmul.mubr.msk.f32.gmra.mrb[122].mxu1 %vm3991_vm4, %v5271_v9  ;;  %12247 = vpow2.f32 %v4700_v51  ;;  %v4708_v34 = vmul.f32 1.442695, %v18031_v49  ;;  %v4485_v9 = vsub.f32 %v18036_v61, %v18035_v4  ;;  %v18047_v61 = vld [vmem:[#allocation17_spill] sm:$0xff] }
 0x4a0   : > { %11632 = vmatmul.mubr.msk.f32.gmra.mrb[98].mxu0 %vm3991_vm4, %v5263_v11  ;;  %11652 = vmatprep.mubr.msk.f32.mxu1 %vm3991_vm4, %v5281_v5  ;;  %v4714_v26 = vmul.f32 1.442695, %v18034_v10  ;;  %12249 = vpow2.f32 %v4710_v27  ;;  %v18038_v11 = vld [vmem:[#allocation84_spill] sm:$0xff]  ;;  %v4720_v54 = vmul.f32 1.442695, %v18045_v59 }
 0x4a1   : > { %11644 = vmatprep.mubr.msk.f32.mxu0 %vm3991_vm4, %v5273_v63  ;;  %v18039_v58 = vsub.f32 %v18037_v29, %v18038_v11  ;;  %12251 = vpow2.f32 %v4708_v34  ;;  %v4722_v19 = vmul.f32 1.442695, %v4485_v9 }
 0x4a2   : > { %12253 = vpow2.f32 %v4714_v26  ;;  %v18046_v26 = vld [vmem:[#allocation18_spill] sm:$0xff] }
 0x4a3   : > { %v4712_v5 = vmul.f32 1.442695, %v18039_v58 }
 0x4a5   : > { %12255 = vpow2.f32 %v4712_v5 }
 0x4a6   : > { %12257 = vpow2.f32 %v4722_v19 }
 0x4a7   : > { %12259 = vpow2.f32 %v4720_v54 }
 0x4a8   : > { %12261 = vrcp.f32 %v15424_v53 }
 0x4a9   : > { %v15543_v13 = vpop.eup %12247  ;;  %12263 = vrcp.f32 %v15224_v7 }
 0x4aa   : > { %v15547_v49 = vpop.eup %12249  ;;  %v5054_v22 = vsel %vm3991_vm4, %v15543_v13, 0.0  ;;  %12265 = vrcp.f32 %v15449_v8 }
 0x4ab   : > { %v15551_v10 = vpop.eup %12251  ;;  %v5069_v29 = vsel %vm3991_vm4, %v15547_v49, 0.0  ;;  %12267 = vrcp.f32 %v15324_v33 }
 0x4ac   : > { %v15557_v11 = vpop.eup %12253  ;;  %12269 = vrcp.f32 %v15442_v6  ;;  %v18053_v6 = vld [vmem:[#allocation61_spill] sm:$0xff] }
 0x4ad   : > { %18048 = vst [vmem:[#allocation109_spill] sm:$0xff] %v15557_v11  ;;  %12271 = vrcp.f32 %v15463_v23 }
 0x4ae   : > { %12273 = vrcp.f32 %v15249_v46 }
 0x4af   : > { %12275 = vrcp.f32 %v15341_v44 }
 0x4b6   : > { %v11526_v18 = vpop.f32.mrb[92].mxu1 }
 0x4b7   : > { %v8605_v63 = vmul.f32 %v11526_v18, %v18040_v24  ;;  %v5581_v16 = vpop.f32.mrb[93].mxu1  ;;  %v5066_v18 = vsel %vm3991_vm4, %v15551_v10, 0.0 }
 0x4b8   : > { %v8604_v41 = vmul.f32 %v5581_v16, %v18041_v57 }
 0x4b9   : > { %v8736_v2 = vsel %vm228_vm3, %v8605_v63, 0.0  ;;  %v15562_v63 = vpop.eup %12255 }
 0x4ba   : > { %v8735_v51 = vsel %vm228_vm3, %v8604_v41, 0.0  ;;  %18049 = vst [vmem:[#allocation62_spill] sm:$0xff] %v15562_v63  ;;  %v5075_v41 = vsel %vm3991_vm4, %v15557_v11, 0.0  ;;  %v5072_v36 = vsel %vm3991_vm4, %v15562_v63, 0.0 }
 0x4bb   : > { %v8737_v27 = vadd.f32 %v8736_v2, %v8735_v51  ;;  %v15569_v2 = vpop.eup %12257 }
 0x4bc   : > { %18051 = vst [vmem:[#allocation136_spill] sm:$0xff] %v15569_v2  ;;  %v15573_v25 = vpop.eup %12259  ;;  %v5087_v54 = vsel %vm3991_vm4, %v15569_v2, 0.0 }
 0x4bd   : > { %18052 = vst [vmem:[#allocation106_spill] sm:$0xff] %v15573_v25  ;;  %v12262_v7 = vpop.eup %12261 }
 0x4be   : > { %v11529_v34 = vpop.f32.mrb[94].mxu1  ;;  %5058 = vadd.xlane.f32.xlu0 %v5057_v45  ;;  %v12264_v8 = vpop.eup %12263 }
 0x4bf   : > { %v5591_v21 = vpop.f32.mrb[95].mxu1  ;;  %v8607_v4 = vmul.f32 %v11529_v34, %v18046_v26 }
 0x4c0   : > { %5055 = vadd.xlane.f32.xlu1 %v5054_v22  ;;  %v8606_v9 = vmul.f32 %v5591_v21, %v18047_v61 }
 0x4c1   : > { %v8740_v16 = vsel %vm228_vm3, %v8607_v4, 0.0 }
 0x4c2   : > { %v8738_v58 = vsel %vm228_vm3, %v8606_v9, 0.0  ;;  %5070 = vadd.xlane.f32.xlu0 %v5069_v29  ;;  %v12266_v9 = vpop.eup %12265 }
 0x4c3   : > { %v8739_v5 = vadd.f32 %v8738_v58, %v8737_v27  ;;  %v5084_v27 = vsel %vm3991_vm4, %v15573_v25, 0.0  ;;  %v12268_v29 = vpop.eup %12267  ;;  %v5283_v58 = vmul.f32 %v12262_v7, %v18053_v6  ;;  %v18056_v6 = vld [vmem:[#allocation44_spill] sm:$0xff] }
 0x4c4   : > { %5067 = vadd.xlane.f32.xlu1 %v5066_v18  ;;  %v12270_v23 = vpop.eup %12269 }
 0x4c5   : > { %v15565_v19 = vadd.f32 %v8740_v16, %v8739_v5  ;;  %v12272_v44 = vpop.eup %12271 }
 0x4c6   : > { %5076 = vadd.xlane.f32.xlu0 %v5075_v41  ;;  %v18054_v41 = vld [vmem:[#allocation99_spill] sm:$0xff]  ;;  %v12274_v11 = vpop.eup %12273 }
 0x4c7   : > { %18050 = vst [vmem:[#allocation187_spill] sm:$0xff] %v15565_v19 }
 0x4c8   : > { %5073 = vadd.xlane.f32.xlu1 %v5072_v36  ;;  %v5275_v36 = vmul.f32 %v12264_v8, %v18054_v41  ;;  %v18058_v8 = vld [vmem:[#allocation92_spill] sm:$0xff]  ;;  %v18060_v41 = vld [vmem:[#allocation43_spill] sm:$0xff] }
 0x4c9   : > { %v15575_v59 = vpop.xlane.xlu0 %5010 }
 0x4ca   : > { %v15579_v51 = vpop.xlane.xlu1 %5007  ;;  %5088 = vadd.xlane.f32.xlu0 %v5087_v54 }
 0x4cc   : > { %5085 = vadd.xlane.f32.xlu1 %v5084_v27  ;;  %v18055_v27 = vld [vmem:[#allocation128_spill] sm:$0xff] }
 0x4cd   : > { %v15584_v45 = vpop.xlane.xlu0 %5022  ;;  %v5285_v19 = vmul.f32 %v12266_v9, %v18055_v27  ;;  %v18059_v9 = vld [vmem:[#allocation88_spill] sm:$0xff] }
 0x4ce   : > { %v15587_v34 = vpop.xlane.xlu1 %5019 }
 0x4d1   : > { %v15592_v22 = vpop.xlane.xlu0 %5028 }
 0x4d2   : > { %v15595_v21 = vpop.xlane.xlu1 %5025 }
 0x4d5   : > { %v15599_v53 = vpop.xlane.xlu0 %5040 }
 0x4d7   : > { %v15601_v4 = vpop.xlane.xlu1 %5037 }
 0x4d9   : > { %v7101_v33 = vpop.permute.xlu0 %7100 }
 0x4da   : > { %v11542_v5 = vpop.f32.mrb[96].mxu1  ;;  %11650 = vmatprep.subr.mxu1 %v7101_v33 }
 0x4db   : > { %v7001_v18 = vpop.permute.xlu1 %7000  ;;  %v8613_v16 = vmul.f32 %v11542_v5, %v18040_v24  ;;  %v5781_v46 = vpop.f32.mrb[97].mxu1  ;;  %11651 = vmatpush3.msra.mxu1 %v7101_v33  ;;  %v18057_v5 = vld [vmem:[#allocation117_spill] sm:$0xff] }
 0x4dc   : > { %v8612_v54 = vmul.f32 %v5781_v46, %v18041_v57  ;;  %11642 = vmatprep.subr.mxu0 %v7001_v18  ;;  %11653 = vmatmul.mubr.msk.f32.vlgmr.msra.gmra.mrb[124].mxu1 %vm3991_vm4, %v5283_v58  ;;  %v5277_v2 = vmul.f32 %v12268_v29, %v18057_v5  ;;  %v12276_v33 = vpop.eup %12275  ;;  %v5287_v58 = vmul.f32 %v12270_v23, %v18058_v8  ;;  %v18061_v29 = vld [vmem:[#allocation83_spill] sm:$0xff] }
 0x4dd   : > { %v8750_v7 = vsel %vm228_vm3, %v8613_v16, 0.0  ;;  %7400 = vrot.lane.b32.xlu1 %v18056_v6, %s12566_s7  ;;  %11643 = vmatpush3.msra.mxu0 %v7001_v18  ;;  %v5297_v16 = vmul.f32 %v12272_v44, %v18059_v9  ;;  %v5279_v18 = vmul.f32 %v12274_v11, %v18061_v29  ;;  %v18063_v11 = vld [vmem:[#allocation160_spill] sm:$0xff]  ;;  %v18064_v6 = vld [vmem:[#allocation105_spill] sm:$0xff]  ;;  %v18070_v29 = vld [vmem:[#allocation78_spill] sm:$0xff] }
 0x4de   : > { %v8749_v63 = vsel %vm228_vm3, %v8612_v54, 0.0  ;;  %11645 = vmatmul.mubr.msk.f32.vlgmr.msra.gmra.mrb[100].mxu0 %vm3991_vm4, %v5275_v36  ;;  %11655 = vmatprep.mubr.msk.f32.mxu1 %vm3991_vm4, %v5285_v19  ;;  %v18062_v54 = vld [vmem:[#allocation95_spill] sm:$0xff]  ;;  %v18065_v5 = vsub.f32 %v18063_v11, %v18064_v6 }
 0x4df   : > { %v8751_v46 = vadd.f32 %v8750_v7, %v8749_v63  ;;  %11647 = vmatprep.mubr.msk.f32.mxu0 %vm3991_vm4, %v5277_v2  ;;  %v5289_v36 = vmul.f32 %v12276_v33, %v18062_v54  ;;  %v18066_v33 = vld [vmem:[#allocation195_spill] sm:$0xff] }
 0x4e0   : > { %7500 = vrot.lane.b32.xlu0 %v18060_v41, %s12566_s7  ;;  %11656 = vmatmul.mubr.msk.f32.gmra.mrb[126].mxu1 %vm3991_vm4, %v5287_v58  ;;  %v4718_v8 = vmul.f32 1.442695, %v18065_v5  ;;  %v18067_v58 = vld [vmem:[#allocation171_spill] sm:$0xff]  ;;  %v18069_v41 = vld [vmem:[#allocation162_spill] sm:$0xff]  ;;  %v18078_v5 = vld [vmem:[#allocation193_spill] sm:$0xff] }
 0x4e1   : > { %11668 = vmatprep.mubr.msk.f32.mxu1 %vm3991_vm4, %v5297_v16  ;;  %v4487_v9 = vsub.f32 %v18067_v58, %v18066_v33  ;;  %v18079_v33 = vld [vmem:[#allocation176_spill] sm:$0xff] }
 0x4e2   : > { %11648 = vmatmul.mubr.msk.f32.gmra.mrb[102].mxu0 %vm3991_vm4, %v5279_v18  ;;  %v18071_v18 = vsub.f32 %v18069_v41, %v18070_v29  ;;  %12277 = vpow2.f32 %v4718_v8  ;;  %v18081_v58 = vld [vmem:[#allocation112_spill] sm:$0xff] }
 0x4e3   : > { %11660 = vmatprep.mubr.msk.f32.mxu0 %vm3991_vm4, %v5289_v36  ;;  %v4726_v36 = vmul.f32 1.442695, %v4487_v9 }
 0x4e4   : > { %v4716_v54 = vmul.f32 1.442695, %v18071_v18  ;;  %v18084_v18 = vld [vmem:[#allocation179_spill] sm:$0xff] }
 0x4e6   : > { %v11545_v63 = vpop.f32.mrb[98].mxu1  ;;  %12279 = vpow2.f32 %v4716_v54 }
 0x4e7   : > { %v5791_v19 = vpop.f32.mrb[99].mxu1  ;;  %v8615_v2 = vmul.f32 %v11545_v63, %v18046_v26  ;;  %v18072_v63 = vld [vmem:[#allocation173_spill] sm:$0xff]  ;;  %12281 = vpow2.f32 %v4726_v36 }
 0x4e8   : > { %v8614_v23 = vmul.f32 %v5791_v19, %v18047_v61  ;;  %v18073_v19 = vld [vmem:[#allocation116_spill] sm:$0xff] }
 0x4e9   : > { %v8754_v7 = vsel %vm228_vm3, %v8615_v2, 0.0  ;;  %v18075_v2 = vld [vmem:[#allocation164_spill] sm:$0xff] }
 0x4ea   : > { %v8752_v44 = vsel %vm228_vm3, %v8614_v23, 0.0 }
 0x4eb   : > { %v8753_v27 = vadd.f32 %v8752_v44, %v8751_v46  ;;  %v18074_v46 = vsub.f32 %v18072_v63, %v18073_v19  ;;  %v18076_v44 = vld [vmem:[#allocation124_spill] sm:$0xff] }
 0x4ec   : > { %v18077_v11 = vsub.f32 %v18075_v2, %v18076_v44  ;;  %v15652_v9 = vpop.eup %12277  ;;  %v18085_v63 = vld [vmem:[#allocation100_spill] sm:$0xff] }
 0x4ed   : > { %v15636_v16 = vadd.f32 %v8754_v7, %v8753_v27  ;;  %v4724_v23 = vmul.f32 1.442695, %v18074_v46  ;;  %v4493_v27 = vsub.f32 %v18079_v33, %v18078_v5  ;;  %v18080_v7 = vld [vmem:[#allocation166_spill] sm:$0xff]  ;;  %18083 = vst [vmem:[#allocation138_spill] sm:$0xff] %v15652_v9  ;;  %v18086_v54 = vsub.f32 %v18084_v18, %v18085_v63 }
 0x4ee   : > { %v4730_v6 = vmul.f32 1.442695, %v18077_v11  ;;  %v18082_v41 = vsub.f32 %v18080_v7, %v18081_v58 }
 0x4ef   : > { %18068 = vst [vmem:[#allocation64_spill] sm:$0xff] %v15636_v16  ;;  %12283 = vpow2.f32 %v4724_v23  ;;  %v4738_v8 = vmul.f32 1.442695, %v4493_v27  ;;  %v4736_v19 = vmul.f32 1.442695, %v18086_v54 }
 0x4f0   : > { %v4728_v29 = vmul.f32 1.442695, %v18082_v41  ;;  %12285 = vpow2.f32 %v4730_v6  ;;  %v15658_v44 = vpop.eup %12279  ;;  %v5081_v6 = vsel %vm3991_vm4, %v15652_v9, 0.0 }
 0x4f1   : > { %18087 = vst [vmem:[#allocation196_spill] sm:$0xff] %v15658_v44  ;;  %v15664_v5 = vpop.eup %12281  ;;  %v5078_v41 = vsel %vm3991_vm4, %v15658_v44, 0.0  ;;  %v18101_v44 = vld [vmem:[#allocation192_spill] sm:$0xff] }
 0x4f2   : > { %12287 = vpow2.f32 %v4728_v29  ;;  %18088 = vst [vmem:[#allocation149_spill] sm:$0xff] %v15664_v5  ;;  %v5093_v54 = vsel %vm3991_vm4, %v15664_v5, 0.0 }
 0x4f3   : > { %12289 = vpow2.f32 %v4738_v8 }
 0x4f4   : > { %12291 = vpow2.f32 %v4736_v19 }
 0x4f5   : > { %12293 = vrcp.f32 %v15457_v15 }
 0x4f6   : > { %12295 = vrcp.f32 %v15280_v37 }
 0x4f7   : > { %12297 = vrcp.f32 %v15482_v17 }
 0x4f8   : > { %12299 = vrcp.f32 %v15473_v47 }
 0x4f9   : > { %v15669_v29 = vpop.eup %12283  ;;  %12301 = vrcp.f32 %v15479_v55 }
 0x4fa   : > { %v11518_v46 = vpop.f32.mrb[68].mxu0  ;;  %18089 = vst [vmem:[#allocation94_spill] sm:$0xff] %v15669_v29  ;;  %v15675_v19 = vpop.eup %12285  ;;  %12303 = vrcp.f32 %v15493_v38 }
 0x4fb   : > { %v8601_v36 = vmul.f32 %v11518_v46, %v18040_v24  ;;  %v5481_v2 = vpop.f32.mrb[69].mxu0  ;;  %18090 = vst [vmem:[#allocation89_spill] sm:$0xff] %v15675_v19  ;;  %12305 = vrcp.f32 %v15469_v60 }
 0x4fc   : > { %v8600_v23 = vmul.f32 %v5481_v2, %v18041_v57  ;;  %12307 = vrcp.f32 %v15488_v35 }
 0x4fd   : > { %v8729_v11 = vsel %vm228_vm3, %v8601_v36, 0.0 }
 0x4fe   : > { %v8728_v33 = vsel %vm228_vm3, %v8600_v23, 0.0  ;;  %v11521_v27 = vpop.f32.mrb[70].mxu0 }
 0x4ff   : > { %5082 = vadd.xlane.f32.xlu0 %v5081_v6  ;;  %v8730_v7 = vadd.f32 %v8729_v11, %v8728_v33  ;;  %v5491_v58 = vpop.f32.mrb[71].mxu0  ;;  %v8603_v8 = vmul.f32 %v11521_v27, %v18046_v26 }
 0x500   : > { %v8602_v18 = vmul.f32 %v5491_v58, %v18047_v61  ;;  %v5090_v58 = vsel %vm3991_vm4, %v15669_v29, 0.0 }
 0x501   : > { %5079 = vadd.xlane.f32.xlu1 %v5078_v41  ;;  %v15683_v41 = vpop.eup %12287  ;;  %v8733_v16 = vsel %vm228_vm3, %v8603_v8, 0.0 }
 0x502   : > { %v11558_v63 = vpop.f32.mrb[100].mxu1  ;;  %v8731_v46 = vsel %vm228_vm3, %v8602_v18, 0.0  ;;  %v11534_v36 = vpop.f32.mrb[72].mxu0  ;;  %18091 = vst [vmem:[#allocation200_spill] sm:$0xff] %v15683_v41 }
 0x503   : > { %v8621_v2 = vmul.f32 %v11558_v63, %v18040_v24  ;;  %5094 = vadd.xlane.f32.xlu0 %v5093_v54  ;;  %v5981_v23 = vpop.f32.mrb[101].mxu1  ;;  %v8732_v11 = vadd.f32 %v8731_v46, %v8730_v7  ;;  %v8609_v6 = vmul.f32 %v11534_v36, %v18040_v24  ;;  %v5681_v33 = vpop.f32.mrb[73].mxu0  ;;  %v5099_v46 = vsel %vm3991_vm4, %v15675_v19, 0.0 }
 0x504   : > { %v8620_v27 = vmul.f32 %v5981_v23, %v18041_v57  ;;  %v8608_v9 = vmul.f32 %v5681_v33, %v18041_v57  ;;  %v15694_v36 = vpop.eup %12289 }
 0x505   : > { %v8764_v18 = vsel %vm228_vm3, %v8621_v2, 0.0  ;;  %5091 = vadd.xlane.f32.xlu1 %v5090_v58  ;;  %v15688_v63 = vadd.f32 %v8733_v16, %v8732_v11  ;;  %v8743_v7 = vsel %vm228_vm3, %v8609_v6, 0.0  ;;  %18093 = vst [vmem:[#allocation96_spill] sm:$0xff] %v15694_v36  ;;  %v5096_v2 = vsel %vm3991_vm4, %v15683_v41, 0.0  ;;  %v15699_v33 = vpop.eup %12291  ;;  %v18099_v41 = vld [vmem:[#allocation132_spill] sm:$0xff] }
 0x506   : > { %v8763_v54 = vsel %vm228_vm3, %v8620_v27, 0.0  ;;  %v8742_v23 = vsel %vm228_vm3, %v8608_v9, 0.0  ;;  %18094 = vst [vmem:[#allocation151_spill] sm:$0xff] %v15699_v33  ;;  %v5111_v6 = vsel %vm3991_vm4, %v15694_v36, 0.0  ;;  %v12294_v55 = vpop.eup %12293 }
 0x507   : > { %18092 = vst [vmem:[#allocation77_spill] sm:$0xff] %v15688_v63  ;;  %v8765_v5 = vadd.f32 %v8764_v18, %v8763_v54  ;;  %5100 = vadd.xlane.f32.xlu0 %v5099_v46  ;;  %v8744_v8 = vadd.f32 %v8743_v7, %v8742_v23  ;;  %v5108_v7 = vsel %vm3991_vm4, %v15699_v33, 0.0 }
 0x509   : > { %5097 = vadd.xlane.f32.xlu1 %v5096_v2 }
 0x50a   : > { %v11537_v16 = vpop.f32.mrb[74].mxu0  ;;  %v15701_v11 = vpop.xlane.xlu0 %5034 }
 0x50b   : > { %v5691_v27 = vpop.f32.mrb[75].mxu0  ;;  %5112 = vadd.xlane.f32.xlu0 %v5111_v6  ;;  %v8611_v58 = vmul.f32 %v11537_v16, %v18046_v26 }
 0x50c   : > { %v15706_v9 = vpop.xlane.xlu1 %5031  ;;  %v8610_v18 = vmul.f32 %v5691_v27, %v18047_v61 }
 0x50d   : > { %5109 = vadd.xlane.f32.xlu1 %v5108_v7  ;;  %v8747_v16 = vsel %vm228_vm3, %v8611_v58, 0.0 }
 0x50e   : > { %v8745_v54 = vsel %vm228_vm3, %v8610_v18, 0.0  ;;  %v11561_v46 = vpop.f32.mrb[102].mxu1  ;;  %v15713_v23 = vpop.xlane.xlu0 %5046 }
 0x50f   : > { %v8746_v2 = vadd.f32 %v8745_v54, %v8744_v8  ;;  %v5991_v6 = vpop.f32.mrb[103].mxu1  ;;  %v8623_v27 = vmul.f32 %v11561_v46, %v18046_v26 }
 0x510   : > { %v15719_v63 = vpop.xlane.xlu1 %5043  ;;  %v8622_v7 = vmul.f32 %v5991_v6, %v18047_v61 }
 0x511   : > { %v15723_v15 = vadd.f32 %v8747_v16, %v8746_v2  ;;  %v8768_v58 = vsel %vm228_vm3, %v8623_v27, 0.0  ;;  %v12296_v2 = vpop.eup %12295 }
 0x512   : > { %v8766_v37 = vsel %vm228_vm3, %v8622_v7, 0.0  ;;  %v15727_v8 = vpop.xlane.xlu0 %5052  ;;  %v12298_v6 = vpop.eup %12297  ;;  %v18097_v7 = vld [vmem:[#allocation191_spill] sm:$0xff] }
 0x513   : > { %18095 = vst [vmem:[#allocation140_spill] sm:$0xff] %v15723_v15  ;;  %v8767_v17 = vadd.f32 %v8766_v37, %v8765_v5  ;;  %v12300_v5 = vpop.eup %12299  ;;  %v5299_v60 = vmul.f32 %v12294_v55, %v18097_v7  ;;  %v5301_v33 = vmul.f32 %v12298_v6, %v18099_v41  ;;  %v18100_v7 = vld [vmem:[#allocation46_spill] sm:$0xff]  ;;  %v18103_v41 = vld [vmem:[#allocation201_spill] sm:$0xff] }
 0x514   : > { %v15732_v18 = vpop.xlane.xlu1 %5049  ;;  %v12302_v15 = vpop.eup %12301 }
 0x515   : > { %v15735_v47 = vadd.f32 %v8768_v58, %v8767_v17  ;;  %v12304_v58 = vpop.eup %12303 }
 0x516   : > { %v15737_v54 = vpop.xlane.xlu0 %5064  ;;  %v12306_v55 = vpop.eup %12305  ;;  %v5313_v6 = vmul.f32 %v12304_v58, %v18103_v41  ;;  %v18108_v41 = vld [vmem:[#allocation168_spill] sm:$0xff] }
 0x517   : > { %18096 = vst [vmem:[#allocation108_spill] sm:$0xff] %v15735_v47  ;;  %v18098_v47 = vld [vmem:[#allocation76_spill] sm:$0xff] }
 0x518   : > { %v15739_v46 = vpop.xlane.xlu1 %5061  ;;  %v5291_v36 = vmul.f32 %v12296_v2, %v18098_v47  ;;  %v18102_v47 = vld [vmem:[#allocation141_spill] sm:$0xff] }
 0x519   : > { %v5303_v2 = vmul.f32 %v12302_v15, %v18102_v47 }
 0x51a   : > { %v11550_v16 = vpop.f32.mrb[76].mxu0  ;;  %v7301_v38 = vpop.permute.xlu0 %7300 }
 0x51b   : > { %v8617_v27 = vmul.f32 %v11550_v16, %v18040_v24  ;;  %v5881_v37 = vpop.f32.mrb[77].mxu0  ;;  %11666 = vmatprep.subr.mxu1 %v7301_v38 }
 0x51c   : > { %v7201_v35 = vpop.permute.xlu1 %7200  ;;  %v8616_v17 = vmul.f32 %v5881_v37, %v18041_v57  ;;  %11667 = vmatpush3.msra.mxu1 %v7301_v38  ;;  %v5293_v37 = vmul.f32 %v12300_v5, %v18101_v44  ;;  %v12308_v38 = vpop.eup %12307 }
 0x51d   : > { %v8757_v19 = vsel %vm228_vm3, %v8617_v27, 0.0  ;;  %11658 = vmatprep.subr.mxu0 %v7201_v35  ;;  %11669 = vmatmul.mubr.msk.f32.vlgmr.msra.gmra.mrb[128].mxu1 %vm3991_vm4, %v5299_v60  ;;  %v18104_v60 = vld [vmem:[#allocation45_spill] sm:$0xff]  ;;  %v18105_v27 = vld [vmem:[#allocation130_spill] sm:$0xff] }
 0x51e   : > { %v8756_v16 = vsel %vm228_vm3, %v8616_v17, 0.0  ;;  %7600 = vrot.lane.b32.xlu1 %v18100_v7, %s12566_s7  ;;  %11659 = vmatpush3.msra.mxu0 %v7201_v35  ;;  %v5295_v35 = vmul.f32 %v12306_v55, %v18105_v27 }
 0x51f   : > { %v8758_v29 = vadd.f32 %v8757_v19, %v8756_v16  ;;  %11661 = vmatmul.mubr.msk.f32.vlgmr.msra.gmra.mrb[104].mxu0 %vm3991_vm4, %v5291_v36  ;;  %11671 = vmatprep.mubr.msk.f32.mxu1 %vm3991_vm4, %v5301_v33  ;;  %v18106_v19 = vld [vmem:[#allocation194_spill] sm:$0xff] }
 0x520   : > { %11663 = vmatprep.mubr.msk.f32.mxu0 %vm3991_vm4, %v5293_v37  ;;  %v5305_v36 = vmul.f32 %v12308_v38, %v18106_v19 }
 0x521   : > { %7700 = vrot.lane.b32.xlu0 %v18104_v60, %s12566_s7  ;;  %11672 = vmatmul.mubr.msk.f32.gmra.mrb[130].mxu1 %vm3991_vm4, %v5303_v2 }
 0x522   : > { %v11553_v44 = vpop.f32.mrb[78].mxu0  ;;  %11684 = vmatprep.mubr.msk.f32.mxu1 %vm3991_vm4, %v5313_v6  ;;  %v18109_v6 = vld [vmem:[#allocation122_spill] sm:$0xff] }
 0x523   : > { %11664 = vmatmul.mubr.msk.f32.gmra.mrb[106].mxu0 %vm3991_vm4, %v5295_v35  ;;  %v5891_v33 = vpop.f32.mrb[79].mxu0  ;;  %v8619_v15 = vmul.f32 %v11553_v44, %v18046_v26  ;;  %v18110_v60 = vsub.f32 %v18108_v41, %v18109_v6  ;;  %v18111_v35 = vld [vmem:[#allocation65_spill] sm:$0xff]  ;;  %v18112_v44 = vld [vmem:[#allocation180_spill] sm:$0xff]  ;;  %v18120_v6 = vld [vmem:[#allocation174_spill] sm:$0xff] }
 0x524   : > { %v8618_v5 = vmul.f32 %v5891_v33, %v18047_v61  ;;  %11676 = vmatprep.mubr.msk.f32.mxu0 %vm3991_vm4, %v5305_v36  ;;  %v4495_v19 = vsub.f32 %v18112_v44, %v18111_v35  ;;  %v18113_v33 = vld [vmem:[#allocation170_spill] sm:$0xff]  ;;  %v18119_v41 = vld [vmem:[#allocation121_spill] sm:$0xff] }
 0x525   : > { %v8761_v16 = vsel %vm228_vm3, %v8619_v15, 0.0  ;;  %v4734_v27 = vmul.f32 1.442695, %v18110_v60  ;;  %v18114_v15 = vld [vmem:[#allocation126_spill] sm:$0xff]  ;;  %v4496_v60 = vsub.f32 %v18120_v6, %v18119_v41 }
 0x526   : > { %v8759_v17 = vsel %vm228_vm3, %v8618_v5, 0.0  ;;  %v18115_v5 = vsub.f32 %v18113_v33, %v18114_v15  ;;  %v18122_v33 = vld [vmem:[#allocation118_spill] sm:$0xff] }
 0x527   : > { %v8760_v58 = vadd.f32 %v8759_v17, %v8758_v29  ;;  %12309 = vpow2.f32 %v4734_v27  ;;  %v4744_v6 = vmul.f32 1.442695, %v4496_v60  ;;  %v18129_v60 = vld [vmem:[#allocation119_spill] sm:$0xff] }
 0x528   : > { %v4732_v17 = vmul.f32 1.442695, %v18115_v5 }
 0x529   : > { %v15769_v55 = vadd.f32 %v8761_v16, %v8760_v58  ;;  %v4742_v58 = vmul.f32 1.442695, %v4495_v19  ;;  %v18121_v19 = vld [vmem:[#allocation172_spill] sm:$0xff] }
 0x52a   : > { %v11574_v7 = vpop.f32.mrb[104].mxu1  ;;  %12311 = vpow2.f32 %v4732_v17  ;;  %v18123_v15 = vsub.f32 %v18121_v19, %v18122_v33 }
 0x52b   : > { %18107 = vst [vmem:[#allocation66_spill] sm:$0xff] %v15769_v55  ;;  %v8629_v37 = vmul.f32 %v11574_v7, %v18040_v24  ;;  %v6181_v38 = vpop.f32.mrb[105].mxu1  ;;  %12313 = vpow2.f32 %v4742_v58 }
 0x52c   : > { %v8628_v47 = vmul.f32 %v6181_v38, %v18041_v57  ;;  %v18116_v38 = vld [vmem:[#allocation181_spill] sm:$0xff]  ;;  %v4746_v5 = vmul.f32 1.442695, %v18123_v15 }
 0x52d   : > { %v8778_v2 = vsel %vm228_vm3, %v8629_v37, 0.0  ;;  %v18117_v37 = vld [vmem:[#allocation87_spill] sm:$0xff] }
 0x52e   : > { %v8777_v29 = vsel %vm228_vm3, %v8628_v47, 0.0  ;;  %v18118_v55 = vsub.f32 %v18116_v38, %v18117_v37  ;;  %v18124_v38 = vld [vmem:[#allocation198_spill] sm:$0xff] }
 0x52f   : > { %v8779_v36 = vadd.f32 %v8778_v2, %v8777_v29  ;;  %v18125_v37 = vld [vmem:[#allocation182_spill] sm:$0xff] }
 0x530   : > { %v4740_v52 = vmul.f32 1.442695, %v18118_v55  ;;  %v4501_v41 = vsub.f32 %v18125_v37, %v18124_v38 }
 0x532   : > { %v11566_v16 = vpop.f32.mrb[80].mxu0  ;;  %v11577_v7 = vpop.f32.mrb[106].mxu1  ;;  %12315 = vpow2.f32 %v4740_v52  ;;  %v4754_v19 = vmul.f32 1.442695, %v4501_v41 }
 0x533   : > { %v8625_v35 = vmul.f32 %v11566_v16, %v18040_v24  ;;  %v6081_v44 = vpop.f32.mrb[81].mxu0  ;;  %v6191_v47 = vpop.f32.mrb[107].mxu1  ;;  %v8631_v2 = vmul.f32 %v11577_v7, %v18046_v26  ;;  %12317 = vpow2.f32 %v4746_v5 }
 0x534   : > { %v8624_v29 = vmul.f32 %v6081_v44, %v18041_v57  ;;  %v8630_v27 = vmul.f32 %v6191_v47, %v18047_v61  ;;  %12319 = vpow2.f32 %v4744_v6 }
 0x535   : > { %v8771_v55 = vsel %vm228_vm3, %v8625_v35, 0.0  ;;  %v8782_v44 = vsel %vm228_vm3, %v8631_v2, 0.0  ;;  %12321 = vpow2.f32 %v4754_v19 }
 0x536   : > { %v8770_v16 = vsel %vm228_vm3, %v8624_v29, 0.0  ;;  %v8780_v17 = vsel %vm228_vm3, %v8630_v27, 0.0  ;;  %v15804_v29 = vpop.eup %12309  ;;  %v18128_v27 = vld [vmem:[#allocation183_spill] sm:$0xff] }
 0x537   : > { %v8772_v7 = vadd.f32 %v8771_v55, %v8770_v16  ;;  %v8781_v25 = vadd.f32 %v8780_v17, %v8779_v36  ;;  %18127 = vst [vmem:[#allocation142_spill] sm:$0xff] %v15804_v29  ;;  %v18130_v55 = vsub.f32 %v18128_v27, %v18129_v60  ;;  %v15813_v37 = vpop.eup %12311 }
 0x539   : > { %v15801_v47 = vadd.f32 %v8782_v44, %v8781_v25  ;;  %v4752_v36 = vmul.f32 1.442695, %v18130_v55 }
 0x53a   : > { %v11569_v33 = vpop.f32.mrb[82].mxu0  ;;  %v11590_v35 = vpop.f32.mrb[108].mxu1 }
 0x53b   : > { %18126 = vst [vmem:[#allocation67_spill] sm:$0xff] %v15801_v47  ;;  %v8637_v58 = vmul.f32 %v11590_v35, %v18040_v24  ;;  %v6091_v15 = vpop.f32.mrb[83].mxu0  ;;  %v6381_v38 = vpop.f32.mrb[109].mxu1  ;;  %v8627_v52 = vmul.f32 %v11569_v33, %v18046_v26  ;;  %v5105_v33 = vsel %vm3991_vm4, %v15804_v29, 0.0  ;;  %12323 = vpow2.f32 %v4752_v36 }
 0x53c   : > { %v8626_v25 = vmul.f32 %v6091_v15, %v18047_v61  ;;  %v8636_v2 = vmul.f32 %v6381_v38, %v18041_v57  ;;  %v15820_v15 = vpop.eup %12313  ;;  %12325 = vrcp.f32 %v15486_v30 }
 0x53d   : > { %v8792_v5 = vsel %vm228_vm3, %v8637_v58, 0.0  ;;  %18131 = vst [vmem:[#allocation73_spill] sm:$0xff] %v15820_v15  ;;  %v8775_v58 = vsel %vm228_vm3, %v8627_v52, 0.0  ;;  %v15829_v55 = vpop.eup %12315  ;;  %12327 = vrcp.f32 %v15491_v48 }
 0x53e   : > { %v8773_v41 = vsel %vm228_vm3, %v8626_v25, 0.0  ;;  %v8791_v16 = vsel %vm228_vm3, %v8636_v2, 0.0  ;;  %v11582_v17 = vpop.f32.mrb[84].mxu0  ;;  %12329 = vrcp.f32 %v15587_v34 }
 0x53f   : > { %v8774_v6 = vadd.f32 %v8773_v41, %v8772_v7  ;;  %v8793_v44 = vadd.f32 %v8792_v5, %v8791_v16  ;;  %v8633_v35 = vmul.f32 %v11582_v17, %v18040_v24  ;;  %v6281_v27 = vpop.f32.mrb[85].mxu0  ;;  %v5102_v7 = vsel %vm3991_vm4, %v15813_v37, 0.0  ;;  %v15834_v17 = vpop.eup %12317 }
 0x540   : > { %v8632_v19 = vmul.f32 %v6281_v27, %v18041_v57  ;;  %5106 = vadd.xlane.f32.xlu0 %v5105_v33  ;;  %v5117_v16 = vsel %vm3991_vm4, %v15820_v15, 0.0  ;;  %18133 = vst [vmem:[#allocation110_spill] sm:$0xff] %v15834_v17  ;;  %12331 = vrcp.f32 %v15579_v51 }
 0x541   : > { %v15824_v38 = vadd.f32 %v8775_v58, %v8774_v6  ;;  %v8785_v60 = vsel %vm228_vm3, %v8633_v35, 0.0  ;;  %v15840_v58 = vpop.eup %12319  ;;  %12333 = vrcp.f32 %v15584_v45 }
 0x542   : > { %v8784_v25 = vsel %vm228_vm3, %v8632_v19, 0.0  ;;  %5103 = vadd.xlane.f32.xlu1 %v5102_v7  ;;  %v11585_v2 = vpop.f32.mrb[86].mxu0  ;;  %v11593_v5 = vpop.f32.mrb[110].mxu1  ;;  %v5114_v19 = vsel %vm3991_vm4, %v15829_v55, 0.0  ;;  %12335 = vrcp.f32 %v15601_v4 }
 0x543   : > { %18132 = vst [vmem:[#allocation97_spill] sm:$0xff] %v15824_v38  ;;  %v8786_v36 = vadd.f32 %v8785_v60, %v8784_v25  ;;  %v6291_v41 = vpop.f32.mrb[87].mxu0  ;;  %v6391_v52 = vpop.f32.mrb[111].mxu1  ;;  %v8635_v6 = vmul.f32 %v11585_v2, %v18046_v26  ;;  %v8639_v35 = vmul.f32 %v11593_v5, %v18046_v26  ;;  %12337 = vrcp.f32 %v15575_v59 }
 0x544   : > { %v8634_v27 = vmul.f32 %v6291_v41, %v18047_v61  ;;  %v8638_v33 = vmul.f32 %v6391_v52, %v18047_v61  ;;  %5118 = vadd.xlane.f32.xlu0 %v5117_v16  ;;  %v5123_v41 = vsel %vm3991_vm4, %v15834_v17, 0.0  ;;  %v15849_v52 = vpop.eup %12321  ;;  %12339 = vrcp.f32 %v15595_v21 }
 0x545   : > { %18134 = vst [vmem:[#allocation91_spill] sm:$0xff] %v15849_v52  ;;  %v8789_v16 = vsel %vm228_vm3, %v8635_v6, 0.0  ;;  %v8796_v15 = vsel %vm228_vm3, %v8639_v35, 0.0 }
 0x546   : > { %v8787_v60 = vsel %vm228_vm3, %v8634_v27, 0.0  ;;  %v8794_v7 = vsel %vm228_vm3, %v8638_v33, 0.0  ;;  %5115 = vadd.xlane.f32.xlu1 %v5114_v19  ;;  %v11598_v25 = vpop.f32.mrb[88].mxu0 }
 0x547   : > { %v8788_v47 = vadd.f32 %v8787_v60, %v8786_v36  ;;  %v8795_v2 = vadd.f32 %v8794_v7, %v8793_v44  ;;  %v8641_v5 = vmul.f32 %v11598_v25, %v18040_v24  ;;  %v6481_v38 = vpop.f32.mrb[89].mxu0  ;;  %v5120_v36 = vsel %vm3991_vm4, %v15840_v58, 0.0  ;;  %v15862_v25 = vpop.eup %12323 }
 0x548   : > { %v8640_v27 = vmul.f32 %v6481_v38, %v18041_v57  ;;  %v11606_v29 = vpop.f32.mrb[112].mxu1  ;;  %5124 = vadd.xlane.f32.xlu0 %v5123_v41  ;;  %18137 = vst [vmem:[#allocation190_spill] sm:$0xff] %v15862_v25 }
 0x549   : > { %v15856_v44 = vadd.f32 %v8789_v16, %v8788_v47  ;;  %v15858_v33 = vadd.f32 %v8796_v15, %v8795_v2  ;;  %v8799_v19 = vsel %vm228_vm3, %v8641_v5, 0.0  ;;  %v8645_v60 = vmul.f32 %v11606_v29, %v18040_v24  ;;  %v6581_v7 = vpop.f32.mrb[113].mxu1 }
 0x54a   : > { %v8798_v6 = vsel %vm228_vm3, %v8640_v27, 0.0  ;;  %v8644_v38 = vmul.f32 %v6581_v7, %v18041_v57  ;;  %5121 = vadd.xlane.f32.xlu1 %v5120_v36  ;;  %v11601_v35 = vpop.f32.mrb[90].mxu0  ;;  %v5135_v15 = vsel %vm3991_vm4, %v15849_v52, 0.0 }
 0x54b   : > { %18135 = vst [vmem:[#allocation80_spill] sm:$0xff] %v15856_v44  ;;  %18136 = vst [vmem:[#allocation68_spill] sm:$0xff] %v15858_v33  ;;  %v8800_v41 = vadd.f32 %v8799_v19, %v8798_v6  ;;  %v8806_v17 = vsel %vm228_vm3, %v8645_v60, 0.0  ;;  %v6491_v47 = vpop.f32.mrb[91].mxu0  ;;  %v15867_v16 = vpop.xlane.xlu0 %5058  ;;  %v8643_v2 = vmul.f32 %v11601_v35, %v18046_v26  ;;  %v5132_v60 = vsel %vm3991_vm4, %v15862_v25, 0.0  ;;  %v18141_v25 = vld [vmem:[#allocation134_spill] sm:$0xff] }
 0x54c   : > { %v8805_v29 = vsel %vm228_vm3, %v8644_v38, 0.0  ;;  %v8642_v5 = vmul.f32 %v6491_v47, %v18047_v61  ;;  %v11609_v27 = vpop.f32.mrb[114].mxu1  ;;  %5136 = vadd.xlane.f32.xlu0 %v5135_v15 }
 0x54d   : > { %v8807_v7 = vadd.f32 %v8806_v17, %v8805_v29  ;;  %v15874_v36 = vpop.xlane.xlu1 %5055  ;;  %v6591_v19 = vpop.f32.mrb[115].mxu1  ;;  %v8647_v33 = vmul.f32 %v11609_v27, %v18046_v26  ;;  %v8803_v30 = vsel %vm228_vm3, %v8643_v2, 0.0 }
 0x54e   : > { %v8801_v6 = vsel %vm228_vm3, %v8642_v5, 0.0  ;;  %v8646_v38 = vmul.f32 %v6591_v19, %v18047_v61  ;;  %5133 = vadd.xlane.f32.xlu1 %v5132_v60  ;;  %v11614_v35 = vpop.f32.mrb[92].mxu0 }
 0x54f   : > { %v8802_v47 = vadd.f32 %v8801_v6, %v8800_v41  ;;  %v8649_v17 = vmul.f32 %v11614_v35, %v18040_v24  ;;  %v6681_v15 = vpop.f32.mrb[93].mxu0  ;;  %v15884_v29 = vpop.xlane.xlu0 %5070  ;;  %v8810_v34 = vsel %vm228_vm3, %v8647_v33, 0.0 }
 0x550   : > { %v8808_v5 = vsel %vm228_vm3, %v8646_v38, 0.0  ;;  %v8648_v27 = vmul.f32 %v6681_v15, %v18041_v57  ;;  %v11622_v44 = vpop.f32.mrb[116].mxu1 }
 0x551   : > { %v15890_v19 = vadd.f32 %v8803_v30, %v8802_v47  ;;  %v8809_v60 = vadd.f32 %v8808_v5, %v8807_v7  ;;  %v8813_v48 = vsel %vm228_vm3, %v8649_v17, 0.0  ;;  %v8653_v41 = vmul.f32 %v11622_v44, %v18040_v24  ;;  %v15894_v6 = vpop.xlane.xlu1 %5067  ;;  %v6781_v35 = vpop.f32.mrb[117].mxu1 }
 0x552   : > { %v8812_v2 = vsel %vm228_vm3, %v8648_v27, 0.0  ;;  %v8652_v38 = vmul.f32 %v6781_v35, %v18041_v57  ;;  %v11617_v15 = vpop.f32.mrb[94].mxu0 }
 0x553   : > { %18138 = vst [vmem:[#allocation144_spill] sm:$0xff] %v15890_v19  ;;  %v15901_v47 = vadd.f32 %v8810_v34, %v8809_v60  ;;  %v8814_v7 = vadd.f32 %v8813_v48, %v8812_v2  ;;  %v8820_v17 = vsel %vm228_vm3, %v8653_v41, 0.0  ;;  %v6691_v44 = vpop.f32.mrb[95].mxu0  ;;  %v15904_v30 = vpop.xlane.xlu0 %5076  ;;  %v8651_v33 = vmul.f32 %v11617_v15, %v18046_v26 }
 0x554   : > { %v8819_v51 = vsel %vm228_vm3, %v8652_v38, 0.0  ;;  %v8650_v5 = vmul.f32 %v6691_v44, %v18047_v61  ;;  %v11625_v27 = vpop.f32.mrb[118].mxu1  ;;  %v12326_v38 = vpop.eup %12325 }
 0x555   : > { %18139 = vst [vmem:[#allocation186_spill] sm:$0xff] %v15901_v47  ;;  %v8821_v45 = vadd.f32 %v8820_v17, %v8819_v51  ;;  %v15911_v60 = vpop.xlane.xlu1 %5073  ;;  %v6791_v48 = vpop.f32.mrb[119].mxu1  ;;  %v8655_v35 = vmul.f32 %v11625_v27, %v18046_v26  ;;  %v8817_v15 = vsel %vm228_vm3, %v8651_v33, 0.0 }
 0x556   : > { %v8815_v41 = vsel %vm228_vm3, %v8650_v5, 0.0  ;;  %v8654_v4 = vmul.f32 %v6791_v48, %v18047_v61  ;;  %v12328_v17 = vpop.eup %12327 }
 0x557   : > { %v8816_v34 = vadd.f32 %v8815_v41, %v8814_v7  ;;  %v15917_v2 = vpop.xlane.xlu0 %5088  ;;  %v12330_v21 = vpop.eup %12329  ;;  %v8824_v5 = vsel %vm228_vm3, %v8655_v35, 0.0  ;;  %v18140_v41 = vld [vmem:[#allocation145_spill] sm:$0xff]  ;;  %v18142_v35 = vld [vmem:[#allocation52_spill] sm:$0xff] }
 0x558   : > { %v8822_v59 = vsel %vm228_vm3, %v8654_v4, 0.0  ;;  %v12332_v7 = vpop.eup %12331  ;;  %v5315_v19 = vmul.f32 %v12328_v17, %v18140_v41  ;;  %v18148_v41 = vld [vmem:[#allocation104_spill] sm:$0xff] }
 0x559   : > { %v15921_v44 = vadd.f32 %v8817_v15, %v8816_v34  ;;  %v8823_v51 = vadd.f32 %v8822_v59, %v8821_v45  ;;  %v15923_v47 = vpop.xlane.xlu1 %5085  ;;  %v12334_v52 = vpop.eup %12333  ;;  %v5307_v34 = vmul.f32 %v12326_v38, %v18141_v25  ;;  %v5317_v45 = vmul.f32 %v12330_v21, %v15264_v40  ;;  %v18143_v40 = vld [vmem:[#allocation49_spill] sm:$0xff]  ;;  %v18146_v21 = vld [vmem:[#allocation86_spill] sm:$0xff] }
 0x55a   : > { %v12336_v4 = vpop.eup %12335  ;;  %v5309_v59 = vmul.f32 %v12332_v7, %v15252_v0 }
 0x55b   : > { %v15926_v27 = vadd.f32 %v8824_v5, %v8823_v51  ;;  %v7501_v48 = vpop.permute.xlu0 %7500  ;;  %v12338_v15 = vpop.eup %12337  ;;  %v5319_v51 = vmul.f32 %v12334_v52, %v15260_v28  ;;  %v5329_v25 = vmul.f32 %v12336_v4, %v15287_v39  ;;  %v18144_v28 = vld [vmem:[#allocation85_spill] sm:$0xff]  ;;  %v18145_v52 = vld [vmem:[#allocation175_spill] sm:$0xff] }
 0x55c   : > { %11682 = vmatprep.subr.mxu1 %v7501_v48  ;;  %v12340_v17 = vpop.eup %12339  ;;  %v4499_v38 = vsub.f32 %v18145_v52, %v18144_v28  ;;  %v18147_v39 = vld [vmem:[#allocation177_spill] sm:$0xff] }
 0x55d   : > { %v7401_v33 = vpop.permute.xlu1 %7400  ;;  %11683 = vmatpush3.msra.mxu1 %v7501_v48  ;;  %v5321_v0 = vmul.f32 %v12340_v17, %v15274_v56  ;;  %v4498_v5 = vsub.f32 %v18147_v39, %v18146_v21 }
 0x55e   : > { %11674 = vmatprep.subr.mxu0 %v7401_v33  ;;  %11685 = vmatmul.mubr.msk.f32.vlgmr.msra.gmra.mrb[132].mxu1 %vm3991_vm4, %v5315_v19  ;;  %v5311_v19 = vmul.f32 %v12338_v15, %v15243_v32  ;;  %v4750_v7 = vmul.f32 1.442695, %v4499_v38 }
 0x55f   : > { %7800 = vrot.lane.b32.xlu1 %v18142_v35, %s12566_s7  ;;  %11675 = vmatpush3.msra.mxu0 %v7401_v33  ;;  %v18149_v33 = vld [vmem:[#allocation184_spill] sm:$0xff] }
 0x560   : > { %11677 = vmatmul.mubr.msk.f32.vlgmr.msra.gmra.mrb[108].mxu0 %vm3991_vm4, %v5307_v34  ;;  %11687 = vmatprep.mubr.msk.f32.mxu1 %vm3991_vm4, %v5317_v45  ;;  %v4503_v4 = vsub.f32 %v18149_v33, %v18148_v41  ;;  %12341 = vpow2.f32 %v4750_v7  ;;  %v18150_v33 = vld [vmem:[#allocation185_spill] sm:$0xff] }
 0x561   : > { %11679 = vmatprep.mubr.msk.f32.mxu0 %vm3991_vm4, %v5309_v59  ;;  %v4748_v59 = vmul.f32 1.442695, %v4498_v5 }
 0x562   : > { %7900 = vrot.lane.b32.xlu0 %v18143_v40, %s12566_s7  ;;  %11688 = vmatmul.mubr.msk.f32.gmra.mrb[134].mxu1 %vm3991_vm4, %v5319_v51 }
 0x563   : > { %11700 = vmatprep.mubr.msk.f32.mxu1 %vm3991_vm4, %v5329_v25  ;;  %12343 = vpow2.f32 %v4748_v59 }
 0x564   : > { %11680 = vmatmul.mubr.msk.f32.gmra.mrb[110].mxu0 %vm3991_vm4, %v5311_v19 }
 0x565   : > { %11692 = vmatprep.mubr.msk.f32.mxu0 %vm3991_vm4, %v5321_v0  ;;  %v4758_v0 = vmul.f32 1.442695, %v4503_v4 }
 0x567   : > { %12345 = vpow2.f32 %v4758_v0 }
 0x56a   : > { %v15977_v59 = vpop.eup %12341 }
 0x56b   : > { %v5129_v0 = vsel %vm3991_vm4, %v15977_v59, 0.0 }
 0x56e   : > { %v11638_v48 = vpop.f32.mrb[120].mxu1 }
 0x56f   : > { %v8661_v32 = vmul.f32 %v11638_v48, %v18040_v24  ;;  %v11630_v34 = vpop.f32.mrb[96].mxu0  ;;  %v6981_v45 = vpop.f32.mrb[121].mxu1 }
 0x570   : > { %v8657_v56 = vmul.f32 %v11630_v34, %v18040_v24  ;;  %v8660_v15 = vmul.f32 %v6981_v45, %v18041_v57  ;;  %v6881_v35 = vpop.f32.mrb[97].mxu0 }
 0x571   : > { %v8834_v17 = vsel %vm228_vm3, %v8661_v32, 0.0  ;;  %v8656_v51 = vmul.f32 %v6881_v35, %v18041_v57  ;;  %v18151_v32 = vld [vmem:[#allocation114_spill] sm:$0xff] }
 0x572   : > { %v8827_v25 = vsel %vm228_vm3, %v8657_v56, 0.0  ;;  %v8833_v40 = vsel %vm228_vm3, %v8660_v15, 0.0  ;;  %v11641_v19 = vpop.f32.mrb[122].mxu1  ;;  %v18152_v34 = vsub.f32 %v18150_v33, %v18151_v32 }
 0x573   : > { %v8835_v28 = vadd.f32 %v8834_v17, %v8833_v40  ;;  %v8826_v52 = vsel %vm228_vm3, %v8656_v51, 0.0  ;;  %v11633_v38 = vpop.f32.mrb[98].mxu0  ;;  %v6991_v21 = vpop.f32.mrb[123].mxu1  ;;  %v8663_v48 = vmul.f32 %v11641_v19, %v18046_v26 }
 0x574   : > { %v8828_v39 = vadd.f32 %v8827_v25, %v8826_v52  ;;  %v8662_v5 = vmul.f32 %v6991_v21, %v18047_v61  ;;  %v6891_v41 = vpop.f32.mrb[99].mxu0  ;;  %v4756_v45 = vmul.f32 1.442695, %v18152_v34  ;;  %v8659_v56 = vmul.f32 %v11633_v38, %v18046_v26  ;;  %v15979_v52 = vpop.eup %12343 }
 0x575   : > { %v8658_v7 = vmul.f32 %v6891_v41, %v18047_v61  ;;  %v8838_v17 = vsel %vm228_vm3, %v8663_v48, 0.0  ;;  %v5126_v38 = vsel %vm3991_vm4, %v15979_v52, 0.0 }
 0x576   : > { %v8836_v4 = vsel %vm228_vm3, %v8662_v5, 0.0  ;;  %12347 = vpow2.f32 %v4756_v45  ;;  %v8831_v25 = vsel %vm228_vm3, %v8659_v56, 0.0 }
 0x577   : > { %v8837_v15 = vadd.f32 %v8836_v4, %v8835_v28  ;;  %v8829_v35 = vsel %vm228_vm3, %v8658_v7, 0.0  ;;  %v15983_v28 = vpop.eup %12345  ;;  %12349 = vrcp.f32 %v15592_v22  ;;  %v18153_v22 = vld [vmem:[#allocation58_spill] sm:$0xff] }
 0x578   : > { %v8830_v51 = vadd.f32 %v8829_v35, %v8828_v39  ;;  %v5141_v39 = vsel %vm3991_vm4, %v15983_v28, 0.0  ;;  %12351 = vrcp.f32 %v15599_v53 }
 0x579   : > { %v15973_v40 = vadd.f32 %v8838_v17, %v8837_v15  ;;  %12353 = vrcp.f32 %v15706_v9 }
 0x57a   : > { %v15975_v19 = vadd.f32 %v8831_v25, %v8830_v51  ;;  %12355 = vrcp.f32 %v15719_v63  ;;  %v18156_v25 = vld [vmem:[#allocation48_spill] sm:$0xff] }
 0x57b   : > { %12357 = vrcp.f32 %v15701_v11  ;;  %v18154_v11 = vld [vmem:[#allocation57_spill] sm:$0xff] }
 0x57c   : > { %12359 = vrcp.f32 %v15713_v23  ;;  %v18155_v23 = vld [vmem:[#allocation60_spill] sm:$0xff] }
 0x57d   : > { %12361 = vrcp.f32 %v15732_v18 }
 0x57e   : > { %12363 = vrcp.f32 %v15739_v46 }
 0x57f   : > { %12365 = vrcp.f32 %v15737_v54 }
 0x580   : > { %v15987_v21 = vpop.eup %12347  ;;  %12367 = vrcp.f32 %v15894_v6 }
 0x581   : > { %5130 = vadd.xlane.f32.xlu0 %v5129_v0  ;;  %v5138_v48 = vsel %vm3991_vm4, %v15987_v21, 0.0  ;;  %v12350_v9 = vpop.eup %12349  ;;  %12369 = vrcp.f32 %v15727_v8 }
 0x582   : > { %v12352_v63 = vpop.eup %12351  ;;  %v5323_v17 = vmul.f32 %v12350_v9, %v15270_v1  ;;  %v18158_v9 = vld [vmem:[#allocation47_spill] sm:$0xff]  ;;  %12371 = vrcp.f32 %v15874_v36 }
 0x583   : > { %5127 = vadd.xlane.f32.xlu1 %v5126_v38  ;;  %v12354_v7 = vpop.eup %12353  ;;  %v5331_v51 = vmul.f32 %v12352_v63, %v15276_v50  ;;  %v18157_v38 = vld [vmem:[#allocation59_spill] sm:$0xff]  ;;  %12373 = vrcp.f32 %v15884_v29 }
 0x584   : > { %v12356_v4 = vpop.eup %12355  ;;  %12375 = vrcp.f32 %v15923_v47 }
 0x585   : > { %5142 = vadd.xlane.f32.xlu0 %v5141_v39  ;;  %v12358_v46 = vpop.eup %12357  ;;  %v5333_v39 = vmul.f32 %v12356_v4, %v15436_v43  ;;  %12377 = vrcp.f32 %v15867_v16 }
 0x586   : > { %v12360_v35 = vpop.eup %12359  ;;  %v5327_v50 = vmul.f32 %v12358_v46, %v15346_v31  ;;  %12379 = vrcp.f32 %v15911_v60 }
 0x587   : > { %5139 = vadd.xlane.f32.xlu1 %v5138_v48  ;;  %v12362_v0 = vpop.eup %12361  ;;  %v5325_v48 = vmul.f32 %v12354_v7, %v15365_v20  ;;  %v5335_v1 = vmul.f32 %v12360_v35, %v15428_v42  ;;  %12381 = vrcp.f32 %v15917_v2 }
 0x588   : > { %v5337_v20 = vmul.f32 %v12362_v0, %v15454_v3 }
 0x58c   : > { %v15993_v5 = vpop.xlane.xlu0 %5082 }
 0x58e   : > { %v15995_v41 = vpop.xlane.xlu1 %5079 }
 0x590   : > { %v15998_v33 = vpop.xlane.xlu0 %5094 }
 0x592   : > { %v16002_v32 = vpop.xlane.xlu1 %5091 }
 0x593   : > { %12383 = vrcp.f32 %v16002_v32 }
 0x594   : > { %v16006_v34 = vpop.xlane.xlu0 %5100  ;;  %12385 = vrcp.f32 %v15904_v30 }
 0x595   : > { %12387 = vrcp.f32 %v15995_v41 }
 0x596   : > { %v16010_v45 = vpop.xlane.xlu1 %5097  ;;  %12389 = vrcp.f32 %v15998_v33 }
 0x598   : > { %8000 = vrot.lane.b32.xlu1 %v18153_v22, %s12566_s7  ;;  %v16015_v53 = vpop.xlane.xlu0 %5112  ;;  %v12364_v22 = vpop.eup %12363 }
 0x599   : > { %v5345_v43 = vmul.f32 %v12364_v22, %v15467_v62  ;;  %v12366_v6 = vpop.eup %12365 }
 0x59a   : > { %v16017_v56 = vpop.xlane.xlu1 %5109  ;;  %v5347_v29 = vmul.f32 %v12366_v6, %v15461_v12 }
 0x59b   : > { %8100 = vrot.lane.b32.xlu0 %v18154_v11, %s12566_s7  ;;  %12391 = vrcp.f32 %v16017_v56  ;;  %v18162_v56 = vld [vmem:[#allocation136_spill] sm:$0xff] }
 0x59c   : > { %8200 = vrot.lane.b32.xlu1 %v18155_v23, %s12566_s7  ;;  %v7701_v18 = vpop.permute.xlu0 %7700  ;;  %12393 = vrcp.f32 %v15993_v5 }
 0x59d   : > { %11698 = vmatprep.subr.mxu1 %v7701_v18  ;;  %12395 = vrcp.f32 %v16010_v45 }
 0x59e   : > { %v7601_v15 = vpop.permute.xlu1 %7600  ;;  %11699 = vmatpush3.msra.mxu1 %v7701_v18  ;;  %12397 = vrcp.f32 %v16006_v34 }
 0x59f   : > { %11690 = vmatprep.subr.mxu0 %v7601_v15  ;;  %8400 = vrot.lane.b32.xlu0 %v18156_v25, %s12566_s7 }
 0x5a0   : > { %8300 = vrot.lane.b32.xlu1 %v18157_v38, %s12566_s7  ;;  %11691 = vmatpush3.msra.mxu0 %v7601_v15 }
 0x5a1   : > { %11701 = vmatmul.mubr.msk.f32.vlgmr.msra.gmra.mrb[136].mxu1 %vm3991_vm4, %v5331_v51  ;;  %11693 = vmatmul.mubr.msk.f32.vlgmr.msra.gmra.mrb[112].mxu0 %vm3991_vm4, %v5323_v17 }
 0x5a2   : > { %11703 = vmatprep.mubr.msk.f32.mxu1 %vm3991_vm4, %v5333_v39  ;;  %11695 = vmatprep.mubr.msk.f32.mxu0 %vm3991_vm4, %v5325_v48 }
 0x5a4   : > { %8500 = vrot.lane.b32.xlu1 %v18158_v9, %s12566_s7  ;;  %s135_s7 = sand.u32 1, %s12553_s10  }
 0x5a5   : > { %11704 = vmatmul.mubr.msk.f32.gmra.mrb[138].mxu1 %vm3991_vm4, %v5335_v1  ;;  %11696 = vmatmul.mubr.msk.f32.gmra.mrb[114].mxu0 %vm3991_vm4, %v5327_v50  ;;  %s10432_s8 = sshll.u32 %s135_s7, 5  ;;  %s16953_s24 = scalar_lea.sflag [#allocation3], %s135_s7 }
 0x5a6   : > { %11716 = vmatprep.mubr.msk.f32.mxu1 %vm3991_vm4, %v5345_v43  ;;  %11708 = vmatprep.mubr.msk.f32.mxu0 %vm3991_vm4, %v5337_v20  ;;  %s137_s14 = scalar_lea.vmem [#allocation2], %s10432_s8 }
 0x5a7   : > { %s10366_s16 = sshll.u32 %s137_s14, 4  ;;  %s16946_s16 = int_to_ptr.vmem [resolvable:$true] %s10366_s16 }
 0x5a8   : > { %s12499_s25 = scalar_lea.vmem %s16946_s16, 512  ;;  %p12506_p0 = scmp.lt.s32.totalorder %s16946_s16, %s12504_s26 }
 0x5a9   : > { %p12500_p11 = scmp.ne.s32.totalorder %s16946_s16, %s12499_s25  ;;  %p12507_p1 = scmp.lt.s32.totalorder %s12505_s27, %s12499_s25 }
 0x5ab   : > { %p12501_p12 = pnand %p12500_p11, %p12623_p5  ;;  %p12508_p2 = por %p12507_p1, %p12506_p0 }
 0x5ad   : > { %p12502_p13 = pneg %p12501_p12 }
 0x5af   : > { %v11654_v63 = vpop.f32.mrb[124].mxu1  ;;  %p12509_p3 = pnand %p12508_p2, %p12502_p13 }
 0x5b0   : > { %v8669_v42 = vmul.f32 %v11654_v63, %v18040_v24  ;;  %v7181_v11 = vpop.f32.mrb[125].mxu1 }
 0x5b1   : > { %v11646_v31 = vpop.f32.mrb[100].mxu0  ;;  %v8668_v7 = vmul.f32 %v7181_v11, %v18041_v57 }
 0x5b2   : > { %v8848_v23 = vsel %vm228_vm3, %v8669_v42, 0.0  ;;  %v8665_v62 = vmul.f32 %v11646_v31, %v18040_v24  ;;  %v7081_v3 = vpop.f32.mrb[101].mxu0 }
 0x5b3   : > { %v8847_v18 = vsel %vm228_vm3, %v8668_v7, 0.0  ;;  %v8664_v4 = vmul.f32 %v7081_v3, %v18041_v57  ;;  %v11657_v46 = vpop.f32.mrb[126].mxu1 }
 0x5b4   : > { %v8841_v15 = vsel %vm228_vm3, %v8665_v62, 0.0  ;;  %v8849_v35 = vadd.f32 %v8848_v23, %v8847_v18  ;;  %v7191_v17 = vpop.f32.mrb[127].mxu1  ;;  %v8671_v25 = vmul.f32 %v11657_v46, %v18046_v26  ;;  %v12368_v46 = vpop.eup %12367  ;;  %12399 = vrcp.f32 %v16015_v53  ;;  %v18163_v53 = vld [vmem:[#allocation94_spill] sm:$0xff] }
 0x5b5   : > { %v8840_v51 = vsel %vm228_vm3, %v8664_v4, 0.0  ;;  %v11649_v0 = vpop.f32.mrb[102].mxu0  ;;  %v8670_v38 = vmul.f32 %v7191_v17, %v18047_v61  ;;  %v5349_v16 = vmul.f32 %v12368_v46, %v15551_v10  ;;  %v18159_v10 = vld [vmem:[#allocation106_spill] sm:$0xff] }
 0x5b6   : > { %v8842_v39 = vadd.f32 %v8841_v15, %v8840_v51  ;;  %v7091_v48 = vpop.f32.mrb[103].mxu0  ;;  %v8667_v22 = vmul.f32 %v11649_v0, %v18046_v26  ;;  %v8852_v43 = vsel %vm228_vm3, %v8671_v25, 0.0  ;;  %v12370_v15 = vpop.eup %12369 }
 0x5b7   : > { %v8850_v1 = vsel %vm228_vm3, %v8670_v38, 0.0  ;;  %v8666_v50 = vmul.f32 %v7091_v48, %v18047_v61  ;;  %v5339_v60 = vmul.f32 %v12370_v15, %v15446_v14  ;;  %v18160_v14 = vld [vmem:[#allocation199_spill] sm:$0xff] }
 0x5b8   : > { %v8851_v9 = vadd.f32 %v8850_v1, %v8849_v35  ;;  %v8845_v11 = vsel %vm228_vm3, %v8667_v22, 0.0  ;;  %v12372_v35 = vpop.eup %12371  ;;  %v18161_v22 = vld [vmem:[#allocation62_spill] sm:$0xff] }
 0x5b9   : > { %v8843_v20 = vsel %vm228_vm3, %v8666_v50, 0.0  ;;  %v12374_v17 = vpop.eup %12373  ;;  %v5341_v0 = vmul.f32 %v12372_v35, %v15543_v13 }
 0x5ba   : > { %v16060_v63 = vadd.f32 %v8852_v43, %v8851_v9  ;;  %v8844_v42 = vadd.f32 %v8843_v20, %v8842_v39  ;;  %v12376_v51 = vpop.eup %12375  ;;  %v5351_v12 = vmul.f32 %v12374_v17, %v15547_v49 }
 0x5bb   : > { %v12378_v25 = vpop.eup %12377  ;;  %v5361_v39 = vmul.f32 %v12376_v51, %v18159_v10 }
 0x5bc   : > { %v16063_v31 = vadd.f32 %v8845_v11, %v8844_v42  ;;  %v12380_v38 = vpop.eup %12379  ;;  %v5343_v48 = vmul.f32 %v12378_v25, %v18160_v14 }
 0x5bd   : > { %v5353_v1 = vmul.f32 %v12380_v38, %v18161_v22  ;;  %v12382_v2 = vpop.eup %12381 }
 0x5be   : > { %v12384_v41 = vpop.eup %12383 }
 0x5bf   : > { %v12386_v33 = vpop.eup %12385 }
 0x5c0   : > { %v12388_v5 = vpop.eup %12387 }
 0x5c1   : > { %v12390_v34 = vpop.eup %12389 }
 0x5cd   : > { %v16065_v7 = vpop.xlane.xlu0 %5106 }
 0x5ce   : > { %12401 = vrcp.f32 %v16065_v7  ;;  %v5365_v7 = vmul.f32 %v12384_v41, %v18163_v53  ;;  %v18174_v53 = vld [vmem:[#allocation190_spill] sm:$0xff] }
 0x5cf   : > { %v16067_v23 = vpop.xlane.xlu1 %5103 }
 0x5d0   : > { %12403 = vrcp.f32 %v16067_v23 }
 0x5d1   : > { %v16070_v62 = vpop.xlane.xlu0 %5118 }
 0x5d3   : > { %v16074_v3 = vpop.xlane.xlu1 %5115 }
 0x5d4   : > { %12405 = vrcp.f32 %v16074_v3 }
 0x5d5   : > { %v16078_v18 = vpop.xlane.xlu0 %5124  ;;  %12407 = vrcp.f32 %v16070_v62  ;;  %v18165_v62 = vld [vmem:[#allocation196_spill] sm:$0xff] }
 0x5d7   : > { %v16082_v4 = vpop.xlane.xlu1 %5121 }
 0x5d8   : > { %12409 = vrcp.f32 %v16082_v4  ;;  %v5357_v4 = vmul.f32 %v12388_v5, %v18165_v62  ;;  %v18172_v5 = vld [vmem:[#allocation142_spill] sm:$0xff]  ;;  %v18177_v62 = vld [vmem:[#allocation91_spill] sm:$0xff] }
 0x5d9   : > { %v16085_v54 = vpop.xlane.xlu0 %5136 }
 0x5db   : > { %v16087_v8 = vpop.xlane.xlu1 %5133 }
 0x5dc   : > { %12411 = vrcp.f32 %v16087_v8 }
 0x5dd   : > { %v7901_v36 = vpop.permute.xlu0 %7900  ;;  %12413 = vrcp.f32 %v16078_v18 }
 0x5de   : > { %11714 = vmatprep.subr.mxu1 %v7901_v36  ;;  %12415 = vrcp.f32 %v16085_v54 }
 0x5df   : > { %v7801_v47 = vpop.permute.xlu1 %7800  ;;  %11715 = vmatpush3.msra.mxu1 %v7901_v36 }
 0x5e0   : > { %11706 = vmatprep.subr.mxu0 %v7801_v47  ;;  %11717 = vmatmul.mubr.msk.f32.vlgmr.msra.gmra.mrb[140].mxu1 %vm3991_vm4, %v5347_v29 }
 0x5e1   : > { %11707 = vmatpush3.msra.mxu0 %v7801_v47  ;;  %11719 = vmatprep.mubr.msk.f32.mxu1 %vm3991_vm4, %v5349_v16 }
 0x5e2   : > { %11709 = vmatmul.mubr.msk.f32.vlgmr.msra.gmra.mrb[116].mxu0 %vm3991_vm4, %v5339_v60 }
 0x5e3   : > { %11711 = vmatprep.mubr.msk.f32.mxu0 %vm3991_vm4, %v5341_v0 }
 0x5e4   : > { %11720 = vmatmul.mubr.msk.f32.gmra.mrb[142].mxu1 %vm3991_vm4, %v5351_v12 }
 0x5e5   : > { %11732 = vmatprep.mubr.msk.f32.mxu1 %vm3991_vm4, %v5361_v39 }
 0x5e6   : > { %11712 = vmatmul.mubr.msk.f32.gmra.mrb[118].mxu0 %vm3991_vm4, %v5343_v48 }
 0x5e7   : > { %11724 = vmatprep.mubr.msk.f32.mxu0 %vm3991_vm4, %v5353_v1 }
 0x5f0   : > { %v11670_v13 = vpop.f32.mrb[128].mxu1 }
 0x5f1   : > { %v8677_v50 = vmul.f32 %v11670_v13, %v18040_v24  ;;  %v7381_v49 = vpop.f32.mrb[129].mxu1 }
 0x5f2   : > { %v11662_v9 = vpop.f32.mrb[104].mxu0  ;;  %v8676_v43 = vmul.f32 %v7381_v49, %v18041_v57 }
 0x5f3   : > { %v8862_v20 = vsel %vm228_vm3, %v8677_v50, 0.0  ;;  %v8673_v42 = vmul.f32 %v11662_v9, %v18040_v24  ;;  %v7281_v11 = vpop.f32.mrb[105].mxu0 }
 0x5f4   : > { %v8861_v6 = vsel %vm228_vm3, %v8676_v43, 0.0  ;;  %v8672_v46 = vmul.f32 %v7281_v11, %v18041_v57  ;;  %v11673_v15 = vpop.f32.mrb[130].mxu1  ;;  %v5363_v43 = vmul.f32 %v12382_v2, %v18162_v56 }
 0x5f5   : > { %v8855_v36 = vsel %vm228_vm3, %v8673_v42, 0.0  ;;  %v8863_v35 = vadd.f32 %v8862_v20, %v8861_v6  ;;  %v7391_v29 = vpop.f32.mrb[131].mxu1  ;;  %v8679_v47 = vmul.f32 %v11673_v15, %v18046_v26  ;;  %v12392_v20 = vpop.eup %12391  ;;  %v18164_v42 = vld [vmem:[#allocation109_spill] sm:$0xff] }
 0x5f6   : > { %v8854_v17 = vsel %vm228_vm3, %v8672_v46, 0.0  ;;  %v11665_v16 = vpop.f32.mrb[106].mxu0  ;;  %v8678_v51 = vmul.f32 %v7391_v29, %v18047_v61  ;;  %v5355_v23 = vmul.f32 %v12386_v33, %v18164_v42  ;;  %v12394_v3 = vpop.eup %12393  ;;  %v18166_v6 = vld [vmem:[#allocation149_spill] sm:$0xff]  ;;  %v18168_v29 = vld [vmem:[#allocation138_spill] sm:$0xff] }
 0x5f7   : > { %v8856_v60 = vadd.f32 %v8855_v36, %v8854_v17  ;;  %v7291_v25 = vpop.f32.mrb[107].mxu0  ;;  %v8675_v0 = vmul.f32 %v11665_v16, %v18046_v26  ;;  %v8866_v39 = vsel %vm228_vm3, %v8679_v47, 0.0  ;;  %v12396_v11 = vpop.eup %12395  ;;  %v5367_v46 = vmul.f32 %v12390_v34, %v18166_v6  ;;  %v18167_v36 = vld [vmem:[#allocation151_spill] sm:$0xff]  ;;  %v18169_v16 = vld [vmem:[#allocation200_spill] sm:$0xff] }
 0x5f8   : > { %v8864_v38 = vsel %vm228_vm3, %v8678_v51, 0.0  ;;  %v8674_v12 = vmul.f32 %v7291_v25, %v18047_v61  ;;  %v12398_v15 = vpop.eup %12397  ;;  %v5359_v17 = vmul.f32 %v12394_v3, %v18168_v29  ;;  %v5369_v51 = vmul.f32 %v12396_v11, %v18169_v16  ;;  %v179_v25 = vld [vmem:[%s16995_s1 + $0x10] sm:$0xff] }
 0x5f9   : > { %v8865_v10 = vadd.f32 %v8864_v38, %v8863_v35  ;;  %v8859_v1 = vsel %vm228_vm3, %v8675_v0, 0.0  ;;  %v5377_v35 = vmul.f32 %v12392_v20, %v18167_v36  ;;  %v12400_v18 = vpop.eup %12399  ;;  %v180_v0 = vld [vmem:[%s16995_s1 + $0x18] sm:$0xff] }
 0x5fa   : > { %v8857_v14 = vsel %vm228_vm3, %v8674_v12, 0.0  ;;  %v12402_v47 = vpop.eup %12401  ;;  %v11850_v2 = vpack.c.bf16 %v180_v0, %v179_v25 }
 0x5fb   : > { %v16120_v48 = vadd.f32 %v8866_v39, %v8865_v10  ;;  %v8858_v22 = vadd.f32 %v8857_v14, %v8856_v60  ;;  %v12404_v60 = vpop.eup %12403  ;;  %v18170_v39 = vld [vmem:[#allocation89_spill] sm:$0xff]  ;;  %v5375_v56 = vmul.f32 %v12402_v47, %v18172_v5  ;;  %v18180_v47 = vld [vmem:[#allocation140_spill] sm:$0xff] }
 0x5fc   : > { %v12406_v38 = vpop.eup %12405  ;;  %v5371_v14 = vmul.f32 %v12398_v15, %v18170_v39 }
 0x5fd   : > { %v16123_v13 = vadd.f32 %v8859_v1, %v8858_v22  ;;  %v12408_v10 = vpop.eup %12407  ;;  %v18171_v22 = vld [vmem:[#allocation96_spill] sm:$0xff] }
 0x5fe   : > { %v5379_v1 = vmul.f32 %v12400_v18, %v18171_v22 }
 0x60e   : > { %v5131_v50 = vpop.xlane.xlu0 %5130 }
 0x610   : > { %v5128_v49 = vpop.xlane.xlu1 %5127 }
 0x611   : > { %12417 = vrcp.f32 %v5128_v49  ;;  %v5373_v49 = vmul.f32 %v12404_v60, %v15813_v37  ;;  %v18173_v37 = vld [vmem:[#allocation73_spill] sm:$0xff] }
 0x612   : > { %v5143_v9 = vpop.xlane.xlu0 %5142 }
 0x614   : > { %v5140_v30 = vpop.xlane.xlu1 %5139 }
 0x615   : > { %12419 = vrcp.f32 %v5140_v30 }
 0x616   : > { %v8101_v32 = vpop.permute.xlu0 %8100  ;;  %12421 = vrcp.f32 %v5131_v50  ;;  %v12410_v50 = vpop.eup %12409 }
 0x617   : > { %11730 = vmatprep.subr.mxu1 %v8101_v32  ;;  %12423 = vrcp.f32 %v5143_v9  ;;  %v12412_v30 = vpop.eup %12411  ;;  %v5381_v9 = vmul.f32 %v12406_v38, %v15829_v55 }
 0x618   : > { %v8001_v45 = vpop.permute.xlu1 %8000  ;;  %11731 = vmatpush3.msra.mxu1 %v8101_v32  ;;  %v12414_v41 = vpop.eup %12413 }
 0x619   : > { %11722 = vmatprep.subr.mxu0 %v8001_v45  ;;  %11733 = vmatmul.mubr.msk.f32.vlgmr.msra.gmra.mrb[144].mxu1 %vm3991_vm4, %v5363_v43  ;;  %v12416_v32 = vpop.eup %12415  ;;  %v5383_v43 = vmul.f32 %v12408_v10, %v18173_v37  ;;  %v18184_v37 = vld [vmem:[#allocation97_spill] sm:$0xff] }
 0x61a   : > { %11723 = vmatpush3.msra.mxu0 %v8001_v45  ;;  %11735 = vmatprep.mubr.msk.f32.mxu1 %vm3991_vm4, %v5365_v7  ;;  %v8401_v54 = vpop.permute.xlu0 %8400  ;;  %v5385_v45 = vmul.f32 %v12410_v50, %v15840_v58  ;;  %v5393_v7 = vmul.f32 %v12412_v30, %v18174_v53  ;;  %v18182_v50 = vld [vmem:[#allocation66_spill] sm:$0xff]  ;;  %v18186_v53 = vld [vmem:[#allocation80_spill] sm:$0xff] }
 0x61b   : > { %11725 = vmatmul.mubr.msk.f32.vlgmr.msra.gmra.mrb[120].mxu0 %vm3991_vm4, %v5355_v23  ;;  %v12418_v34 = vpop.eup %12417  ;;  %v18176_v23 = vld [vmem:[#allocation110_spill] sm:$0xff] }
 0x61c   : > { %v8201_v8 = vpop.permute.xlu1 %8200  ;;  %11727 = vmatprep.mubr.msk.f32.mxu0 %vm3991_vm4, %v5357_v4  ;;  %v5387_v3 = vmul.f32 %v12414_v41, %v18176_v23  ;;  %v5395_v4 = vmul.f32 %v12416_v32, %v18177_v62  ;;  %v5389_v11 = vmul.f32 %v12418_v34, %v15979_v52  ;;  %v18178_v52 = vld [vmem:[#allocation77_spill] sm:$0xff]  ;;  %v18183_v32 = vld [vmem:[#allocation108_spill] sm:$0xff] }
 0x61d   : > { %11738 = vmatprep.subr.mxu0 %v8201_v8  ;;  %11736 = vmatmul.mubr.msk.f32.gmra.mrb[146].mxu1 %vm3991_vm4, %v5367_v46 }
 0x61e   : > { %11739 = vmatpush3.msra.mxu0 %v8201_v8  ;;  %11748 = vmatprep.mubr.msk.f32.mxu1 %vm3991_vm4, %v5377_v35 }
 0x61f   : > { %11728 = vmatmul.mubr.msk.f32.gmra.mrb[122].mxu0 %vm3991_vm4, %v5359_v17  ;;  %11754 = vmatprep.subr.mxu0 %v8401_v54  ;;  %v12420_v20 = vpop.eup %12419 }
 0x620   : > { %v8301_v12 = vpop.permute.xlu1 %8300  ;;  %11740 = vmatprep.mubr.msk.f32.mxu0 %vm3991_vm4, %v5369_v51  ;;  %v12422_v42 = vpop.eup %12421  ;;  %v5397_v6 = vmul.f32 %v12420_v20, %v15987_v21  ;;  %v18188_v20 = vld [vmem:[#allocation144_spill] sm:$0xff] }
 0x621   : > { %11746 = vmatprep.subr.mxu1 %v8301_v12  ;;  %v12424_v58 = vpop.eup %12423  ;;  %v5391_v46 = vmul.f32 %v12422_v42, %v15977_v59  ;;  %v18179_v59 = vld [vmem:[#allocation187_spill] sm:$0xff]  ;;  %v18189_v42 = vld [vmem:[#allocation186_spill] sm:$0xff] }
 0x622   : > { %11747 = vmatpush3.msra.mxu1 %v8301_v12  ;;  %v5399_v15 = vmul.f32 %v12424_v58, %v15983_v28 }
 0x623   : > { %11741 = vmatmul.mubr.msk.f32.vlgmr.msra.gmra.mrb[124].mxu0 %vm3991_vm4, %v5371_v14  ;;  %11749 = vmatmul.mubr.msk.f32.vlgmr.msra.gmra.mrb[148].mxu1 %vm3991_vm4, %v5379_v1  ;;  %v18181_v14 = vld [vmem:[#allocation64_spill] sm:$0xff] }
 0x624   : > { %11755 = vmatpush3.msra.mxu0 %v8401_v54  ;;  %v8501_v33 = vpop.permute.xlu1 %8500  ;;  %11743 = vmatprep.mubr.msk.f32.mxu0 %vm3991_vm4, %v5373_v49 }
 0x625   : > { %11751 = vmatprep.mubr.msk.f32.mxu1 %vm3991_vm4, %v5381_v9  ;;  %11762 = vmatprep.subr.mxu1 %v8501_v33 }
 0x626   : > { %11763 = vmatpush3.msra.mxu1 %v8501_v33  ;;  %11852 = vmatprep.subr.msk.bf16.mxu0 %vm12640_vm2, %v11850_v2 }
 0x627   : > { %11744 = vmatmul.mubr.msk.f32.gmra.mrb[126].mxu0 %vm3991_vm4, %v5375_v56  ;;  %11752 = vmatmul.mubr.msk.f32.gmra.mrb[150].mxu1 %vm3991_vm4, %v5383_v43 }
 0x628   : > { %11756 = vmatprep.mubr.msk.f32.mxu0 %vm3991_vm4, %v5385_v45  ;;  %11764 = vmatprep.mubr.msk.f32.mxu1 %vm3991_vm4, %v5393_v7  ;;  %v18185_v45 = vld [vmem:[#allocation67_spill] sm:$0xff]  ;;  %v18187_v7 = vld [vmem:[#allocation68_spill] sm:$0xff] }
 0x62b   : > { %11757 = vmatmul.mubr.msk.f32.vlgmr.msra.gmra.mrb[128].mxu0 %vm3991_vm4, %v5387_v3  ;;  %11765 = vmatmul.mubr.msk.f32.vlgmr.msra.gmra.mrb[152].mxu1 %vm3991_vm4, %v5395_v4 }
 0x62c   : > { %11759 = vmatprep.mubr.msk.f32.mxu0 %vm3991_vm4, %v5389_v11  ;;  %11767 = vmatprep.mubr.msk.f32.mxu1 %vm3991_vm4, %v5397_v6 }
 0x62d   : > { %11855 = vmatpush3.bf16.msk.msra.mxu0 %vm12640_vm2, %v11850_v2 }
 0x62f   : > { %11760 = vmatmul.mubr.msk.f32.gmra.mrb[130].mxu0 %vm3991_vm4, %v5391_v46  ;;  %11768 = vmatmul.mubr.msk.f32.gmra.mrb[154].mxu1 %vm3991_vm4, %v5399_v15 }
 0x630   : > { %11774 = vmatprep.mubr.msk.f32.mxu0 %vm228_vm3, %v18178_v52 }
 0x631   : > { %v11686_v21 = vpop.f32.mrb[132].mxu1 }
 0x632   : > { %v8685_v8 = vmul.f32 %v11686_v21, %v18040_v24  ;;  %v7581_v36 = vpop.f32.mrb[133].mxu1 }
 0x633   : > { %v11678_v35 = vpop.f32.mrb[108].mxu0  ;;  %v8684_v18 = vmul.f32 %v7581_v36, %v18041_v57  ;;  %11775 = vmatmul.mubr.msk.f32.vlgmr.msra.gmra.mrb[132].mxu0 %vm228_vm3, %v18179_v59 }
 0x634   : > { %v8876_v28 = vsel %vm228_vm3, %v8685_v8, 0.0  ;;  %v8681_v29 = vmul.f32 %v11678_v35, %v18040_v24  ;;  %v7481_v17 = vpop.f32.mrb[109].mxu0  ;;  %11777 = vmatprep.mubr.msk.f32.mxu0 %vm228_vm3, %v18180_v47 }
 0x635   : > { %v8875_v54 = vsel %vm228_vm3, %v8684_v18, 0.0  ;;  %v8680_v16 = vmul.f32 %v7481_v17, %v18041_v57  ;;  %v11689_v51 = vpop.f32.mrb[134].mxu1 }
 0x636   : > { %v8869_v60 = vsel %vm228_vm3, %v8681_v29, 0.0  ;;  %v8877_v25 = vadd.f32 %v8876_v28, %v8875_v54  ;;  %v7591_v0 = vpop.f32.mrb[135].mxu1  ;;  %v8687_v12 = vmul.f32 %v11689_v51, %v18046_v26 }
 0x637   : > { %v8868_v38 = vsel %vm228_vm3, %v8680_v16, 0.0  ;;  %v11681_v10 = vpop.f32.mrb[110].mxu0  ;;  %v8686_v39 = vmul.f32 %v7591_v0, %v18047_v61  ;;  %11778 = vmatmul.mubr.msk.f32.gmra.mrb[134].mxu0 %vm228_vm3, %v18181_v14 }
 0x638   : > { %v8870_v22 = vadd.f32 %v8869_v60, %v8868_v38  ;;  %v7491_v1 = vpop.f32.mrb[111].mxu0  ;;  %11780 = vmatprep.mubr.msk.f32.mxu0 %vm228_vm3, %v18182_v50  ;;  %v8683_v49 = vmul.f32 %v11681_v10, %v18046_v26  ;;  %v8880_v41 = vsel %vm228_vm3, %v8687_v12, 0.0 }
 0x639   : > { %v8878_v2 = vsel %vm228_vm3, %v8686_v39, 0.0  ;;  %v8682_v30 = vmul.f32 %v7491_v1, %v18047_v61 }
 0x63a   : > { %v8879_v9 = vadd.f32 %v8878_v2, %v8877_v25  ;;  %v8873_v43 = vsel %vm228_vm3, %v8683_v49, 0.0 }
 0x63b   : > { %v8871_v33 = vsel %vm228_vm3, %v8682_v30, 0.0  ;;  %11781 = vmatmul.mubr.msk.f32.gmra.mrb[136].mxu0 %vm228_vm3, %v18183_v32 }
 0x63c   : > { %v8881_v5 = vadd.f32 %v8880_v41, %v8879_v9  ;;  %v8872_v56 = vadd.f32 %v8871_v33, %v8870_v22  ;;  %11783 = vmatprep.mubr.msk.f32.mxu0 %vm228_vm3, %v18184_v37 }
 0x63e   : > { %v8874_v34 = vadd.f32 %v8873_v43, %v8872_v56 }
 0x63f   : > { %11784 = vmatmul.mubr.msk.f32.gmra.mrb[138].mxu0 %vm228_vm3, %v18185_v45 }
 0x640   : > { %11786 = vmatprep.mubr.msk.f32.mxu0 %vm228_vm3, %v18186_v53 }
 0x643   : > { %11787 = vmatmul.mubr.msk.f32.gmra.mrb[140].mxu0 %vm228_vm3, %v18187_v7 }
 0x644   : > { %11789 = vmatprep.mubr.msk.f32.mxu0 %vm228_vm3, %v18188_v20 }
 0x647   : > { %11790 = vmatmul.mubr.msk.f32.gmra.mrb[142].mxu0 %vm228_vm3, %v18189_v42 }
 0x648   : > { %11792 = vmatprep.mubr.msk.f32.mxu0 %vm228_vm3, %v15921_v44 }
 0x64b   : > { %11793 = vmatmul.mubr.msk.f32.gmra.mrb[144].mxu0 %vm228_vm3, %v15926_v27 }
 0x64c   : > { %11795 = vmatprep.mubr.msk.f32.mxu0 %vm228_vm3, %v15975_v19 }
 0x64f   : > { %11796 = vmatmul.mubr.msk.f32.gmra.mrb[146].mxu0 %vm228_vm3, %v15973_v40 }
 0x650   : > { %11798 = vmatprep.mubr.msk.f32.mxu0 %vm228_vm3, %v16063_v31 }
 0x653   : > { %11799 = vmatmul.mubr.msk.f32.gmra.mrb[148].mxu0 %vm228_vm3, %v16060_v63 }
 0x654   : > { %11801 = vmatprep.mubr.msk.f32.mxu0 %vm228_vm3, %v16123_v13 }
 0x657   : > { %11802 = vmatmul.mubr.msk.f32.gmra.mrb[150].mxu0 %vm228_vm3, %v16120_v48 }
 0x658   : > { %11804 = vmatprep.mubr.msk.f32.mxu0 %vm228_vm3, %v8874_v34 }
 0x65b   : > { %11805 = vmatmul.mubr.msk.f32.gmra.mrb[152].mxu0 %vm228_vm3, %v8881_v5 }
 0x674   : > { %v11702_v44 = vpop.f32.mrb[136].mxu1  ;;  %v11694_v27 = vpop.f32.mrb[112].mxu0 }
 0x675   : > { %v8693_v40 = vmul.f32 %v11702_v44, %v18040_v24  ;;  %v8689_v19 = vmul.f32 %v11694_v27, %v18040_v24  ;;  %v7781_v31 = vpop.f32.mrb[137].mxu1  ;;  %v7681_v23 = vpop.f32.mrb[113].mxu0 }
 0x676   : > { %v8692_v63 = vmul.f32 %v7781_v31, %v18041_v57  ;;  %v8688_v3 = vmul.f32 %v7681_v23, %v18041_v57 }
 0x677   : > { %v8890_v13 = vsel %vm228_vm3, %v8693_v40, 0.0  ;;  %v8883_v48 = vsel %vm228_vm3, %v8689_v19, 0.0 }
 0x678   : > { %v8889_v62 = vsel %vm228_vm3, %v8692_v63, 0.0  ;;  %v8882_v4 = vsel %vm228_vm3, %v8688_v3, 0.0  ;;  %v11705_v58 = vpop.f32.mrb[138].mxu1  ;;  %v11697_v11 = vpop.f32.mrb[114].mxu0 }
 0x679   : > { %v8891_v6 = vadd.f32 %v8890_v13, %v8889_v62  ;;  %v8884_v46 = vadd.f32 %v8883_v48, %v8882_v4  ;;  %v7791_v15 = vpop.f32.mrb[139].mxu1  ;;  %v7691_v52 = vpop.f32.mrb[115].mxu0  ;;  %v8695_v21 = vmul.f32 %v11705_v58, %v18046_v26  ;;  %v8691_v8 = vmul.f32 %v11697_v11, %v18046_v26 }
 0x67a   : > { %v8694_v36 = vmul.f32 %v7791_v15, %v18047_v61  ;;  %v8690_v35 = vmul.f32 %v7691_v52, %v18047_v61 }
 0x67b   : > { %v8894_v17 = vsel %vm228_vm3, %v8695_v21, 0.0  ;;  %v8887_v47 = vsel %vm228_vm3, %v8691_v8, 0.0 }
 0x67c   : > { %v8892_v18 = vsel %vm228_vm3, %v8694_v36, 0.0  ;;  %v8885_v59 = vsel %vm228_vm3, %v8690_v35, 0.0 }
 0x67d   : > { %v8893_v28 = vadd.f32 %v8892_v18, %v8891_v6  ;;  %v8886_v29 = vadd.f32 %v8885_v59, %v8884_v46 }
 0x67f   : > { %v8895_v54 = vadd.f32 %v8894_v17, %v8893_v28  ;;  %v8888_v16 = vadd.f32 %v8887_v47, %v8886_v29 }
 0x681   : > { %11807 = vmatprep.mubr.msk.f32.mxu0 %vm228_vm3, %v8888_v16 }
 0x682   : > { %11808 = vmatmul.mubr.msk.f32.gmra.mrb[154].mxu0 %vm228_vm3, %v8895_v54 }
 0x6b3   : > { %v11718_v51 = vpop.f32.mrb[140].mxu1 }
 0x6b4   : > { %v8701_v60 = vmul.f32 %v11718_v51, %v18040_v24  ;;  %v7981_v25 = vpop.f32.mrb[141].mxu1 }
 0x6b5   : > { %v11710_v0 = vpop.f32.mrb[116].mxu0  ;;  %v8700_v38 = vmul.f32 %v7981_v25, %v18041_v57 }
 0x6b6   : > { %v8904_v12 = vsel %vm228_vm3, %v8701_v60, 0.0  ;;  %v8697_v10 = vmul.f32 %v11710_v0, %v18040_v24  ;;  %v7881_v39 = vpop.f32.mrb[117].mxu0 }
 0x6b7   : > { %v8903_v14 = vsel %vm228_vm3, %v8700_v38, 0.0  ;;  %v8696_v22 = vmul.f32 %v7881_v39, %v18041_v57  ;;  %v11721_v1 = vpop.f32.mrb[142].mxu1 }
 0x6b8   : > { %v8897_v50 = vsel %vm228_vm3, %v8697_v10, 0.0  ;;  %v8905_v49 = vadd.f32 %v8904_v12, %v8903_v14  ;;  %v7991_v2 = vpop.f32.mrb[143].mxu1  ;;  %v8703_v9 = vmul.f32 %v11721_v1, %v18046_v26 }
 0x6b9   : > { %v8896_v30 = vsel %vm228_vm3, %v8696_v22, 0.0  ;;  %v11713_v41 = vpop.f32.mrb[118].mxu0  ;;  %v8702_v33 = vmul.f32 %v7991_v2, %v18047_v61 }
 0x6ba   : > { %v8898_v32 = vadd.f32 %v8897_v50, %v8896_v30  ;;  %v7891_v5 = vpop.f32.mrb[119].mxu0  ;;  %v8699_v56 = vmul.f32 %v11713_v41, %v18046_v26  ;;  %v8908_v45 = vsel %vm228_vm3, %v8703_v9, 0.0 }
 0x6bb   : > { %v8906_v37 = vsel %vm228_vm3, %v8702_v33, 0.0  ;;  %v8698_v43 = vmul.f32 %v7891_v5, %v18047_v61 }
 0x6bc   : > { %v8907_v34 = vadd.f32 %v8906_v37, %v8905_v49  ;;  %v8901_v42 = vsel %vm228_vm3, %v8699_v56, 0.0 }
 0x6bd   : > { %v8899_v53 = vsel %vm228_vm3, %v8698_v43, 0.0 }
 0x6be   : > { %v8909_v7 = vadd.f32 %v8908_v45, %v8907_v34  ;;  %v8900_v20 = vadd.f32 %v8899_v53, %v8898_v32 }
 0x6c0   : > { %v8902_v44 = vadd.f32 %v8901_v42, %v8900_v20  ;;  %v18190_v20 = vld [vmem:[#allocation6_spill] sm:$0xff] }
 0x6c1   : > { %v8954_v42 = vsub.s32 6, %v18190_v20 }
 0x6c2   : > { %11810 = vmatprep.mubr.msk.f32.mxu0 %vm228_vm3, %v8902_v44 }
 0x6c3   : > { %11811 = vmatmul.mubr.msk.f32.gmra.mrb[156].mxu0 %vm228_vm3, %v8909_v7 }
 0x6ec   : > { %v11734_v27 = vpop.f32.mrb[144].mxu1 }
 0x6ed   : > { %v8709_v40 = vmul.f32 %v11734_v27, %v18040_v24  ;;  %v8181_v19 = vpop.f32.mrb[145].mxu1 }
 0x6ee   : > { %v11726_v31 = vpop.f32.mrb[120].mxu0  ;;  %v8708_v23 = vmul.f32 %v8181_v19, %v18041_v57 }
 0x6ef   : > { %v8918_v63 = vsel %vm228_vm3, %v8709_v40, 0.0  ;;  %v8705_v3 = vmul.f32 %v11726_v31, %v18040_v24  ;;  %v8081_v13 = vpop.f32.mrb[121].mxu0 }
 0x6f0   : > { %v8917_v48 = vsel %vm228_vm3, %v8708_v23, 0.0  ;;  %v8704_v62 = vmul.f32 %v8081_v13, %v18041_v57  ;;  %v11737_v4 = vpop.f32.mrb[146].mxu1 }
 0x6f1   : > { %v8911_v58 = vsel %vm228_vm3, %v8705_v3, 0.0  ;;  %v8919_v11 = vadd.f32 %v8918_v63, %v8917_v48  ;;  %v8191_v6 = vpop.f32.mrb[147].mxu1  ;;  %v8711_v15 = vmul.f32 %v11737_v4, %v18046_v26 }
 0x6f2   : > { %v8910_v46 = vsel %vm228_vm3, %v8704_v62, 0.0  ;;  %v11729_v52 = vpop.f32.mrb[122].mxu0  ;;  %v8710_v21 = vmul.f32 %v8191_v6, %v18047_v61 }
 0x6f3   : > { %v8912_v8 = vadd.f32 %v8911_v58, %v8910_v46  ;;  %v8091_v36 = vpop.f32.mrb[123].mxu0  ;;  %v8707_v35 = vmul.f32 %v11729_v52, %v18046_v26  ;;  %v8922_v29 = vsel %vm228_vm3, %v8711_v15, 0.0 }
 0x6f4   : > { %v8920_v18 = vsel %vm228_vm3, %v8710_v21, 0.0  ;;  %v8706_v59 = vmul.f32 %v8091_v36, %v18047_v61 }
 0x6f5   : > { %v8921_v28 = vadd.f32 %v8920_v18, %v8919_v11  ;;  %v8915_v12 = vsel %vm228_vm3, %v8707_v35, 0.0 }
 0x6f6   : > { %v8913_v17 = vsel %vm228_vm3, %v8706_v59, 0.0  ;;  %v11742_v47 = vpop.f32.mrb[124].mxu0  ;;  %v11750_v54 = vpop.f32.mrb[148].mxu1 }
 0x6f7   : > { %v8923_v16 = vadd.f32 %v8922_v29, %v8921_v28  ;;  %v8914_v51 = vadd.f32 %v8913_v17, %v8912_v8  ;;  %v8713_v60 = vmul.f32 %v11742_v47, %v18040_v24  ;;  %v8717_v25 = vmul.f32 %v11750_v54, %v18040_v24  ;;  %v8281_v0 = vpop.f32.mrb[125].mxu0  ;;  %v8381_v38 = vpop.f32.mrb[149].mxu1 }
 0x6f8   : > { %v8712_v10 = vmul.f32 %v8281_v0, %v18041_v57  ;;  %v8716_v39 = vmul.f32 %v8381_v38, %v18041_v57 }
 0x6f9   : > { %v8916_v14 = vadd.f32 %v8915_v12, %v8914_v51  ;;  %v8925_v22 = vsel %vm228_vm3, %v8713_v60, 0.0  ;;  %v8932_v1 = vsel %vm228_vm3, %v8717_v25, 0.0 }
 0x6fa   : > { %v8924_v50 = vsel %vm228_vm3, %v8712_v10, 0.0  ;;  %v8931_v49 = vsel %vm228_vm3, %v8716_v39, 0.0  ;;  %v11745_v2 = vpop.f32.mrb[126].mxu0  ;;  %v11753_v30 = vpop.f32.mrb[150].mxu1  ;;  %v18191_v10 = vld [vmem:[#allocation9_spill] sm:$0xff] }
 0x6fb   : > { %v8926_v9 = vadd.f32 %v8925_v22, %v8924_v50  ;;  %v8933_v41 = vadd.f32 %v8932_v1, %v8931_v49  ;;  %v8291_v33 = vpop.f32.mrb[127].mxu0  ;;  %v8391_v32 = vpop.f32.mrb[151].mxu1  ;;  %11813 = vmatprep.mubr.msk.f32.mxu0 %vm228_vm3, %v8916_v14  ;;  %v8715_v5 = vmul.f32 %v11745_v2, %v18046_v26  ;;  %v8719_v56 = vmul.f32 %v11753_v30, %v18046_v26  ;;  %v18192_v14 = vld [vmem:[#allocation7_spill] sm:$0xff] }
 0x6fc   : > { %v8714_v37 = vmul.f32 %v8291_v33, %v18047_v61  ;;  %v8718_v43 = vmul.f32 %v8391_v32, %v18047_v61  ;;  %11814 = vmatmul.mubr.msk.f32.gmra.mrb[158].mxu0 %vm228_vm3, %v8923_v16 }
 0x6fd   : > { %v8929_v63 = vsel %vm228_vm3, %v8715_v5, 0.0  ;;  %v8936_v3 = vsel %vm228_vm3, %v8719_v56, 0.0 }
 0x6fe   : > { %v8927_v34 = vsel %vm228_vm3, %v8714_v37, 0.0  ;;  %v8934_v45 = vsel %vm228_vm3, %v8718_v43, 0.0  ;;  %v11758_v53 = vpop.f32.mrb[128].mxu0  ;;  %v11766_v7 = vpop.f32.mrb[152].mxu1  ;;  %v18194_v37 = vld [vmem:[#allocation11_spill] sm:$0xff] }
 0x6ff   : > { %v8928_v44 = vadd.f32 %v8927_v34, %v8926_v9  ;;  %v8935_v27 = vadd.f32 %v8934_v45, %v8933_v41  ;;  %v8721_v40 = vmul.f32 %v11758_v53, %v18040_v24  ;;  %v8725_v19 = vmul.f32 %v11766_v7, %v18040_v24  ;;  %v8481_v31 = vpop.f32.mrb[129].mxu0  ;;  %v8581_v23 = vpop.f32.mrb[153].mxu1  ;;  %v18193_v41 = vld [vmem:[#allocation14_spill] sm:$0xff] }
 0x700   : > { %v8720_v13 = vmul.f32 %v8481_v31, %v18041_v57  ;;  %v8724_v48 = vmul.f32 %v8581_v23, %v18041_v57  ;;  %v16338_v57 = vld [vmem:[%s16995_s1 + $0x48] sm:$0xff] }
 0x701   : > { %v8930_v62 = vadd.f32 %v8929_v63, %v8928_v44  ;;  %v8937_v4 = vadd.f32 %v8936_v3, %v8935_v27  ;;  %v8939_v58 = vsel %vm228_vm3, %v8721_v40, 0.0  ;;  %v8946_v11 = vsel %vm228_vm3, %v8725_v19, 0.0  ;;  %v18196_v19 = vld [vmem:[#allocation24_spill] sm:$0xff] }
 0x702   : > { %v8938_v6 = vsel %vm228_vm3, %v8720_v13, 0.0  ;;  %v8945_v24 = vsel %vm228_vm3, %v8724_v48, 0.0  ;;  %v11761_v46 = vpop.f32.mrb[130].mxu0  ;;  %v11769_v15 = vpop.f32.mrb[154].mxu1  ;;  %v16341_v35 = vrot.slane %v16338_v57, %v8954_v42  ;;  %v18195_v42 = vld [vmem:[#allocation20_spill] sm:$0xff] }
 0x703   : > { %v8940_v52 = vadd.f32 %v8939_v58, %v8938_v6  ;;  %v8947_v21 = vadd.f32 %v8946_v11, %v8945_v24  ;;  %v8491_v8 = vpop.f32.mrb[131].mxu0  ;;  %v8591_v36 = vpop.f32.mrb[155].mxu1  ;;  %11816 = vmatprep.mubr.msk.f32.mxu0 %vm228_vm3, %v8930_v62  ;;  %v8723_v18 = vmul.f32 %v11761_v46, %v18046_v26  ;;  %v8727_v59 = vmul.f32 %v11769_v15, %v18046_v26  ;;  %v18197_v48 = vld [vmem:[#allocation16_spill] sm:$0xff] }
 0x704   : > { %v8722_v28 = vmul.f32 %v8491_v8, %v18047_v61  ;;  %v8726_v29 = vmul.f32 %v8591_v36, %v18047_v61  ;;  %11817 = vmatmul.mubr.msk.f32.gmra.mrb[160].mxu0 %vm228_vm3, %v8937_v4  ;;  %v18198_v11 = vld [vmem:[#allocation28_spill] sm:$0xff] }
 0x705   : > { %v8943_v0 = vsel %vm228_vm3, %v8723_v18, 0.0  ;;  %v8950_v26 = vsel %vm228_vm3, %v8727_v59, 0.0 }
 0x706   : > { %v8941_v17 = vsel %vm228_vm3, %v8722_v28, 0.0  ;;  %v8948_v47 = vsel %vm228_vm3, %v8726_v29, 0.0  ;;  %v11776_v54 = vpop.f32.mrb[132].mxu0  ;;  %v18200_v28 = vld [vmem:[#allocation32_spill] sm:$0xff] }
 0x707   : > { %v8942_v16 = vadd.f32 %v8941_v17, %v8940_v52  ;;  %v8949_v51 = vadd.f32 %v8948_v47, %v8947_v21  ;;  %v9127_v60 = vadd.f32 %v11776_v54, %v16341_v35  ;;  %v9121_v25 = vpop.f32.mrb[133].mxu0  ;;  %v18199_v21 = vld [vmem:[#allocation22_spill] sm:$0xff] }
 0x708   : > { %v9122_v38 = vadd.f32 %v9121_v25, %v16341_v35  ;;  %v18201_v47 = vld [vmem:[#allocation30_spill] sm:$0xff] }
 0x709   : > { %v8944_v12 = vadd.f32 %v8943_v0, %v8942_v16  ;;  %v8951_v61 = vadd.f32 %v8950_v26, %v8949_v51  ;;  %v16355_v39 = vadd.f32 %v9127_v60, %v18191_v10  ;;  %v18202_v25 = vld [vmem:[#allocation26_spill] sm:$0xff] }
 0x70a   : > { %v16358_v22 = vadd.f32 %v9122_v38, %v18192_v14  ;;  %v11779_v1 = vpop.f32.mrb[134].mxu0 }
 0x70b   : > { %v9137_v50 = vadd.f32 %v11779_v1, %v16341_v35  ;;  %v9131_v49 = vpop.f32.mrb[135].mxu0  ;;  %11819 = vmatprep.mubr.msk.f32.mxu0 %vm228_vm3, %v8944_v12  ;;  %v9315_v2 = vsel %vm228_vm3, %v16355_v39, 0.0  ;;  %v18203_v12 = vld [vmem:[#allocation35_spill] sm:$0xff] }
 0x70c   : > { %v9132_v30 = vadd.f32 %v9131_v49, %v16341_v35  ;;  %9316 = vadd.xlane.f32.xlu1 %v9315_v2  ;;  %11820 = vmatmul.mubr.msk.f32.gmra.mrb[162].mxu0 %vm228_vm3, %v8951_v61  ;;  %v9312_v9 = vsel %vm228_vm3, %v16358_v22, 0.0  ;;  %v18204_v2 = vld [vmem:[#allocation36_spill] sm:$0xff] }
 0x70d   : > { %v16369_v33 = vadd.f32 %v9137_v50, %v18193_v41  ;;  %9313 = vadd.xlane.f32.xlu0 %v9312_v9  ;;  %v18205_v41 = vld [vmem:[#allocation34_spill] sm:$0xff] }
 0x70e   : > { %v11782_v32 = vpop.f32.mrb[136].mxu0  ;;  %v16374_v43 = vadd.f32 %v9132_v30, %v18194_v37 }
 0x70f   : > { %v9141_v5 = vpop.f32.mrb[137].mxu0  ;;  %v9321_v56 = vsel %vm228_vm3, %v16369_v33, 0.0  ;;  %v9147_v34 = vadd.f32 %v11782_v32, %v16341_v35 }
 0x710   : > { %v9142_v27 = vadd.f32 %v9141_v5, %v16341_v35  ;;  %v9318_v40 = vsel %vm228_vm3, %v16374_v43, 0.0 }
 0x711   : > { %9322 = vadd.xlane.f32.xlu0 %v9321_v56  ;;  %v16379_v44 = vadd.f32 %v9147_v34, %v18195_v42 }
 0x712   : > { %v11785_v45 = vpop.f32.mrb[138].mxu0  ;;  %v16391_v62 = vadd.f32 %v9142_v27, %v18197_v48  ;;  %v18207_v27 = vld [vmem:[#allocation37_spill] sm:$0xff]  ;;  %v18208_v48 = vld [vmem:[#allocation40_spill] sm:$0xff] }
 0x713   : > { %v9157_v53 = vadd.f32 %v11785_v45, %v16341_v35  ;;  %v9151_v7 = vpop.f32.mrb[139].mxu0  ;;  %v9327_v58 = vsel %vm228_vm3, %v16379_v44, 0.0 }
 0x714   : > { %v9152_v4 = vadd.f32 %v9151_v7, %v16341_v35  ;;  %v9324_v59 = vsel %vm228_vm3, %v16391_v62, 0.0 }
 0x715   : > { %v16385_v31 = vadd.f32 %v9157_v53, %v18196_v19  ;;  %9319 = vadd.xlane.f32.xlu0 %v9318_v40  ;;  %v18206_v53 = vld [vmem:[#allocation38_spill] sm:$0xff] }
 0x716   : > { %v11788_v23 = vpop.f32.mrb[140].mxu0  ;;  %v16403_v8 = vadd.f32 %v9152_v4, %v18199_v21 }
 0x717   : > { %v9167_v63 = vadd.f32 %v11788_v23, %v16341_v35  ;;  %v9161_v3 = vpop.f32.mrb[141].mxu0  ;;  %v9333_v13 = vsel %vm228_vm3, %v16385_v31, 0.0 }
 0x718   : > { %9334 = vadd.xlane.f32.xlu1 %v9333_v13  ;;  %v9162_v36 = vadd.f32 %v9161_v3, %v16341_v35  ;;  %v9330_v26 = vsel %vm228_vm3, %v16403_v8, 0.0 }
 0x719   : > { %v16397_v6 = vadd.f32 %v9167_v63, %v18198_v11  ;;  %9328 = vadd.xlane.f32.xlu0 %v9327_v58  ;;  %v18209_v11 = vld [vmem:[#allocation39_spill] sm:$0xff] }
 0x71a   : > { %v11791_v24 = vpop.f32.mrb[142].mxu0  ;;  %v16419_v0 = vadd.f32 %v9162_v36, %v18202_v25 }
 0x71b   : > { %v9177_v46 = vadd.f32 %v11791_v24, %v16341_v35  ;;  %v9171_v15 = vpop.f32.mrb[143].mxu0  ;;  %v9339_v52 = vsel %vm228_vm3, %v16397_v6, 0.0 }
 0x71c   : > { %v9172_v18 = vadd.f32 %v9171_v15, %v16341_v35  ;;  %9340 = vadd.xlane.f32.xlu1 %v9339_v52  ;;  %v9336_v49 = vsel %vm228_vm3, %v16419_v0, 0.0 }
 0x71d   : > { %v16410_v29 = vadd.f32 %v9177_v46, %v18200_v28  ;;  %9325 = vadd.xlane.f32.xlu0 %v9324_v59  ;;  %v18210_v59 = vld [vmem:[#allocation10_spill] sm:$0xff] }
 0x71e   : > { %v11794_v17 = vpop.f32.mrb[144].mxu0  ;;  %v16413_v54 = vadd.f32 %v9172_v18, %v18201_v47 }
 0x71f   : > { %v9187_v16 = vadd.f32 %v11794_v17, %v16341_v35  ;;  %v9181_v51 = vpop.f32.mrb[145].mxu0  ;;  %v9345_v60 = vsel %vm228_vm3, %v16410_v29, 0.0  ;;  %v18211_v17 = vld [vmem:[#allocation41_spill] sm:$0xff] }
 0x720   : > { %9346 = vadd.xlane.f32.xlu1 %v9345_v60  ;;  %v9182_v10 = vadd.f32 %v9181_v51, %v16341_v35  ;;  %v9342_v1 = vsel %vm228_vm3, %v16413_v54, 0.0  ;;  %v18212_v60 = vld [vmem:[#allocation8_spill] sm:$0xff] }
 0x721   : > { %9331 = vadd.xlane.f32.xlu0 %v9330_v26  ;;  %v16424_v61 = vadd.f32 %v9187_v16, %v18203_v12 }
 0x722   : > { %v11797_v38 = vpop.f32.mrb[146].mxu0  ;;  %v16436_v32 = vadd.f32 %v9182_v10, %v18205_v41 }
 0x723   : > { %v9191_v14 = vpop.f32.mrb[147].mxu0  ;;  %v9197_v5 = vadd.f32 %v11797_v38, %v16341_v35  ;;  %v9351_v37 = vsel %vm228_vm3, %v16424_v61, 0.0 }
 0x724   : > { %v9192_v50 = vadd.f32 %v9191_v14, %v16341_v35  ;;  %9343 = vadd.xlane.f32.xlu1 %v9342_v1  ;;  %v9348_v63 = vsel %vm228_vm3, %v16436_v32, 0.0  ;;  %v18213_v1 = vld [vmem:[#allocation12_spill] sm:$0xff] }
 0x725   : > { %9337 = vadd.xlane.f32.xlu0 %v9336_v49  ;;  %v16448_v40 = vadd.f32 %v9197_v5, %v18207_v27 }
 0x726   : > { %v16433_v30 = vadd.f32 %v9192_v50, %v18204_v2  ;;  %v11800_v9 = vpop.f32.mrb[148].mxu0 }
 0x727   : > { %v9201_v56 = vpop.f32.mrb[149].mxu0  ;;  %v9207_v19 = vadd.f32 %v11800_v9, %v16341_v35  ;;  %v9357_v21 = vsel %vm228_vm3, %v16448_v40, 0.0 }
 0x728   : > { %v9202_v34 = vadd.f32 %v9201_v56, %v16341_v35  ;;  %9352 = vadd.xlane.f32.xlu1 %v9351_v37  ;;  %v9354_v45 = vsel %vm228_vm3, %v16433_v30, 0.0  ;;  %v18214_v56 = vld [vmem:[#allocation21_spill] sm:$0xff] }
 0x729   : > { %9355 = vadd.xlane.f32.xlu0 %v9354_v45  ;;  %v16460_v24 = vadd.f32 %v9207_v19, %v18209_v11 }
 0x72a   : > { %v16445_v7 = vadd.f32 %v9202_v34, %v18206_v53  ;;  %v11803_v42 = vpop.f32.mrb[150].mxu0  ;;  %v18215_v34 = vld [vmem:[#allocation19_spill] sm:$0xff] }
 0x72b   : > { %v9211_v23 = vpop.f32.mrb[151].mxu0  ;;  %v9217_v46 = vadd.f32 %v11803_v42, %v16341_v35  ;;  %v9363_v16 = vsel %vm228_vm3, %v16460_v24, 0.0 }
 0x72c   : > { %v9212_v3 = vadd.f32 %v9211_v23, %v16341_v35  ;;  %9349 = vadd.xlane.f32.xlu1 %v9348_v63  ;;  %v9360_v13 = vsel %vm228_vm3, %v16445_v7, 0.0 }
 0x72d   : > { %9361 = vadd.xlane.f32.xlu0 %v9360_v13  ;;  %v16473_v47 = vadd.f32 %v9217_v46, %v18211_v17  ;;  %v18218_v17 = vld [vmem:[#allocation15_spill] sm:$0xff] }
 0x72e   : > { %v16457_v4 = vadd.f32 %v9212_v3, %v18208_v48  ;;  %v11806_v58 = vpop.f32.mrb[152].mxu0 }
 0x72f   : > { %v9227_v15 = vadd.f32 %v11806_v58, %v16341_v35  ;;  %v9221_v52 = vpop.f32.mrb[153].mxu0  ;;  %v9369_v26 = vsel %vm228_vm3, %v16473_v47, 0.0 }
 0x730   : > { %v9222_v36 = vadd.f32 %v9221_v52, %v16341_v35  ;;  %9358 = vadd.xlane.f32.xlu1 %v9357_v21  ;;  %v9366_v18 = vsel %vm228_vm3, %v16457_v4, 0.0  ;;  %v18216_v52 = vld [vmem:[#allocation25_spill] sm:$0xff] }
 0x731   : > { %v16470_v28 = vadd.f32 %v9227_v15, %v18210_v59  ;;  %9367 = vadd.xlane.f32.xlu0 %v9366_v18 }
 0x732   : > { %v16480_v25 = vadd.f32 %v9222_v36, %v18212_v60  ;;  %v18217_v36 = vld [vmem:[#allocation23_spill] sm:$0xff] }
 0x733   : > { %v9375_v51 = vsel %vm228_vm3, %v16470_v28, 0.0 }
 0x734   : > { %9364 = vadd.xlane.f32.xlu1 %v9363_v16  ;;  %v9372_v38 = vsel %vm228_vm3, %v16480_v25, 0.0 }
 0x735   : > { %9376 = vadd.xlane.f32.xlu0 %v9375_v51 }
 0x738   : > { %9370 = vadd.xlane.f32.xlu1 %v9369_v26 }
 0x739   : > { %9373 = vadd.xlane.f32.xlu0 %v9372_v38 }
 0x755   : > { %v11809_v12 = vpop.f32.mrb[154].mxu0 }
 0x756   : > { %v9231_v10 = vpop.f32.mrb[155].mxu0  ;;  %v9237_v58 = vadd.f32 %v11809_v12, %v16341_v35 }
 0x757   : > { %v9232_v14 = vadd.f32 %v9231_v10, %v16341_v35 }
 0x758   : > { %v16516_v16 = vadd.f32 %v9237_v58, %v18218_v17 }
 0x759   : > { %v16488_v50 = vadd.f32 %v9232_v14, %v18213_v1 }
 0x75a   : > { %v9381_v1 = vsel %vm228_vm3, %v16516_v16, 0.0 }
 0x75b   : > { %v9378_v49 = vsel %vm228_vm3, %v16488_v50, 0.0 }
 0x75c   : > { %9379 = vadd.xlane.f32.xlu0 %v9378_v49  ;;  %v18219_v49 = vld [vmem:[#allocation29_spill] sm:$0xff] }
 0x796   : > { %v11812_v2 = vpop.f32.mrb[156].mxu0 }
 0x797   : > { %v9247_v9 = vadd.f32 %v11812_v2, %v16341_v35  ;;  %v9241_v41 = vpop.f32.mrb[157].mxu0 }
 0x798   : > { %v9242_v5 = vadd.f32 %v9241_v41, %v16341_v35  ;;  %v18220_v41 = vld [vmem:[#allocation27_spill] sm:$0xff] }
 0x799   : > { %v16495_v37 = vadd.f32 %v9247_v9, %v18214_v56  ;;  %v9317_v63 = vpop.xlane.xlu1 %9316 }
 0x79a   : > { %v16498_v45 = vadd.f32 %v9242_v5, %v18215_v34  ;;  %v9314_v27 = vpop.xlane.xlu0 %9313  ;;  %v9410_v9 = vmul.f32 0.083333336, %v9317_v63 }
 0x79b   : > { %v9387_v53 = vsel %vm228_vm3, %v16495_v37, 0.0  ;;  %v9409_v34 = vmul.f32 0.083333336, %v9314_v27 }
 0x79c   : > { %9388 = vadd.xlane.f32.xlu0 %v9387_v53  ;;  %v9384_v42 = vsel %vm228_vm3, %v16498_v45, 0.0 }
 0x79d   : > { %9385 = vadd.xlane.f32.xlu1 %v9384_v42 }
 0x79e   : > { %v9323_v19 = vpop.xlane.xlu0 %9322 }
 0x7a2   : > { %v9320_v23 = vpop.xlane.xlu0 %9319 }
 0x7a5   : > { %v9335_v15 = vpop.xlane.xlu1 %9334 }
 0x7a6   : > { %v9329_v11 = vpop.xlane.xlu0 %9328 }
 0x7a9   : > { %v9341_v38 = vpop.xlane.xlu1 %9340 }
 0x7aa   : > { %v9326_v60 = vpop.xlane.xlu0 %9325 }
 0x7ad   : > { %v9347_v42 = vpop.xlane.xlu1 %9346 }
 0x7ae   : > { %v9332_v53 = vpop.xlane.xlu0 %9331 }
 0x7cf   : > { %v11815_v3 = vpop.f32.mrb[158].mxu0 }
 0x7d0   : > { %v9257_v13 = vadd.f32 %v11815_v3, %v16341_v35  ;;  %v9251_v48 = vpop.f32.mrb[159].mxu0 }
 0x7d1   : > { %v9252_v46 = vadd.f32 %v9251_v48, %v16341_v35  ;;  %v9412_v48 = vmul.f32 0.083333336, %v9323_v19 }
 0x7d2   : > { %v16508_v21 = vadd.f32 %v9257_v13, %v18216_v52  ;;  %v16533_v13 = vsub.f32 %v16355_v39, %v9410_v9  ;;  %v16539_v52 = vsub.f32 %v16358_v22, %v9409_v34  ;;  %v18222_v39 = vld [vmem:[#allocation31_spill] sm:$0xff] }
 0x7d3   : > { %v16511_v18 = vadd.f32 %v9252_v46, %v18217_v36  ;;  %v9411_v36 = vmul.f32 0.083333336, %v9320_v23  ;;  %v16549_v19 = vsub.f32 %v16369_v33, %v9412_v48 }
 0x7d4   : > { %v9393_v59 = vsel %vm228_vm3, %v16508_v21, 0.0  ;;  %v9474_v23 = vmul.f32 %v16533_v13, %v16533_v13  ;;  %v9473_v33 = vmul.f32 %v16539_v52, %v16539_v52 }
 0x7d5   : > { %9394 = vadd.xlane.f32.xlu1 %v9393_v59  ;;  %v9390_v51 = vsel %vm228_vm3, %v16511_v18, 0.0  ;;  %v18221_v59 = vld [vmem:[#allocation33_spill] sm:$0xff] }
 0x7d6   : > { %9391 = vadd.xlane.f32.xlu0 %v9390_v51  ;;  %v9338_v51 = vpop.xlane.xlu0 %9337  ;;  %v9508_v9 = vsel %vm228_vm3, %v9474_v23, 0.0  ;;  %v9505_v34 = vsel %vm228_vm3, %v9473_v33, 0.0 }
 0x7d7   : > { %v11818_v26 = vpop.f32.mrb[160].mxu0 }
 0x7d8   : > { %v9267_v12 = vadd.f32 %v11818_v26, %v16341_v35  ;;  %v9261_v10 = vpop.f32.mrb[161].mxu0 }
 0x7d9   : > { %v9262_v14 = vadd.f32 %v9261_v10, %v16341_v35  ;;  %v9344_v10 = vpop.xlane.xlu1 %9343 }
 0x7da   : > { %v16525_v2 = vadd.f32 %v9267_v12, %v18219_v49  ;;  %9382 = vadd.xlane.f32.xlu0 %v9381_v1  ;;  %v9414_v12 = vmul.f32 0.083333336, %v9329_v11  ;;  %v9413_v49 = vmul.f32 0.083333336, %v9326_v60  ;;  %v9415_v60 = vmul.f32 0.083333336, %v9332_v53 }
 0x7db   : > { %v16528_v5 = vadd.f32 %v9262_v14, %v18220_v41  ;;  %v9416_v14 = vmul.f32 0.083333336, %v9335_v15  ;;  %v9476_v41 = vmul.f32 %v16549_v19, %v16549_v19  ;;  %v9418_v15 = vmul.f32 0.083333336, %v9341_v38 }
 0x7dc   : > { %v9399_v56 = vsel %vm228_vm3, %v16525_v2, 0.0  ;;  %v16563_v11 = vsub.f32 %v16379_v44, %v9414_v12  ;;  %v16575_v44 = vsub.f32 %v16391_v62, %v9413_v49  ;;  %v16587_v62 = vsub.f32 %v16403_v8, %v9415_v60 }
 0x7dd   : > { %9400 = vadd.xlane.f32.xlu1 %v9399_v56  ;;  %v9396_v63 = vsel %vm228_vm3, %v16528_v5, 0.0  ;;  %v9356_v56 = vpop.xlane.xlu0 %9355  ;;  %v9353_v48 = vpop.xlane.xlu1 %9352  ;;  %v16581_v38 = vsub.f32 %v16397_v6, %v9418_v15  ;;  %v9417_v53 = vmul.f32 0.083333336, %v9338_v51  ;;  %v9419_v12 = vmul.f32 0.083333336, %v9344_v10 }
 0x7de   : > { %v9477_v6 = vmul.f32 %v16575_v44, %v16575_v44  ;;  %v9423_v51 = vmul.f32 0.083333336, %v9356_v56  ;;  %v9422_v10 = vmul.f32 0.083333336, %v9353_v48 }
 0x7df   : > { %v11821_v3 = vpop.f32.mrb[162].mxu0  ;;  %v9482_v23 = vmul.f32 %v16581_v38, %v16581_v38  ;;  %v16599_v8 = vsub.f32 %v16419_v0, %v9417_v53 }
 0x7e0   : > { %v9277_v58 = vadd.f32 %v11821_v3, %v16341_v35  ;;  %v9271_v46 = vpop.f32.mrb[163].mxu0  ;;  %v16611_v0 = vsub.f32 %v16433_v30, %v9423_v51 }
 0x7e1   : > { %v9272_v27 = vadd.f32 %v9271_v46, %v16341_v35  ;;  %9397 = vadd.xlane.f32.xlu1 %v9396_v63  ;;  %v16556_v35 = vsub.f32 %v16374_v43, %v9411_v36  ;;  %v16569_v43 = vsub.f32 %v16385_v31, %v9416_v14  ;;  %v9478_v31 = vmul.f32 %v16563_v11, %v16563_v11 }
 0x7e2   : > { %v16543_v17 = vadd.f32 %v9277_v58, %v18221_v59  ;;  %v9514_v58 = vsel %vm228_vm3, %v9476_v41, 0.0  ;;  %v9420_v46 = vmul.f32 0.083333336, %v9347_v42  ;;  %v9350_v59 = vpop.xlane.xlu1 %9349  ;;  %v9517_v14 = vsel %vm228_vm3, %v9477_v6, 0.0 }
 0x7e3   : > { %v16546_v26 = vadd.f32 %v9272_v27, %v18222_v39  ;;  %v9475_v3 = vmul.f32 %v16556_v35, %v16556_v35  ;;  %v9480_v36 = vmul.f32 %v16569_v43, %v16569_v43  ;;  %v9362_v27 = vpop.xlane.xlu0 %9361  ;;  %v9520_v39 = vsel %vm228_vm3, %v9478_v31, 0.0 }
 0x7e4   : > { %v9405_v22 = vsel %vm228_vm3, %v16543_v17, 0.0  ;;  %v16593_v42 = vsub.f32 %v16410_v29, %v9420_v46  ;;  %v16605_v29 = vsub.f32 %v16413_v54, %v9419_v12  ;;  %v9532_v49 = vsel %vm228_vm3, %v9482_v23, 0.0 }
 0x7e5   : > { %9406 = vadd.xlane.f32.xlu0 %v9405_v22  ;;  %v9402_v1 = vsel %vm228_vm3, %v16546_v26, 0.0  ;;  %v9511_v63 = vsel %vm228_vm3, %v9475_v3, 0.0  ;;  %v9526_v22 = vsel %vm228_vm3, %v9480_v36, 0.0  ;;  %v9425_v15 = vmul.f32 0.083333336, %v9362_v27 }
 0x7e6   : > { %9403 = vadd.xlane.f32.xlu1 %v9402_v1  ;;  %v9479_v1 = vmul.f32 %v16587_v62, %v16587_v62  ;;  %v9359_v41 = vpop.xlane.xlu1 %9358  ;;  %v9481_v54 = vmul.f32 %v16599_v8, %v16599_v8  ;;  %v9421_v3 = vmul.f32 0.083333336, %v9350_v59  ;;  %v9483_v60 = vmul.f32 %v16605_v29, %v16605_v29 }
 0x7e7   : > { %v9368_v33 = vpop.xlane.xlu0 %9367  ;;  %v16623_v30 = vsub.f32 %v16445_v7, %v9425_v15  ;;  %v9424_v27 = vmul.f32 0.083333336, %v9359_v41 }
 0x7e8   : > { %v9523_v56 = vsel %vm228_vm3, %v9479_v1, 0.0  ;;  %v9427_v31 = vmul.f32 0.083333336, %v9368_v33  ;;  %v16629_v36 = vsub.f32 %v16436_v32, %v9421_v3  ;;  %v9535_v53 = vsel %vm228_vm3, %v9483_v60, 0.0 }
 0x7e9   : > { %9509 = vadd.xlane.f32.xlu0 %v9508_v9  ;;  %v9484_v9 = vmul.f32 %v16593_v42, %v16593_v42  ;;  %v9489_v12 = vmul.f32 %v16623_v30, %v16623_v30  ;;  %v16641_v32 = vsub.f32 %v16448_v40, %v9424_v27 }
 0x7ea   : > { %9506 = vadd.xlane.f32.xlu1 %v9505_v34  ;;  %v16617_v34 = vsub.f32 %v16424_v61, %v9422_v10  ;;  %v9365_v46 = vpop.xlane.xlu1 %9364  ;;  %v9487_v61 = vmul.f32 %v16611_v0, %v16611_v0  ;;  %v16635_v7 = vsub.f32 %v16457_v4, %v9427_v31 }
 0x7eb   : > { %v9538_v48 = vsel %vm228_vm3, %v9484_v9, 0.0  ;;  %v9553_v33 = vsel %vm228_vm3, %v9489_v12, 0.0 }
 0x7ec   : > { %v9486_v59 = vmul.f32 %v16617_v34, %v16617_v34  ;;  %v9547_v6 = vsel %vm228_vm3, %v9487_v61, 0.0  ;;  %v9491_v40 = vmul.f32 %v16635_v7, %v16635_v7 }
 0x7ed   : > { %9515 = vadd.xlane.f32.xlu0 %v9514_v58  ;;  %v9377_v58 = vpop.xlane.xlu0 %9376 }
 0x7ee   : > { %9512 = vadd.xlane.f32.xlu1 %v9511_v63  ;;  %v9529_v63 = vsel %vm228_vm3, %v9481_v54, 0.0  ;;  %v9544_v51 = vsel %vm228_vm3, %v9486_v59, 0.0  ;;  %v9371_v1 = vpop.xlane.xlu1 %9370  ;;  %v9559_v3 = vsel %vm228_vm3, %v9491_v40, 0.0 }
 0x7ef   : > { %v9428_v9 = vmul.f32 0.083333336, %v9371_v1 }
 0x7f1   : > { %9521 = vadd.xlane.f32.xlu0 %v9520_v39  ;;  %v9430_v39 = vmul.f32 0.083333336, %v9377_v58  ;;  %v9374_v23 = vpop.xlane.xlu0 %9373 }
 0x7f2   : > { %9527 = vadd.xlane.f32.xlu1 %v9526_v22  ;;  %v9426_v22 = vmul.f32 0.083333336, %v9365_v46  ;;  %v9429_v10 = vmul.f32 0.083333336, %v9374_v23 }
 0x7f3   : > { %v16647_v4 = vsub.f32 %v16470_v28, %v9430_v39 }
 0x7f4   : > { %v16659_v28 = vsub.f32 %v16480_v25, %v9429_v10 }
 0x7f5   : > { %9518 = vadd.xlane.f32.xlu0 %v9517_v14  ;;  %v9485_v14 = vmul.f32 %v16629_v36, %v16629_v36  ;;  %v9380_v41 = vpop.xlane.xlu0 %9379 }
 0x7f6   : > { %9533 = vadd.xlane.f32.xlu1 %v9532_v49  ;;  %v16653_v49 = vsub.f32 %v16460_v24, %v9426_v22  ;;  %v9431_v54 = vmul.f32 0.083333336, %v9380_v41  ;;  %v16665_v24 = vsub.f32 %v16473_v47, %v9428_v9  ;;  %v9493_v46 = vmul.f32 %v16659_v28, %v16659_v28 }
 0x7f7   : > { %v9541_v15 = vsel %vm228_vm3, %v9485_v14, 0.0 }
 0x7f8   : > { %v9490_v58 = vmul.f32 %v16653_v49, %v16653_v49  ;;  %v16671_v31 = vsub.f32 %v16488_v50, %v9431_v54  ;;  %v9492_v47 = vmul.f32 %v16665_v24, %v16665_v24  ;;  %v9565_v61 = vsel %vm228_vm3, %v9493_v46, 0.0 }
 0x7f9   : > { %9524 = vadd.xlane.f32.xlu0 %v9523_v56  ;;  %v9488_v56 = vmul.f32 %v16641_v32, %v16641_v32 }
 0x7fa   : > { %9539 = vadd.xlane.f32.xlu1 %v9538_v48  ;;  %v9494_v48 = vmul.f32 %v16647_v4, %v16647_v4  ;;  %v9495_v27 = vmul.f32 %v16671_v31, %v16671_v31  ;;  %v9562_v50 = vsel %vm228_vm3, %v9492_v47, 0.0 }
 0x7fb   : > { %v9550_v60 = vsel %vm228_vm3, %v9488_v56, 0.0 }
 0x7fc   : > { %v9568_v25 = vsel %vm228_vm3, %v9494_v48, 0.0 }
 0x7fd   : > { %9530 = vadd.xlane.f32.xlu0 %v9529_v63  ;;  %v9556_v63 = vsel %vm228_vm3, %v9490_v58, 0.0 }
 0x7fe   : > { %9536 = vadd.xlane.f32.xlu1 %v9535_v53  ;;  %v9571_v53 = vsel %vm228_vm3, %v9495_v27, 0.0 }
 0x801   : > { %9548 = vadd.xlane.f32.xlu0 %v9547_v6 }
 0x802   : > { %9545 = vadd.xlane.f32.xlu1 %v9544_v51 }
 0x805   : > { %9554 = vadd.xlane.f32.xlu0 %v9553_v33 }
 0x806   : > { %9542 = vadd.xlane.f32.xlu1 %v9541_v15 }
 0x809   : > { %9560 = vadd.xlane.f32.xlu0 %v9559_v3 }
 0x80a   : > { %9551 = vadd.xlane.f32.xlu1 %v9550_v60 }
 0x80d   : > { %9569 = vadd.xlane.f32.xlu0 %v9568_v25 }
 0x80e   : > { %9557 = vadd.xlane.f32.xlu1 %v9556_v63 }
 0x811   : > { %9566 = vadd.xlane.f32.xlu0 %v9565_v61 }
 0x812   : > { %9563 = vadd.xlane.f32.xlu1 %v9562_v50 }
 0x815   : > { %9572 = vadd.xlane.f32.xlu0 %v9571_v53 }
 0x829   : > { %v9389_v59 = vpop.xlane.xlu0 %9388 }
 0x82a   : > { %v9434_v39 = vmul.f32 0.083333336, %v9389_v59  ;;  %v9386_v6 = vpop.xlane.xlu1 %9385 }
 0x82b   : > { %v9433_v12 = vmul.f32 0.083333336, %v9386_v6 }
 0x82c   : > { %v16685_v22 = vsub.f32 %v16495_v37, %v9434_v39  ;;  %v181_v37 = vld [vmem:[%s16995_s1 + $0x20] sm:$0xff] }
 0x82d   : > { %v16688_v23 = vsub.f32 %v16498_v45, %v9433_v12  ;;  %v182_v45 = vld [vmem:[%s16995_s1 + $0x28] sm:$0xff] }
 0x82e   : > { %v9498_v51 = vmul.f32 %v16685_v22, %v16685_v22  ;;  %v11856_v33 = vpack.c.bf16 %v182_v45, %v181_v37 }
 0x82f   : > { %v9497_v14 = vmul.f32 %v16688_v23, %v16688_v23 }
 0x830   : > { %v9580_v1 = vsel %vm228_vm3, %v9498_v51, 0.0  ;;  %11858 = vmatprep.subr.msk.bf16.mxu1 %vm12640_vm2, %v11856_v33 }
 0x831   : > { %9581 = vadd.xlane.f32.xlu0 %v9580_v1  ;;  %v9577_v10 = vsel %vm228_vm3, %v9497_v14, 0.0  ;;  %11861 = vmatpush3.bf16.msk.msra.mxu1 %vm12640_vm2, %v11856_v33 }
 0x832   : > { %9578 = vadd.xlane.f32.xlu1 %v9577_v10 }
 0x862   : > { %v9395_v40 = vpop.xlane.xlu1 %9394 }
 0x863   : > { %v9436_v9 = vmul.f32 0.083333336, %v9395_v40  ;;  %v9392_v41 = vpop.xlane.xlu0 %9391 }
 0x864   : > { %v9435_v15 = vmul.f32 0.083333336, %v9392_v41 }
 0x865   : > { %v16707_v56 = vsub.f32 %v16508_v21, %v9436_v9 }
 0x866   : > { %v16710_v54 = vsub.f32 %v16511_v18, %v9435_v15 }
 0x867   : > { %v9383_v3 = vpop.xlane.xlu0 %9382  ;;  %v9500_v48 = vmul.f32 %v16707_v56, %v16707_v56 }
 0x868   : > { %v9432_v60 = vmul.f32 0.083333336, %v9383_v3  ;;  %v9499_v58 = vmul.f32 %v16710_v54, %v16710_v54 }
 0x869   : > { %v9586_v55 = vsel %vm228_vm3, %v9500_v48, 0.0 }
 0x86a   : > { %v16718_v25 = vsub.f32 %v16516_v16, %v9432_v60  ;;  %v9401_v46 = vpop.xlane.xlu1 %9400  ;;  %9587 = vadd.xlane.f32.xlu1 %v9586_v55  ;;  %v9583_v21 = vsel %vm228_vm3, %v9499_v58, 0.0 }
 0x86b   : > { %v9438_v63 = vmul.f32 0.083333336, %v9401_v46  ;;  %9584 = vadd.xlane.f32.xlu0 %v9583_v21 }
 0x86c   : > { %v9496_v18 = vmul.f32 %v16718_v25, %v16718_v25 }
 0x86d   : > { %v16724_v47 = vsub.f32 %v16525_v2, %v9438_v63 }
 0x86e   : > { %v9398_v61 = vpop.xlane.xlu1 %9397  ;;  %v9574_v27 = vsel %vm228_vm3, %v9496_v18, 0.0 }
 0x86f   : > { %v9437_v50 = vmul.f32 0.083333336, %v9398_v61  ;;  %9575 = vadd.xlane.f32.xlu0 %v9574_v27  ;;  %v9502_v16 = vmul.f32 %v16724_v47, %v16724_v47 }
 0x871   : > { %v16730_v53 = vsub.f32 %v16528_v5, %v9437_v50  ;;  %v9592_v59 = vsel %vm228_vm3, %v9502_v16, 0.0 }
 0x872   : > { %v9407_v39 = vpop.xlane.xlu0 %9406  ;;  %9593 = vadd.xlane.f32.xlu1 %v9592_v59 }
 0x873   : > { %v9440_v6 = vmul.f32 0.083333336, %v9407_v39  ;;  %v9404_v12 = vpop.xlane.xlu1 %9403  ;;  %v9501_v2 = vmul.f32 %v16730_v53, %v16730_v53 }
 0x874   : > { %v9439_v51 = vmul.f32 0.083333336, %v9404_v12 }
 0x875   : > { %v16736_v14 = vsub.f32 %v16543_v17, %v9440_v6  ;;  %v9589_v1 = vsel %vm228_vm3, %v9501_v2, 0.0 }
 0x876   : > { %v16740_v10 = vsub.f32 %v16546_v26, %v9439_v51  ;;  %v9510_v5 = vpop.xlane.xlu0 %9509  ;;  %9590 = vadd.xlane.f32.xlu1 %v9589_v1 }
 0x877   : > { %v9507_v37 = vpop.xlane.xlu1 %9506  ;;  %v9504_v45 = vmul.f32 %v16736_v14, %v16736_v14  ;;  %v9602_v26 = vmul.f32 0.083333336, %v9510_v5 }
 0x878   : > { %v9503_v33 = vmul.f32 %v16740_v10, %v16740_v10  ;;  %v9601_v48 = vmul.f32 0.083333336, %v9507_v37 }
 0x879   : > { %v9598_v40 = vsel %vm228_vm3, %v9504_v45, 0.0  ;;  %v9634_v58 = vadd.f32 1e-05, %v9602_v26 }
 0x87a   : > { %9599 = vadd.xlane.f32.xlu0 %v9598_v40  ;;  %v9516_v9 = vpop.xlane.xlu0 %9515  ;;  %v9595_v17 = vsel %vm228_vm3, %v9503_v33, 0.0  ;;  %v9633_v63 = vadd.f32 1e-05, %v9601_v48  ;;  %v9731_v33 = vsub.s32 2, %v18190_v20 }
 0x87b   : > { %9596 = vadd.xlane.f32.xlu1 %v9595_v17  ;;  %v9513_v41 = vpop.xlane.xlu1 %9512  ;;  %v9604_v18 = vmul.f32 0.083333336, %v9516_v9  ;;  %12425 = vrsqrt.f32 %v9634_v58  ;;  %v9767_v58 = vsub.s32 3, %v18190_v20 }
 0x87c   : > { %v9603_v55 = vmul.f32 0.083333336, %v9513_v41 }
 0x87d   : > { %v9636_v39 = vadd.f32 1e-05, %v9604_v18 }
 0x87e   : > { %v9522_v15 = vpop.xlane.xlu0 %9521  ;;  %v9635_v50 = vadd.f32 1e-05, %v9603_v55 }
 0x87f   : > { %v9528_v3 = vpop.xlane.xlu1 %9527  ;;  %v9606_v17 = vmul.f32 0.083333336, %v9522_v15 }
 0x882   : > { %v9519_v60 = vpop.xlane.xlu0 %9518 }
 0x883   : > { %v9534_v46 = vpop.xlane.xlu1 %9533  ;;  %v9605_v5 = vmul.f32 0.083333336, %v9519_v60 }
 0x884   : > { %v9610_v21 = vmul.f32 0.083333336, %v9534_v46  ;;  %v16751_v46 = vrot.slane %v16338_v57, %v9731_v33 }
 0x885   : > { %v12426_v9 = vpop.eup %12425  ;;  %v9637_v41 = vadd.f32 1e-05, %v9605_v5 }
 0x886   : > { %v9642_v61 = vadd.f32 1e-05, %v9610_v21  ;;  %v9525_v27 = vpop.xlane.xlu0 %9524 }
 0x887   : > { %v9540_v16 = vpop.xlane.xlu1 %9539 }
 0x888   : > { %12427 = vrsqrt.f32 %v9642_v61  ;;  %v9612_v59 = vmul.f32 0.083333336, %v9540_v16  ;;  %v16757_v16 = vrot.slane %v16338_v57, %v9767_v58 }
 0x889   : > { %12429 = vrsqrt.f32 %v9633_v63  ;;  %v9698_v63 = vmul.f32 %v12426_v9, %v16533_v13 }
 0x88a   : > { %v9644_v6 = vadd.f32 1e-05, %v9612_v59  ;;  %v9531_v12 = vpop.xlane.xlu0 %9530  ;;  %12431 = vrsqrt.f32 %v9635_v50  ;;  %v9638_v50 = vadd.f32 1e-05, %v9606_v17 }
 0x88b   : > { %v9609_v2 = vmul.f32 0.083333336, %v9531_v12  ;;  %v9537_v51 = vpop.xlane.xlu1 %9536  ;;  %v9608_v12 = vmul.f32 0.083333336, %v9528_v3 }
 0x88c   : > { %v9611_v1 = vmul.f32 0.083333336, %v9537_v51  ;;  %12433 = vrsqrt.f32 %v9644_v6 }
 0x88d   : > { %v9641_v37 = vadd.f32 1e-05, %v9609_v2  ;;  %12435 = vrsqrt.f32 %v9636_v39  ;;  %v9640_v3 = vadd.f32 1e-05, %v9608_v12 }
 0x88e   : > { %v9643_v45 = vadd.f32 1e-05, %v9611_v1  ;;  %v9549_v40 = vpop.xlane.xlu0 %9548 }
 0x88f   : > { %12437 = vrsqrt.f32 %v9641_v37  ;;  %v9546_v26 = vpop.xlane.xlu1 %9545  ;;  %v9615_v21 = vmul.f32 0.083333336, %v9549_v40 }
 0x890   : > { %12439 = vrsqrt.f32 %v9643_v45  ;;  %v9614_v18 = vmul.f32 0.083333336, %v9546_v26  ;;  %v9607_v45 = vmul.f32 0.083333336, %v9525_v27 }
 0x891   : > { %12441 = vrsqrt.f32 %v9637_v41  ;;  %v9647_v39 = vadd.f32 1e-05, %v9615_v21 }
 0x892   : > { %v12428_v48 = vpop.eup %12427  ;;  %v9646_v2 = vadd.f32 1e-05, %v9614_v18  ;;  %12443 = vrsqrt.f32 %v9638_v50  ;;  %v9639_v58 = vadd.f32 1e-05, %v9607_v45 }
 0x893   : > { %v12430_v55 = vpop.eup %12429  ;;  %v9706_v60 = vmul.f32 %v12428_v48, %v16581_v38  ;;  %v9734_v38 = vmul.f32 %v16751_v46, %v9698_v63  ;;  %v9543_v5 = vpop.xlane.xlu1 %9542  ;;  %12445 = vrsqrt.f32 %v9647_v39 }
 0x894   : > { %v12432_v61 = vpop.eup %12431  ;;  %v9697_v59 = vmul.f32 %v12430_v55, %v16539_v52  ;;  %12447 = vrsqrt.f32 %v9646_v2  ;;  %v9613_v17 = vmul.f32 0.083333336, %v9543_v5 }
 0x895   : > { %v9742_v15 = vmul.f32 %v16751_v46, %v9706_v60  ;;  %v9699_v13 = vmul.f32 %v12432_v61, %v16556_v35  ;;  %v9770_v35 = vadd.f32 %v16757_v16, %v9734_v38 }
 0x896   : > { %v12434_v6 = vpop.eup %12433  ;;  %v9733_v57 = vmul.f32 %v16751_v46, %v9697_v59 }
 0x897   : > { %v12436_v51 = vpop.eup %12435  ;;  %v9778_v1 = vadd.f32 %v16757_v16, %v9742_v15  ;;  %v9708_v52 = vmul.f32 %v12434_v6, %v16593_v42  ;;  %v9735_v41 = vmul.f32 %v16751_v46, %v9699_v13  ;;  %v9645_v42 = vadd.f32 1e-05, %v9613_v17  ;;  %v9552_v50 = vpop.xlane.xlu1 %9551 }
 0x898   : > { %v9700_v48 = vmul.f32 %v12436_v51, %v16549_v19  ;;  %v9808_v18 = vsel %vm228_vm3, %v9770_v35, 0.0  ;;  %v9616_v5 = vmul.f32 0.083333336, %v9552_v50 }
 0x899   : > { %v12438_v37 = vpop.eup %12437  ;;  %v9864_v26 = vsel %vm228_vm3, %v9778_v1, 0.0  ;;  %v9744_v55 = vmul.f32 %v16751_v46, %v9708_v52  ;;  %12449 = vrsqrt.f32 %v9645_v42  ;;  %v9771_v61 = vadd.f32 %v16757_v16, %v9735_v41 }
 0x89a   : > { %v12440_v33 = vpop.eup %12439  ;;  %v9705_v40 = vmul.f32 %v12438_v37, %v16599_v8  ;;  %v9769_v8 = vadd.f32 %v16757_v16, %v9733_v57  ;;  %v9865_v21 = vrot.slane %v9864_v26, 4  ;;  %12451 = vrsqrt.f32 %v9640_v3 }
 0x89b   : > { %v9707_v9 = vmul.f32 %v12440_v33, %v16605_v29  ;;  %v12442_v60 = vpop.eup %12441  ;;  %v9736_v19 = vmul.f32 %v16751_v46, %v9700_v48  ;;  %12453 = vrsqrt.f32 %v9639_v58  ;;  %v9780_v39 = vadd.f32 %v16757_v16, %v9744_v55 }
 0x89c   : > { %v9741_v27 = vmul.f32 %v16751_v46, %v9705_v40  ;;  %v9801_v15 = vsel %vm228_vm3, %v9769_v8, 0.0  ;;  %v9701_v59 = vmul.f32 %v12442_v60, %v16575_v44  ;;  %v12444_v12 = vpop.eup %12443  ;;  %v9809_v2 = vrot.slane %v9808_v18, 4 }
 0x89d   : > { %v9743_v29 = vmul.f32 %v16751_v46, %v9707_v9  ;;  %v9866_v51 = vadd.f32 %v9865_v21, %v9864_v26  ;;  %v12446_v13 = vpop.eup %12445  ;;  %v9815_v1 = vsel %vm228_vm3, %v9771_v61, 0.0  ;;  %v9802_v45 = vrot.slane %v9801_v15, 4 }
 0x89e   : > { %v9777_v63 = vadd.f32 %v16757_v16, %v9741_v27  ;;  %v12448_v37 = vpop.eup %12447  ;;  %v9772_v33 = vadd.f32 %v16757_v16, %v9736_v19  ;;  %v9737_v57 = vmul.f32 %v16751_v46, %v9701_v59  ;;  %v9878_v44 = vsel %vm228_vm3, %v9780_v39, 0.0 }
 0x89f   : > { %v9779_v6 = vadd.f32 %v16757_v16, %v9743_v29  ;;  %v9810_v3 = vadd.f32 %v9809_v2, %v9808_v18  ;;  %v9816_v9 = vrot.slane %v9815_v1, 4  ;;  %v9702_v17 = vmul.f32 %v12444_v12, %v16563_v11 }
 0x8a0   : > { %v9857_v38 = vsel %vm228_vm3, %v9777_v63, 0.0  ;;  %v9867_v35 = vrot.slane %v9866_v51, 2  ;;  %v9711_v41 = vmul.f32 %v12446_v13, %v16611_v0  ;;  %v9710_v26 = vmul.f32 %v12448_v37, %v16617_v34 }
 0x8a1   : > { %v9858_v52 = vrot.slane %v9857_v38, 4  ;;  %v9871_v40 = vsel %vm228_vm3, %v9779_v6, 0.0  ;;  %v9648_v27 = vadd.f32 1e-05, %v9616_v5  ;;  %v9803_v58 = vadd.f32 %v9802_v45, %v9801_v15 }
 0x8a2   : > { %v9879_v42 = vrot.slane %v9878_v44, 4  ;;  %v9872_v8 = vrot.slane %v9871_v40, 4  ;;  %v9822_v29 = vsel %vm228_vm3, %v9772_v33, 0.0  ;;  %v9773_v60 = vadd.f32 %v16757_v16, %v9737_v57  ;;  %v9555_v57 = vpop.xlane.xlu0 %9554 }
 0x8a3   : > { %v12450_v48 = vpop.eup %12449  ;;  %v9859_v21 = vadd.f32 %v9858_v52, %v9857_v38  ;;  %v9811_v11 = vrot.slane %v9810_v3, 2  ;;  %v9817_v61 = vadd.f32 %v9816_v9, %v9815_v1  ;;  %v9738_v0 = vmul.f32 %v16751_v46, %v9702_v17 }
 0x8a4   : > { %v12452_v55 = vpop.eup %12451  ;;  %v9709_v63 = vmul.f32 %v12450_v48, %v16629_v36  ;;  %v9868_v19 = vadd.f32 %v9867_v35, %v9866_v51  ;;  %v9747_v34 = vmul.f32 %v16751_v46, %v9711_v41  ;;  %v9746_v50 = vmul.f32 %v16751_v46, %v9710_v26 }
 0x8a5   : > { %v12454_v18 = vpop.eup %12453  ;;  %12455 = vrsqrt.f32 %v9648_v27  ;;  %v9804_v59 = vrot.slane %v9803_v58, 2  ;;  %v9823_v39 = vrot.slane %v9822_v29, 4  ;;  %v9880_v6 = vadd.f32 %v9879_v42, %v9878_v44 }
 0x8a6   : > { %v9745_v15 = vmul.f32 %v16751_v46, %v9709_v63  ;;  %v9873_v12 = vadd.f32 %v9872_v8, %v9871_v40  ;;  %v9829_v2 = vsel %vm228_vm3, %v9773_v60, 0.0  ;;  %v9703_v36 = vmul.f32 %v12454_v18, %v16587_v62 }
 0x8a7   : > { %v9860_v38 = vrot.slane %v9859_v21, 2  ;;  %v9812_v1 = vadd.f32 %v9811_v11, %v9810_v3  ;;  %v9818_v51 = vrot.slane %v9817_v61, 2  ;;  %v9704_v5 = vmul.f32 %v12452_v55, %v16569_v43 }
 0x8a8   : > { %v9781_v13 = vadd.f32 %v16757_v16, %v9745_v15  ;;  %v9869_v37 = vrot.slane %v9868_v19, 1  ;;  %v9783_v45 = vadd.f32 %v16757_v16, %v9747_v34  ;;  %v9782_v33 = vadd.f32 %v16757_v16, %v9746_v50 }
 0x8a9   : > { %v9824_v52 = vadd.f32 %v9823_v39, %v9822_v29  ;;  %v9830_v40 = vrot.slane %v9829_v2, 4  ;;  %v9881_v9 = vrot.slane %v9880_v6, 2  ;;  %v9874_v17 = vrot.slane %v9873_v12, 2 }
 0x8aa   : > { %v9885_v44 = vsel %vm228_vm3, %v9781_v13, 0.0  ;;  %v9805_v62 = vadd.f32 %v9804_v59, %v9803_v58  ;;  %v9774_v35 = vadd.f32 %v16757_v16, %v9738_v0  ;;  %v9739_v3 = vmul.f32 %v16751_v46, %v9703_v36 }
 0x8ab   : > { %v9861_v41 = vadd.f32 %v9860_v38, %v9859_v21  ;;  %v9813_v26 = vrot.slane %v9812_v1, 1  ;;  %v9740_v43 = vmul.f32 %v16751_v46, %v9704_v5  ;;  %v16809_v27 = vmul.f32 0.083333336, %v9555_v57 }
 0x8ac   : > { %v9886_v48 = vrot.slane %v9885_v44, 4  ;;  %v9819_v42 = vadd.f32 %v9818_v51, %v9817_v61  ;;  %v9870_v8 = vadd.f32 %v9869_v37, %v9868_v19  ;;  %v9899_v55 = vsel %vm228_vm3, %v9783_v45, 0.0 }
 0x8ad   : > { %v9892_v29 = vsel %vm228_vm3, %v9782_v33, 0.0  ;;  %v16813_v60 = vadd.f32 %v9881_v9, %v9880_v6  ;;  %v9875_v58 = vadd.f32 %v9874_v17, %v9873_v12  ;;  %v9825_v63 = vrot.slane %v9824_v52, 2 }
 0x8ae   : > { %v9831_v18 = vadd.f32 %v9830_v40, %v9829_v2  ;;  %v9806_v0 = vrot.slane %v9805_v62, 1  ;;  %v9775_v21 = vadd.f32 %v16757_v16, %v9739_v3  ;;  %v9862_v34 = vrot.slane %v9861_v41, 1 }
 0x8af   : > { %v12456_v11 = vpop.eup %12455  ;;  %v9836_v50 = vsel %vm228_vm3, %v9774_v35, 0.0  ;;  %v9900_v15 = vrot.slane %v9899_v55, 4  ;;  %v9893_v59 = vrot.slane %v9892_v29, 4  ;;  %v9887_v61 = vadd.f32 %v9886_v48, %v9885_v44 }
 0x8b0   : > { %v9826_v19 = vadd.f32 %v9825_v63, %v9824_v52  ;;  %v16817_v39 = vmul.f32 0.125, %v9870_v8  ;;  %v9820_v36 = vrot.slane %v9819_v42, 1  ;;  %v9832_v6 = vrot.slane %v9831_v18, 2 }
 0x8b1   : > { %v9837_v38 = vrot.slane %v9836_v50, 4  ;;  %v9883_v12 = vrot.slane %v16813_v60, 1  ;;  %v9876_v2 = vrot.slane %v9875_v58, 1  ;;  %v9712_v13 = vmul.f32 %v12456_v11, %v16641_v32 }
 0x8b2   : > { %v9776_v51 = vadd.f32 %v16757_v16, %v9740_v43  ;;  %v9863_v5 = vadd.f32 %v9862_v34, %v9861_v41  ;;  %v9827_v37 = vrot.slane %v9826_v19, 1  ;;  %v9833_v45 = vadd.f32 %v9832_v6, %v9831_v18 }
 0x8b3   : > { %v9843_v33 = vsel %vm228_vm3, %v9775_v21, 0.0  ;;  %v9901_v57 = vadd.f32 %v9900_v15, %v9899_v55  ;;  %v9894_v44 = vadd.f32 %v9893_v59, %v9892_v29  ;;  %v9888_v52 = vrot.slane %v9887_v61, 2 }
 0x8b4   : > { %v9838_v40 = vadd.f32 %v9837_v38, %v9836_v50  ;;  %v9807_v9 = vadd.f32 %v9806_v0, %v9805_v62  ;;  %v9814_v17 = vadd.f32 %v9813_v26, %v9812_v1  ;;  %v9821_v35 = vadd.f32 %v9820_v36, %v9819_v42 }
 0x8b5   : > { %v9834_v3 = vrot.slane %v9833_v45, 1  ;;  %v9748_v48 = vmul.f32 %v16751_v46, %v9712_v13  ;;  %v9844_v8 = vrot.slane %v9843_v33, 4  ;;  %v9850_v41 = vsel %vm228_vm3, %v9776_v51, 0.0 }
 0x8b6   : > { %v9839_v32 = vrot.slane %v9838_v40, 2  ;;  %v9877_v43 = vadd.f32 %v9876_v2, %v9875_v58  ;;  %v9828_v63 = vadd.f32 %v9827_v37, %v9826_v19  ;;  %v9851_v11 = vrot.slane %v9850_v41, 4 }
 0x8b7   : > { %v9835_v18 = vadd.f32 %v9834_v3, %v9833_v45  ;;  %v9895_v21 = vrot.slane %v9894_v44, 2  ;;  %v9889_v55 = vadd.f32 %v9888_v52, %v9887_v61  ;;  %v9845_v34 = vadd.f32 %v9844_v8, %v9843_v33  ;;  %v9558_v8 = vpop.xlane.xlu1 %9557 }
 0x8b8   : > { %v9840_v29 = vadd.f32 %v9839_v32, %v9838_v40  ;;  %v9852_v62 = vadd.f32 %v9851_v11, %v9850_v41  ;;  %v10026_v1 = vmul.f32 0.125, %v9807_v9  ;;  %v10027_v26 = vmul.f32 0.125, %v9814_v17  ;;  %v9561_v17 = vpop.xlane.xlu0 %9560 }
 0x8b9   : > { %v10028_v42 = vmul.f32 0.125, %v9821_v35  ;;  %v10034_v0 = vmul.f32 0.125, %v9863_v5  ;;  %v9784_v50 = vadd.f32 %v16757_v16, %v9748_v48  ;;  %v9846_v59 = vrot.slane %v9845_v34, 2 }
 0x8ba   : > { %v9841_v15 = vrot.slane %v9840_v29, 1  ;;  %v9853_v58 = vrot.slane %v9852_v62, 2  ;;  %v10029_v19 = vmul.f32 0.125, %v9828_v63  ;;  %v10030_v36 = vmul.f32 0.125, %v9835_v18 }
 0x8bb   : > { %v10095_v6 = vsel %vm10094_vm5, %v10027_v26, %v10026_v1  ;;  %v9847_v38 = vadd.f32 %v9846_v59, %v9845_v34  ;;  %v9890_v13 = vrot.slane %v9889_v55, 1  ;;  %v9884_v37 = vadd.f32 %v9883_v12, %v16813_v60 }
 0x8bc   : > { %v9842_v61 = vadd.f32 %v9841_v15, %v9840_v29  ;;  %v10097_v2 = vsel %vm10096_vm6, %v10028_v42, %v10095_v6  ;;  %v9854_v51 = vadd.f32 %v9853_v58, %v9852_v62  ;;  %v9896_v45 = vadd.f32 %v9895_v21, %v9894_v44  ;;  %v9570_v59 = vpop.xlane.xlu0 %9569 }
 0x8bd   : > { %v9902_v5 = vrot.slane %v9901_v57, 2  ;;  %v10036_v33 = vmul.f32 0.125, %v9877_v43  ;;  %v9848_v52 = vrot.slane %v9847_v38, 1  ;;  %v10099_v40 = vsel %vm10098_vm7, %v10029_v19, %v10097_v2 }
 0x8be   : > { %v9891_v9 = vadd.f32 %v9890_v13, %v9889_v55  ;;  %v9855_v35 = vrot.slane %v9854_v51, 1  ;;  %v9897_v3 = vrot.slane %v9896_v45, 1  ;;  %v9906_v32 = vsel %vm228_vm3, %v9784_v50, 0.0 }
 0x8bf   : > { %v9903_v48 = vadd.f32 %v9902_v5, %v9901_v57  ;;  %v9849_v41 = vadd.f32 %v9848_v52, %v9847_v38  ;;  %v10031_v63 = vmul.f32 0.125, %v9842_v61  ;;  %v10101_v18 = vsel %vm10100_vm8, %v10030_v36, %v10099_v40 }
 0x8c0   : > { %v9907_v11 = vrot.slane %v9906_v32, 4  ;;  %v9856_v60 = vadd.f32 %v9855_v35, %v9854_v51  ;;  %v10037_v44 = vmul.f32 0.125, %v9884_v37  ;;  %v10038_v43 = vmul.f32 0.125, %v9891_v9  ;;  %v9567_v52 = vpop.xlane.xlu0 %9566 }
 0x8c1   : > { %v9904_v12 = vrot.slane %v9903_v48, 1  ;;  %v10032_v21 = vmul.f32 0.125, %v9849_v41  ;;  %v9898_v29 = vadd.f32 %v9897_v3, %v9896_v45  ;;  %v10108_v55 = vsel %vm10094_vm5, %v16817_v39, %v10034_v0  ;;  %v9564_v39 = vpop.xlane.xlu1 %9563 }
 0x8c2   : > { %v9908_v34 = vadd.f32 %v9907_v11, %v9906_v32  ;;  %v9618_v62 = vmul.f32 0.083333336, %v9558_v8  ;;  %v10033_v57 = vmul.f32 0.125, %v9856_v60  ;;  %v10103_v1 = vsel %vm10102_vm9, %v10031_v63, %v10101_v18 }
 0x8c3   : > { %v10109_v26 = vsel %vm10096_vm6, %v10036_v33, %v10108_v55  ;;  %v10105_v42 = vsel %vm10104_vm10, %v10032_v21, %v10103_v1  ;;  %v9905_v19 = vadd.f32 %v9904_v12, %v9903_v48  ;;  %v9649_v6 = vadd.f32 1e-05, %v16809_v27 }
 0x8c4   : > { %v9909_v50 = vrot.slane %v9908_v34, 2  ;;  %v10110_v15 = vsel %vm10098_vm7, %v10037_v44, %v10109_v26  ;;  %v10107_v58 = vsel %vm10106_vm11, %v10033_v57, %v10105_v42  ;;  %v10039_v61 = vmul.f32 0.125, %v9898_v29  ;;  %v9573_v3 = vpop.xlane.xlu0 %9572 }
 0x8c5   : > { %v10111_v36 = vsel %vm10100_vm8, %v10038_v43, %v10110_v15  ;;  %11826 = vmatprep.mubr.msk.f32.mxu1 %vm228_vm3, %v10107_v58  ;;  %v9619_v38 = vmul.f32 0.083333336, %v9561_v17  ;;  %v9650_v2 = vadd.f32 1e-05, %v9618_v62  ;;  %v9620_v37 = vmul.f32 0.083333336, %v9564_v39  ;;  %v9579_v21 = vpop.xlane.xlu1 %9578 }
 0x8c6   : > { %v9910_v0 = vadd.f32 %v9909_v50, %v9908_v34  ;;  %v10112_v51 = vsel %vm10102_vm9, %v10039_v61, %v10111_v36  ;;  %v10040_v45 = vmul.f32 0.125, %v9905_v19  ;;  %12457 = vrsqrt.f32 %v9649_v6 }
 0x8c7   : > { %v9651_v33 = vadd.f32 1e-05, %v9619_v38  ;;  %12459 = vrsqrt.f32 %v9650_v2  ;;  %v9652_v9 = vadd.f32 1e-05, %v9620_v37  ;;  %v9621_v17 = vmul.f32 0.083333336, %v9567_v52 }
 0x8c8   : > { %v9911_v13 = vrot.slane %v9910_v0, 1  ;;  %v10113_v40 = vsel %vm10104_vm10, %v10040_v45, %v10112_v51  ;;  %v9622_v48 = vmul.f32 0.083333336, %v9570_v59  ;;  %v9623_v41 = vmul.f32 0.083333336, %v9573_v3  ;;  %v9582_v44 = vpop.xlane.xlu0 %9581 }
 0x8c9   : > { %12461 = vrsqrt.f32 %v9651_v33  ;;  %v9653_v8 = vadd.f32 1e-05, %v9621_v17  ;;  %v9626_v55 = vmul.f32 0.083333336, %v9582_v44  ;;  %v9625_v1 = vmul.f32 0.083333336, %v9579_v21 }
 0x8ca   : > { %v9912_v5 = vadd.f32 %v9911_v13, %v9910_v0  ;;  %12463 = vrsqrt.f32 %v9652_v9  ;;  %v9654_v18 = vadd.f32 1e-05, %v9622_v48  ;;  %v9655_v12 = vadd.f32 1e-05, %v9623_v41 }
 0x8cb   : > { %12465 = vrsqrt.f32 %v9653_v8  ;;  %v9658_v26 = vadd.f32 1e-05, %v9626_v55  ;;  %v9657_v15 = vadd.f32 1e-05, %v9625_v1 }
 0x8cc   : > { %v10041_v27 = vmul.f32 0.125, %v9912_v5  ;;  %12467 = vrsqrt.f32 %v9654_v18 }
 0x8cd   : > { %12469 = vrsqrt.f32 %v9655_v12 }
 0x8ce   : > { %v10114_v35 = vsel %vm10106_vm11, %v10041_v27, %v10113_v40  ;;  %12471 = vrsqrt.f32 %v9658_v26 }
 0x8cf   : > { %11827 = vmatmul.mubr.msk.f32.vlgmr.msra.gmra.mrb[156].mxu1 %vm228_vm3, %v10114_v35  ;;  %12473 = vrsqrt.f32 %v9657_v15 }
 0x8d0   : > { %v12458_v32 = vpop.eup %12457 }
 0x8d1   : > { %v12460_v63 = vpop.eup %12459  ;;  %v9713_v11 = vmul.f32 %v12458_v32, %v16623_v30 }
 0x8d2   : > { %v9714_v60 = vmul.f32 %v12460_v63, %v16653_v49 }
 0x8d3   : > { %v12462_v43 = vpop.eup %12461  ;;  %v9749_v34 = vmul.f32 %v16751_v46, %v9713_v11 }
 0x8d4   : > { %v12464_v29 = vpop.eup %12463  ;;  %v9715_v62 = vmul.f32 %v12462_v43, %v16635_v7  ;;  %v9750_v57 = vmul.f32 %v16751_v46, %v9714_v60 }
 0x8d5   : > { %v9716_v30 = vmul.f32 %v12464_v29, %v16665_v24  ;;  %v9785_v49 = vadd.f32 %v16757_v16, %v9749_v34  ;;  %v12466_v59 = vpop.eup %12465 }
 0x8d6   : > { %v9751_v42 = vmul.f32 %v16751_v46, %v9715_v62  ;;  %v9786_v50 = vadd.f32 %v16757_v16, %v9750_v57  ;;  %v12468_v7 = vpop.eup %12467  ;;  %v9717_v24 = vmul.f32 %v12466_v59, %v16659_v28 }
 0x8d7   : > { %v9752_v58 = vmul.f32 %v16751_v46, %v9716_v30  ;;  %v9913_v19 = vsel %vm228_vm3, %v9785_v49, 0.0  ;;  %v12470_v39 = vpop.eup %12469  ;;  %v9718_v38 = vmul.f32 %v12468_v7, %v16647_v4 }
 0x8d8   : > { %v9787_v36 = vadd.f32 %v16757_v16, %v9751_v42  ;;  %v9920_v6 = vsel %vm228_vm3, %v9786_v50, 0.0  ;;  %v9914_v0 = vrot.slane %v9913_v19, 4  ;;  %v9753_v51 = vmul.f32 %v16751_v46, %v9717_v24  ;;  %v12472_v40 = vpop.eup %12471 }
 0x8d9   : > { %v9788_v61 = vadd.f32 %v16757_v16, %v9752_v58  ;;  %v9921_v2 = vrot.slane %v9920_v6, 4  ;;  %v9719_v37 = vmul.f32 %v12470_v39, %v16671_v31  ;;  %v9754_v28 = vmul.f32 %v16751_v46, %v9718_v38  ;;  %v12474_v17 = vpop.eup %12473 }
 0x8da   : > { %v9927_v13 = vsel %vm228_vm3, %v9787_v36, 0.0  ;;  %v9915_v45 = vadd.f32 %v9914_v0, %v9913_v19  ;;  %v9789_v27 = vadd.f32 %v16757_v16, %v9753_v51  ;;  %v9722_v31 = vmul.f32 %v12472_v40, %v16685_v22 }
 0x8db   : > { %v9934_v5 = vsel %vm228_vm3, %v9788_v61, 0.0  ;;  %v9928_v33 = vrot.slane %v9927_v13, 4  ;;  %v9922_v52 = vadd.f32 %v9921_v2, %v9920_v6  ;;  %v9755_v4 = vmul.f32 %v16751_v46, %v9719_v37 }
 0x8dc   : > { %v9935_v9 = vrot.slane %v9934_v5, 4  ;;  %v9916_v35 = vrot.slane %v9915_v45, 2  ;;  %v9790_v48 = vadd.f32 %v16757_v16, %v9754_v28  ;;  %v9941_v41 = vsel %vm228_vm3, %v9789_v27, 0.0 }
 0x8dd   : > { %v9929_v3 = vadd.f32 %v9928_v33, %v9927_v13  ;;  %v9923_v32 = vrot.slane %v9922_v52, 2  ;;  %v9791_v18 = vadd.f32 %v16757_v16, %v9755_v4  ;;  %v9721_v44 = vmul.f32 %v12474_v17, %v16688_v23 }
 0x8de   : > { %v9936_v63 = vadd.f32 %v9935_v9, %v9934_v5  ;;  %v9917_v12 = vadd.f32 %v9916_v35, %v9915_v45  ;;  %v9948_v55 = vsel %vm228_vm3, %v9790_v48, 0.0  ;;  %v9942_v62 = vrot.slane %v9941_v41, 4 }
 0x8df   : > { %v9930_v21 = vrot.slane %v9929_v3, 2  ;;  %v9924_v29 = vadd.f32 %v9923_v32, %v9922_v52  ;;  %v9758_v22 = vmul.f32 %v16751_v46, %v9722_v31  ;;  %v9955_v49 = vsel %vm228_vm3, %v9791_v18, 0.0 }
 0x8e0   : > { %v9937_v30 = vrot.slane %v9936_v63, 2  ;;  %v9757_v26 = vmul.f32 %v16751_v46, %v9721_v44  ;;  %v9949_v23 = vrot.slane %v9948_v55, 4  ;;  %v9918_v50 = vrot.slane %v9917_v12, 1 }
 0x8e1   : > { %v9931_v15 = vadd.f32 %v9930_v21, %v9929_v3  ;;  %v9925_v59 = vrot.slane %v9924_v29, 1  ;;  %v9794_v58 = vadd.f32 %v16757_v16, %v9758_v22  ;;  %v9943_v36 = vadd.f32 %v9942_v62, %v9941_v41 }
 0x8e2   : > { %v9956_v6 = vrot.slane %v9955_v49, 4  ;;  %v9793_v39 = vadd.f32 %v16757_v16, %v9757_v26  ;;  %v9938_v0 = vadd.f32 %v9937_v30, %v9936_v63  ;;  %v9950_v61 = vadd.f32 %v9949_v23, %v9948_v55 }
 0x8e3   : > { %v9926_v2 = vadd.f32 %v9925_v59, %v9924_v29  ;;  %v9932_v13 = vrot.slane %v9931_v15, 1  ;;  %v9976_v51 = vsel %vm228_vm3, %v9794_v58, 0.0  ;;  %v9919_v45 = vadd.f32 %v9918_v50, %v9917_v12 }
 0x8e4   : > { %v9944_v5 = vrot.slane %v9943_v36, 2  ;;  %v9957_v33 = vadd.f32 %v9956_v6, %v9955_v49  ;;  %v9969_v52 = vsel %vm228_vm3, %v9793_v39, 0.0  ;;  %v9939_v40 = vrot.slane %v9938_v0, 1 }
 0x8e5   : > { %v9951_v27 = vrot.slane %v9950_v61, 2  ;;  %v9977_v4 = vrot.slane %v9976_v51, 4  ;;  %v9933_v17 = vadd.f32 %v9932_v13, %v9931_v15  ;;  %v10043_v3 = vmul.f32 0.125, %v9926_v2 }
 0x8e6   : > { %v9958_v41 = vrot.slane %v9957_v33, 2  ;;  %v10042_v63 = vmul.f32 0.125, %v9919_v45  ;;  %v9970_v18 = vrot.slane %v9969_v52, 4  ;;  %v9940_v21 = vadd.f32 %v9939_v40, %v9938_v0 }
 0x8e7   : > { %v9952_v29 = vadd.f32 %v9951_v27, %v9950_v61  ;;  %v10044_v39 = vmul.f32 0.125, %v9933_v17 }
 0x8e8   : > { %v9971_v49 = vadd.f32 %v9970_v18, %v9969_v52  ;;  %v10045_v15 = vmul.f32 0.125, %v9940_v21 }
 0x8e9   : > { %v9953_v50 = vrot.slane %v9952_v29, 1 }
 0x8ea   : > { %v9972_v0 = vrot.slane %v9971_v49, 2 }
 0x8f7   : > { %v9588_v8 = vpop.xlane.xlu1 %9587 }
 0x8f8   : > { %v9628_v11 = vmul.f32 0.083333336, %v9588_v8  ;;  %v9585_v60 = vpop.xlane.xlu0 %9584  ;;  %v9945_v8 = vadd.f32 %v9944_v5, %v9943_v36 }
 0x8f9   : > { %v9627_v43 = vmul.f32 0.083333336, %v9585_v60 }
 0x8fa   : > { %v9660_v34 = vadd.f32 1e-05, %v9628_v11  ;;  %v9946_v30 = vrot.slane %v9945_v8, 1 }
 0x8fb   : > { %v9659_v57 = vadd.f32 1e-05, %v9627_v43 }
 0x8fc   : > { %12475 = vrsqrt.f32 %v9660_v34  ;;  %v9576_v1 = vpop.xlane.xlu0 %9575  ;;  %v9978_v34 = vadd.f32 %v9977_v4, %v9976_v51  ;;  %v9973_v4 = vadd.f32 %v9972_v0, %v9971_v49 }
 0x8fd   : > { %12477 = vrsqrt.f32 %v9659_v57  ;;  %v9624_v42 = vmul.f32 0.083333336, %v9576_v1 }
 0x8fe   : > { %v9979_v58 = vrot.slane %v9978_v34, 2  ;;  %v9974_v21 = vrot.slane %v9973_v4, 1 }
 0x8ff   : > { %v9656_v19 = vadd.f32 1e-05, %v9624_v42  ;;  %v9594_v7 = vpop.xlane.xlu1 %9593 }
 0x900   : > { %v9630_v24 = vmul.f32 0.083333336, %v9594_v7  ;;  %v9980_v5 = vadd.f32 %v9979_v58, %v9978_v34 }
 0x901   : > { %12479 = vrsqrt.f32 %v9656_v19 }
 0x902   : > { %v9662_v38 = vadd.f32 1e-05, %v9630_v24 }
 0x903   : > { %v9591_v37 = vpop.xlane.xlu1 %9590 }
 0x904   : > { %12481 = vrsqrt.f32 %v9662_v38  ;;  %v9629_v28 = vmul.f32 0.083333336, %v9591_v37  ;;  %v9947_v38 = vadd.f32 %v9946_v30, %v9945_v8 }
 0x906   : > { %v12476_v9 = vpop.eup %12475  ;;  %v9661_v35 = vadd.f32 1e-05, %v9629_v28 }
 0x907   : > { %v12478_v48 = vpop.eup %12477  ;;  %v9724_v32 = vmul.f32 %v12476_v9, %v16707_v56  ;;  %v9600_v31 = vpop.xlane.xlu0 %9599  ;;  %v10115_v56 = vsel %vm10094_vm5, %v10043_v3, %v10042_v63 }
 0x908   : > { %v9723_v11 = vmul.f32 %v12478_v48, %v16710_v54  ;;  %12483 = vrsqrt.f32 %v9661_v35  ;;  %v9632_v60 = vmul.f32 0.083333336, %v9600_v31  ;;  %v9597_v12 = vpop.xlane.xlu1 %9596  ;;  %v9959_v54 = vadd.f32 %v9958_v41, %v9957_v33 }
 0x909   : > { %v9760_v44 = vmul.f32 %v16751_v46, %v9724_v32  ;;  %v9631_v43 = vmul.f32 0.083333336, %v9597_v12  ;;  %v10116_v37 = vsel %vm10096_vm6, %v10044_v39, %v10115_v56  ;;  %v9954_v33 = vadd.f32 %v9953_v50, %v9952_v29 }
 0x90a   : > { %v9759_v55 = vmul.f32 %v16751_v46, %v9723_v11  ;;  %v9664_v62 = vadd.f32 1e-05, %v9632_v60  ;;  %v9960_v51 = vrot.slane %v9959_v54, 1  ;;  %v10117_v52 = vsel %vm10098_vm7, %v10045_v15, %v10116_v37 }
 0x90b   : > { %v12480_v22 = vpop.eup %12479  ;;  %v9796_v57 = vadd.f32 %v16757_v16, %v9760_v44  ;;  %v9663_v1 = vadd.f32 1e-05, %v9631_v43  ;;  %v10046_v35 = vmul.f32 0.125, %v9947_v38  ;;  %v10047_v63 = vmul.f32 0.125, %v9954_v33 }
 0x90c   : > { %v9795_v26 = vadd.f32 %v16757_v16, %v9759_v55  ;;  %v9720_v42 = vmul.f32 %v12480_v22, %v16718_v25  ;;  %12485 = vrsqrt.f32 %v9664_v62  ;;  %v9961_v41 = vadd.f32 %v9960_v51, %v9959_v54 }
 0x90d   : > { %v9990_v23 = vsel %vm228_vm3, %v9796_v57, 0.0  ;;  %12487 = vrsqrt.f32 %v9663_v1  ;;  %v10118_v18 = vsel %vm10100_vm8, %v10046_v35, %v10117_v52  ;;  %v9981_v12 = vrot.slane %v9980_v5, 1 }
 0x90e   : > { %v12482_v59 = vpop.eup %12481  ;;  %v9991_v19 = vrot.slane %v9990_v23, 4  ;;  %v9983_v7 = vsel %vm228_vm3, %v9795_v26, 0.0  ;;  %v9756_v36 = vmul.f32 %v16751_v46, %v9720_v42  ;;  %v10048_v26 = vmul.f32 0.125, %v9961_v41 }
 0x90f   : > { %v9984_v6 = vrot.slane %v9983_v7, 4  ;;  %v9726_v24 = vmul.f32 %v12482_v59, %v16724_v47  ;;  %v9982_v50 = vadd.f32 %v9981_v12, %v9980_v5 }
 0x910   : > { %v9992_v61 = vadd.f32 %v9991_v19, %v9990_v23  ;;  %v9792_v25 = vadd.f32 %v16757_v16, %v9756_v36  ;;  %v9975_v23 = vadd.f32 %v9974_v21, %v9973_v4  ;;  %v184_v21 = vld [vmem:[%s16995_s1 + $0x38] sm:$0xff] }
 0x911   : > { %v9985_v2 = vadd.f32 %v9984_v6, %v9983_v7  ;;  %v9762_v13 = vmul.f32 %v16751_v46, %v9726_v24 }
 0x912   : > { %v12484_v45 = vpop.eup %12483  ;;  %v9962_v28 = vsel %vm228_vm3, %v9792_v25, 0.0  ;;  %v9993_v17 = vrot.slane %v9992_v61, 2 }
 0x913   : > { %v9986_v47 = vrot.slane %v9985_v2, 2  ;;  %v9798_v40 = vadd.f32 %v16757_v16, %v9762_v13  ;;  %v9725_v27 = vmul.f32 %v12484_v45, %v16730_v53  ;;  %v9963_v9 = vrot.slane %v9962_v28, 4 }
 0x914   : > { %v9994_v34 = vadd.f32 %v9993_v17, %v9992_v61 }
 0x915   : > { %v9987_v3 = vadd.f32 %v9986_v47, %v9985_v2  ;;  %v9761_v48 = vmul.f32 %v16751_v46, %v9725_v27  ;;  %v9964_v32 = vadd.f32 %v9963_v9, %v9962_v28  ;;  %v10004_v31 = vsel %vm228_vm3, %v9798_v40, 0.0 }
 0x916   : > { %v12486_v8 = vpop.eup %12485  ;;  %v10005_v11 = vrot.slane %v10004_v31, 4  ;;  %v9995_v19 = vrot.slane %v9994_v34, 1  ;;  %v10051_v2 = vmul.f32 0.125, %v9982_v50 }
 0x917   : > { %v12488_v60 = vpop.eup %12487  ;;  %v9797_v53 = vadd.f32 %v16757_v16, %v9761_v48  ;;  %v9728_v44 = vmul.f32 %v12486_v8, %v16736_v14  ;;  %v9965_v43 = vrot.slane %v9964_v32, 2  ;;  %v9988_v57 = vrot.slane %v9987_v3, 1 }
 0x918   : > { %v9727_v29 = vmul.f32 %v12488_v60, %v16740_v10  ;;  %v10006_v55 = vadd.f32 %v10005_v11, %v10004_v31  ;;  %v10119_v14 = vsel %vm10102_vm9, %v10047_v63, %v10118_v18  ;;  %v9996_v45 = vadd.f32 %v9995_v19, %v9994_v34  ;;  %v185_v34 = vld [vmem:[%s16995_s1 + $0x40] sm:$0xff] }
 0x919   : > { %v9997_v62 = vsel %vm228_vm3, %v9797_v53, 0.0  ;;  %v9764_v56 = vmul.f32 %v16751_v46, %v9728_v44  ;;  %v9966_v22 = vadd.f32 %v9965_v43, %v9964_v32  ;;  %v9989_v58 = vadd.f32 %v9988_v57, %v9987_v3  ;;  %v183_v43 = vld [vmem:[%s16995_s1 + $0x30] sm:$0xff] }
 0x91a   : > { %v9998_v1 = vrot.slane %v9997_v62, 4  ;;  %v9763_v30 = vmul.f32 %v16751_v46, %v9727_v29  ;;  %v10007_v54 = vrot.slane %v10006_v55, 2  ;;  %v10120_v0 = vsel %vm10104_vm10, %v10048_v26, %v10119_v14 }
 0x91b   : > { %v9967_v49 = vrot.slane %v9966_v22, 1  ;;  %v9800_v42 = vadd.f32 %v16757_v16, %v9764_v56  ;;  %v10052_v37 = vmul.f32 0.125, %v9989_v58  ;;  %v10053_v3 = vmul.f32 0.125, %v9996_v45 }
 0x91c   : > { %v9799_v10 = vadd.f32 %v16757_v16, %v9763_v30  ;;  %v9999_v15 = vadd.f32 %v9998_v1, %v9997_v62  ;;  %v10008_v6 = vadd.f32 %v10007_v54, %v10006_v55  ;;  %v10050_v16 = vmul.f32 0.125, %v9975_v23  ;;  %v12498_v62 = vld [vmem:[%s16995_s1 + $0x48] sm:$0xff] }
 0x91d   : > { %v9968_v59 = vadd.f32 %v9967_v49, %v9966_v22  ;;  %v10018_v7 = vsel %vm228_vm3, %v9800_v42, 0.0  ;;  %v11862_v29 = vpack.c.bf16 %v184_v21, %v183_v43  ;;  %v10060_v55 = vsub.s32 4, %v18190_v20 }
 0x91e   : > { %v10000_v36 = vrot.slane %v9999_v15, 2  ;;  %v10011_v46 = vsel %vm228_vm3, %v9799_v10, 0.0  ;;  %v10019_v24 = vrot.slane %v10018_v7, 4  ;;  %v10009_v33 = vrot.slane %v10008_v6, 1 }
 0x91f   : > { %v10049_v39 = vmul.f32 0.125, %v9968_v59  ;;  %v10012_v61 = vrot.slane %v10011_v46, 4  ;;  %v10122_v27 = vsel %vm10094_vm5, %v10051_v2, %v10050_v16  ;;  %11863 = vmatprep.subr.bf16.mxu1 %v11862_v29  ;;  %v10061_v56 = vrot.slane %v12498_v62, %v10060_v55 }
 0x920   : > { %v10001_v25 = vadd.f32 %v10000_v36, %v9999_v15  ;;  %v10020_v38 = vadd.f32 %v10019_v24, %v10018_v7  ;;  %v10123_v4 = vsel %vm10096_vm6, %v10052_v37, %v10122_v27  ;;  %v10010_v35 = vadd.f32 %v10009_v33, %v10008_v6  ;;  %11865 = vmatpush3.bf16.msra.mxu1 %v11862_v29 }
 0x921   : > { %v10121_v13 = vsel %vm10106_vm11, %v10049_v39, %v10120_v0  ;;  %v10013_v51 = vadd.f32 %v10012_v61, %v10011_v46  ;;  %v10124_v8 = vsel %vm10098_vm7, %v10053_v3, %v10123_v4  ;;  %11836 = vmatprep.subr.mxu1 %v185_v34 }
 0x922   : > { %11829 = vmatprep.mubr.msk.f32.mxu1 %vm228_vm3, %v10121_v13  ;;  %v10002_v5 = vrot.slane %v10001_v25, 1  ;;  %v10021_v28 = vrot.slane %v10020_v38, 2  ;;  %v10055_v18 = vmul.f32 0.125, %v10010_v35  ;;  %v10248_v13 = vsub.s32 5, %v18190_v20 }
 0x923   : > { %v10014_v52 = vrot.slane %v10013_v51, 2 }
 0x924   : > { %v10003_v47 = vadd.f32 %v10002_v5, %v10001_v25  ;;  %v10022_v40 = vadd.f32 %v10021_v28, %v10020_v38  ;;  %11837 = vmatpush3.msra.mxu1 %v185_v34 }
 0x925   : > { %v10015_v9 = vadd.f32 %v10014_v52, %v10013_v51  ;;  %v10249_v51 = vrot.slane %v12498_v62, %v10248_v13 }
 0x926   : > { %v10023_v17 = vrot.slane %v10022_v40, 1  ;;  %v10054_v48 = vmul.f32 0.125, %v10003_v47 }
 0x927   : > { %v10016_v32 = vrot.slane %v10015_v9, 1 }
 0x928   : > { %v10024_v31 = vadd.f32 %v10023_v17, %v10022_v40  ;;  %v10125_v63 = vsel %vm10100_vm8, %v10054_v48, %v10124_v8 }
 0x929   : > { %v10017_v41 = vadd.f32 %v10016_v32, %v10015_v9  ;;  %v10126_v12 = vsel %vm10102_vm9, %v10055_v18, %v10125_v63 }
 0x92a   : > { %v10057_v60 = vmul.f32 0.125, %v10024_v31 }
 0x92b   : > { %v10056_v11 = vmul.f32 0.125, %v10017_v41 }
 0x92d   : > { %v10127_v53 = vsel %vm10104_vm10, %v10056_v11, %v10126_v12 }
 0x92e   : > { %v10128_v44 = vsel %vm10106_vm11, %v10057_v60, %v10127_v53 }
 0x92f   : > { %11830 = vmatmul.mubr.msk.f32.gmra.mrb[158].mxu1 %vm228_vm3, %v10128_v44 }
 0x9a2   : > { %v11828_v22 = vpop.f32.mrb[156].mxu1 }
 0x9a3   : > { %v10212_v57 = vadd.f32 %v11828_v22, %v10061_v56  ;;  %v10206_v1 = vpop.f32.mrb[157].mxu1 }
 0x9a4   : > { %v10207_v30 = vadd.f32 %v10206_v1, %v10061_v56 }
 0x9a5   : > { %v10231_v54 = vmul.f32 0.70710677, %v10212_v57  ;;  %v10226_v50 = vmul.f32 0.5, %v10212_v57 }
 0x9a6   : > { %v10230_v49 = vmul.f32 0.70710677, %v10207_v30  ;;  %v10225_v10 = vmul.f32 0.5, %v10207_v30 }
 0x9a7   : > { %12489 = verf.f32 %v10231_v54 }
 0x9a8   : > { %12491 = verf.f32 %v10230_v49 }
 0x9b1   : > { %v12490_v26 = vpop.eup %12489 }
 0x9b2   : > { %v12492_v14 = vpop.eup %12491  ;;  %v10239_v42 = vadd.f32 1.0, %v12490_v26 }
 0x9b3   : > { %v10238_v23 = vadd.f32 1.0, %v12492_v14 }
 0x9b4   : > { %v10243_v59 = vmul.f32 %v10239_v42, %v10226_v50 }
 0x9b5   : > { %v10242_v15 = vmul.f32 %v10238_v23, %v10225_v10 }
 0x9b7   : > { %11838 = vmatprep.mubr.msk.f32.mxu1 %vm10250_vm12, %v10242_v15 }
 0x9b8   : > { %11839 = vmatmul.mubr.msk.f32.vlgmr.msra.gmra.mrb[160].mxu1 %vm10250_vm12, %v10243_v59 }
 0xa02   : > { %v11831_v58 = vpop.f32.mrb[158].mxu1 }
 0xa03   : > { %v10222_v19 = vadd.f32 %v11831_v58, %v10061_v56  ;;  %v10216_v7 = vpop.f32.mrb[159].mxu1 }
 0xa04   : > { %v10217_v36 = vadd.f32 %v10216_v7, %v10061_v56 }
 0xa05   : > { %v10233_v6 = vmul.f32 0.70710677, %v10222_v19  ;;  %v10228_v38 = vmul.f32 0.5, %v10222_v19 }
 0xa06   : > { %v10232_v46 = vmul.f32 0.70710677, %v10217_v36  ;;  %v10227_v61 = vmul.f32 0.5, %v10217_v36 }
 0xa07   : > { %12493 = verf.f32 %v10233_v6 }
 0xa08   : > { %12495 = verf.f32 %v10232_v46 }
 0xa11   : > { %v12494_v24 = vpop.eup %12493 }
 0xa12   : > { %v12496_v39 = vpop.eup %12495  ;;  %v10241_v0 = vadd.f32 1.0, %v12494_v24 }
 0xa13   : > { %v10240_v25 = vadd.f32 1.0, %v12496_v39 }
 0xa14   : > { %v10245_v2 = vmul.f32 %v10241_v0, %v10228_v38 }
 0xa15   : > { %v10244_v16 = vmul.f32 %v10240_v25, %v10227_v61 }
 0xa17   : > { %11841 = vmatprep.mubr.msk.f32.mxu1 %vm10250_vm12, %v10244_v16 }
 0xa18   : > { %11842 = vmatmul.mubr.msk.f32.gmra.mrb[162].mxu1 %vm10250_vm12, %v10245_v2 }
 0xa8b   : > { %v11840_v37 = vpop.f32.mrb[160].mxu1 }
 0xa8c   : > { %v10335_v45 = vadd.f32 %v11840_v37, %v10249_v51  ;;  %v10329_v5 = vpop.f32.mrb[161].mxu1 }
 0xa8d   : > { %v10330_v33 = vadd.f32 %v10329_v5, %v10249_v51 }
 0xa8e   : > { %10349 = vst [vmem:[%s137_s14 + $0x8] sm:$0xff] %v10335_v45 }
 0xa8f   : > { %10348 = vst [vmem:[%s137_s14] sm:$0xff] %v10330_v33 }
 0xaeb   : > { %v11843_v28 = vpop.f32.mrb[162].mxu1 }
 0xaec   : > { %v10345_v20 = vadd.f32 %v11843_v28, %v10249_v51  ;;  %v10339_v52 = vpop.f32.mrb[163].mxu1 }
 0xaed   : > { %v10340_v47 = vadd.f32 %v10339_v52, %v10249_v51 }
 0xaee   : > { %10351 = vst [vmem:[%s137_s14 + $0x18] sm:$0xff] %v10345_v20 }
 0xaef   : > { %10350 = vst [vmem:[%s137_s14 + $0x10] sm:$0xff] %v10340_v47 }
 0xaf0   : > { %12512 = shalt.err (!%p12509_p3)
}
 0xaf1   : > { %s12513_s28 = scalar_lea.hbm %s16951_s23, 512  ;;  %s12517_s3 = scalar_lea.hbm %s16996_s2, 1024 }
 0xaf2   : > { %p12514_p4 = scmp.ne.s32.totalorder %s16951_s23, %s12513_s28  ;;  %p12518_p9 = scmp.lt.u32.totalorder %s16951_s23, %s16996_s2 }
 0xaf3   : > { %p12519_p10 = scmp.lt.u32.totalorder %s12517_s3, %s12513_s28  ;;  %p12521_p12 = scmp.lt.u32.totalorder %s12513_s28, %s16951_s23 }
 0xaf4   : > { %p12515_p7 = pnand %p12514_p4, %p12623_p5 }
 0xaf5   : > { %p12520_p11 = por %p12519_p10, %p12518_p9 }
 0xaf6   : > { %p12516_p8 = pneg %p12515_p7 }
 0xaf7   : > { %p12522_p13 = por %p12521_p12, %p12520_p11 }
 0xaf9   : > { %p12523_p0 = pnand %p12522_p13, %p12516_p8 }
 0xafb   : > { %12526 = shalt.err (!%p12523_p0)
}
 0xafc   : > { %s12568_s6 = smov 128   ;;  %s12569_s7 = smov 8  }
 0xafd   : > { %11868 = dma.vmem_to_hbm [thread:$0]  (%p12623_p5), %s16946_s16, 512, %s16951_s23, %s16953_s24, %s12568_s6, %s12568_s6, %s12569_s7  }
 0xafe PF: > { %p11874_p1 = scmp.ge.s32.totalorder %s12561_s12, 2  ;;  %s10381_s8 = sand.u32 1, %s12549_s9  }
 0xaff   : > { %s10382_s14 = scalar_lea.sflag [#allocation3], %s10381_s8 }
 0xb00   : > { %p11871_p2 = pnand %p11874_p1, %p12627_p6 }
 0xb02   : > { %12544 = dma.done.wait (!%p11871_p2), %s10382_s14, 512  }
 0xb03   : > { %12546 = vsyncadd (!%p11871_p2), %s10382_s14, 4294966784  ;;  %p12_p3 = scmp.ge.s32.totalorder %s12610_s15, 4   ;;  %s18223_s9 = smov %s12553_s10 }
 0xb04   : > { %s18224_s10 = smov %s12557_s11  ;;  %s18225_s11 = smov %s12621_s18 }
 0xb05   : > { %s18226_s12 = smov %s12610_s15  ;;  %14 = sbr.rel (!%p12_p3) target bundleno = 3 (0x3), region = 63 }
 0xb0c   :  { %10387 = vsyncpa [#allocation3], 1 }
 0xb0d   :  { %10389 = vsyncpa [#allocation3 + $0x1], 1 }

</bundles_post_ra>
